<compile_context>
chip_gen: v6e
topology: v6e:2x2x1
jax: 0.10.0
libtpu: 0.0.40
codegen_flags: <defaults>
</compile_context>

<pallas_src>
import functools

import jax
import jax.numpy as jnp
from jax import lax
from jax.experimental import pallas as pl
from jax.experimental.pallas import tpu as pltpu


def encoder_kernel(x1_ref, mask_ref, w1_ref, b1_ref, w2_ref, b2_ref,
                   w3_ref, b3_ref, o_ref, p1_ref, p2_ref, col2_ref, col3_ref,
                   *, H, W, WB, rb, store_base):
    """Fused 3-layer conv3x3+ReLU encoder for one batch image.

    Flat activation layout (f32, per layer): padded-image position (py, px),
    py in [0, H+2), px in [0, WB), lives at flat row py*WB + px + pad_head
    with pad_head = store_base - WB - 1 chosen so every chunk store and every
    per-ky tap base load is 8-row aligned.  Grid columns x >= W are junk and
    are masked to zero before being stored: they land exactly on the next
    buffer's zero-padding slots.
    """
    m = rb * WB                      # matmul rows per row chunk
    nchunks = H // rb

    # Hoisted per-invocation constants (biases, junk-column mask).
    keep = mask_ref[...]             # (m, 1) f32, 1.0 on real columns
    b1 = b1_ref[...]
    b2 = b2_ref[...]
    b3 = b3_ref[...]

    def zero_edges(p_ref):
        rows, c = p_ref.shape
        tail = store_base + H * WB
        p_ref[0:store_base, :] = jnp.zeros((store_base, c), p_ref.dtype)
        p_ref[tail:rows, :] = jnp.zeros((rows - tail, c), p_ref.dtype)

    zero_edges(p1_ref)
    zero_edges(p2_ref)

    def store_padded(p_ref, g0, val_f32):
        # Junk grid columns land exactly on the zero-padding slots of the
        # flat buffer -> zero them so the padding stays zero.  The store
        # origin is a multiple of 8 (aligned f32 rows).
        s0 = store_base + g0
        p_ref[s0:s0 + m, :] = val_f32 * keep

    # ---- Layer 1: prebuilt im2col (K = 9*Cin), one dot per row chunk. -----
    # TODO(synk): at real camera resolutions, build this (m, 27) patch tile
    # in-kernel from the raw padded frame instead of materializing x1 in HBM.
    for i in range(nchunks):
        g0 = i * m                   # static -> all offsets compile-time
        acc = jnp.dot(x1_ref[0, g0:g0 + m, :], w1_ref[...],
                      preferred_element_type=jnp.float32)
        store_padded(p1_ref, g0, jnp.maximum(acc + b1, 0.0))

    # ---- Layers 2/3: K-concatenated im2col in VMEM -> ONE dot per chunk ---
    def conv_layer(pin_ref, col_ref, w_ref, b, consume):
        cin = pin_ref.shape[-1]
        zrow = jnp.zeros((1, cin), jnp.float32)
        # TODO(synk): at real camera resolutions replace this static unroll
        # with lax.fori_loop (small unroll factor) + pl.multiple_of on the
        # chunk starts to keep code size / live ranges bounded.
        for i in range(nchunks):
            g0 = i * m
            for ky in range(3):
                # One aligned base load per ky (== the kx=1 tap); kx=0/2 are
                # +-1-row in-register shifts of it, so no misaligned VMEM
                # access is ever issued.
                b0 = g0 + store_base + (ky - 1) * WB      # multiple of 8
                base = pin_ref[b0:b0 + m, :]
                t0 = jnp.concatenate([zrow, base[:m - 1, :]], axis=0)
                t2 = jnp.concatenate([base[1:, :], zrow], axis=0)
                for kx, tap in ((0, t0), (1, base), (2, t2)):
                    c0 = (3 * ky + kx) * cin
                    col_ref[:, c0:c0 + cin] = tap.astype(col_ref.dtype)
            acc = jnp.dot(col_ref[...], w_ref[...],
                          preferred_element_type=jnp.float32)
            consume(g0, jnp.maximum(acc + b, 0.0))

    conv_layer(p1_ref, col2_ref, w2_ref, b2,
               lambda g0, v: store_padded(p2_ref, g0, v))

    def to_out(g0, v):
        # Drop junk grid columns in-kernel: store only the W real pixels of
        # each image row (aligned, lane-dense C3=128 f32 stores).
        y0 = g0 // WB
        for r in range(rb):
            o_ref[0, (y0 + r) * W:(y0 + r + 1) * W, :] = (
                v[r * WB:r * WB + W, :].astype(o_ref.dtype))

    conv_layer(p2_ref, col3_ref, w3_ref, b3, to_out)


def _layer1_patches(x_nhwc, WB):
    """im2col patches for the first conv on the (H, WB) padded output grid.

    Returns (N, H*WB, 9*Cin): row g = y*WB + x holds the 3x3xCin patch around
    output position (y, x); columns x >= W are junk and are masked in-kernel.
    """
    N, H, W, _ = x_nhwc.shape
    xp = jnp.pad(x_nhwc, ((0, 0), (1, 1), (1, WB + 1 - W), (0, 0)))
    taps = [xp[:, ky:ky + H, kx:kx + WB, :]
            for ky in range(3) for kx in range(3)]
    x1 = jnp.concatenate(taps, axis=-1)                # (N, H, WB, 9*Cin)
    return x1.reshape(N, H * WB, x1.shape[-1])


@jax.jit
def single_camera_encoder(x_nchw, params):
    """Forward pass matching torch SingleCameraEncoder.forward (NCHW in/out)."""
    (w1, b1), (w2, b2), (w3, b3) = params
    x = jnp.transpose(x_nchw, (0, 2, 3, 1))            # NCHW -> NHWC (once)
    N, H, W, Cin = x.shape
    C1, C2, C3 = w1.shape[-1], w2.shape[-1], w3.shape[-1]

    WB = ((W + 2 + 7) // 8) * 8          # flat-buffer row width, mult. of 8
    rb = 1                               # largest divisor of H with m <= 192
    for d in range(1, H + 1):
        if H % d == 0 and d * WB <= 192:
            rb = d
    m = rb * WB
    store_base = ((WB + 1 + 7) // 8) * 8         # aligned chunk-store origin
    p_rows = store_base + (H + 1) * WB           # flat buffer rows (+ slack)

    x1 = _layer1_patches(x, WB).astype(jnp.bfloat16)   # (N, H*WB, 9*Cin)
    mask = (jnp.arange(m) % WB < W).astype(jnp.float32).reshape(m, 1)
    w1s = w1.reshape(9 * Cin, C1).astype(jnp.bfloat16)
    w2s = w2.reshape(9 * C1, C2).astype(jnp.bfloat16)  # K-stacked, tap-major
    w3s = w3.reshape(9 * C2, C3).astype(jnp.bfloat16)

    out_flat = pl.pallas_call(
        functools.partial(encoder_kernel, H=H, W=W, WB=WB, rb=rb,
                          store_base=store_base),
        out_shape=jax.ShapeDtypeStruct((N, H * W, C3), jnp.float32),
        grid_spec=pltpu.PrefetchScalarGridSpec(
            num_scalar_prefetch=0,
            grid=(N,),
            in_specs=[
                pl.BlockSpec((1, H * WB, 9 * Cin), lambda n: (n, 0, 0)),
                pl.BlockSpec((m, 1), lambda n: (0, 0)),
                pl.BlockSpec((9 * Cin, C1), lambda n: (0, 0)),
                pl.BlockSpec((1, C1), lambda n: (0, 0)),
                pl.BlockSpec((9 * C1, C2), lambda n: (0, 0)),
                pl.BlockSpec((1, C2), lambda n: (0, 0)),
                pl.BlockSpec((9 * C2, C3), lambda n: (0, 0)),
                pl.BlockSpec((1, C3), lambda n: (0, 0)),
            ],
            out_specs=pl.BlockSpec((1, H * W, C3), lambda n: (n, 0, 0)),
            scratch_shapes=[
                pltpu.VMEM((p_rows, C1), jnp.float32),     # layer-1 acts
                pltpu.VMEM((p_rows, C2), jnp.float32),     # layer-2 acts
                pltpu.VMEM((m, 9 * C1), jnp.bfloat16),     # layer-2 im2col
                pltpu.VMEM((m, 9 * C2), jnp.bfloat16),     # layer-3 im2col
            ],
        ),
        # TODO(synk): at real camera resolutions add a second ("parallel")
        # row-block grid axis with a 2-row halo (sized against v7x's 64 MiB
        # VMEM) and set per-generation vmem_limit_bytes; at 16x16 the whole
        # frame trivially fits every generation's default scoped VMEM.
        compiler_params=pltpu.CompilerParams(
            dimension_semantics=("parallel",)),
    )(x1, mask, w1s, b1, w2s, b2, w3s, b3)

    out = out_flat.reshape(N, H, W, C3)                # free reshape
    return jnp.transpose(out, (0, 3, 1, 2))            # NHWC -> NCHW (once)


def _reference_encoder(x_nchw, params):
    """Pure-JAX reference with the same numerics policy as the kernel
    (bf16 MXU operands, f32 accumulation / bias / ReLU, f32 intermediates)."""
    x = x_nchw
    for (w, b) in params:
        y = lax.conv_general_dilated(
            x.astype(jnp.bfloat16), w.astype(jnp.bfloat16),
            window_strides=(1, 1), padding=((1, 1), (1, 1)),
            dimension_numbers=("NCHW", "HWIO", "NCHW"),
            preferred_element_type=jnp.float32)
        x = jnp.maximum(y + b[0][None, :, None, None], 0.0)
    return x


if __name__ == "__main__":
    key = jax.random.PRNGKey(0)
    k_x, k_p = jax.random.split(key)

    # Shapes consistent with the module: batch=2, input_channels=3,
    # spatial=16x16, latent_dim=128.
    N, Cin, H, W = 2, 3, 16, 16
    latent_dim = 128
    channels = [Cin, 32, 64, latent_dim]

    x = jax.random.normal(k_x, (N, Cin, H, W), jnp.float32)

    # Deterministic parameter init (PyTorch-style uniform bound 1/sqrt(fan_in)).
    params = []
    for i in range(3):
        k_p, kw, kb = jax.random.split(k_p, 3)
        cin, cout = channels[i], channels[i + 1]
        bound = 1.0 / float((cin * 9) ** 0.5)
        w = jax.random.uniform(kw, (3, 3, cin, cout), jnp.float32, -bound, bound)
        b = jax.random.uniform(kb, (1, cout), jnp.float32, -bound, bound)
        params.append((w, b))
    params = tuple(params)

    out = jax.block_until_ready(single_camera_encoder(x, params))
    assert out.shape == (N, latent_dim, H, W), out.shape

    ref = jax.block_until_ready(_reference_encoder(x, params))
    assert jnp.allclose(out, ref, atol=1e-3, rtol=1e-3), (
        float(jnp.max(jnp.abs(out - ref))))

    print("KERNEL_OK")
</pallas_src>

<mosaic_0001>
module attributes {stable_mosaic.version = 11 : i64} {
  func.func @encoder_kernel(%arg0: i32, %arg1: memref<1x384x27xbf16, #tpu.memory_space<vmem>>, %arg2: memref<192x1xf32, #tpu.memory_space<vmem>>, %arg3: memref<27x32xbf16, #tpu.memory_space<vmem>>, %arg4: memref<1x32xf32, #tpu.memory_space<vmem>>, %arg5: memref<288x64xbf16, #tpu.memory_space<vmem>>, %arg6: memref<1x64xf32, #tpu.memory_space<vmem>>, %arg7: memref<576x128xbf16, #tpu.memory_space<vmem>>, %arg8: memref<1x128xf32, #tpu.memory_space<vmem>>, %arg9: memref<1x256x128xf32, #tpu.memory_space<vmem>>, %arg10: memref<440x32xf32, #tpu.memory_space<vmem>>, %arg11: memref<440x64xf32, #tpu.memory_space<vmem>>, %arg12: memref<192x288xbf16, #tpu.memory_space<vmem>>, %arg13: memref<192x576xbf16, #tpu.memory_space<vmem>>) attributes {dimension_semantics = [#tpu.dimension_semantics<parallel>], iteration_bounds = array<i64: 2>, scalar_prefetch = 0 : i64, scratch_operands = 4 : i64, tpu.core_type = #tpu.core_type<tc>, window_params = [{transform_indices = @transform_0, window_bounds = array<i64: 1, 384, 27>}, {pipeline_mode = #tpu.pipeline_mode<synchronous>, transform_indices = @transform_1, window_bounds = array<i64: 192, 1>}, {pipeline_mode = #tpu.pipeline_mode<synchronous>, transform_indices = @transform_2, window_bounds = array<i64: 27, 32>}, {pipeline_mode = #tpu.pipeline_mode<synchronous>, transform_indices = @transform_3, window_bounds = array<i64: 1, 32>}, {pipeline_mode = #tpu.pipeline_mode<synchronous>, transform_indices = @transform_4, window_bounds = array<i64: 288, 64>}, {pipeline_mode = #tpu.pipeline_mode<synchronous>, transform_indices = @transform_5, window_bounds = array<i64: 1, 64>}, {pipeline_mode = #tpu.pipeline_mode<synchronous>, transform_indices = @transform_6, window_bounds = array<i64: 576, 128>}, {pipeline_mode = #tpu.pipeline_mode<synchronous>, transform_indices = @transform_7, window_bounds = array<i64: 1, 128>}, {transform_indices = @transform_8, window_bounds = array<i64: 1, 256, 128>}]} {
    %c0 = arith.constant 0 : index
    %c0_0 = arith.constant 0 : index
    %0 = vector.load %arg2[%c0, %c0_0] : memref<192x1xf32, #tpu.memory_space<vmem>>, vector<192x1xf32>
    %c0_1 = arith.constant 0 : index
    %c0_2 = arith.constant 0 : index
    %1 = vector.load %arg4[%c0_1, %c0_2] : memref<1x32xf32, #tpu.memory_space<vmem>>, vector<1x32xf32>
    %c0_3 = arith.constant 0 : index
    %c0_4 = arith.constant 0 : index
    %2 = vector.load %arg6[%c0_3, %c0_4] : memref<1x64xf32, #tpu.memory_space<vmem>>, vector<1x64xf32>
    %c0_5 = arith.constant 0 : index
    %c0_6 = arith.constant 0 : index
    %3 = vector.load %arg8[%c0_5, %c0_6] : memref<1x128xf32, #tpu.memory_space<vmem>>, vector<1x128xf32>
    %cst = arith.constant 0.000000e+00 : f32
    %4 = vector.broadcast %cst : f32 to vector<32x32xf32>
    %c0_7 = arith.constant 0 : index
    %c0_8 = arith.constant 0 : index
    %5 = vector.load %arg10[%c0_7, %c0_8] : memref<440x32xf32, #tpu.memory_space<vmem>>, vector<32x32xf32>
    tpu.vector_store %arg10[%c0_7, %c0_8], %4 {strides = array<i32>} : memref<440x32xf32, #tpu.memory_space<vmem>>, vector<32x32xf32>,
    %cst_9 = arith.constant 0.000000e+00 : f32
    %6 = vector.broadcast %cst_9 : f32 to vector<24x32xf32>
    %c416 = arith.constant 416 : index
    %c0_10 = arith.constant 0 : index
    %7 = vector.load %arg10[%c416, %c0_10] : memref<440x32xf32, #tpu.memory_space<vmem>>, vector<24x32xf32>
    tpu.vector_store %arg10[%c416, %c0_10], %6 {strides = array<i32>} : memref<440x32xf32, #tpu.memory_space<vmem>>, vector<24x32xf32>,
    %cst_11 = arith.constant 0.000000e+00 : f32
    %8 = vector.broadcast %cst_11 : f32 to vector<32x64xf32>
    %c0_12 = arith.constant 0 : index
    %c0_13 = arith.constant 0 : index
    %9 = vector.load %arg11[%c0_12, %c0_13] : memref<440x64xf32, #tpu.memory_space<vmem>>, vector<32x64xf32>
    tpu.vector_store %arg11[%c0_12, %c0_13], %8 {strides = array<i32>} : memref<440x64xf32, #tpu.memory_space<vmem>>, vector<32x64xf32>,
    %cst_14 = arith.constant 0.000000e+00 : f32
    %10 = vector.broadcast %cst_14 : f32 to vector<24x64xf32>
    %c416_15 = arith.constant 416 : index
    %c0_16 = arith.constant 0 : index
    %11 = vector.load %arg11[%c416_15, %c0_16] : memref<440x64xf32, #tpu.memory_space<vmem>>, vector<24x64xf32>
    tpu.vector_store %arg11[%c416_15, %c0_16], %10 {strides = array<i32>} : memref<440x64xf32, #tpu.memory_space<vmem>>, vector<24x64xf32>,
    %c0_17 = arith.constant 0 : index
    %c0_18 = arith.constant 0 : index
    %c0_19 = arith.constant 0 : index
    %12 = vector.load %arg1[%c0_17, %c0_18, %c0_19] : memref<1x384x27xbf16, #tpu.memory_space<vmem>>, vector<1x192x27xbf16>
    %13 = vector.shape_cast %12 : vector<1x192x27xbf16> to vector<192x27xbf16>
    %c0_20 = arith.constant 0 : index
    %c0_21 = arith.constant 0 : index
    %14 = vector.load %arg3[%c0_20, %c0_21] : memref<27x32xbf16, #tpu.memory_space<vmem>>, vector<27x32xbf16>
    %cst_22 = arith.constant dense<0.000000e+00> : vector<192x32xf32>
    %15 = tpu.matmul %13, %14, %cst_22 {dimension_numbers = #tpu.dot_dimension_numbers<[1], [0], [0], [1], [0, 0, 1, 1], [], []>} : vector<192x27xbf16>, vector<27x32xbf16>, vector<192x32xf32> -> vector<192x32xf32>
    %16 = vector.broadcast %1 : vector<1x32xf32> to vector<192x32xf32>
    %17 = arith.addf %15, %16 : vector<192x32xf32>
    %cst_23 = arith.constant 0.000000e+00 : f32
    %18 = vector.broadcast %cst_23 : f32 to vector<192x32xf32>
    %19 = arith.maximumf %17, %18 : vector<192x32xf32>
    %20 = vector.broadcast %0 : vector<192x1xf32> to vector<192x32xf32>
    %21 = arith.mulf %19, %20 : vector<192x32xf32>
    %c32 = arith.constant 32 : index
    %c0_24 = arith.constant 0 : index
    %22 = vector.load %arg10[%c32, %c0_24] : memref<440x32xf32, #tpu.memory_space<vmem>>, vector<192x32xf32>
    tpu.vector_store %arg10[%c32, %c0_24], %21 {strides = array<i32>} : memref<440x32xf32, #tpu.memory_space<vmem>>, vector<192x32xf32>,
    %c0_25 = arith.constant 0 : index
    %c192 = arith.constant 192 : index
    %c0_26 = arith.constant 0 : index
    %23 = vector.load %arg1[%c0_25, %c192, %c0_26] : memref<1x384x27xbf16, #tpu.memory_space<vmem>>, vector<1x192x27xbf16>
    %24 = vector.shape_cast %23 : vector<1x192x27xbf16> to vector<192x27xbf16>
    %c0_27 = arith.constant 0 : index
    %c0_28 = arith.constant 0 : index
    %25 = vector.load %arg3[%c0_27, %c0_28] : memref<27x32xbf16, #tpu.memory_space<vmem>>, vector<27x32xbf16>
    %cst_29 = arith.constant dense<0.000000e+00> : vector<192x32xf32>
    %26 = tpu.matmul %24, %25, %cst_29 {dimension_numbers = #tpu.dot_dimension_numbers<[1], [0], [0], [1], [0, 0, 1, 1], [], []>} : vector<192x27xbf16>, vector<27x32xbf16>, vector<192x32xf32> -> vector<192x32xf32>
    %27 = vector.broadcast %1 : vector<1x32xf32> to vector<192x32xf32>
    %28 = arith.addf %26, %27 : vector<192x32xf32>
    %cst_30 = arith.constant 0.000000e+00 : f32
    %29 = vector.broadcast %cst_30 : f32 to vector<192x32xf32>
    %30 = arith.maximumf %28, %29 : vector<192x32xf32>
    %31 = vector.broadcast %0 : vector<192x1xf32> to vector<192x32xf32>
    %32 = arith.mulf %30, %31 : vector<192x32xf32>
    %c224 = arith.constant 224 : index
    %c0_31 = arith.constant 0 : index
    %33 = vector.load %arg10[%c224, %c0_31] : memref<440x32xf32, #tpu.memory_space<vmem>>, vector<192x32xf32>
    tpu.vector_store %arg10[%c224, %c0_31], %32 {strides = array<i32>} : memref<440x32xf32, #tpu.memory_space<vmem>>, vector<192x32xf32>,
    %cst_32 = arith.constant 0.000000e+00 : f32
    %34 = vector.broadcast %cst_32 : f32 to vector<1x32xf32>
    %c8 = arith.constant 8 : index
    %c0_33 = arith.constant 0 : index
    %35 = vector.load %arg10[%c8, %c0_33] : memref<440x32xf32, #tpu.memory_space<vmem>>, vector<192x32xf32>
    %36 = vector.extract_strided_slice %35 {offsets = [0, 0], sizes = [191, 32], strides = [1, 1]} : vector<192x32xf32> to vector<191x32xf32>
    %37 = tpu.concatenate %34, %36 in 0 : vector<1x32xf32>, vector<191x32xf32> -> vector<192x32xf32>
    %38 = vector.extract_strided_slice %35 {offsets = [1, 0], sizes = [191, 32], strides = [1, 1]} : vector<192x32xf32> to vector<191x32xf32>
    %39 = tpu.concatenate %38, %34 in 0 : vector<191x32xf32>, vector<1x32xf32> -> vector<192x32xf32>
    %40 = arith.truncf %37 : vector<192x32xf32> to vector<192x32xbf16>
    %c0_34 = arith.constant 0 : index
    %c0_35 = arith.constant 0 : index
    %41 = vector.load %arg12[%c0_34, %c0_35] : memref<192x288xbf16, #tpu.memory_space<vmem>>, vector<192x32xbf16>
    tpu.vector_store %arg12[%c0_34, %c0_35], %40 {strides = array<i32>} : memref<192x288xbf16, #tpu.memory_space<vmem>>, vector<192x32xbf16>,
    %42 = arith.truncf %35 : vector<192x32xf32> to vector<192x32xbf16>
    %c0_36 = arith.constant 0 : index
    %c32_37 = arith.constant 32 : index
    %43 = vector.load %arg12[%c0_36, %c32_37] : memref<192x288xbf16, #tpu.memory_space<vmem>>, vector<192x32xbf16>
    tpu.vector_store %arg12[%c0_36, %c32_37], %42 {strides = array<i32>} : memref<192x288xbf16, #tpu.memory_space<vmem>>, vector<192x32xbf16>,
    %44 = arith.truncf %39 : vector<192x32xf32> to vector<192x32xbf16>
    %c0_38 = arith.constant 0 : index
    %c64 = arith.constant 64 : index
    %45 = vector.load %arg12[%c0_38, %c64] : memref<192x288xbf16, #tpu.memory_space<vmem>>, vector<192x32xbf16>
    tpu.vector_store %arg12[%c0_38, %c64], %44 {strides = array<i32>} : memref<192x288xbf16, #tpu.memory_space<vmem>>, vector<192x32xbf16>,
    %c32_39 = arith.constant 32 : index
    %c0_40 = arith.constant 0 : index
    %46 = vector.load %arg10[%c32_39, %c0_40] : memref<440x32xf32, #tpu.memory_space<vmem>>, vector<192x32xf32>
    %47 = vector.extract_strided_slice %46 {offsets = [0, 0], sizes = [191, 32], strides = [1, 1]} : vector<192x32xf32> to vector<191x32xf32>
    %48 = tpu.concatenate %34, %47 in 0 : vector<1x32xf32>, vector<191x32xf32> -> vector<192x32xf32>
    %49 = vector.extract_strided_slice %46 {offsets = [1, 0], sizes = [191, 32], strides = [1, 1]} : vector<192x32xf32> to vector<191x32xf32>
    %50 = tpu.concatenate %49, %34 in 0 : vector<191x32xf32>, vector<1x32xf32> -> vector<192x32xf32>
    %51 = arith.truncf %48 : vector<192x32xf32> to vector<192x32xbf16>
    %c0_41 = arith.constant 0 : index
    %c96 = arith.constant 96 : index
    %52 = vector.load %arg12[%c0_41, %c96] : memref<192x288xbf16, #tpu.memory_space<vmem>>, vector<192x32xbf16>
    tpu.vector_store %arg12[%c0_41, %c96], %51 {strides = array<i32>} : memref<192x288xbf16, #tpu.memory_space<vmem>>, vector<192x32xbf16>,
    %53 = arith.truncf %46 : vector<192x32xf32> to vector<192x32xbf16>
    %c0_42 = arith.constant 0 : index
    %c128 = arith.constant 128 : index
    %54 = vector.load %arg12[%c0_42, %c128] : memref<192x288xbf16, #tpu.memory_space<vmem>>, vector<192x32xbf16>
    tpu.vector_store %arg12[%c0_42, %c128], %53 {strides = array<i32>} : memref<192x288xbf16, #tpu.memory_space<vmem>>, vector<192x32xbf16>,
    %55 = arith.truncf %50 : vector<192x32xf32> to vector<192x32xbf16>
    %c0_43 = arith.constant 0 : index
    %c160 = arith.constant 160 : index
    %56 = vector.load %arg12[%c0_43, %c160] : memref<192x288xbf16, #tpu.memory_space<vmem>>, vector<192x32xbf16>
    tpu.vector_store %arg12[%c0_43, %c160], %55 {strides = array<i32>} : memref<192x288xbf16, #tpu.memory_space<vmem>>, vector<192x32xbf16>,
    %c56 = arith.constant 56 : index
    %c0_44 = arith.constant 0 : index
    %57 = vector.load %arg10[%c56, %c0_44] : memref<440x32xf32, #tpu.memory_space<vmem>>, vector<192x32xf32>
    %58 = vector.extract_strided_slice %57 {offsets = [0, 0], sizes = [191, 32], strides = [1, 1]} : vector<192x32xf32> to vector<191x32xf32>
    %59 = tpu.concatenate %34, %58 in 0 : vector<1x32xf32>, vector<191x32xf32> -> vector<192x32xf32>
    %60 = vector.extract_strided_slice %57 {offsets = [1, 0], sizes = [191, 32], strides = [1, 1]} : vector<192x32xf32> to vector<191x32xf32>
    %61 = tpu.concatenate %60, %34 in 0 : vector<191x32xf32>, vector<1x32xf32> -> vector<192x32xf32>
    %62 = arith.truncf %59 : vector<192x32xf32> to vector<192x32xbf16>
    %c0_45 = arith.constant 0 : index
    %c192_46 = arith.constant 192 : index
    %63 = vector.load %arg12[%c0_45, %c192_46] : memref<192x288xbf16, #tpu.memory_space<vmem>>, vector<192x32xbf16>
    tpu.vector_store %arg12[%c0_45, %c192_46], %62 {strides = array<i32>} : memref<192x288xbf16, #tpu.memory_space<vmem>>, vector<192x32xbf16>,
    %64 = arith.truncf %57 : vector<192x32xf32> to vector<192x32xbf16>
    %c0_47 = arith.constant 0 : index
    %c224_48 = arith.constant 224 : index
    %65 = vector.load %arg12[%c0_47, %c224_48] : memref<192x288xbf16, #tpu.memory_space<vmem>>, vector<192x32xbf16>
    tpu.vector_store %arg12[%c0_47, %c224_48], %64 {strides = array<i32>} : memref<192x288xbf16, #tpu.memory_space<vmem>>, vector<192x32xbf16>,
    %66 = arith.truncf %61 : vector<192x32xf32> to vector<192x32xbf16>
    %c0_49 = arith.constant 0 : index
    %c256 = arith.constant 256 : index
    %67 = vector.load %arg12[%c0_49, %c256] : memref<192x288xbf16, #tpu.memory_space<vmem>>, vector<192x32xbf16>
    tpu.vector_store %arg12[%c0_49, %c256], %66 {strides = array<i32>} : memref<192x288xbf16, #tpu.memory_space<vmem>>, vector<192x32xbf16>,
    %c0_50 = arith.constant 0 : index
    %c0_51 = arith.constant 0 : index
    %68 = vector.load %arg12[%c0_50, %c0_51] : memref<192x288xbf16, #tpu.memory_space<vmem>>, vector<192x288xbf16>
    %c0_52 = arith.constant 0 : index
    %c0_53 = arith.constant 0 : index
    %69 = vector.load %arg5[%c0_52, %c0_53] : memref<288x64xbf16, #tpu.memory_space<vmem>>, vector<288x64xbf16>
    %cst_54 = arith.constant dense<0.000000e+00> : vector<192x64xf32>
    %70 = tpu.matmul %68, %69, %cst_54 {dimension_numbers = #tpu.dot_dimension_numbers<[1], [0], [0], [1], [0, 0, 1, 1], [], []>} : vector<192x288xbf16>, vector<288x64xbf16>, vector<192x64xf32> -> vector<192x64xf32>
    %71 = vector.broadcast %2 : vector<1x64xf32> to vector<192x64xf32>
    %72 = arith.addf %70, %71 : vector<192x64xf32>
    %cst_55 = arith.constant 0.000000e+00 : f32
    %73 = vector.broadcast %cst_55 : f32 to vector<192x64xf32>
    %74 = arith.maximumf %72, %73 : vector<192x64xf32>
    %75 = vector.broadcast %0 : vector<192x1xf32> to vector<192x64xf32>
    %76 = arith.mulf %74, %75 : vector<192x64xf32>
    %c32_56 = arith.constant 32 : index
    %c0_57 = arith.constant 0 : index
    %77 = vector.load %arg11[%c32_56, %c0_57] : memref<440x64xf32, #tpu.memory_space<vmem>>, vector<192x64xf32>
    tpu.vector_store %arg11[%c32_56, %c0_57], %76 {strides = array<i32>} : memref<440x64xf32, #tpu.memory_space<vmem>>, vector<192x64xf32>,
    %c200 = arith.constant 200 : index
    %c0_58 = arith.constant 0 : index
    %78 = vector.load %arg10[%c200, %c0_58] : memref<440x32xf32, #tpu.memory_space<vmem>>, vector<192x32xf32>
    %79 = vector.extract_strided_slice %78 {offsets = [0, 0], sizes = [191, 32], strides = [1, 1]} : vector<192x32xf32> to vector<191x32xf32>
    %80 = tpu.concatenate %34, %79 in 0 : vector<1x32xf32>, vector<191x32xf32> -> vector<192x32xf32>
    %81 = vector.extract_strided_slice %78 {offsets = [1, 0], sizes = [191, 32], strides = [1, 1]} : vector<192x32xf32> to vector<191x32xf32>
    %82 = tpu.concatenate %81, %34 in 0 : vector<191x32xf32>, vector<1x32xf32> -> vector<192x32xf32>
    %83 = arith.truncf %80 : vector<192x32xf32> to vector<192x32xbf16>
    %c0_59 = arith.constant 0 : index
    %c0_60 = arith.constant 0 : index
    %84 = vector.load %arg12[%c0_59, %c0_60] : memref<192x288xbf16, #tpu.memory_space<vmem>>, vector<192x32xbf16>
    tpu.vector_store %arg12[%c0_59, %c0_60], %83 {strides = array<i32>} : memref<192x288xbf16, #tpu.memory_space<vmem>>, vector<192x32xbf16>,
    %85 = arith.truncf %78 : vector<192x32xf32> to vector<192x32xbf16>
    %c0_61 = arith.constant 0 : index
    %c32_62 = arith.constant 32 : index
    %86 = vector.load %arg12[%c0_61, %c32_62] : memref<192x288xbf16, #tpu.memory_space<vmem>>, vector<192x32xbf16>
    tpu.vector_store %arg12[%c0_61, %c32_62], %85 {strides = array<i32>} : memref<192x288xbf16, #tpu.memory_space<vmem>>, vector<192x32xbf16>,
    %87 = arith.truncf %82 : vector<192x32xf32> to vector<192x32xbf16>
    %c0_63 = arith.constant 0 : index
    %c64_64 = arith.constant 64 : index
    %88 = vector.load %arg12[%c0_63, %c64_64] : memref<192x288xbf16, #tpu.memory_space<vmem>>, vector<192x32xbf16>
    tpu.vector_store %arg12[%c0_63, %c64_64], %87 {strides = array<i32>} : memref<192x288xbf16, #tpu.memory_space<vmem>>, vector<192x32xbf16>,
    %c224_65 = arith.constant 224 : index
    %c0_66 = arith.constant 0 : index
    %89 = vector.load %arg10[%c224_65, %c0_66] : memref<440x32xf32, #tpu.memory_space<vmem>>, vector<192x32xf32>
    %90 = vector.extract_strided_slice %89 {offsets = [0, 0], sizes = [191, 32], strides = [1, 1]} : vector<192x32xf32> to vector<191x32xf32>
    %91 = tpu.concatenate %34, %90 in 0 : vector<1x32xf32>, vector<191x32xf32> -> vector<192x32xf32>
    %92 = vector.extract_strided_slice %89 {offsets = [1, 0], sizes = [191, 32], strides = [1, 1]} : vector<192x32xf32> to vector<191x32xf32>
    %93 = tpu.concatenate %92, %34 in 0 : vector<191x32xf32>, vector<1x32xf32> -> vector<192x32xf32>
    %94 = arith.truncf %91 : vector<192x32xf32> to vector<192x32xbf16>
    %c0_67 = arith.constant 0 : index
    %c96_68 = arith.constant 96 : index
    %95 = vector.load %arg12[%c0_67, %c96_68] : memref<192x288xbf16, #tpu.memory_space<vmem>>, vector<192x32xbf16>
    tpu.vector_store %arg12[%c0_67, %c96_68], %94 {strides = array<i32>} : memref<192x288xbf16, #tpu.memory_space<vmem>>, vector<192x32xbf16>,
    %96 = arith.truncf %89 : vector<192x32xf32> to vector<192x32xbf16>
    %c0_69 = arith.constant 0 : index
    %c128_70 = arith.constant 128 : index
    %97 = vector.load %arg12[%c0_69, %c128_70] : memref<192x288xbf16, #tpu.memory_space<vmem>>, vector<192x32xbf16>
    tpu.vector_store %arg12[%c0_69, %c128_70], %96 {strides = array<i32>} : memref<192x288xbf16, #tpu.memory_space<vmem>>, vector<192x32xbf16>,
    %98 = arith.truncf %93 : vector<192x32xf32> to vector<192x32xbf16>
    %c0_71 = arith.constant 0 : index
    %c160_72 = arith.constant 160 : index
    %99 = vector.load %arg12[%c0_71, %c160_72] : memref<192x288xbf16, #tpu.memory_space<vmem>>, vector<192x32xbf16>
    tpu.vector_store %arg12[%c0_71, %c160_72], %98 {strides = array<i32>} : memref<192x288xbf16, #tpu.memory_space<vmem>>, vector<192x32xbf16>,
    %c248 = arith.constant 248 : index
    %c0_73 = arith.constant 0 : index
    %100 = vector.load %arg10[%c248, %c0_73] : memref<440x32xf32, #tpu.memory_space<vmem>>, vector<192x32xf32>
    %101 = vector.extract_strided_slice %100 {offsets = [0, 0], sizes = [191, 32], strides = [1, 1]} : vector<192x32xf32> to vector<191x32xf32>
    %102 = tpu.concatenate %34, %101 in 0 : vector<1x32xf32>, vector<191x32xf32> -> vector<192x32xf32>
    %103 = vector.extract_strided_slice %100 {offsets = [1, 0], sizes = [191, 32], strides = [1, 1]} : vector<192x32xf32> to vector<191x32xf32>
    %104 = tpu.concatenate %103, %34 in 0 : vector<191x32xf32>, vector<1x32xf32> -> vector<192x32xf32>
    %105 = arith.truncf %102 : vector<192x32xf32> to vector<192x32xbf16>
    %c0_74 = arith.constant 0 : index
    %c192_75 = arith.constant 192 : index
    %106 = vector.load %arg12[%c0_74, %c192_75] : memref<192x288xbf16, #tpu.memory_space<vmem>>, vector<192x32xbf16>
    tpu.vector_store %arg12[%c0_74, %c192_75], %105 {strides = array<i32>} : memref<192x288xbf16, #tpu.memory_space<vmem>>, vector<192x32xbf16>,
    %107 = arith.truncf %100 : vector<192x32xf32> to vector<192x32xbf16>
    %c0_76 = arith.constant 0 : index
    %c224_77 = arith.constant 224 : index
    %108 = vector.load %arg12[%c0_76, %c224_77] : memref<192x288xbf16, #tpu.memory_space<vmem>>, vector<192x32xbf16>
    tpu.vector_store %arg12[%c0_76, %c224_77], %107 {strides = array<i32>} : memref<192x288xbf16, #tpu.memory_space<vmem>>, vector<192x32xbf16>,
    %109 = arith.truncf %104 : vector<192x32xf32> to vector<192x32xbf16>
    %c0_78 = arith.constant 0 : index
    %c256_79 = arith.constant 256 : index
    %110 = vector.load %arg12[%c0_78, %c256_79] : memref<192x288xbf16, #tpu.memory_space<vmem>>, vector<192x32xbf16>
    tpu.vector_store %arg12[%c0_78, %c256_79], %109 {strides = array<i32>} : memref<192x288xbf16, #tpu.memory_space<vmem>>, vector<192x32xbf16>,
    %c0_80 = arith.constant 0 : index
    %c0_81 = arith.constant 0 : index
    %111 = vector.load %arg12[%c0_80, %c0_81] : memref<192x288xbf16, #tpu.memory_space<vmem>>, vector<192x288xbf16>
    %c0_82 = arith.constant 0 : index
    %c0_83 = arith.constant 0 : index
    %112 = vector.load %arg5[%c0_82, %c0_83] : memref<288x64xbf16, #tpu.memory_space<vmem>>, vector<288x64xbf16>
    %cst_84 = arith.constant dense<0.000000e+00> : vector<192x64xf32>
    %113 = tpu.matmul %111, %112, %cst_84 {dimension_numbers = #tpu.dot_dimension_numbers<[1], [0], [0], [1], [0, 0, 1, 1], [], []>} : vector<192x288xbf16>, vector<288x64xbf16>, vector<192x64xf32> -> vector<192x64xf32>
    %114 = vector.broadcast %2 : vector<1x64xf32> to vector<192x64xf32>
    %115 = arith.addf %113, %114 : vector<192x64xf32>
    %cst_85 = arith.constant 0.000000e+00 : f32
    %116 = vector.broadcast %cst_85 : f32 to vector<192x64xf32>
    %117 = arith.maximumf %115, %116 : vector<192x64xf32>
    %118 = vector.broadcast %0 : vector<192x1xf32> to vector<192x64xf32>
    %119 = arith.mulf %117, %118 : vector<192x64xf32>
    %c224_86 = arith.constant 224 : index
    %c0_87 = arith.constant 0 : index
    %120 = vector.load %arg11[%c224_86, %c0_87] : memref<440x64xf32, #tpu.memory_space<vmem>>, vector<192x64xf32>
    tpu.vector_store %arg11[%c224_86, %c0_87], %119 {strides = array<i32>} : memref<440x64xf32, #tpu.memory_space<vmem>>, vector<192x64xf32>,
    %cst_88 = arith.constant 0.000000e+00 : f32
    %121 = vector.broadcast %cst_88 : f32 to vector<1x64xf32>
    %c8_89 = arith.constant 8 : index
    %c0_90 = arith.constant 0 : index
    %122 = vector.load %arg11[%c8_89, %c0_90] : memref<440x64xf32, #tpu.memory_space<vmem>>, vector<192x64xf32>
    %123 = vector.extract_strided_slice %122 {offsets = [0, 0], sizes = [191, 64], strides = [1, 1]} : vector<192x64xf32> to vector<191x64xf32>
    %124 = tpu.concatenate %121, %123 in 0 : vector<1x64xf32>, vector<191x64xf32> -> vector<192x64xf32>
    %125 = vector.extract_strided_slice %122 {offsets = [1, 0], sizes = [191, 64], strides = [1, 1]} : vector<192x64xf32> to vector<191x64xf32>
    %126 = tpu.concatenate %125, %121 in 0 : vector<191x64xf32>, vector<1x64xf32> -> vector<192x64xf32>
    %127 = arith.truncf %124 : vector<192x64xf32> to vector<192x64xbf16>
    %c0_91 = arith.constant 0 : index
    %c0_92 = arith.constant 0 : index
    %128 = vector.load %arg13[%c0_91, %c0_92] : memref<192x576xbf16, #tpu.memory_space<vmem>>, vector<192x64xbf16>
    tpu.vector_store %arg13[%c0_91, %c0_92], %127 {strides = array<i32>} : memref<192x576xbf16, #tpu.memory_space<vmem>>, vector<192x64xbf16>,
    %129 = arith.truncf %122 : vector<192x64xf32> to vector<192x64xbf16>
    %c0_93 = arith.constant 0 : index
    %c64_94 = arith.constant 64 : index
    %130 = vector.load %arg13[%c0_93, %c64_94] : memref<192x576xbf16, #tpu.memory_space<vmem>>, vector<192x64xbf16>
    tpu.vector_store %arg13[%c0_93, %c64_94], %129 {strides = array<i32>} : memref<192x576xbf16, #tpu.memory_space<vmem>>, vector<192x64xbf16>,
    %131 = arith.truncf %126 : vector<192x64xf32> to vector<192x64xbf16>
    %c0_95 = arith.constant 0 : index
    %c128_96 = arith.constant 128 : index
    %132 = vector.load %arg13[%c0_95, %c128_96] : memref<192x576xbf16, #tpu.memory_space<vmem>>, vector<192x64xbf16>
    tpu.vector_store %arg13[%c0_95, %c128_96], %131 {strides = array<i32>} : memref<192x576xbf16, #tpu.memory_space<vmem>>, vector<192x64xbf16>,
    %c32_97 = arith.constant 32 : index
    %c0_98 = arith.constant 0 : index
    %133 = vector.load %arg11[%c32_97, %c0_98] : memref<440x64xf32, #tpu.memory_space<vmem>>, vector<192x64xf32>
    %134 = vector.extract_strided_slice %133 {offsets = [0, 0], sizes = [191, 64], strides = [1, 1]} : vector<192x64xf32> to vector<191x64xf32>
    %135 = tpu.concatenate %121, %134 in 0 : vector<1x64xf32>, vector<191x64xf32> -> vector<192x64xf32>
    %136 = vector.extract_strided_slice %133 {offsets = [1, 0], sizes = [191, 64], strides = [1, 1]} : vector<192x64xf32> to vector<191x64xf32>
    %137 = tpu.concatenate %136, %121 in 0 : vector<191x64xf32>, vector<1x64xf32> -> vector<192x64xf32>
    %138 = arith.truncf %135 : vector<192x64xf32> to vector<192x64xbf16>
    %c0_99 = arith.constant 0 : index
    %c192_100 = arith.constant 192 : index
    %139 = vector.load %arg13[%c0_99, %c192_100] : memref<192x576xbf16, #tpu.memory_space<vmem>>, vector<192x64xbf16>
    tpu.vector_store %arg13[%c0_99, %c192_100], %138 {strides = array<i32>} : memref<192x576xbf16, #tpu.memory_space<vmem>>, vector<192x64xbf16>,
    %140 = arith.truncf %133 : vector<192x64xf32> to vector<192x64xbf16>
    %c0_101 = arith.constant 0 : index
    %c256_102 = arith.constant 256 : index
    %141 = vector.load %arg13[%c0_101, %c256_102] : memref<192x576xbf16, #tpu.memory_space<vmem>>, vector<192x64xbf16>
    tpu.vector_store %arg13[%c0_101, %c256_102], %140 {strides = array<i32>} : memref<192x576xbf16, #tpu.memory_space<vmem>>, vector<192x64xbf16>,
    %142 = arith.truncf %137 : vector<192x64xf32> to vector<192x64xbf16>
    %c0_103 = arith.constant 0 : index
    %c320 = arith.constant 320 : index
    %143 = vector.load %arg13[%c0_103, %c320] : memref<192x576xbf16, #tpu.memory_space<vmem>>, vector<192x64xbf16>
    tpu.vector_store %arg13[%c0_103, %c320], %142 {strides = array<i32>} : memref<192x576xbf16, #tpu.memory_space<vmem>>, vector<192x64xbf16>,
    %c56_104 = arith.constant 56 : index
    %c0_105 = arith.constant 0 : index
    %144 = vector.load %arg11[%c56_104, %c0_105] : memref<440x64xf32, #tpu.memory_space<vmem>>, vector<192x64xf32>
    %145 = vector.extract_strided_slice %144 {offsets = [0, 0], sizes = [191, 64], strides = [1, 1]} : vector<192x64xf32> to vector<191x64xf32>
    %146 = tpu.concatenate %121, %145 in 0 : vector<1x64xf32>, vector<191x64xf32> -> vector<192x64xf32>
    %147 = vector.extract_strided_slice %144 {offsets = [1, 0], sizes = [191, 64], strides = [1, 1]} : vector<192x64xf32> to vector<191x64xf32>
    %148 = tpu.concatenate %147, %121 in 0 : vector<191x64xf32>, vector<1x64xf32> -> vector<192x64xf32>
    %149 = arith.truncf %146 : vector<192x64xf32> to vector<192x64xbf16>
    %c0_106 = arith.constant 0 : index
    %c384 = arith.constant 384 : index
    %150 = vector.load %arg13[%c0_106, %c384] : memref<192x576xbf16, #tpu.memory_space<vmem>>, vector<192x64xbf16>
    tpu.vector_store %arg13[%c0_106, %c384], %149 {strides = array<i32>} : memref<192x576xbf16, #tpu.memory_space<vmem>>, vector<192x64xbf16>,
    %151 = arith.truncf %144 : vector<192x64xf32> to vector<192x64xbf16>
    %c0_107 = arith.constant 0 : index
    %c448 = arith.constant 448 : index
    %152 = vector.load %arg13[%c0_107, %c448] : memref<192x576xbf16, #tpu.memory_space<vmem>>, vector<192x64xbf16>
    tpu.vector_store %arg13[%c0_107, %c448], %151 {strides = array<i32>} : memref<192x576xbf16, #tpu.memory_space<vmem>>, vector<192x64xbf16>,
    %153 = arith.truncf %148 : vector<192x64xf32> to vector<192x64xbf16>
    %c0_108 = arith.constant 0 : index
    %c512 = arith.constant 512 : index
    %154 = vector.load %arg13[%c0_108, %c512] : memref<192x576xbf16, #tpu.memory_space<vmem>>, vector<192x64xbf16>
    tpu.vector_store %arg13[%c0_108, %c512], %153 {strides = array<i32>} : memref<192x576xbf16, #tpu.memory_space<vmem>>, vector<192x64xbf16>,
    %c0_109 = arith.constant 0 : index
    %c0_110 = arith.constant 0 : index
    %155 = vector.load %arg13[%c0_109, %c0_110] : memref<192x576xbf16, #tpu.memory_space<vmem>>, vector<192x576xbf16>
    %c0_111 = arith.constant 0 : index
    %c0_112 = arith.constant 0 : index
    %156 = vector.load %arg7[%c0_111, %c0_112] : memref<576x128xbf16, #tpu.memory_space<vmem>>, vector<576x128xbf16>
    %cst_113 = arith.constant dense<0.000000e+00> : vector<192x128xf32>
    %157 = tpu.matmul %155, %156, %cst_113 {dimension_numbers = #tpu.dot_dimension_numbers<[1], [0], [0], [1], [0, 0, 1, 1], [], []>} : vector<192x576xbf16>, vector<576x128xbf16>, vector<192x128xf32> -> vector<192x128xf32>
    %158 = vector.broadcast %3 : vector<1x128xf32> to vector<192x128xf32>
    %159 = arith.addf %157, %158 : vector<192x128xf32>
    %cst_114 = arith.constant 0.000000e+00 : f32
    %160 = vector.broadcast %cst_114 : f32 to vector<192x128xf32>
    %161 = arith.maximumf %159, %160 : vector<192x128xf32>
    %162 = vector.extract_strided_slice %161 {offsets = [0, 0], sizes = [16, 128], strides = [1, 1]} : vector<192x128xf32> to vector<16x128xf32>
    %c0_115 = arith.constant 0 : index
    %c0_116 = arith.constant 0 : index
    %c0_117 = arith.constant 0 : index
    %163 = vector.load %arg9[%c0_115, %c0_116, %c0_117] : memref<1x256x128xf32, #tpu.memory_space<vmem>>, vector<1x16x128xf32>
    %164 = vector.shape_cast %163 : vector<1x16x128xf32> to vector<16x128xf32>
    %165 = vector.shape_cast %162 : vector<16x128xf32> to vector<1x16x128xf32>
    tpu.vector_store %arg9[%c0_115, %c0_116, %c0_117], %165 {strides = array<i32>} : memref<1x256x128xf32, #tpu.memory_space<vmem>>, vector<1x16x128xf32>,
    %166 = vector.extract_strided_slice %161 {offsets = [24, 0], sizes = [16, 128], strides = [1, 1]} : vector<192x128xf32> to vector<16x128xf32>
    %c0_118 = arith.constant 0 : index
    %c16 = arith.constant 16 : index
    %c0_119 = arith.constant 0 : index
    %167 = vector.load %arg9[%c0_118, %c16, %c0_119] : memref<1x256x128xf32, #tpu.memory_space<vmem>>, vector<1x16x128xf32>
    %168 = vector.shape_cast %167 : vector<1x16x128xf32> to vector<16x128xf32>
    %169 = vector.shape_cast %166 : vector<16x128xf32> to vector<1x16x128xf32>
    tpu.vector_store %arg9[%c0_118, %c16, %c0_119], %169 {strides = array<i32>} : memref<1x256x128xf32, #tpu.memory_space<vmem>>, vector<1x16x128xf32>,
    %170 = vector.extract_strided_slice %161 {offsets = [48, 0], sizes = [16, 128], strides = [1, 1]} : vector<192x128xf32> to vector<16x128xf32>
    %c0_120 = arith.constant 0 : index
    %c32_121 = arith.constant 32 : index
    %c0_122 = arith.constant 0 : index
    %171 = vector.load %arg9[%c0_120, %c32_121, %c0_122] : memref<1x256x128xf32, #tpu.memory_space<vmem>>, vector<1x16x128xf32>
    %172 = vector.shape_cast %171 : vector<1x16x128xf32> to vector<16x128xf32>
    %173 = vector.shape_cast %170 : vector<16x128xf32> to vector<1x16x128xf32>
    tpu.vector_store %arg9[%c0_120, %c32_121, %c0_122], %173 {strides = array<i32>} : memref<1x256x128xf32, #tpu.memory_space<vmem>>, vector<1x16x128xf32>,
    %174 = vector.extract_strided_slice %161 {offsets = [72, 0], sizes = [16, 128], strides = [1, 1]} : vector<192x128xf32> to vector<16x128xf32>
    %c0_123 = arith.constant 0 : index
    %c48 = arith.constant 48 : index
    %c0_124 = arith.constant 0 : index
    %175 = vector.load %arg9[%c0_123, %c48, %c0_124] : memref<1x256x128xf32, #tpu.memory_space<vmem>>, vector<1x16x128xf32>
    %176 = vector.shape_cast %175 : vector<1x16x128xf32> to vector<16x128xf32>
    %177 = vector.shape_cast %174 : vector<16x128xf32> to vector<1x16x128xf32>
    tpu.vector_store %arg9[%c0_123, %c48, %c0_124], %177 {strides = array<i32>} : memref<1x256x128xf32, #tpu.memory_space<vmem>>, vector<1x16x128xf32>,
    %178 = vector.extract_strided_slice %161 {offsets = [96, 0], sizes = [16, 128], strides = [1, 1]} : vector<192x128xf32> to vector<16x128xf32>
    %c0_125 = arith.constant 0 : index
    %c64_126 = arith.constant 64 : index
    %c0_127 = arith.constant 0 : index
    %179 = vector.load %arg9[%c0_125, %c64_126, %c0_127] : memref<1x256x128xf32, #tpu.memory_space<vmem>>, vector<1x16x128xf32>
    %180 = vector.shape_cast %179 : vector<1x16x128xf32> to vector<16x128xf32>
    %181 = vector.shape_cast %178 : vector<16x128xf32> to vector<1x16x128xf32>
    tpu.vector_store %arg9[%c0_125, %c64_126, %c0_127], %181 {strides = array<i32>} : memref<1x256x128xf32, #tpu.memory_space<vmem>>, vector<1x16x128xf32>,
    %182 = vector.extract_strided_slice %161 {offsets = [120, 0], sizes = [16, 128], strides = [1, 1]} : vector<192x128xf32> to vector<16x128xf32>
    %c0_128 = arith.constant 0 : index
    %c80 = arith.constant 80 : index
    %c0_129 = arith.constant 0 : index
    %183 = vector.load %arg9[%c0_128, %c80, %c0_129] : memref<1x256x128xf32, #tpu.memory_space<vmem>>, vector<1x16x128xf32>
    %184 = vector.shape_cast %183 : vector<1x16x128xf32> to vector<16x128xf32>
    %185 = vector.shape_cast %182 : vector<16x128xf32> to vector<1x16x128xf32>
    tpu.vector_store %arg9[%c0_128, %c80, %c0_129], %185 {strides = array<i32>} : memref<1x256x128xf32, #tpu.memory_space<vmem>>, vector<1x16x128xf32>,
    %186 = vector.extract_strided_slice %161 {offsets = [144, 0], sizes = [16, 128], strides = [1, 1]} : vector<192x128xf32> to vector<16x128xf32>
    %c0_130 = arith.constant 0 : index
    %c96_131 = arith.constant 96 : index
    %c0_132 = arith.constant 0 : index
    %187 = vector.load %arg9[%c0_130, %c96_131, %c0_132] : memref<1x256x128xf32, #tpu.memory_space<vmem>>, vector<1x16x128xf32>
    %188 = vector.shape_cast %187 : vector<1x16x128xf32> to vector<16x128xf32>
    %189 = vector.shape_cast %186 : vector<16x128xf32> to vector<1x16x128xf32>
    tpu.vector_store %arg9[%c0_130, %c96_131, %c0_132], %189 {strides = array<i32>} : memref<1x256x128xf32, #tpu.memory_space<vmem>>, vector<1x16x128xf32>,
    %190 = vector.extract_strided_slice %161 {offsets = [168, 0], sizes = [16, 128], strides = [1, 1]} : vector<192x128xf32> to vector<16x128xf32>
    %c0_133 = arith.constant 0 : index
    %c112 = arith.constant 112 : index
    %c0_134 = arith.constant 0 : index
    %191 = vector.load %arg9[%c0_133, %c112, %c0_134] : memref<1x256x128xf32, #tpu.memory_space<vmem>>, vector<1x16x128xf32>
    %192 = vector.shape_cast %191 : vector<1x16x128xf32> to vector<16x128xf32>
    %193 = vector.shape_cast %190 : vector<16x128xf32> to vector<1x16x128xf32>
    tpu.vector_store %arg9[%c0_133, %c112, %c0_134], %193 {strides = array<i32>} : memref<1x256x128xf32, #tpu.memory_space<vmem>>, vector<1x16x128xf32>,
    %c200_135 = arith.constant 200 : index
    %c0_136 = arith.constant 0 : index
    %194 = vector.load %arg11[%c200_135, %c0_136] : memref<440x64xf32, #tpu.memory_space<vmem>>, vector<192x64xf32>
    %195 = vector.extract_strided_slice %194 {offsets = [0, 0], sizes = [191, 64], strides = [1, 1]} : vector<192x64xf32> to vector<191x64xf32>
    %196 = tpu.concatenate %121, %195 in 0 : vector<1x64xf32>, vector<191x64xf32> -> vector<192x64xf32>
    %197 = vector.extract_strided_slice %194 {offsets = [1, 0], sizes = [191, 64], strides = [1, 1]} : vector<192x64xf32> to vector<191x64xf32>
    %198 = tpu.concatenate %197, %121 in 0 : vector<191x64xf32>, vector<1x64xf32> -> vector<192x64xf32>
    %199 = arith.truncf %196 : vector<192x64xf32> to vector<192x64xbf16>
    %c0_137 = arith.constant 0 : index
    %c0_138 = arith.constant 0 : index
    %200 = vector.load %arg13[%c0_137, %c0_138] : memref<192x576xbf16, #tpu.memory_space<vmem>>, vector<192x64xbf16>
    tpu.vector_store %arg13[%c0_137, %c0_138], %199 {strides = array<i32>} : memref<192x576xbf16, #tpu.memory_space<vmem>>, vector<192x64xbf16>,
    %201 = arith.truncf %194 : vector<192x64xf32> to vector<192x64xbf16>
    %c0_139 = arith.constant 0 : index
    %c64_140 = arith.constant 64 : index
    %202 = vector.load %arg13[%c0_139, %c64_140] : memref<192x576xbf16, #tpu.memory_space<vmem>>, vector<192x64xbf16>
    tpu.vector_store %arg13[%c0_139, %c64_140], %201 {strides = array<i32>} : memref<192x576xbf16, #tpu.memory_space<vmem>>, vector<192x64xbf16>,
    %203 = arith.truncf %198 : vector<192x64xf32> to vector<192x64xbf16>
    %c0_141 = arith.constant 0 : index
    %c128_142 = arith.constant 128 : index
    %204 = vector.load %arg13[%c0_141, %c128_142] : memref<192x576xbf16, #tpu.memory_space<vmem>>, vector<192x64xbf16>
    tpu.vector_store %arg13[%c0_141, %c128_142], %203 {strides = array<i32>} : memref<192x576xbf16, #tpu.memory_space<vmem>>, vector<192x64xbf16>,
    %c224_143 = arith.constant 224 : index
    %c0_144 = arith.constant 0 : index
    %205 = vector.load %arg11[%c224_143, %c0_144] : memref<440x64xf32, #tpu.memory_space<vmem>>, vector<192x64xf32>
    %206 = vector.extract_strided_slice %205 {offsets = [0, 0], sizes = [191, 64], strides = [1, 1]} : vector<192x64xf32> to vector<191x64xf32>
    %207 = tpu.concatenate %121, %206 in 0 : vector<1x64xf32>, vector<191x64xf32> -> vector<192x64xf32>
    %208 = vector.extract_strided_slice %205 {offsets = [1, 0], sizes = [191, 64], strides = [1, 1]} : vector<192x64xf32> to vector<191x64xf32>
    %209 = tpu.concatenate %208, %121 in 0 : vector<191x64xf32>, vector<1x64xf32> -> vector<192x64xf32>
    %210 = arith.truncf %207 : vector<192x64xf32> to vector<192x64xbf16>
    %c0_145 = arith.constant 0 : index
    %c192_146 = arith.constant 192 : index
    %211 = vector.load %arg13[%c0_145, %c192_146] : memref<192x576xbf16, #tpu.memory_space<vmem>>, vector<192x64xbf16>
    tpu.vector_store %arg13[%c0_145, %c192_146], %210 {strides = array<i32>} : memref<192x576xbf16, #tpu.memory_space<vmem>>, vector<192x64xbf16>,
    %212 = arith.truncf %205 : vector<192x64xf32> to vector<192x64xbf16>
    %c0_147 = arith.constant 0 : index
    %c256_148 = arith.constant 256 : index
    %213 = vector.load %arg13[%c0_147, %c256_148] : memref<192x576xbf16, #tpu.memory_space<vmem>>, vector<192x64xbf16>
    tpu.vector_store %arg13[%c0_147, %c256_148], %212 {strides = array<i32>} : memref<192x576xbf16, #tpu.memory_space<vmem>>, vector<192x64xbf16>,
    %214 = arith.truncf %209 : vector<192x64xf32> to vector<192x64xbf16>
    %c0_149 = arith.constant 0 : index
    %c320_150 = arith.constant 320 : index
    %215 = vector.load %arg13[%c0_149, %c320_150] : memref<192x576xbf16, #tpu.memory_space<vmem>>, vector<192x64xbf16>
    tpu.vector_store %arg13[%c0_149, %c320_150], %214 {strides = array<i32>} : memref<192x576xbf16, #tpu.memory_space<vmem>>, vector<192x64xbf16>,
    %c248_151 = arith.constant 248 : index
    %c0_152 = arith.constant 0 : index
    %216 = vector.load %arg11[%c248_151, %c0_152] : memref<440x64xf32, #tpu.memory_space<vmem>>, vector<192x64xf32>
    %217 = vector.extract_strided_slice %216 {offsets = [0, 0], sizes = [191, 64], strides = [1, 1]} : vector<192x64xf32> to vector<191x64xf32>
    %218 = tpu.concatenate %121, %217 in 0 : vector<1x64xf32>, vector<191x64xf32> -> vector<192x64xf32>
    %219 = vector.extract_strided_slice %216 {offsets = [1, 0], sizes = [191, 64], strides = [1, 1]} : vector<192x64xf32> to vector<191x64xf32>
    %220 = tpu.concatenate %219, %121 in 0 : vector<191x64xf32>, vector<1x64xf32> -> vector<192x64xf32>
    %221 = arith.truncf %218 : vector<192x64xf32> to vector<192x64xbf16>
    %c0_153 = arith.constant 0 : index
    %c384_154 = arith.constant 384 : index
    %222 = vector.load %arg13[%c0_153, %c384_154] : memref<192x576xbf16, #tpu.memory_space<vmem>>, vector<192x64xbf16>
    tpu.vector_store %arg13[%c0_153, %c384_154], %221 {strides = array<i32>} : memref<192x576xbf16, #tpu.memory_space<vmem>>, vector<192x64xbf16>,
    %223 = arith.truncf %216 : vector<192x64xf32> to vector<192x64xbf16>
    %c0_155 = arith.constant 0 : index
    %c448_156 = arith.constant 448 : index
    %224 = vector.load %arg13[%c0_155, %c448_156] : memref<192x576xbf16, #tpu.memory_space<vmem>>, vector<192x64xbf16>
    tpu.vector_store %arg13[%c0_155, %c448_156], %223 {strides = array<i32>} : memref<192x576xbf16, #tpu.memory_space<vmem>>, vector<192x64xbf16>,
    %225 = arith.truncf %220 : vector<192x64xf32> to vector<192x64xbf16>
    %c0_157 = arith.constant 0 : index
    %c512_158 = arith.constant 512 : index
    %226 = vector.load %arg13[%c0_157, %c512_158] : memref<192x576xbf16, #tpu.memory_space<vmem>>, vector<192x64xbf16>
    tpu.vector_store %arg13[%c0_157, %c512_158], %225 {strides = array<i32>} : memref<192x576xbf16, #tpu.memory_space<vmem>>, vector<192x64xbf16>,
    %c0_159 = arith.constant 0 : index
    %c0_160 = arith.constant 0 : index
    %227 = vector.load %arg13[%c0_159, %c0_160] : memref<192x576xbf16, #tpu.memory_space<vmem>>, vector<192x576xbf16>
    %c0_161 = arith.constant 0 : index
    %c0_162 = arith.constant 0 : index
    %228 = vector.load %arg7[%c0_161, %c0_162] : memref<576x128xbf16, #tpu.memory_space<vmem>>, vector<576x128xbf16>
    %cst_163 = arith.constant dense<0.000000e+00> : vector<192x128xf32>
    %229 = tpu.matmul %227, %228, %cst_163 {dimension_numbers = #tpu.dot_dimension_numbers<[1], [0], [0], [1], [0, 0, 1, 1], [], []>} : vector<192x576xbf16>, vector<576x128xbf16>, vector<192x128xf32> -> vector<192x128xf32>
    %230 = vector.broadcast %3 : vector<1x128xf32> to vector<192x128xf32>
    %231 = arith.addf %229, %230 : vector<192x128xf32>
    %cst_164 = arith.constant 0.000000e+00 : f32
    %232 = vector.broadcast %cst_164 : f32 to vector<192x128xf32>
    %233 = arith.maximumf %231, %232 : vector<192x128xf32>
    %234 = vector.extract_strided_slice %233 {offsets = [0, 0], sizes = [16, 128], strides = [1, 1]} : vector<192x128xf32> to vector<16x128xf32>
    %c0_165 = arith.constant 0 : index
    %c128_166 = arith.constant 128 : index
    %c0_167 = arith.constant 0 : index
    %235 = vector.load %arg9[%c0_165, %c128_166, %c0_167] : memref<1x256x128xf32, #tpu.memory_space<vmem>>, vector<1x16x128xf32>
    %236 = vector.shape_cast %235 : vector<1x16x128xf32> to vector<16x128xf32>
    %237 = vector.shape_cast %234 : vector<16x128xf32> to vector<1x16x128xf32>
    tpu.vector_store %arg9[%c0_165, %c128_166, %c0_167], %237 {strides = array<i32>} : memref<1x256x128xf32, #tpu.memory_space<vmem>>, vector<1x16x128xf32>,
    %238 = vector.extract_strided_slice %233 {offsets = [24, 0], sizes = [16, 128], strides = [1, 1]} : vector<192x128xf32> to vector<16x128xf32>
    %c0_168 = arith.constant 0 : index
    %c144 = arith.constant 144 : index
    %c0_169 = arith.constant 0 : index
    %239 = vector.load %arg9[%c0_168, %c144, %c0_169] : memref<1x256x128xf32, #tpu.memory_space<vmem>>, vector<1x16x128xf32>
    %240 = vector.shape_cast %239 : vector<1x16x128xf32> to vector<16x128xf32>
    %241 = vector.shape_cast %238 : vector<16x128xf32> to vector<1x16x128xf32>
    tpu.vector_store %arg9[%c0_168, %c144, %c0_169], %241 {strides = array<i32>} : memref<1x256x128xf32, #tpu.memory_space<vmem>>, vector<1x16x128xf32>,
    %242 = vector.extract_strided_slice %233 {offsets = [48, 0], sizes = [16, 128], strides = [1, 1]} : vector<192x128xf32> to vector<16x128xf32>
    %c0_170 = arith.constant 0 : index
    %c160_171 = arith.constant 160 : index
    %c0_172 = arith.constant 0 : index
    %243 = vector.load %arg9[%c0_170, %c160_171, %c0_172] : memref<1x256x128xf32, #tpu.memory_space<vmem>>, vector<1x16x128xf32>
    %244 = vector.shape_cast %243 : vector<1x16x128xf32> to vector<16x128xf32>
    %245 = vector.shape_cast %242 : vector<16x128xf32> to vector<1x16x128xf32>
    tpu.vector_store %arg9[%c0_170, %c160_171, %c0_172], %245 {strides = array<i32>} : memref<1x256x128xf32, #tpu.memory_space<vmem>>, vector<1x16x128xf32>,
    %246 = vector.extract_strided_slice %233 {offsets = [72, 0], sizes = [16, 128], strides = [1, 1]} : vector<192x128xf32> to vector<16x128xf32>
    %c0_173 = arith.constant 0 : index
    %c176 = arith.constant 176 : index
    %c0_174 = arith.constant 0 : index
    %247 = vector.load %arg9[%c0_173, %c176, %c0_174] : memref<1x256x128xf32, #tpu.memory_space<vmem>>, vector<1x16x128xf32>
    %248 = vector.shape_cast %247 : vector<1x16x128xf32> to vector<16x128xf32>
    %249 = vector.shape_cast %246 : vector<16x128xf32> to vector<1x16x128xf32>
    tpu.vector_store %arg9[%c0_173, %c176, %c0_174], %249 {strides = array<i32>} : memref<1x256x128xf32, #tpu.memory_space<vmem>>, vector<1x16x128xf32>,
    %250 = vector.extract_strided_slice %233 {offsets = [96, 0], sizes = [16, 128], strides = [1, 1]} : vector<192x128xf32> to vector<16x128xf32>
    %c0_175 = arith.constant 0 : index
    %c192_176 = arith.constant 192 : index
    %c0_177 = arith.constant 0 : index
    %251 = vector.load %arg9[%c0_175, %c192_176, %c0_177] : memref<1x256x128xf32, #tpu.memory_space<vmem>>, vector<1x16x128xf32>
    %252 = vector.shape_cast %251 : vector<1x16x128xf32> to vector<16x128xf32>
    %253 = vector.shape_cast %250 : vector<16x128xf32> to vector<1x16x128xf32>
    tpu.vector_store %arg9[%c0_175, %c192_176, %c0_177], %253 {strides = array<i32>} : memref<1x256x128xf32, #tpu.memory_space<vmem>>, vector<1x16x128xf32>,
    %254 = vector.extract_strided_slice %233 {offsets = [120, 0], sizes = [16, 128], strides = [1, 1]} : vector<192x128xf32> to vector<16x128xf32>
    %c0_178 = arith.constant 0 : index
    %c208 = arith.constant 208 : index
    %c0_179 = arith.constant 0 : index
    %255 = vector.load %arg9[%c0_178, %c208, %c0_179] : memref<1x256x128xf32, #tpu.memory_space<vmem>>, vector<1x16x128xf32>
    %256 = vector.shape_cast %255 : vector<1x16x128xf32> to vector<16x128xf32>
    %257 = vector.shape_cast %254 : vector<16x128xf32> to vector<1x16x128xf32>
    tpu.vector_store %arg9[%c0_178, %c208, %c0_179], %257 {strides = array<i32>} : memref<1x256x128xf32, #tpu.memory_space<vmem>>, vector<1x16x128xf32>,
    %258 = vector.extract_strided_slice %233 {offsets = [144, 0], sizes = [16, 128], strides = [1, 1]} : vector<192x128xf32> to vector<16x128xf32>
    %c0_180 = arith.constant 0 : index
    %c224_181 = arith.constant 224 : index
    %c0_182 = arith.constant 0 : index
    %259 = vector.load %arg9[%c0_180, %c224_181, %c0_182] : memref<1x256x128xf32, #tpu.memory_space<vmem>>, vector<1x16x128xf32>
    %260 = vector.shape_cast %259 : vector<1x16x128xf32> to vector<16x128xf32>
    %261 = vector.shape_cast %258 : vector<16x128xf32> to vector<1x16x128xf32>
    tpu.vector_store %arg9[%c0_180, %c224_181, %c0_182], %261 {strides = array<i32>} : memref<1x256x128xf32, #tpu.memory_space<vmem>>, vector<1x16x128xf32>,
    %262 = vector.extract_strided_slice %233 {offsets = [168, 0], sizes = [16, 128], strides = [1, 1]} : vector<192x128xf32> to vector<16x128xf32>
    %c0_183 = arith.constant 0 : index
    %c240 = arith.constant 240 : index
    %c0_184 = arith.constant 0 : index
    %263 = vector.load %arg9[%c0_183, %c240, %c0_184] : memref<1x256x128xf32, #tpu.memory_space<vmem>>, vector<1x16x128xf32>
    %264 = vector.shape_cast %263 : vector<1x16x128xf32> to vector<16x128xf32>
    %265 = vector.shape_cast %262 : vector<16x128xf32> to vector<1x16x128xf32>
    tpu.vector_store %arg9[%c0_183, %c240, %c0_184], %265 {strides = array<i32>} : memref<1x256x128xf32, #tpu.memory_space<vmem>>, vector<1x16x128xf32>,
    return
  }
  func.func @transform_0(%arg0: i32) -> (i32, i32, i32) {
    %c0_i32 = arith.constant 0 : i32
    %c0_i32_0 = arith.constant 0 : i32
    %c0_i32_1 = arith.constant 0 : i32
    return %arg0, %c0_i32, %c0_i32_0 : i32, i32, i32
  }
  func.func @transform_1(%arg0: i32) -> (i32, i32) {
    %c0_i32 = arith.constant 0 : i32
    %c0_i32_0 = arith.constant 0 : i32
    %c0_i32_1 = arith.constant 0 : i32
    return %c0_i32, %c0_i32_0 : i32, i32
  }
  func.func @transform_2(%arg0: i32) -> (i32, i32) {
    %c0_i32 = arith.constant 0 : i32
    %c0_i32_0 = arith.constant 0 : i32
    %c0_i32_1 = arith.constant 0 : i32
    return %c0_i32, %c0_i32_0 : i32, i32
  }
  func.func @transform_3(%arg0: i32) -> (i32, i32) {
    %c0_i32 = arith.constant 0 : i32
    %c0_i32_0 = arith.constant 0 : i32
    %c0_i32_1 = arith.constant 0 : i32
    return %c0_i32, %c0_i32_0 : i32, i32
  }
  func.func @transform_4(%arg0: i32) -> (i32, i32) {
    %c0_i32 = arith.constant 0 : i32
    %c0_i32_0 = arith.constant 0 : i32
    %c0_i32_1 = arith.constant 0 : i32
    return %c0_i32, %c0_i32_0 : i32, i32
  }
  func.func @transform_5(%arg0: i32) -> (i32, i32) {
    %c0_i32 = arith.constant 0 : i32
    %c0_i32_0 = arith.constant 0 : i32
    %c0_i32_1 = arith.constant 0 : i32
    return %c0_i32, %c0_i32_0 : i32, i32
  }
  func.func @transform_6(%arg0: i32) -> (i32, i32) {
    %c0_i32 = arith.constant 0 : i32
    %c0_i32_0 = arith.constant 0 : i32
    %c0_i32_1 = arith.constant 0 : i32
    return %c0_i32, %c0_i32_0 : i32, i32
  }
  func.func @transform_7(%arg0: i32) -> (i32, i32) {
    %c0_i32 = arith.constant 0 : i32
    %c0_i32_0 = arith.constant 0 : i32
    %c0_i32_1 = arith.constant 0 : i32
    return %c0_i32, %c0_i32_0 : i32, i32
  }
  func.func @transform_8(%arg0: i32) -> (i32, i32, i32) {
    %c0_i32 = arith.constant 0 : i32
    %c0_i32_0 = arith.constant 0 : i32
    %c0_i32_1 = arith.constant 0 : i32
    return %arg0, %c0_i32, %c0_i32_0 : i32, i32, i32
  }
}

</mosaic_0001>

<bundles_post_ra>
// kernel: single_camera_encoder.1
= control target key start
LH: loop header
LB: loop body
LE: loop exit
PB: predicated region body
PF: predicated region fallthrough
CT: control target
= control target key end

     0   :  { %13 = vsyncpa [#allocation7], 0  ;;  %s21888_s0 = inlined_call_operand.vmem [shape: bf16[2,384,27], index: 0, kind: input, shape index: {}]   ;;  %s21889_s1 = inlined_call_operand.vmem [shape: f32[192,1], index: 1, kind: input, shape index: {}]   ;;  %s21890_s2 = inlined_call_operand.vmem [shape: bf16[27,32], index: 2, kind: input, shape index: {}]   ;;  %s21891_s3 = inlined_call_operand.vmem [shape: f32[1,32], index: 3, kind: input, shape index: {}]   ;;  %s21892_s4 = inlined_call_operand.vmem [shape: bf16[288,64], index: 4, kind: input, shape index: {}]   ;;  %s21893_s5 = inlined_call_operand.vmem [shape: f32[1,64], index: 5, kind: input, shape index: {}]   ;;  %s21894_s6 = inlined_call_operand.vmem [shape: bf16[576,128], index: 6, kind: input, shape index: {}]   ;;  %s21895_s7 = inlined_call_operand.vmem [shape: f32[1,128], index: 7, kind: input, shape index: {}]   ;;  %s21896_s8 = inlined_call_operand.hbm [shape: f32[2,256,128], index: 8, kind: output, shape index: {}]  }
   0x1   :  { %15 = vsyncpa [#allocation7 + $0x1], 0  ;;  %s16025_s27 = smov 0   ;;  %s16027_s28 = smov 0  }
   0x2   :  { %s16029_s29 = smov 0   ;;  %s16031_s30 = smov 0  }
   0x3 LB: > { %s16046_s9 = sadd.s32 4294967295, %s15969_s30   ;;  %s12495_s10 = sadd.s32 4294967294, %s15969_s30   ;;  %s15969_s30 = sphi %s16031_s30, %s22274_s30   ;;  %s15965_s29 = sphi %s16029_s29, %s22273_s29   ;;  %s15961_s28 = sphi %s16027_s28, %s22272_s28   ;;  %s15957_s27 = sphi %s16025_s27, %s22271_s27  }
   0x4   : > { %s16050_s11 = sadd.s32 1, %s15969_s30   ;;  %s201_s12 = sadd.s32 1, %s15965_s29 }
   0x5   : > { %s198_s13 = ssub.s32 %s15969_s30, %s16050_s11  ;;  %p211_p0 = scmp.ne.s32.totalorder %s15965_s29, %s15961_s28 }
   0x6   : > { %p199_p1 = scmp.eq.s32.totalorder %s198_s13, 0  ;;  %p212_p2 = scmp.eq.s32.totalorder %s16046_s9, 1 }
   0x7   : > { %p217_p3 = scmp.ne.s32.totalorder %s15961_s28, %s15957_s27  ;;  %p218_p4 = scmp.eq.s32.totalorder %s12495_s10, 1 }
   0x8   : > { %s16061_s14 = scalar_select %p199_p1, %s15965_s29, %s201_s12  }
   0x9   : > { %p16063_p5 = por %p212_p2, %p211_p0  ;;  %p16067_p6 = por %p218_p4, %p217_p3 }
   0xa   : > { %p12498_p7 = scmp.ge.s32.totalorder %s15969_s30, 1  ;;  %p265_p8 = scmp.lt.s32.totalorder %s15969_s30, 3 }
   0xc   : > { %p266_p9 = pnand %p12498_p7, %p265_p8 }
   0xe   : > { %269 = sbr.rel (%p266_p9) target bundleno = 1563 (0x61b), region = 52 }
  0x13   : > { %v15480_v0 = vld [vmem:[%s21890_s2 + $0x8] sm:$0x3f]   ;;  %vm490_vm0 = vcmask 1044480   ;;  %vm491_vm1 = vcmask 1045504   ;;  %v15971_v1 = vmov 65535   ;;  %v15482_v4 = vld [vmem:[%s21890_s2] sm:$0xff]  }
  0x14   : > { %v492_v2 = vsel %vm490_vm0, 4294967295, %v15971_v1  ;;  %v15481_v3 = vld [vmem:[%s21890_s2 + $0x8] sm:$0x3f]   ;;  %p299_p10 = scmp.lt.s32.totalorder %s16046_s9, 1  ;;  %v15483_v8 = vld [vmem:[%s21890_s2] sm:$0xff]   ;;  %v15972_v9 = vmov 0  }
  0x15   : > { %v493_v5 = vsel %vm491_vm1, %v492_v2, 0  ;;  %15479 = vset.pattern.permute.xlu1 %v15972_v9  ;;  %15478 = vset.pattern.permute.xlu0 %v15972_v9  ;;  %v307_v10 = vld [vmem:[%s21889_s1 + $0x10] sm:$0xff]  ;;  %v305_v11 = vld [vmem:[%s21889_s1] sm:$0xff]  ;;  %vm453_vm2 = vcmask 220160   ;;  %v308_v12 = vld [vmem:[%s21889_s1 + $0x18] sm:$0xff]  ;;  %vm332_vm3 = vcmask 261120  }
  0x16   : > { %v495_v6 = vand.u32 %v15480_v0, %v493_v5  ;;  %v954_v7 = vand.u32 %v15481_v3, %v493_v5  ;;  %s300_s25 = scalar_select %p299_p10, %s16046_s9, 1  ;;  %662 = vperm.xlu1 %15479, %v307_v10   ;;  %652 = vperm.xlu0 %15478, %v305_v11   ;;  %v306_v13 = vld [vmem:[%s21889_s1 + $0x8] sm:$0xff]  ;;  %v309_v19 = vld [vmem:[%s21889_s1 + $0x20] sm:$0xff]  ;;  %v312_v22 = vld [vmem:[%s21889_s1 + $0x38] sm:$0xff]  ;;  %v15973_v58 = vmov 0.0   ;;  %vm1278_vm4 = vcmask 1046528  }
  0x17   : > { %v310_v17 = vld [vmem:[%s21889_s1 + $0x28] sm:$0xff]  ;;  %v311_v24 = vld [vmem:[%s21889_s1 + $0x30] sm:$0xff]  ;;  %v313_v29 = vld [vmem:[%s21889_s1 + $0x40] sm:$0xff]  ;;  %335 = vst.msk [vmem:[#allocation2 + $0x10] sm:$0xff] %vm332_vm3, %v15973_v58  ;;  %s15975_s13 = smov 64   ;;  %vm340_vm5 = vcmask 523264  }
  0x18   : > { %15254 = vmatprep.subr.bf16.mxu0 %v495_v6  ;;  %15282 = vmatprep.subr.bf16.mxu1 %v954_v7  ;;  %s15430_s17 = smul.u32 192, %s300_s25  ;;  %v314_v28 = vld [vmem:[%s21889_s1 + $0x48] sm:$0xff]  ;;  %v316_v30 = vld [vmem:[%s21889_s1 + $0x58] sm:$0xff]  ;;  %v315_v32 = vld [vmem:[%s21889_s1 + $0x50] sm:$0xff]  ;;  %334 = vst.msk [vmem:[#allocation2 + $0x8] sm:$0xff] %vm332_vm3, %v15973_v58  ;;  %vm1205_vm6 = vcmask 1040384  }
  0x19   : > { %15255 = vmatpush3.bf16.msra.mxu0 %v495_v6  ;;  %15283 = vmatpush3.bf16.msra.mxu1 %v954_v7  ;;  %v318_v36 = vld [vmem:[%s21889_s1 + $0x68] sm:$0xff]  ;;  %v317_v37 = vld [vmem:[%s21889_s1 + $0x60] sm:$0xff]  ;;  %v320_v39 = vld [vmem:[%s21889_s1 + $0x78] sm:$0xff]  ;;  %336 = vst.msk [vmem:[#allocation2 + $0x18] sm:$0xff] %vm332_vm3, %v15973_v58  ;;  %vm1616_vm7 = vcmask 519424   ;;  %vm1447_vm8 = vcmask 257024  }
  0x1a   : > { %15256 = vmatprep.subr.bf16.mxu0 %v15482_v4  ;;  %15284 = vmatprep.subr.bf16.mxu1 %v15483_v8  ;;  %s16096_s20 = scalar_lea.vmem %s21888_s0, %s15430_s17  ;;  %v319_v42 = vld [vmem:[%s21889_s1 + $0x70] sm:$0xff]  ;;  %v322_v44 = vld [vmem:[%s21889_s1 + $0x88] sm:$0xff]  ;;  %v321_v45 = vld [vmem:[%s21889_s1 + $0x80] sm:$0xff]  ;;  %337 = vst.msk [vmem:[#allocation2 + $0x1a0] sm:$0xff] %vm332_vm3, %v15973_v58  ;;  %vm1785_vm9 = vcmask 781824   ;;  %s15976_s24 = smov 96  }
  0x1b   : > { %v15484_v14 = vld [vmem:[%s16096_s20] sm:$0xff]   ;;  %v15486_v16 = vld [vmem:[%s16096_s20 + $0x8] sm:$0xff]   ;;  %667 = vperm.xlu1 %15479, %v308_v12   ;;  %v15488_v20 = vld [vmem:[%s16096_s20 + $0x10] sm:$0xff]   ;;  %657 = vperm.xlu0 %15478, %v306_v13   ;;  %338 = vst.msk [vmem:[#allocation2 + $0x1a8] sm:$0xff] %vm332_vm3, %v15973_v58  ;;  %vm2146_vm10 = vcmask 1044224   ;;  %vm6821_vm11 = vcmask 519168  }
  0x1c   : > { %v15485_v15 = vld [vmem:[%s16096_s20 + $0x60] sm:$0xff]   ;;  %15258 = vmatprep.mubr.msk.bf16.mxu0 %vm453_vm2, %v15484_v14  ;;  %v15487_v18 = vld [vmem:[%s16096_s20 + $0x68] sm:$0xff]   ;;  %v15489_v21 = vld [vmem:[%s16096_s20 + $0x70] sm:$0xff]   ;;  %339 = vst.msk [vmem:[#allocation2 + $0x1b0] sm:$0xff] %vm332_vm3, %v15973_v58  ;;  %vm6990_vm12 = vcmask 1043968  }
  0x1d   : > { %15257 = vmatpush3.bf16.msra.mxu0 %v15482_v4  ;;  %15285 = vmatpush3.bf16.msra.mxu1 %v15483_v8  ;;  %v15490_v23 = vld [vmem:[%s16096_s20 + $0x18] sm:$0xff]   ;;  %v15492_v26 = vld [vmem:[%s16096_s20 + $0x20] sm:$0xff]   ;;  %v15494_v31 = vld [vmem:[%s16096_s20 + $0x28] sm:$0xff]   ;;  %342 = vst.msk [vmem:[#allocation3 + $0x8] sm:$0xff] %vm340_vm5, %v15973_v58 }
  0x1e   : > { %15286 = vmatprep.mubr.msk.bf16.mxu1 %vm453_vm2, %v15485_v15  ;;  %v15491_v25 = vld [vmem:[%s16096_s20 + $0x78] sm:$0xff]   ;;  %v15493_v27 = vld [vmem:[%s16096_s20 + $0x80] sm:$0xff]   ;;  %v15495_v33 = vld [vmem:[%s16096_s20 + $0x88] sm:$0xff]   ;;  %343 = vst.msk [vmem:[#allocation3 + $0x10] sm:$0xff] %vm340_vm5, %v15973_v58 }
  0x1f   : > { %677 = vperm.xlu1 %15479, %v310_v17   ;;  %672 = vperm.xlu0 %15478, %v309_v19   ;;  %v15496_v34 = vld [vmem:[%s16096_s20 + $0x30] sm:$0xff]   ;;  %v15498_v38 = vld [vmem:[%s16096_s20 + $0x38] sm:$0xff]   ;;  %v15500_v41 = vld [vmem:[%s16096_s20 + $0x40] sm:$0xff]   ;;  %344 = vst.msk [vmem:[#allocation3 + $0x18] sm:$0xff] %vm340_vm5, %v15973_v58 }
  0x20   : > { %15259 = vmatmul.mubr.msk.bf16.vlgmr.msra.gmra.mxu0 %vm453_vm2, %v15486_v16  ;;  %15287 = vmatmul.mubr.msk.bf16.vlgmr.msra.gmra.mxu1 %vm453_vm2, %v15487_v18  ;;  %v15497_v35 = vld [vmem:[%s16096_s20 + $0x90] sm:$0xff]   ;;  %v15499_v40 = vld [vmem:[%s16096_s20 + $0x98] sm:$0xff]   ;;  %v15501_v43 = vld [vmem:[%s16096_s20 + $0xa0] sm:$0xff]   ;;  %345 = vst.msk [vmem:[#allocation3 + $0x1a0] sm:$0xff] %vm340_vm5, %v15973_v58 }
  0x21   : > { %15262 = vmatprep.mubr.msk.bf16.mxu0 %vm453_vm2, %v15488_v20  ;;  %15290 = vmatprep.mubr.msk.bf16.mxu1 %vm453_vm2, %v15489_v21  ;;  %v15502_v46 = vld [vmem:[%s16096_s20 + $0x48] sm:$0xff]   ;;  %v324_v47 = vld [vmem:[%s21889_s1 + $0x98] sm:$0xff]  ;;  %v15504_v49 = vld [vmem:[%s16096_s20 + $0x50] sm:$0xff]   ;;  %346 = vst.msk [vmem:[#allocation3 + $0x1a8] sm:$0xff] %vm340_vm5, %v15973_v58 }
  0x22   : > { %v15503_v48 = vld [vmem:[%s16096_s20 + $0xa8] sm:$0xff]   ;;  %v323_v50 = vld [vmem:[%s21889_s1 + $0x90] sm:$0xff]  ;;  %v325_v53 = vld [vmem:[%s21889_s1 + $0xa0] sm:$0xff]  ;;  %347 = vst.msk [vmem:[#allocation3 + $0x1b0] sm:$0xff] %vm340_vm5, %v15973_v58 }
  0x23   : > { %687 = vperm.xlu1 %15479, %v312_v22   ;;  %682 = vperm.xlu0 %15478, %v311_v24   ;;  %v15505_v51 = vld [vmem:[%s16096_s20 + $0xb0] sm:$0xff]   ;;  %v326_v52 = vld [vmem:[%s21889_s1 + $0xa8] sm:$0xff]  ;;  %v15506_v54 = vld [vmem:[%s16096_s20 + $0x58] sm:$0xff]  }
  0x24   : > { %v328_v55 = vld [vmem:[%s21889_s1 + $0xb8] sm:$0xff]  ;;  %v327_v57 = vld [vmem:[%s21889_s1 + $0xb0] sm:$0xff]  ;;  %v16220_v60 = vld [vmem:[#allocation2 + $0x8] sm:$0xff] }
  0x25   : > { %v15507_v56 = vld [vmem:[%s16096_s20 + $0xb8] sm:$0xff]   ;;  %v16218_v59 = vld [vmem:[#allocation2 + $0x10] sm:$0xff]  ;;  %v13797_v62 = vpack.c.bf16 %v16220_v60, %v16220_v60  ;;  %s15974_s20 = smov 32   ;;  %v1279_v5 = vrot.slane %v16220_v60, 1  ;;  %v15508_v8 = vld [vmem:[%s21892_s4 + $0x88] sm:$0xff]  }
  0x26   : > { %v13798_v61 = vpack.c.bf16 %v16218_v59, %v16218_v59  ;;  %v16226_v63 = vld [vmem:[#allocation2 + $0x18] sm:$0xff]  ;;  %v1280_v0 = vrot.slane %v16218_v59, 1  ;;  %15310 = vmatprep.subr.bf16.mxu1 %v15508_v8  ;;  %v15509_v9 = vld [vmem:[%s21892_s4 + $0x80] sm:$0xff]  }
  0x27   : > { %697 = vperm.xlu1 %15479, %v314_v28   ;;  %692 = vperm.xlu0 %15478, %v313_v29   ;;  %v1282_v1 = vrot.slane %v16226_v63, 1  ;;  %v13799_v4 = vpack.c.bf16 %v16226_v63, %v16226_v63  ;;  %v21897_v58 = vrot.slane %v16226_v63, 7 }
  0x28   : > { %15263 = vmatmul.mubr.msk.bf16.gmra.mxu0 %vm453_vm2, %v15490_v23  ;;  %15291 = vmatmul.mubr.msk.bf16.gmra.mxu1 %vm453_vm2, %v15491_v25  ;;  %v1281_v6 = vsel %vm1278_vm4, %v1279_v5, %v1280_v0 }
  0x29   : > { %15266 = vmatprep.mubr.msk.bf16.mxu0 %vm453_vm2, %v15492_v26  ;;  %15294 = vmatprep.mubr.msk.bf16.mxu1 %vm453_vm2, %v15493_v27  ;;  %v1283_v2 = vsel %vm1278_vm4, %v1280_v0, %v1282_v1  ;;  %v13821_v7 = vpack.c.bf16 %v1281_v6, %v1281_v6 }
  0x2a   : > { %v13822_v3 = vpack.c.bf16 %v1283_v2, %v1283_v2  ;;  %15311 = vmatpush3.bf16.msra.mxu1 %v15508_v8 }
  0x2b   : > { %707 = vperm.xlu1 %15479, %v316_v30   ;;  %702 = vperm.xlu0 %15478, %v315_v32   ;;  %v16301_v32 = vld [vmem:[%s21891_s3] ss:$0 sm:$0xff] }
  0x2c   : > { %15312 = vmatprep.subr.bf16.mxu1 %v15509_v9 }
  0x2e   : > { %15313 = vmatpush3.bf16.msra.mxu1 %v15509_v9 }
  0x2f   : > { %717 = vperm.xlu1 %15479, %v318_v36   ;;  %712 = vperm.xlu0 %15478, %v317_v37  }
  0x30   : > { %15267 = vmatmul.mubr.msk.bf16.gmra.mxu0 %vm453_vm2, %v15494_v31  ;;  %15295 = vmatmul.mubr.msk.bf16.gmra.mxu1 %vm453_vm2, %v15495_v33 }
  0x31   : > { %15270 = vmatprep.mubr.msk.bf16.mxu0 %vm453_vm2, %v15496_v34  ;;  %15298 = vmatprep.mubr.msk.bf16.mxu1 %vm453_vm2, %v15497_v35  ;;  %v1207_v34 = vrot.slane %v16218_v59, 7  ;;  %v1206_v35 = vrot.slane %v16220_v60, 7 }
  0x33   : > { %727 = vperm.xlu1 %15479, %v320_v39   ;;  %722 = vperm.xlu0 %15478, %v319_v42   ;;  %v1208_v42 = vsel %vm1205_vm6, %v1206_v35, %v1207_v34  ;;  %v1210_v6 = vsel %vm1205_vm6, %v1207_v34, %v21897_v58 }
  0x37   : > { %737 = vperm.xlu1 %15479, %v322_v44   ;;  %732 = vperm.xlu0 %15478, %v321_v45   ;;  %v1277_v44 = vsel %vm1205_vm6, 0.0, %v1206_v35 }
  0x38   : > { %15271 = vmatmul.mubr.msk.bf16.gmra.mxu0 %vm453_vm2, %v15498_v38  ;;  %15299 = vmatmul.mubr.msk.bf16.gmra.mxu1 %vm453_vm2, %v15499_v40 }
  0x39   : > { %15274 = vmatprep.mubr.msk.bf16.mxu0 %vm453_vm2, %v15500_v41  ;;  %15302 = vmatprep.mubr.msk.bf16.mxu1 %vm453_vm2, %v15501_v43 }
  0x3b   : > { %747 = vperm.xlu1 %15479, %v324_v47   ;;  %742 = vperm.xlu0 %15478, %v323_v50  }
  0x3f   : > { %757 = vperm.xlu1 %15479, %v326_v52   ;;  %752 = vperm.xlu0 %15478, %v325_v53  }
  0x40   : > { %15275 = vmatmul.mubr.msk.bf16.gmra.mxu0 %vm453_vm2, %v15502_v46  ;;  %15303 = vmatmul.mubr.msk.bf16.gmra.mxu1 %vm453_vm2, %v15503_v48  ;;  %v13774_v48 = vpack.c.bf16 %v1208_v42, %v1208_v42 }
  0x41   : > { %15278 = vmatprep.mubr.msk.bf16.mxu0 %vm453_vm2, %v15504_v49  ;;  %15306 = vmatprep.mubr.msk.bf16.mxu1 %vm453_vm2, %v15505_v51  ;;  %v13773_v49 = vpack.c.bf16 %v1277_v44, %v1277_v44 }
  0x42   : > { %1449 = vst.msk [vmem:[#allocation4 + $0xc] sm:$0xf] %vm1447_vm8, %v13774_v48 }
  0x43   : > { %767 = vperm.xlu1 %15479, %v328_v55   ;;  %762 = vperm.xlu0 %15478, %v327_v57   ;;  %1448 = vst.msk [vmem:[#allocation4] sm:$0xf] %vm1447_vm8, %v13773_v49 }
  0x47   : > { %1546 = vrot.lane.b32.xlu1 %v13798_v61, %s15974_s20  ;;  %1544 = vrot.lane.b32.xlu0 %v13797_v62, %s15974_s20 }
  0x48   : > { %15279 = vmatmul.mubr.msk.bf16.gmra.mxu0 %vm453_vm2, %v15506_v54  ;;  %15307 = vmatmul.mubr.msk.bf16.gmra.mxu1 %vm453_vm2, %v15507_v56 }
  0x4b   : > { %1715 = vrot.lane.b32.xlu1 %v13822_v3, %s15975_s13  ;;  %1548 = vrot.lane.b32.xlu0 %v13799_v4, %s15974_s20 }
  0x4f   : > { %1713 = vrot.lane.b32.xlu0 %v13821_v7, %s15975_s13 }
  0x91   : > { %v16254_v10 = vpop.permute.xlu1 %662  ;;  %v16256_v11 = vpop.permute.xlu0 %652 }
  0x92   : > { %22006 = vst [vmem:[#allocation9_spill] sm:$0xff] %v16254_v10  ;;  %22007 = vst [vmem:[#allocation10_spill] sm:$0xff] %v16256_v11 }
  0x96   : > { %v16258_v12 = vpop.permute.xlu1 %667  ;;  %v16260_v13 = vpop.permute.xlu0 %657 }
  0x97   : > { %22008 = vst [vmem:[#allocation11_spill] sm:$0xff] %v16258_v12  ;;  %22009 = vst [vmem:[#allocation12_spill] sm:$0xff] %v16260_v13 }
  0x9a   : > { %v16262_v14 = vpop.permute.xlu1 %677  ;;  %v16264_v15 = vpop.permute.xlu0 %672 }
  0x9b   : > { %22010 = vst [vmem:[#allocation13_spill] sm:$0xff] %v16262_v14  ;;  %22011 = vst [vmem:[#allocation14_spill] sm:$0xff] %v16264_v15 }
  0x9e   : > { %v16266_v16 = vpop.permute.xlu1 %687  ;;  %v16268_v17 = vpop.permute.xlu0 %682 }
  0x9f   : > { %22012 = vst [vmem:[#allocation15_spill] sm:$0xff] %v16266_v16  ;;  %22013 = vst [vmem:[#allocation16_spill] sm:$0xff] %v16268_v17 }
  0xa2   : > { %v16270_v18 = vpop.permute.xlu1 %697  ;;  %v16272_v19 = vpop.permute.xlu0 %692 }
  0xa3   : > { %22014 = vst [vmem:[#allocation17_spill] sm:$0xff] %v16270_v18  ;;  %22015 = vst [vmem:[#allocation18_spill] sm:$0xff] %v16272_v19 }
  0xa6   : > { %v16274_v20 = vpop.permute.xlu1 %707  ;;  %v16276_v21 = vpop.permute.xlu0 %702 }
  0xa7   : > { %22016 = vst [vmem:[#allocation19_spill] sm:$0xff] %v16274_v20  ;;  %22017 = vst [vmem:[#allocation20_spill] sm:$0xff] %v16276_v21 }
  0xaa   : > { %v16278_v22 = vpop.permute.xlu1 %717  ;;  %v16280_v23 = vpop.permute.xlu0 %712 }
  0xab   : > { %22018 = vst [vmem:[#allocation21_spill] sm:$0xff] %v16278_v22  ;;  %22019 = vst [vmem:[#allocation22_spill] sm:$0xff] %v16280_v23 }
  0xae   : > { %v16282_v24 = vpop.permute.xlu1 %727  ;;  %v16284_v25 = vpop.permute.xlu0 %722 }
  0xaf   : > { %22020 = vst [vmem:[#allocation23_spill] sm:$0xff] %v16282_v24  ;;  %22021 = vst [vmem:[#allocation24_spill] sm:$0xff] %v16284_v25 }
  0xb2   : > { %v16286_v26 = vpop.permute.xlu1 %737  ;;  %v16288_v27 = vpop.permute.xlu0 %732 }
  0xb3   : > { %22022 = vst [vmem:[#allocation25_spill] sm:$0xff] %v16286_v26  ;;  %22023 = vst [vmem:[#allocation26_spill] sm:$0xff] %v16288_v27 }
  0xb6   : > { %v16290_v28 = vpop.permute.xlu1 %747  ;;  %v16292_v29 = vpop.permute.xlu0 %742 }
  0xb7   : > { %22024 = vst [vmem:[#allocation27_spill] sm:$0xff] %v16290_v28  ;;  %22025 = vst [vmem:[#allocation28_spill] sm:$0xff] %v16292_v29 }
  0xba   : > { %v16294_v30 = vpop.permute.xlu1 %757  ;;  %v16296_v31 = vpop.permute.xlu0 %752 }
  0xbb   : > { %22026 = vst [vmem:[#allocation29_spill] sm:$0xff] %v16294_v30  ;;  %22027 = vst [vmem:[#allocation30_spill] sm:$0xff] %v16296_v31 }
  0xbe   : > { %v16303_v33 = vpop.permute.xlu1 %767  ;;  %v16307_v36 = vpop.permute.xlu0 %762 }
  0xbf   : > { %22028 = vst [vmem:[#allocation31_spill] sm:$0xff] %v16303_v33  ;;  %22029 = vst [vmem:[#allocation32_spill] sm:$0xff] %v16307_v36 }
  0xc2   : > { %v1547_v43 = vpop.permute.xlu1 %1546  ;;  %v1545_v50 = vpop.permute.xlu0 %1544 }
  0xc3   : > { %1618 = vst.msk [vmem:[#allocation4 + $0xc] sm:$0xf] %vm1616_vm7, %v1547_v43  ;;  %1617 = vst.msk [vmem:[#allocation4] sm:$0xf] %vm1616_vm7, %v1545_v50 }
  0xc6   : > { %v1716_v0 = vpop.permute.xlu1 %1715  ;;  %v1549_v7 = vpop.permute.xlu0 %1548 }
  0xc7   : > { %1787 = vst.msk [vmem:[#allocation4 + $0xc] sm:$0xf] %vm1785_vm9, %v1716_v0 }
  0xca   : > { %v1714_v50 = vpop.permute.xlu0 %1713 }
  0xcb   : > { %1786 = vst.msk [vmem:[#allocation4] sm:$0xf] %vm1785_vm9, %v1714_v50 }
  0xe0   : > { %v15260_v37 = vpop.f32.mrf.mxu0  ;;  %v15288_v39 = vpop.f32.mrf.mxu1 }
  0xe1   : > { %v540_v38 = vadd.f32 %v15260_v37, %v16301_v32  ;;  %v999_v40 = vadd.f32 %v15288_v39, %v16301_v32 }
  0xe2   : > { %v531_v41 = vpop.f32.mrf.mxu0  ;;  %v990_v47 = vpop.f32.mrf.mxu1 }
  0xe3   : > { %v628_v45 = vmax.f32 %v540_v38, 0.0  ;;  %v532_v46 = vadd.f32 %v16301_v32, %v531_v41  ;;  %v1087_v51 = vmax.f32 %v999_v40, 0.0  ;;  %v991_v52 = vadd.f32 %v16301_v32, %v990_v47 }
  0xe4   : > { %v15261_v53 = vpop.f32.mrf.mxu0  ;;  %v15289_v57 = vpop.f32.mrf.mxu1  ;;  %v13775_v38 = vpack.c.bf16 %v1210_v6, %v1210_v6 }
  0xe5   : > { %v772_v54 = vmul.f32 %v16254_v10, %v628_v45  ;;  %v626_v55 = vmax.f32 %v532_v46, 0.0  ;;  %v543_v56 = vadd.f32 %v15261_v53, %v16301_v32  ;;  %v1111_v59 = vmul.f32 %v1087_v51, %v16254_v10 }
  0xe6   : > { %v1085_v60 = vmax.f32 %v991_v52, 0.0  ;;  %v1002_v61 = vadd.f32 %v15289_v57, %v16301_v32  ;;  %v534_v62 = vpop.f32.mrf.mxu0  ;;  %v993_v5 = vpop.f32.mrf.mxu1  ;;  %1450 = vst.msk [vmem:[#allocation4 + $0x18] sm:$0xf] %vm1447_vm8, %v13775_v38 }
  0xe7   : > { %796 = vst.msk [vmem:[#allocation2 + $0x30] sm:$0xff] %vm332_vm3, %v772_v54  ;;  %v770_v2 = vmul.f32 %v16256_v11, %v626_v55  ;;  %v629_v3 = vmax.f32 %v543_v56, 0.0  ;;  %v535_v4 = vadd.f32 %v16301_v32, %v534_v62  ;;  %1135 = vst.msk [vmem:[#allocation2 + $0xf0] sm:$0xff] %vm332_vm3, %v1111_v59  ;;  %v994_v35 = vadd.f32 %v16301_v32, %v993_v5 }
  0xe8   : > { %v1109_v8 = vmul.f32 %v1085_v60, %v16256_v11  ;;  %v1088_v9 = vmax.f32 %v1002_v61, 0.0  ;;  %v15264_v37 = vpop.f32.mrf.mxu0  ;;  %v15292_v42 = vpop.f32.mrf.mxu1  ;;  %1619 = vst.msk [vmem:[#allocation4 + $0x18] sm:$0xf] %vm1616_vm7, %v1549_v7 }
  0xe9   : > { %794 = vst.msk [vmem:[#allocation2 + $0x20] sm:$0xff] %vm332_vm3, %v770_v2  ;;  %v773_v39 = vmul.f32 %v16258_v12, %v629_v3  ;;  %v627_v40 = vmax.f32 %v535_v4, 0.0  ;;  %v556_v41 = vadd.f32 %v15264_v37, %v16301_v32  ;;  %v1086_v43 = vmax.f32 %v994_v35, 0.0 }
  0xea   : > { %1133 = vst.msk [vmem:[#allocation2 + $0xe0] sm:$0xff] %vm332_vm3, %v1109_v8  ;;  %v1112_v34 = vmul.f32 %v1088_v9, %v16258_v12  ;;  %v1015_v44 = vadd.f32 %v15292_v42, %v16301_v32  ;;  %v547_v45 = vpop.f32.mrf.mxu0  ;;  %v1006_v49 = vpop.f32.mrf.mxu1 }
  0xeb   : > { %797 = vst.msk [vmem:[#allocation2 + $0x38] sm:$0xff] %vm332_vm3, %v773_v39  ;;  %v771_v46 = vmul.f32 %v16260_v13, %v627_v40  ;;  %v632_v47 = vmax.f32 %v556_v41, 0.0  ;;  %v548_v48 = vadd.f32 %v16301_v32, %v547_v45  ;;  %v1110_v51 = vmul.f32 %v1086_v43, %v16260_v13 }
  0xec   : > { %1136 = vst.msk [vmem:[#allocation2 + $0xf8] sm:$0xff] %vm332_vm3, %v1112_v34  ;;  %v1091_v52 = vmax.f32 %v1015_v44, 0.0  ;;  %v1007_v53 = vadd.f32 %v16301_v32, %v1006_v49  ;;  %v15265_v54 = vpop.f32.mrf.mxu0  ;;  %v15293_v59 = vpop.f32.mrf.mxu1 }
  0xed   : > { %795 = vst.msk [vmem:[#allocation2 + $0x28] sm:$0xff] %vm332_vm3, %v771_v46  ;;  %v776_v55 = vmul.f32 %v16268_v17, %v632_v47  ;;  %v630_v56 = vmax.f32 %v548_v48, 0.0  ;;  %v559_v57 = vadd.f32 %v15265_v54, %v16301_v32  ;;  %1134 = vst.msk [vmem:[#allocation2 + $0xe8] sm:$0xff] %vm332_vm3, %v1110_v51  ;;  %v1018_v62 = vadd.f32 %v15293_v59, %v16301_v32 }
  0xee   : > { %v1115_v60 = vmul.f32 %v1091_v52, %v16268_v17  ;;  %v1089_v61 = vmax.f32 %v1007_v53, 0.0  ;;  %v550_v0 = vpop.f32.mrf.mxu0  ;;  %v16355_v2 = vld [vmem:[#allocation2 + $0x30] sm:$0xff]  ;;  %v1009_v6 = vpop.f32.mrf.mxu1 }
  0xef   : > { %800 = vst.msk [vmem:[#allocation2 + $0x50] sm:$0xff] %vm332_vm3, %v776_v55  ;;  %v774_v3 = vmul.f32 %v16264_v15, %v630_v56  ;;  %v633_v4 = vmax.f32 %v559_v57, 0.0  ;;  %v551_v5 = vadd.f32 %v16301_v32, %v550_v0  ;;  %v13802_v7 = vpack.c.bf16 %v16355_v2, %v16355_v2 }
  0xf0   : > { %1139 = vst.msk [vmem:[#allocation2 + $0x110] sm:$0xff] %vm332_vm3, %v1115_v60  ;;  %v1113_v8 = vmul.f32 %v1089_v61, %v16264_v15  ;;  %v1092_v9 = vmax.f32 %v1018_v62, 0.0  ;;  %v1010_v35 = vadd.f32 %v16301_v32, %v1009_v6  ;;  %v15268_v37 = vpop.f32.mrf.mxu0  ;;  %v21898_v38 = vrot.slane %v16355_v2, 7  ;;  %v16366_v39 = vld [vmem:[#allocation2 + $0x20] sm:$0xff]  ;;  %v15296_v34 = vpop.f32.mrf.mxu1 }
  0xf1   : > { %798 = vst.msk [vmem:[#allocation2 + $0x40] sm:$0xff] %vm332_vm3, %v774_v3  ;;  %v777_v40 = vmul.f32 %v16266_v16, %v633_v4  ;;  %v631_v41 = vmax.f32 %v551_v5, 0.0  ;;  %v572_v42 = vadd.f32 %v15268_v37, %v16301_v32  ;;  %1554 = vrot.lane.b32.xlu1 %v13802_v7, %s15974_s20  ;;  %v1288_v43 = vrot.slane %v16355_v2, 1 }
  0xf2   : > { %1137 = vst.msk [vmem:[#allocation2 + $0x100] sm:$0xff] %vm332_vm3, %v1113_v8  ;;  %v1116_v44 = vmul.f32 %v1092_v9, %v16266_v16  ;;  %v1090_v45 = vmax.f32 %v1010_v35, 0.0  ;;  %v1031_v46 = vadd.f32 %v15296_v34, %v16301_v32  ;;  %v563_v47 = vpop.f32.mrf.mxu0  ;;  %v1163_v48 = vld [vmem:[#allocation2 + $0x38] sm:$0xff]  ;;  %v13800_v49 = vpack.c.bf16 %v16366_v39, %v16366_v39  ;;  %v1022_v53 = vpop.f32.mrf.mxu1 }
  0xf3   : > { %801 = vst.msk [vmem:[#allocation2 + $0x58] sm:$0xff] %vm332_vm3, %v777_v40  ;;  %v775_v50 = vmul.f32 %v16262_v14, %v631_v41  ;;  %v636_v51 = vmax.f32 %v572_v42, 0.0  ;;  %v564_v52 = vadd.f32 %v16301_v32, %v563_v47  ;;  %v13803_v54 = vpack.c.bf16 %v1163_v48, %v1163_v48 }
  0xf4   : > { %1140 = vst.msk [vmem:[#allocation2 + $0x118] sm:$0xff] %vm332_vm3, %v1116_v44  ;;  %v1114_v55 = vmul.f32 %v1090_v45, %v16262_v14  ;;  %v1095_v56 = vmax.f32 %v1031_v46, 0.0  ;;  %v1023_v57 = vadd.f32 %v16301_v32, %v1022_v53  ;;  %v15269_v59 = vpop.f32.mrf.mxu0  ;;  %v16384_v60 = vrot.slane %v1163_v48, 7  ;;  %v15297_v3 = vpop.f32.mrf.mxu1 }
  0xf5   : > { %799 = vst.msk [vmem:[#allocation2 + $0x48] sm:$0xff] %vm332_vm3, %v775_v50  ;;  %v780_v61 = vmul.f32 %v16276_v21, %v636_v51  ;;  %v634_v62 = vmax.f32 %v564_v52, 0.0  ;;  %v575_v0 = vadd.f32 %v15269_v59, %v16301_v32  ;;  %1556 = vrot.lane.b32.xlu0 %v13803_v54, %s15974_s20  ;;  %v1290_v4 = vrot.slane %v1163_v48, 1  ;;  %1550 = vrot.lane.b32.xlu1 %v13800_v49, %s15974_s20 }
  0xf6   : > { %1138 = vst.msk [vmem:[#allocation2 + $0x108] sm:$0xff] %vm332_vm3, %v1114_v55  ;;  %v1119_v5 = vmul.f32 %v1095_v56, %v16276_v21  ;;  %v1093_v6 = vmax.f32 %v1023_v57, 0.0  ;;  %v1034_v7 = vadd.f32 %v15297_v3, %v16301_v32  ;;  %v16395_v8 = vrot.slane %v16366_v39, 7  ;;  %v566_v9 = vpop.f32.mrf.mxu0  ;;  %v1025_v42 = vpop.f32.mrf.mxu1 }
  0xf7   : > { %804 = vst.msk [vmem:[#allocation2 + $0x70] sm:$0xff] %vm332_vm3, %v780_v61  ;;  %v778_v35 = vmul.f32 %v16272_v19, %v634_v62  ;;  %v637_v37 = vmax.f32 %v575_v0, 0.0  ;;  %v1284_v40 = vrot.slane %v16366_v39, 1  ;;  %v567_v41 = vadd.f32 %v16301_v32, %v566_v9 }
  0xf8   : > { %1143 = vst.msk [vmem:[#allocation2 + $0x130] sm:$0xff] %vm332_vm3, %v1119_v5  ;;  %v1117_v34 = vmul.f32 %v1093_v6, %v16272_v19  ;;  %v1096_v44 = vmax.f32 %v1034_v7, 0.0  ;;  %v1026_v45 = vadd.f32 %v16301_v32, %v1025_v42  ;;  %v15272_v46 = vpop.f32.mrf.mxu0  ;;  %v16404_v47 = vld [vmem:[#allocation2 + $0x40] sm:$0xff]  ;;  %v1291_v48 = vsel %vm1278_vm4, %v1288_v43, %v1290_v4  ;;  %v15300_v52 = vpop.f32.mrf.mxu1 }
  0xf9   : > { %802 = vst.msk [vmem:[#allocation2 + $0x60] sm:$0xff] %vm332_vm3, %v778_v35  ;;  %v781_v49 = vmul.f32 %v16274_v20, %v637_v37  ;;  %v635_v50 = vmax.f32 %v567_v41, 0.0  ;;  %v588_v51 = vadd.f32 %v15272_v46, %v16301_v32  ;;  %v2580_v53 = vrot.slane %v16404_v47, 1  ;;  %2891 = vrot.lane.b32.xlu1 %v13803_v54, %s15976_s24  ;;  %v5148_v58 = vld [vmem:[#allocation2 + $0x100] sm:$0xff] }
  0xfa   : > { %1141 = vst.msk [vmem:[#allocation2 + $0x120] sm:$0xff] %vm332_vm3, %v1117_v34  ;;  %v1120_v55 = vmul.f32 %v1096_v44, %v16274_v20  ;;  %v1094_v56 = vmax.f32 %v1026_v45, 0.0  ;;  %v1047_v57 = vadd.f32 %v15300_v52, %v16301_v32  ;;  %v1285_v59 = vsel %vm1278_vm4, %v1282_v1, %v1284_v40  ;;  %v579_v61 = vpop.f32.mrf.mxu0  ;;  %v1038_v5 = vpop.f32.mrf.mxu1 }
  0xfb   : > { %805 = vst.msk [vmem:[#allocation2 + $0x78] sm:$0xff] %vm332_vm3, %v781_v49  ;;  %v779_v62 = vmul.f32 %v16270_v18, %v635_v50  ;;  %v640_v0 = vmax.f32 %v588_v51, 0.0  ;;  %v2581_v54 = vsel %vm1278_vm4, %v1290_v4, %v2580_v53  ;;  %v13823_v3 = vpack.c.bf16 %v1285_v59, %v1285_v59 }
  0xfc   : > { %1144 = vst.msk [vmem:[#allocation2 + $0x138] sm:$0xff] %vm332_vm3, %v1120_v55  ;;  %v1118_v6 = vmul.f32 %v1094_v56, %v16270_v18  ;;  %v1099_v7 = vmax.f32 %v1047_v57, 0.0  ;;  %v16429_v9 = vpack.c.bf16 %v2581_v54, %v2581_v54  ;;  %v580_v1 = vadd.f32 %v16301_v32, %v579_v61  ;;  %v15273_v35 = vpop.f32.mrf.mxu0  ;;  %v15301_v42 = vpop.f32.mrf.mxu1  ;;  %v16457_v54 = vld [vmem:[#allocation2 + $0x28] sm:$0xff]  ;;  %v15529_v18 = vld [vmem:[%s21892_s4 + $0x20] sm:$0xff]  }
  0xfd   : > { %803 = vst.msk [vmem:[#allocation2 + $0x68] sm:$0xff] %vm332_vm3, %v779_v62  ;;  %v784_v37 = vmul.f32 %v16284_v25, %v640_v0  ;;  %1717 = vrot.lane.b32.xlu0 %v13823_v3, %s15975_s13  ;;  %v1039_v4 = vadd.f32 %v16301_v32, %v1038_v5  ;;  %v591_v41 = vadd.f32 %v15273_v35, %v16301_v32  ;;  %v1929_v49 = vsel %vm1205_vm6, 0.0, %v16395_v8 }
  0xfe   : > { %v16437_v34 = vpack.c.bf16 %v1291_v48, %v1291_v48  ;;  %1142 = vst.msk [vmem:[#allocation2 + $0x128] sm:$0xff] %vm332_vm3, %v1118_v6  ;;  %v1123_v44 = vmul.f32 %v1099_v7, %v16284_v25  ;;  %v638_v45 = vmax.f32 %v580_v1, 0.0  ;;  %v1050_v46 = vadd.f32 %v15301_v42, %v16301_v32  ;;  %v582_v50 = vpop.f32.mrf.mxu0  ;;  %v1041_v56 = vpop.f32.mrf.mxu1 }
  0xff   : > { %3083 = vst.msk [vmem:[#allocation4 + $0x8] sm:$0xf] %vm1447_vm8, %v16429_v9  ;;  %v1097_v51 = vmax.f32 %v1039_v4, 0.0  ;;  %v641_v52 = vmax.f32 %v591_v41, 0.0  ;;  %v13845_v48 = vpack.c.bf16 %v1929_v49, %v1929_v49  ;;  %v583_v55 = vadd.f32 %v16301_v32, %v582_v50 }
 0x100   : > { %808 = vst.msk [vmem:[#allocation2 + $0x90] sm:$0xff] %vm332_vm3, %v784_v37  ;;  %1723 = vrot.lane.b32.xlu1 %v16437_v34, %s15975_s13  ;;  %1147 = vst.msk [vmem:[#allocation2 + $0x150] sm:$0xff] %vm332_vm3, %v1123_v44  ;;  %v782_v57 = vmul.f32 %v16280_v23, %v638_v45  ;;  %v1100_v59 = vmax.f32 %v1050_v46, 0.0  ;;  %v1042_v61 = vadd.f32 %v16301_v32, %v1041_v56  ;;  %v15276_v62 = vpop.f32.mrf.mxu0  ;;  %v15304_v1 = vpop.f32.mrf.mxu1  ;;  %v1213_v46 = vrot.slane %v16457_v54, 7 }
 0x101   : > { %v1864_v0 = vsel %vm1205_vm6, %v21898_v38, %v16384_v60  ;;  %v1121_v3 = vmul.f32 %v1097_v51, %v16280_v23  ;;  %v785_v5 = vmul.f32 %v16282_v24, %v641_v52  ;;  %2074 = vrot.lane.b32.xlu0 %v13845_v48, %s15976_s24  ;;  %v639_v6 = vmax.f32 %v583_v55, 0.0  ;;  %v16540_v38 = vld [vmem:[#allocation2 + $0x108] sm:$0xff] }
 0x102   : > { %v604_v7 = vadd.f32 %v15276_v62, %v16301_v32  ;;  %806 = vst.msk [vmem:[#allocation2 + $0x80] sm:$0xff] %vm332_vm3, %v782_v57  ;;  %v1124_v35 = vmul.f32 %v1100_v59, %v16282_v24  ;;  %v1098_v37 = vmax.f32 %v1042_v61, 0.0  ;;  %v1063_v4 = vadd.f32 %v15304_v1, %v16301_v32  ;;  %v595_v42 = vpop.f32.mrf.mxu0  ;;  %v1054_v49 = vpop.f32.mrf.mxu1  ;;  %22030 = vst [vmem:[#allocation33_spill] sm:$0xff] %v16540_v38 }
 0x103   : > { %v16466_v41 = vpack.c.bf16 %v1864_v0, %v1864_v0  ;;  %1145 = vst.msk [vmem:[#allocation2 + $0x140] sm:$0xff] %vm332_vm3, %v1121_v3  ;;  %809 = vst.msk [vmem:[#allocation2 + $0x98] sm:$0xff] %vm332_vm3, %v785_v5  ;;  %v783_v44 = vmul.f32 %v16278_v22, %v639_v6  ;;  %v16478_v52 = vpack.c.bf16 %v16457_v54, %v16457_v54  ;;  %v2578_v62 = vsel %vm1205_vm6, 0.0, %v16384_v60  ;;  %v16487_v0 = vld [vmem:[#allocation2 + $0x50] sm:$0xff] }
 0x104   : > { %v644_v45 = vmax.f32 %v604_v7, 0.0  ;;  %1148 = vst.msk [vmem:[#allocation2 + $0x158] sm:$0xff] %vm332_vm3, %v1124_v35  ;;  %v1122_v50 = vmul.f32 %v1098_v37, %v16278_v22  ;;  %v1103_v51 = vmax.f32 %v1063_v4, 0.0  ;;  %v596_v48 = vadd.f32 %v16301_v32, %v595_v42  ;;  %v15277_v55 = vpop.f32.mrf.mxu0  ;;  %v15305_v61 = vpop.f32.mrf.mxu1 }
 0x105   : > { %2080 = vrot.lane.b32.xlu1 %v16466_v41, %s15976_s24  ;;  %807 = vst.msk [vmem:[#allocation2 + $0x88] sm:$0xff] %vm332_vm3, %v783_v44  ;;  %v1055_v57 = vadd.f32 %v16301_v32, %v1054_v49  ;;  %v607_v59 = vadd.f32 %v15277_v55, %v16301_v32  ;;  %1552 = vrot.lane.b32.xlu0 %v16478_v52, %s15974_s20  ;;  %v1286_v35 = vrot.slane %v16457_v54, 1  ;;  %v16502_v55 = vld [vmem:[#allocation2 + $0x48] sm:$0xff]  ;;  %v16615_v54 = vld [vmem:[#allocation2 + $0x70] sm:$0xff] }
 0x106   : > { %v788_v56 = vmul.f32 %v16292_v29, %v644_v45  ;;  %1146 = vst.msk [vmem:[#allocation2 + $0x148] sm:$0xff] %vm332_vm3, %v1122_v50  ;;  %v1127_v3 = vmul.f32 %v1103_v51, %v16292_v29  ;;  %v642_v5 = vmax.f32 %v596_v48, 0.0  ;;  %v1066_v6 = vadd.f32 %v15305_v61, %v16301_v32  ;;  %v598_v1 = vpop.f32.mrf.mxu0  ;;  %v1057_v44 = vpop.f32.mrf.mxu1  ;;  %v15526_v29 = vld [vmem:[%s21892_s4 + $0x68] sm:$0xff]  }
 0x107   : > { %v13917_v7 = vpack.c.bf16 %v2578_v62, %v2578_v62  ;;  %v1101_v37 = vmax.f32 %v1055_v57, 0.0  ;;  %v645_v4 = vmax.f32 %v607_v59, 0.0  ;;  %v599_v42 = vadd.f32 %v16301_v32, %v598_v1  ;;  %1454 = vst.msk [vmem:[#allocation4 + $0x48] sm:$0xf] %vm1447_vm8, %v16466_v41  ;;  %2268 = vst.msk [vmem:[#allocation4 + $0x10] sm:$0xf] %vm1447_vm8, %v16478_v52 }
 0x108   : > { %812 = vst.msk [vmem:[#allocation2 + $0xb0] sm:$0xff] %vm332_vm3, %v788_v56  ;;  %1151 = vst.msk [vmem:[#allocation2 + $0x170] sm:$0xff] %vm332_vm3, %v1127_v3  ;;  %v786_v45 = vmul.f32 %v16288_v27, %v642_v5  ;;  %v1104_v49 = vmax.f32 %v1066_v6, 0.0  ;;  %v1058_v50 = vadd.f32 %v16301_v32, %v1057_v44  ;;  %v15280_v51 = vpop.f32.mrf.mxu0  ;;  %v1296_v48 = vrot.slane %v16487_v0, 1  ;;  %v16504_v56 = vld [vmem:[#allocation2 + $0x58] sm:$0xff]  ;;  %v15308_v3 = vpop.f32.mrf.mxu1 }
 0x109   : > { %2723 = vrot.lane.b32.xlu1 %v13917_v7, %s15975_s13  ;;  %v1125_v57 = vmul.f32 %v1101_v37, %v16288_v27  ;;  %v789_v59 = vmul.f32 %v16290_v28, %v645_v4  ;;  %v643_v61 = vmax.f32 %v599_v42, 0.0  ;;  %v620_v62 = vadd.f32 %v15280_v51, %v16301_v32  ;;  %2367 = vrot.lane.b32.xlu0 %v16437_v34, %s15974_s20 }
 0x10a   : > { %810 = vst.msk [vmem:[#allocation2 + $0xa0] sm:$0xff] %vm332_vm3, %v786_v45  ;;  %v1128_v5 = vmul.f32 %v1104_v49, %v16290_v28  ;;  %v1102_v6 = vmax.f32 %v1058_v50, 0.0  ;;  %v1079_v7 = vadd.f32 %v15308_v3, %v16301_v32  ;;  %v13806_v1 = vpack.c.bf16 %v16487_v0, %v16487_v0  ;;  %v611_v37 = vpop.f32.mrf.mxu0  ;;  %v1070_v49 = vpop.f32.mrf.mxu1 }
 0x10b   : > { %1149 = vst.msk [vmem:[#allocation2 + $0x160] sm:$0xff] %vm332_vm3, %v1125_v57  ;;  %813 = vst.msk [vmem:[#allocation2 + $0xb8] sm:$0xff] %vm332_vm3, %v789_v59  ;;  %v787_v4 = vmul.f32 %v16286_v26, %v643_v61  ;;  %v648_v42 = vmax.f32 %v620_v62, 0.0  ;;  %v2582_v44 = vrot.slane %v16502_v55, 1  ;;  %v21899_v45 = vrot.slane %v16504_v56, 1 }
 0x10c   : > { %1152 = vst.msk [vmem:[#allocation2 + $0x178] sm:$0xff] %vm332_vm3, %v1128_v5  ;;  %v1126_v34 = vmul.f32 %v1102_v6, %v16286_v26  ;;  %v1107_v50 = vmax.f32 %v1079_v7, 0.0  ;;  %v612_v51 = vadd.f32 %v16301_v32, %v611_v37  ;;  %v1071_v57 = vadd.f32 %v16301_v32, %v1070_v49  ;;  %v15281_v59 = vpop.f32.mrf.mxu0  ;;  %v15309_v6 = vpop.f32.mrf.mxu1  ;;  %v5147_v7 = vld [vmem:[#allocation2 + $0xf8] sm:$0xff] }
 0x10d   : > { %1562 = vrot.lane.b32.xlu1 %v13806_v1, %s15974_s20  ;;  %811 = vst.msk [vmem:[#allocation2 + $0xa8] sm:$0xff] %vm332_vm3, %v787_v4  ;;  %v792_v61 = vmul.f32 %v16307_v36, %v648_v42  ;;  %v2585_v62 = vsel %vm1278_vm4, %v2582_v44, %v1296_v48  ;;  %v2587_v3 = vsel %vm1278_vm4, %v1296_v48, %v21899_v45 }
 0x10e   : > { %v623_v5 = vadd.f32 %v15281_v59, %v16301_v32  ;;  %1150 = vst.msk [vmem:[#allocation2 + $0x168] sm:$0xff] %vm332_vm3, %v1126_v34  ;;  %v1131_v37 = vmul.f32 %v1107_v50, %v16307_v36  ;;  %v16535_v49 = vpack.c.bf16 %v2585_v62, %v2585_v62  ;;  %v16537_v4 = vpack.c.bf16 %v2587_v3, %v2587_v3  ;;  %v614_v50 = vpop.f32.mrf.mxu0  ;;  %v16636_v36 = vld [vmem:[#allocation2 + $0x138] sm:$0xff] }
 0x10f   : > { %2897 = vrot.lane.b32.xlu0 %v13806_v1, %s15976_s24  ;;  %v646_v42 = vmax.f32 %v612_v51, 0.0  ;;  %816 = vst.msk [vmem:[#allocation2 + $0xd0] sm:$0xff] %vm332_vm3, %v792_v61  ;;  %v1105_v48 = vmax.f32 %v1071_v57, 0.0  ;;  %v1082_v45 = vadd.f32 %v15309_v6, %v16301_v32  ;;  %v2583_v34 = vsel %vm1278_vm4, %v2580_v53, %v2582_v44  ;;  %v16750_v19 = vld [vmem:[#allocation2 + $0xb0] sm:$0xff] }
 0x110   : > { %v649_v59 = vmax.f32 %v623_v5, 0.0  ;;  %1155 = vst.msk [vmem:[#allocation2 + $0x190] sm:$0xff] %vm332_vm3, %v1131_v37  ;;  %v16553_v51 = vpack.c.bf16 %v2583_v34, %v2583_v34  ;;  %v5267_v57 = vrot.slane %v5147_v7, 1  ;;  %v5268_v61 = vrot.slane %v5148_v58, 1  ;;  %v1073_v5 = vpop.f32.mrf.mxu1  ;;  %v16572_v7 = vld [vmem:[#allocation2 + $0x60] sm:$0xff]  ;;  %v16574_v37 = vld [vmem:[#allocation2 + $0x68] sm:$0xff] }
 0x111   : > { %3085 = vst.msk [vmem:[#allocation4 + $0x20] sm:$0xf] %vm1447_vm8, %v16535_v49  ;;  %3086 = vst.msk [vmem:[#allocation4 + $0x2c] sm:$0xf] %vm1447_vm8, %v16537_v4  ;;  %v790_v1 = vmul.f32 %v16296_v31, %v646_v42  ;;  %v1129_v62 = vmul.f32 %v1105_v48, %v16296_v31  ;;  %v1108_v53 = vmax.f32 %v1082_v45, 0.0  ;;  %v21900_v44 = vrot.slane %v16540_v38, 1 }
 0x112   : > { %v793_v3 = vmul.f32 %v16303_v33, %v649_v59  ;;  %3084 = vst.msk [vmem:[#allocation4 + $0x14] sm:$0xf] %vm1447_vm8, %v16553_v51  ;;  %v1287_v6 = vsel %vm1278_vm4, %v1284_v40, %v1286_v35  ;;  %v1289_v58 = vsel %vm1278_vm4, %v1286_v35, %v1288_v43  ;;  %v615_v45 = vadd.f32 %v16301_v32, %v614_v50  ;;  %v15522_v34 = vld [vmem:[%s21892_s4 + $0x78] sm:$0xff]   ;;  %v5160_v14 = vld [vmem:[#allocation2 + $0x160] sm:$0xff]  ;;  %v16789_v15 = vld [vmem:[#allocation2 + $0x170] sm:$0xff] }
 0x113   : > { %814 = vst.msk [vmem:[#allocation2 + $0xc0] sm:$0xff] %vm332_vm3, %v790_v1  ;;  %1153 = vst.msk [vmem:[#allocation2 + $0x180] sm:$0xff] %vm332_vm3, %v1129_v62  ;;  %v1132_v39 = vmul.f32 %v1108_v53, %v16303_v33  ;;  %v5269_v40 = vsel %vm1278_vm4, %v5267_v57, %v5268_v61  ;;  %v5271_v42 = vsel %vm1278_vm4, %v5268_v61, %v21900_v44  ;;  %v15523_v50 = vld [vmem:[%s21892_s4 + $0x38] sm:$0xff]   ;;  %v2588_v61 = vrot.slane %v16572_v7, 1 }
 0x114   : > { %817 = vst.msk [vmem:[#allocation2 + $0xd8] sm:$0xff] %vm332_vm3, %v793_v3  ;;  %v16583_v48 = vpack.c.bf16 %v1287_v6, %v1287_v6  ;;  %v16585_v43 = vpack.c.bf16 %v1289_v58, %v1289_v58  ;;  %v647_v35 = vmax.f32 %v615_v45, 0.0  ;;  %v1074_v59 = vadd.f32 %v16301_v32, %v1073_v5  ;;  %v16608_v3 = vld [vmem:[#allocation2 + $0x118] sm:$0xff]  ;;  %v5152_v45 = vld [vmem:[#allocation2 + $0x120] sm:$0xff]  ;;  %14666 = vmatprep.subr.bf16.mxu0 %v15522_v34  ;;  %v16726_v20 = vld [vmem:[#allocation2 + $0xa8] sm:$0xff] }
 0x115   : > { %1156 = vst.msk [vmem:[#allocation2 + $0x198] sm:$0xff] %vm332_vm3, %v1132_v39  ;;  %v1860_v1 = vsel %vm1205_vm6, %v16395_v8, %v1213_v46  ;;  %v22031_v32 = vrot.slane %v16355_v2, 7  ;;  %v2590_v62 = vrot.slane %v16574_v37, 1  ;;  %22032 = vst [vmem:[#allocation34_spill] sm:$0xff] %v16608_v3  ;;  %v14181_v53 = vpack.c.bf16 %v5269_v40, %v5269_v40  ;;  %v16613_v2 = vld [vmem:[#allocation2 + $0x128] sm:$0xff]  ;;  %v16625_v44 = vld [vmem:[#allocation2 + $0x78] sm:$0xff]  ;;  %14667 = vmatpush3.bf16.msra.mxu0 %v15523_v50 }
 0x116   : > { %1719 = vrot.lane.b32.xlu1 %v16583_v48, %s15975_s13  ;;  %v14182_v5 = vpack.c.bf16 %v5271_v42, %v5271_v42  ;;  %1721 = vrot.lane.b32.xlu0 %v16585_v43, %s15975_s13  ;;  %v791_v6 = vmul.f32 %v16294_v30, %v647_v35  ;;  %v1106_v58 = vmax.f32 %v1074_v59, 0.0  ;;  %v16627_v35 = vld [vmem:[#allocation2 + $0x1a0] sm:$0xff]  ;;  %v21909_v33 = vrot.slane %v16608_v3, 1  ;;  %v16752_v16 = vld [vmem:[#allocation2 + $0xb8] sm:$0xff] }
 0x117   : > { %v1862_v57 = vsel %vm1205_vm6, %v1213_v46, %v22031_v32  ;;  %v16617_v46 = vpack.c.bf16 %v1860_v1, %v1860_v1  ;;  %v22033_v32 = vrot.slane %v16504_v56, 1  ;;  %v2591_v42 = vsel %vm1278_vm4, %v2588_v61, %v2590_v62  ;;  %v16791_v12 = vld [vmem:[#allocation2 + $0x178] sm:$0xff] }
 0x118   : > { %v16619_v39 = vpack.c.bf16 %v1862_v57, %v1862_v57  ;;  %v15511_v59 = vld [vmem:[#allocation4 + $0x20] ss:$12 sps:$4 sm:$0xff]   ;;  %815 = vst.msk [vmem:[#allocation2 + $0xc8] sm:$0xff] %vm332_vm3, %v791_v6  ;;  %v1130_v34 = vmul.f32 %v1106_v58, %v16294_v30  ;;  %v16633_v57 = vpack.c.bf16 %v2591_v42, %v2591_v42  ;;  %v5276_v50 = vrot.slane %v5152_v45, 1 }
 0x119   : > { %v2589_v40 = vsel %vm1278_vm4, %v22033_v32, %v2588_v61  ;;  %v16638_v32 = vld [vmem:[#allocation2 + $0x80] sm:$0xff]  ;;  %v5278_v31 = vrot.slane %v16613_v2, 1  ;;  %v2592_v6 = vrot.slane %v16615_v54, 1  ;;  %v2594_v58 = vrot.slane %v16625_v44, 1  ;;  %v5154_v45 = vld [vmem:[#allocation2 + $0x130] sm:$0xff]  ;;  %v16691_v30 = vld [vmem:[#allocation2 + $0x98] sm:$0xff] }
 0x11a   : > { %v16631_v1 = vpack.c.bf16 %v2589_v40, %v2589_v40  ;;  %v15510_v61 = vld [vmem:[#allocation4 + $0x8] ss:$12 sps:$4 sm:$0xff]   ;;  %2076 = vrot.lane.b32.xlu1 %v16617_v46, %s15976_s24  ;;  %1154 = vst.msk [vmem:[#allocation2 + $0x188] sm:$0xff] %vm332_vm3, %v1130_v34  ;;  %2078 = vrot.lane.b32.xlu0 %v16619_v39, %s15976_s24  ;;  %v16660_v40 = vld [vmem:[#allocation2 + $0x88] sm:$0xff]  ;;  %v16663_v42 = vrot.slane %v16638_v32, 1  ;;  %v15524_v34 = vld [vmem:[%s21892_s4 + $0x70] sm:$0xff]  }
 0x11b   : > { %5771 = vst.msk [vmem:[#allocation4 + $0x8] sm:$0xf] %vm1447_vm8, %v14181_v53  ;;  %5772 = vst.msk [vmem:[#allocation4 + $0x14] sm:$0xf] %vm1447_vm8, %v14182_v5  ;;  %15314 = vmatprep.mubr.msk.bf16.mxu1 %vm332_vm3, %v15510_v61  ;;  %v5277_v53 = vsel %vm1278_vm4, %v21909_v33, %v5276_v50  ;;  %v5279_v5 = vsel %vm1278_vm4, %v5276_v50, %v5278_v31  ;;  %v15525_v61 = vld [vmem:[%s21892_s4 + $0x30] sm:$0xff]   ;;  %v2593_v50 = vsel %vm1278_vm4, %v2590_v62, %v2592_v6 }
 0x11c   : > { %3087 = vst.msk [vmem:[#allocation4 + $0x38] sm:$0xf] %vm1447_vm8, %v16631_v1  ;;  %3088 = vst.msk [vmem:[#allocation4 + $0x44] sm:$0xf] %vm1447_vm8, %v16633_v57  ;;  %15315 = vmatmul.mubr.msk.bf16.vlgmr.msra.gmra.mxu1 %vm332_vm3, %v15511_v59  ;;  %v2595_v33 = vsel %vm1278_vm4, %v2592_v6, %v2594_v58  ;;  %v16675_v2 = vld [vmem:[#allocation2 + $0x90] sm:$0xff]  ;;  %v16681_v26 = vpack.c.bf16 %v2593_v50, %v2593_v50  ;;  %v5280_v24 = vrot.slane %v5154_v45, 1  ;;  %14668 = vmatprep.subr.bf16.mxu0 %v15524_v34 }
 0x11d   : > { %22034 = vst [vmem:[#allocation35_spill] sm:$0xff] %v16663_v42  ;;  %v16683_v27 = vpack.c.bf16 %v2595_v33, %v2595_v33  ;;  %v13804_v62 = vpack.c.bf16 %v16404_v47, %v16404_v47  ;;  %v5156_v59 = vld [vmem:[#allocation2 + $0x140] sm:$0xff]  ;;  %v16689_v6 = vld [vmem:[#allocation2 + $0x148] sm:$0xff]  ;;  %v14185_v28 = vpack.c.bf16 %v5277_v53, %v5277_v53  ;;  %v14186_v25 = vpack.c.bf16 %v5279_v5, %v5279_v5  ;;  %v16713_v50 = vld [vmem:[#allocation2 + $0x158] sm:$0xff] }
 0x11e   : > { %22035 = vst [vmem:[#allocation36_spill] sm:$0xff] %v16681_v26  ;;  %2365 = vrot.lane.b32.xlu1 %v16585_v43, %s15974_s20  ;;  %2363 = vrot.lane.b32.xlu0 %v16583_v48, %s15974_s20  ;;  %v2597_v33 = vsel %vm1278_vm4, %v2594_v58, %v16663_v42  ;;  %v2598_v45 = vrot.slane %v16660_v40, 1  ;;  %3089 = vst.msk [vmem:[#allocation4 + $0x50] sm:$0xf] %vm1447_vm8, %v16681_v26  ;;  %v16703_v43 = vsel %vm1278_vm4, %v5278_v31, %v5280_v24  ;;  %v15527_v34 = vld [vmem:[%s21892_s4 + $0x28] sm:$0xff]  }
 0x11f   : > { %3090 = vst.msk [vmem:[#allocation4 + $0x5c] sm:$0xf] %vm1447_vm8, %v16683_v27  ;;  %v22036_v53 = vrot.slane %v16636_v36, 1  ;;  %v16710_v48 = vpack.c.bf16 %v2597_v33, %v2597_v33  ;;  %v2600_v58 = vrot.slane %v16675_v2, 1  ;;  %14669 = vmatpush3.bf16.msra.mxu0 %v15525_v61  ;;  %v5284_v22 = vrot.slane %v5156_v59, 1  ;;  %v5158_v33 = vld [vmem:[#allocation2 + $0x150] sm:$0xff] }
 0x120   : > { %v2599_v31 = vsel %vm1278_vm4, %v16663_v42, %v2598_v45  ;;  %v5286_v23 = vrot.slane %v16689_v6, 1  ;;  %14670 = vmatprep.subr.bf16.mxu0 %v15526_v29  ;;  %v16736_v6 = vpack.c.bf16 %v16504_v56, %v16504_v56  ;;  %v22042_v13 = vrot.slane %v16713_v50, 1  ;;  %1453 = vst.msk [vmem:[#allocation4 + $0x3c] sm:$0xf] %vm1447_vm8, %v16619_v39  ;;  %1452 = vst.msk [vmem:[#allocation4 + $0x30] sm:$0xf] %vm1447_vm8, %v16617_v46 }
 0x121   : > { %v16708_v5 = vsel %vm1278_vm4, %v5280_v24, %v22036_v53  ;;  %22037 = vst [vmem:[#allocation37_spill] sm:$0xff] %v16710_v48  ;;  %v16722_v24 = vrot.slane %v16691_v30, 1  ;;  %v16724_v53 = vld [vmem:[#allocation2 + $0xa0] sm:$0xff]  ;;  %v16729_v21 = vpack.c.bf16 %v2599_v31, %v2599_v31  ;;  %3091 = vst.msk [vmem:[#allocation4 + $0x68] sm:$0xf] %vm1447_vm8, %v16710_v48  ;;  %v2601_v59 = vsel %vm1278_vm4, %v2598_v45, %v2600_v58  ;;  %v15791_v46 = vld [vmem:[#allocation2 + $0x38] sm:$0xff] }
 0x122   : > { %1558 = vrot.lane.b32.xlu1 %v13804_v62, %s15974_s20  ;;  %2893 = vrot.lane.b32.xlu0 %v13804_v62, %s15976_s24  ;;  %v16743_v31 = vpack.c.bf16 %v2601_v59, %v2601_v59  ;;  %v16748_v45 = vpack.c.bf16 %v16502_v55, %v16502_v55  ;;  %v14188_v62 = vpack.c.bf16 %v16708_v5, %v16708_v5  ;;  %v2604_v5 = vrot.slane %v16724_v53, 1  ;;  %v16808_v48 = vld [vmem:[#allocation2 + $0xc0] sm:$0xff] }
 0x123   : > { %v15512_v61 = vld [vmem:[#allocation4 + $0x38] ss:$12 sps:$4 sm:$0xff]   ;;  %22038 = vst [vmem:[#allocation38_spill] sm:$0xff] %v16729_v21  ;;  %v2603_v29 = vsel %vm1278_vm4, %v2600_v58, %v16722_v24  ;;  %3092 = vst.msk [vmem:[#allocation4 + $0x74] sm:$0xf] %vm1447_vm8, %v16729_v21  ;;  %14671 = vmatpush3.bf16.msra.mxu0 %v15527_v34  ;;  %v2606_v58 = vrot.slane %v16726_v20, 1  ;;  %v5287_v34 = vsel %vm1278_vm4, %v5284_v22, %v5286_v23 }
 0x124   : > { %5775 = vst.msk [vmem:[#allocation4 + $0x38] sm:$0xf] %vm1447_vm8, %v14185_v28  ;;  %5776 = vst.msk [vmem:[#allocation4 + $0x44] sm:$0xf] %vm1447_vm8, %v14186_v25  ;;  %v15528_v25 = vld [vmem:[%s21892_s4 + $0x60] sm:$0xff]   ;;  %15318 = vmatprep.mubr.msk.bf16.mxu1 %vm332_vm3, %v15512_v61  ;;  %v14187_v28 = vpack.c.bf16 %v16703_v43, %v16703_v43  ;;  %v16765_v59 = vpack.c.bf16 %v2603_v29, %v2603_v29  ;;  %v22041_v61 = vrot.slane %v16636_v36, 1 }
 0x125   : > { %22039 = vst [vmem:[#allocation39_spill] sm:$0xff] %v16743_v31  ;;  %3093 = vst.msk [vmem:[#allocation4 + $0x80] sm:$0xf] %vm1447_vm8, %v16743_v31  ;;  %v5288_v43 = vrot.slane %v5158_v33, 1  ;;  %v16777_v29 = vld [vmem:[#allocation2 + $0x168] sm:$0xff]  ;;  %14672 = vmatprep.subr.bf16.mxu0 %v15528_v25  ;;  %v16786_v33 = vrot.slane %v16750_v19, 1  ;;  %v2605_v11 = vsel %vm1278_vm4, %v16722_v24, %v2604_v5  ;;  %v2607_v42 = vsel %vm1278_vm4, %v2604_v5, %v2606_v58 }
 0x126   : > { %22040 = vst [vmem:[#allocation40_spill] sm:$0xff] %v16765_v59  ;;  %v5285_v17 = vsel %vm1278_vm4, %v22041_v61, %v5284_v22  ;;  %3094 = vst.msk [vmem:[#allocation4 + $0x8c] sm:$0xf] %vm1447_vm8, %v16765_v59  ;;  %2369 = vrot.lane.b32.xlu1 %v16429_v9, %s15974_s20  ;;  %v2610_v61 = vrot.slane %v16752_v16, 1  ;;  %v15530_v22 = vld [vmem:[%s21892_s4 + $0x58] sm:$0xff]   ;;  %1564 = vrot.lane.b32.xlu0 %v16736_v6, %s15974_s20  ;;  %v13977_v31 = vpack.c.bf16 %v2605_v11, %v2605_v11 }
 0x127   : > { %v15513_v25 = vld [vmem:[#allocation4 + $0x50] ss:$12 sps:$4 sm:$0xff]   ;;  %v5289_v10 = vsel %vm1278_vm4, %v5286_v23, %v5288_v43  ;;  %v5291_v36 = vsel %vm1278_vm4, %v5288_v43, %v22042_v13  ;;  %v13978_v21 = vpack.c.bf16 %v2607_v42, %v2607_v42  ;;  %v5292_v59 = vrot.slane %v5160_v14, 1  ;;  %14673 = vmatpush3.bf16.msra.mxu0 %v15529_v18  ;;  %v15531_v43 = vld [vmem:[%s21892_s4 + $0x18] sm:$0xff]   ;;  %2272 = vst.msk [vmem:[#allocation4 + $0x40] sm:$0xf] %vm1447_vm8, %v16748_v45 }
 0x128   : > { %5777 = vst.msk [vmem:[#allocation4 + $0x50] sm:$0xf] %vm1447_vm8, %v14187_v28  ;;  %5778 = vst.msk [vmem:[#allocation4 + $0x5c] sm:$0xf] %vm1447_vm8, %v14188_v62  ;;  %v5294_v23 = vrot.slane %v16777_v29, 1  ;;  %v16810_v13 = vld [vmem:[#allocation2 + $0xc8] sm:$0xff]  ;;  %15319 = vmatmul.mubr.msk.bf16.gmra.mxu1 %vm332_vm3, %v15513_v25  ;;  %v14189_v5 = vpack.c.bf16 %v5285_v17, %v5285_v17  ;;  %v14190_v28 = vpack.c.bf16 %v5287_v34, %v5287_v34  ;;  %14674 = vmatprep.subr.bf16.mxu0 %v15530_v22 }
 0x129   : > { %v2609_v11 = vsel %vm1278_vm4, %v2606_v58, %v16786_v33  ;;  %v2611_v14 = vsel %vm1278_vm4, %v16786_v33, %v2610_v61  ;;  %v16820_v42 = vld [vmem:[#allocation2 + $0x180] sm:$0xff]  ;;  %v16822_v62 = vld [vmem:[#allocation2 + $0x188] sm:$0xff]  ;;  %3095 = vst.msk [vmem:[#allocation4 + $0x98] sm:$0xf] %vm1447_vm8, %v13977_v31  ;;  %3096 = vst.msk [vmem:[#allocation4 + $0xa4] sm:$0xf] %vm1447_vm8, %v13978_v21  ;;  %v14191_v38 = vpack.c.bf16 %v5289_v10, %v5289_v10 }
 0x12a   : > { %2895 = vrot.lane.b32.xlu1 %v16748_v45, %s15976_s24  ;;  %v13979_v18 = vpack.c.bf16 %v2609_v11, %v2609_v11  ;;  %v13980_v17 = vpack.c.bf16 %v2611_v14, %v2611_v14  ;;  %v5296_v29 = vrot.slane %v16789_v15, 1  ;;  %v5298_v58 = vrot.slane %v16791_v12, 1  ;;  %v16830_v34 = vld [vmem:[#allocation2 + $0xd0] sm:$0xff]  ;;  %v16832_v25 = vld [vmem:[#allocation2 + $0xd8] sm:$0xff]  ;;  %2899 = vrot.lane.b32.xlu0 %v16736_v6, %s15976_s24 }
 0x12b   : > { %v15514_v3 = vld [vmem:[#allocation4 + $0x68] ss:$12 sps:$4 sm:$0xff]   ;;  %v14192_v26 = vpack.c.bf16 %v5291_v36, %v5291_v36  ;;  %v2612_v31 = vrot.slane %v16808_v48, 1  ;;  %v2614_v21 = vrot.slane %v16810_v13, 1  ;;  %v22043_v12 = vrot.slane %v16713_v50, 1  ;;  %14675 = vmatpush3.bf16.msra.mxu0 %v15531_v43  ;;  %v15532_v50 = vld [vmem:[%s21892_s4 + $0x50] sm:$0xff]  }
 0x12c   : > { %5779 = vst.msk [vmem:[#allocation4 + $0x68] sm:$0xf] %vm1447_vm8, %v14189_v5  ;;  %5780 = vst.msk [vmem:[#allocation4 + $0x74] sm:$0xf] %vm1447_vm8, %v14190_v28  ;;  %v5295_v22 = vsel %vm1278_vm4, %v5292_v59, %v5294_v23  ;;  %v22044_v10 = vrot.slane %v16504_v56, 7  ;;  %v22045_v6 = vrot.slane %v16487_v0, 7  ;;  %15322 = vmatprep.mubr.msk.bf16.mxu1 %vm332_vm3, %v15514_v3  ;;  %v5297_v14 = vsel %vm1278_vm4, %v5294_v23, %v5296_v29 }
 0x12d   : > { %v5293_v15 = vsel %vm1278_vm4, %v22043_v12, %v5292_v59  ;;  %3097 = vst.msk [vmem:[#allocation4 + $0xb0] sm:$0xf] %vm1447_vm8, %v13979_v18  ;;  %3098 = vst.msk [vmem:[#allocation4 + $0xbc] sm:$0xf] %vm1447_vm8, %v13980_v17  ;;  %v22046_v5 = vrot.slane %v16404_v47, 7  ;;  %v15533_v59 = vld [vmem:[%s21892_s4 + $0x10] sm:$0xff]   ;;  %v2613_v18 = vsel %vm1278_vm4, %v2610_v61, %v2612_v31  ;;  %v2615_v17 = vsel %vm1278_vm4, %v2612_v31, %v2614_v21 }
 0x12e   : > { %v1872_v36 = vsel %vm1205_vm6, %v22045_v6, %v22044_v10  ;;  %v15515_v11 = vld [vmem:[#allocation4 + $0x80] ss:$12 sps:$4 sm:$0xff]   ;;  %v5299_v43 = vsel %vm1278_vm4, %v5296_v29, %v5298_v58  ;;  %1731 = vrot.lane.b32.xlu1 %v16537_v4, %s15975_s13  ;;  %v13981_v12 = vpack.c.bf16 %v2613_v18, %v2613_v18  ;;  %v13982_v3 = vpack.c.bf16 %v2615_v17, %v2615_v17  ;;  %v16880_v29 = vld [vmem:[#allocation2 + $0xe8] sm:$0xff] }
 0x12f   : > { %v1866_v28 = vsel %vm1205_vm6, %v16384_v60, %v22046_v5  ;;  %v5300_v60 = vrot.slane %v16820_v42, 1  ;;  %5781 = vst.msk [vmem:[#allocation4 + $0x80] sm:$0xf] %vm1447_vm8, %v14191_v38  ;;  %5782 = vst.msk [vmem:[#allocation4 + $0x8c] sm:$0xf] %vm1447_vm8, %v14192_v26  ;;  %v5302_v10 = vrot.slane %v16822_v62, 1  ;;  %v14193_v61 = vpack.c.bf16 %v5293_v15, %v5293_v15  ;;  %1725 = vrot.lane.b32.xlu0 %v16429_v9, %s15975_s13 }
 0x130   : > { %v16872_v23 = vld [vmem:[#allocation2 + $0x198] sm:$0xff]  ;;  %v2616_v42 = vrot.slane %v16830_v34, 1  ;;  %v2618_v38 = vrot.slane %v16832_v25, 1  ;;  %v16878_v26 = vld [vmem:[#allocation2 + $0xe0] sm:$0xff]  ;;  %14676 = vmatprep.subr.bf16.mxu0 %v15532_v50  ;;  %v14194_v31 = vpack.c.bf16 %v5295_v22, %v5295_v22  ;;  %v14195_v6 = vpack.c.bf16 %v5297_v14, %v5297_v14  ;;  %3099 = vst.msk [vmem:[#allocation4 + $0xc8] sm:$0xf] %vm1447_vm8, %v13981_v12  ;;  %15323 = vmatmul.mubr.msk.bf16.gmra.mxu1 %vm332_vm3, %v15515_v11 }
 0x131   : > { %v16882_v5 = vpack.c.bf16 %v1872_v36, %v1872_v36  ;;  %v16884_v62 = vpack.c.bf16 %v1866_v28, %v1866_v28  ;;  %3100 = vst.msk [vmem:[#allocation4 + $0xd4] sm:$0xf] %vm1447_vm8, %v13982_v3  ;;  %v5166_v9 = vld [vmem:[#allocation2 + $0x190] sm:$0xff]  ;;  %14677 = vmatpush3.bf16.msra.mxu0 %v15533_v59  ;;  %v15534_v15 = vld [vmem:[%s21892_s4 + $0x48] sm:$0xff]   ;;  %v14196_v36 = vpack.c.bf16 %v5299_v43, %v5299_v43  ;;  %v5306_v12 = vrot.slane %v16872_v23, 1 }
 0x132   : > { %v15535_v50 = vld [vmem:[%s21892_s4 + $0x8] sm:$0xff]   ;;  %v5301_v28 = vsel %vm1278_vm4, %v5298_v58, %v5300_v60  ;;  %v2617_v14 = vsel %vm1278_vm4, %v2614_v21, %v2616_v42  ;;  %v2619_v18 = vsel %vm1278_vm4, %v2616_v42, %v2618_v38  ;;  %v16903_v3 = vld [vmem:[#allocation2 + $0xf0] sm:$0xff]  ;;  %v5303_v21 = vsel %vm1278_vm4, %v5300_v60, %v5302_v10  ;;  %14678 = vmatprep.subr.bf16.mxu0 %v15534_v15  ;;  %v15536_v60 = vld [vmem:[%s21892_s4 + $0x40] sm:$0xff]  }
 0x133   : > { %v15516_v22 = vld [vmem:[#allocation4 + $0x98] ss:$12 sps:$4 sm:$0xff]   ;;  %2088 = vrot.lane.b32.xlu1 %v16882_v5, %s15976_s24  ;;  %v13983_v59 = vpack.c.bf16 %v2617_v14, %v2617_v14  ;;  %v13984_v17 = vpack.c.bf16 %v2619_v18, %v2619_v18  ;;  %2082 = vrot.lane.b32.xlu0 %v16884_v62, %s15976_s24  ;;  %v5304_v43 = vrot.slane %v5166_v9, 1  ;;  %v16915_v23 = vpack.c.bf16 %v16615_v54, %v16615_v54 }
 0x134   : > { %5783 = vst.msk [vmem:[#allocation4 + $0x98] sm:$0xf] %vm1447_vm8, %v14193_v61  ;;  %5784 = vst.msk [vmem:[#allocation4 + $0xa4] sm:$0xf] %vm1447_vm8, %v14194_v31  ;;  %v5169_v11 = vld [vmem:[#allocation2 + $0x1a8] sm:$0xff]  ;;  %15326 = vmatprep.mubr.msk.bf16.mxu1 %vm332_vm3, %v15516_v22  ;;  %v2620_v61 = vrot.slane %v16878_v26, 1  ;;  %v14197_v31 = vpack.c.bf16 %v5301_v28, %v5301_v28 }
 0x135   : > { %v15517_v58 = vld [vmem:[#allocation4 + $0xb0] ss:$12 sps:$4 sm:$0xff]   ;;  %3101 = vst.msk [vmem:[#allocation4 + $0xe0] sm:$0xf] %vm1447_vm8, %v13983_v59  ;;  %3102 = vst.msk [vmem:[#allocation4 + $0xec] sm:$0xf] %vm1447_vm8, %v13984_v17  ;;  %14679 = vmatpush3.bf16.msra.mxu0 %v15535_v50  ;;  %v5305_v9 = vsel %vm1278_vm4, %v5302_v10, %v5304_v43  ;;  %v5307_v17 = vsel %vm1278_vm4, %v5304_v43, %v5306_v12 }
 0x136   : > { %5785 = vst.msk [vmem:[#allocation4 + $0xb0] sm:$0xf] %vm1447_vm8, %v14195_v6  ;;  %5786 = vst.msk [vmem:[#allocation4 + $0xbc] sm:$0xf] %vm1447_vm8, %v14196_v36  ;;  %v2622_v42 = vrot.slane %v16880_v29, 1  ;;  %v5310_v6 = vrot.slane %v5169_v11, 1  ;;  %v14198_v36 = vpack.c.bf16 %v5303_v21, %v5303_v21  ;;  %v2621_v14 = vsel %vm1278_vm4, %v2618_v38, %v2620_v61  ;;  %14680 = vmatprep.subr.bf16.mxu0 %v15536_v60 }
 0x137   : > { %v2624_v22 = vrot.slane %v16903_v3, 1  ;;  %1570 = vrot.lane.b32.xlu1 %v16915_v23, %s15974_s20  ;;  %v5170_v15 = vld [vmem:[#allocation2 + $0x1b0] sm:$0xff]  ;;  %2725 = vrot.lane.b32.xlu0 %v16884_v62, %s15975_s13  ;;  %v13985_v28 = vpack.c.bf16 %v2621_v14, %v2621_v14  ;;  %v15537_v43 = vld [vmem:[%s21892_s4] sm:$0xff]   ;;  %v14199_v60 = vpack.c.bf16 %v5305_v9, %v5305_v9  ;;  %1455 = vst.msk [vmem:[#allocation4 + $0x54] sm:$0xf] %vm1447_vm8, %v16884_v62  ;;  %v2526_v52 = vrot.slane %v16660_v40, 7 }
 0x138   : > { %v2623_v18 = vsel %vm1278_vm4, %v2620_v61, %v2622_v42  ;;  %v15518_v59 = vld [vmem:[#allocation4 + $0xc8] ss:$12 sps:$4 sm:$0xff]   ;;  %v5312_v21 = vrot.slane %v5170_v15, 1  ;;  %15327 = vmatmul.mubr.msk.bf16.gmra.mxu1 %vm332_vm3, %v15517_v58  ;;  %v22047_v61 = vrot.slane %v16627_v35, 1  ;;  %1458 = vst.msk [vmem:[#allocation4 + $0x78] sm:$0xf] %vm1447_vm8, %v16882_v5 }
 0x139   : > { %v13986_v11 = vpack.c.bf16 %v2623_v18, %v2623_v18  ;;  %v2625_v50 = vsel %vm1278_vm4, %v2622_v42, %v2624_v22  ;;  %5787 = vst.msk [vmem:[#allocation4 + $0xc8] sm:$0xf] %vm1447_vm8, %v14197_v31  ;;  %5788 = vst.msk [vmem:[#allocation4 + $0xd4] sm:$0xf] %vm1447_vm8, %v14198_v36  ;;  %v2650_v10 = vsel %vm1278_vm4, %v2624_v22, 0.0  ;;  %v1221_v31 = vrot.slane %v16502_v55, 7  ;;  %15330 = vmatprep.mubr.msk.bf16.mxu1 %vm332_vm3, %v15518_v59 }
 0x13a   : > { %v13987_v38 = vpack.c.bf16 %v2625_v50, %v2625_v50  ;;  %3103 = vst.msk [vmem:[#allocation4 + $0xf8] sm:$0xf] %vm1447_vm8, %v13985_v28  ;;  %v5311_v42 = vsel %vm1278_vm4, %v22047_v61, %v5310_v6  ;;  %v13988_v22 = vpack.c.bf16 %v2650_v10, %v2650_v10  ;;  %v14200_v36 = vpack.c.bf16 %v5307_v17, %v5307_v17 }
 0x13b   : > { %3104 = vst.msk [vmem:[#allocation4 + $0x104] sm:$0xf] %vm1447_vm8, %v13986_v11  ;;  %2905 = vrot.lane.b32.xlu1 %v16915_v23, %s15976_s24  ;;  %1560 = vrot.lane.b32.xlu0 %v16748_v45, %s15974_s20  ;;  %v22048_v55 = vmov %v22047_v61  ;;  %v14202_v14 = vpack.c.bf16 %v5311_v42, %v5311_v42  ;;  %v5313_v18 = vsel %vm1278_vm4, %v5310_v6, %v5312_v21  ;;  %v5338_v15 = vsel %vm1278_vm4, %v5312_v21, 0.0 }
 0x13c   : > { %3105 = vst.msk [vmem:[#allocation4 + $0x110] sm:$0xf] %vm1447_vm8, %v13987_v38  ;;  %v15519_v58 = vld [vmem:[#allocation4 + $0xe0] ss:$12 sps:$4 sm:$0xff]   ;;  %3106 = vst.msk [vmem:[#allocation4 + $0x11c] sm:$0xf] %vm1447_vm8, %v13988_v22  ;;  %v5309_v9 = vsel %vm1278_vm4, %v5306_v12, %v22048_v55  ;;  %14681 = vmatpush3.bf16.msra.mxu0 %v15537_v43  ;;  %v14203_v12 = vpack.c.bf16 %v5313_v18, %v5313_v18  ;;  %v14204_v50 = vpack.c.bf16 %v5338_v15, %v5338_v15 }
 0x13d   : > { %5789 = vst.msk [vmem:[#allocation4 + $0xe0] sm:$0xf] %vm1447_vm8, %v14199_v60  ;;  %5790 = vst.msk [vmem:[#allocation4 + $0xec] sm:$0xf] %vm1447_vm8, %v14200_v36  ;;  %v22049_v59 = vrot.slane %v16404_v47, 7  ;;  %v22050_v28 = vrot.slane %v16226_v63, 7  ;;  %v14201_v11 = vpack.c.bf16 %v5309_v9, %v5309_v9  ;;  %v13872_v22 = vpack.c.bf16 %v15791_v46, %v15791_v46 }
 0x13e   : > { %v22051_v38 = vrot.slane %v16487_v0, 7  ;;  %v16987_v21 = vrot.slane %v16691_v30, 7  ;;  %v16994_v43 = vrot.slane %v16675_v2, 7  ;;  %v15790_v0 = vld [vmem:[#allocation2 + $0x20] sm:$0xff]  ;;  %v1229_v30 = vrot.slane %v16574_v37, 7  ;;  %v17039_v55 = vld [vmem:[#allocation2 + $0xb8] sm:$0xff] }
 0x13f   : > { %v1868_v17 = vsel %vm1205_vm6, %v22049_v59, %v1221_v31  ;;  %1727 = vrot.lane.b32.xlu1 %v16553_v51, %s15975_s13  ;;  %v1212_v35 = vsel %vm1205_vm6, %v22050_v28, %v16395_v8  ;;  %2731 = vrot.lane.b32.xlu0 %v16882_v5, %s15975_s13  ;;  %v15789_v8 = vld [vmem:[#allocation2 + $0x30] sm:$0xff]  ;;  %v13869_v42 = vpack.c.bf16 %v15790_v0, %v15790_v0  ;;  %v1231_v60 = vrot.slane %v16615_v54, 7  ;;  %v17102_v0 = vld [vmem:[#allocation2 + $0xc0] sm:$0xff] }
 0x140   : > { %v13776_v47 = vpack.c.bf16 %v1212_v35, %v1212_v35  ;;  %v16972_v10 = vpack.c.bf16 %v1868_v17, %v1868_v17  ;;  %15331 = vmatmul.mubr.msk.bf16.gmra.mxu1 %vm332_vm3, %v15519_v58  ;;  %v13871_v39 = vpack.c.bf16 %v15789_v8, %v15789_v8  ;;  %v1224_v41 = vsel %vm1205_vm6, %v1221_v31, %v22051_v38  ;;  %v17031_v58 = vld [vmem:[#allocation2 + $0xa0] sm:$0xff]  ;;  %v15792_v35 = vld [vmem:[#allocation2 + $0x50] sm:$0xff] }
 0x141   : > { %v13782_v61 = vpack.c.bf16 %v1224_v41, %v1224_v41  ;;  %v1888_v31 = vsel %vm1205_vm6, %v16994_v43, %v16987_v21  ;;  %2267 = vst.msk [vmem:[#allocation4 + $0x4] sm:$0xf] %vm1447_vm8, %v13869_v42  ;;  %v17015_v36 = vrot.slane %v16638_v32, 7  ;;  %2270 = vst.msk [vmem:[#allocation4 + $0x28] sm:$0xf] %vm1447_vm8, %v13872_v22  ;;  %v1232_v32 = vsel %vm1205_vm6, %v1229_v30, %v1231_v60  ;;  %v15793_v38 = vld [vmem:[#allocation2 + $0x40] sm:$0xff] }
 0x142   : > { %v15520_v6 = vld [vmem:[#allocation4 + $0xf8] ss:$12 sps:$4 sm:$0xff]   ;;  %1451 = vst.msk [vmem:[#allocation4 + $0x24] sm:$0xf] %vm1447_vm8, %v13776_v47  ;;  %2269 = vst.msk [vmem:[#allocation4 + $0x1c] sm:$0xf] %vm1447_vm8, %v13871_v39  ;;  %v2529_v40 = vsel %vm1205_vm6, %v2526_v52, %v16994_v43  ;;  %v13873_v41 = vpack.c.bf16 %v15793_v38, %v15793_v38 }
 0x143   : > { %5791 = vst.msk [vmem:[#allocation4 + $0xf8] sm:$0xf] %vm1447_vm8, %v14201_v11  ;;  %5792 = vst.msk [vmem:[#allocation4 + $0x104] sm:$0xf] %vm1447_vm8, %v14202_v14  ;;  %15334 = vmatprep.mubr.msk.bf16.mxu1 %vm332_vm3, %v15520_v6  ;;  %v15521_v63 = vld [vmem:[#allocation4 + $0x110] ss:$12 sps:$4 sm:$0xff]   ;;  %2084 = vrot.lane.b32.xlu1 %v16972_v10, %s15976_s24  ;;  %v2527_v62 = vsel %vm1205_vm6, %v17015_v36, %v2526_v52  ;;  %v17042_v5 = vpack.c.bf16 %v2529_v40, %v2529_v40 }
 0x144   : > { %5793 = vst.msk [vmem:[#allocation4 + $0x110] sm:$0xf] %vm1447_vm8, %v14203_v12  ;;  %5794 = vst.msk [vmem:[#allocation4 + $0x11c] sm:$0xf] %vm1447_vm8, %v14204_v50  ;;  %2375 = vrot.lane.b32.xlu0 %v16537_v4, %s15974_s20  ;;  %v17009_v4 = vpack.c.bf16 %v1888_v31, %v1888_v31  ;;  %v17044_v9 = vpack.c.bf16 %v2527_v62, %v2527_v62  ;;  %v17046_v14 = vpack.c.bf16 %v1232_v32, %v1232_v32  ;;  %v17070_v12 = vld [vmem:[#allocation2 + $0xa8] sm:$0xff]  ;;  %v17115_v46 = vld [vmem:[#allocation2 + $0xd0] sm:$0xff] }
 0x145   : > { %1457 = vst.msk [vmem:[#allocation4 + $0x6c] sm:$0xf] %vm1447_vm8, %v13782_v61  ;;  %v1227_v18 = vrot.slane %v16572_v7, 7  ;;  %v17052_v15 = vrot.slane %v17031_v58, 1  ;;  %v2532_v59 = vrot.slane %v16724_v53, 7  ;;  %v17058_v17 = vrot.slane %v17039_v55, 1 }
 0x146   : > { %1466 = vst.msk [vmem:[#allocation4 + $0xd8] sm:$0xf] %vm1447_vm8, %v17009_v4  ;;  %1461 = vst.msk [vmem:[#allocation4 + $0x9c] sm:$0xf] %vm1447_vm8, %v17046_v14  ;;  %v13875_v11 = vpack.c.bf16 %v15792_v35, %v15792_v35  ;;  %v17096_v8 = vrot.slane %v17070_v12, 7  ;;  %v1233_v39 = vrot.slane %v16625_v44, 7  ;;  %v17128_v32 = vpack.c.bf16 %v16625_v44, %v16625_v44 }
 0x147   : > { %2727 = vrot.lane.b32.xlu1 %v16972_v10, %s15975_s13  ;;  %1465 = vst.msk [vmem:[#allocation4 + $0xcc] sm:$0xf] %vm1447_vm8, %v17042_v5  ;;  %1464 = vst.msk [vmem:[#allocation4 + $0xc0] sm:$0xf] %vm1447_vm8, %v17044_v9  ;;  %v17068_v28 = vsel %vm1278_vm4, %v16722_v24, %v17052_v15  ;;  %v17078_v50 = vsel %vm1205_vm6, %v16987_v21, %v2532_v59  ;;  %v17083_v47 = vsel %vm1278_vm4, %v16786_v33, %v17058_v17 }
 0x148   : > { %1729 = vrot.lane.b32.xlu0 %v16535_v49, %s15975_s13  ;;  %15335 = vmatmul.mubr.msk.bf16.gmra.mxu1 %vm332_vm3, %v15521_v63  ;;  %v22052_v24 = vrot.slane %v16504_v56, 7  ;;  %1456 = vst.msk [vmem:[#allocation4 + $0x60] sm:$0xf] %vm1447_vm8, %v16972_v10  ;;  %2273 = vst.msk [vmem:[#allocation4 + $0x4c] sm:$0xf] %vm1447_vm8, %v13875_v11  ;;  %v1318_v63 = vrot.slane %v17070_v12, 1  ;;  %v13878_v53 = vpack.c.bf16 %v16574_v37, %v16574_v37 }
 0x149   : > { %2271 = vst.msk [vmem:[#allocation4 + $0x34] sm:$0xf] %vm1447_vm8, %v13873_v41  ;;  %v17131_v45 = vrot.slane %v17102_v0, 1  ;;  %v1901_v40 = vrot.slane %v17115_v46, 7  ;;  %v17151_v35 = vrot.slane %v17039_v55, 7  ;;  %v1897_v11 = vrot.slane %v17102_v0, 7 }
 0x14a   : > { %v2517_v6 = vsel %vm1205_vm6, %v22052_v24, %v1227_v18  ;;  %v17109_v42 = vsel %vm1278_vm4, %v17052_v15, %v1318_v63  ;;  %2277 = vst.msk [vmem:[#allocation4 + $0x7c] sm:$0xf] %vm1447_vm8, %v16915_v23  ;;  %2276 = vst.msk [vmem:[#allocation4 + $0x70] sm:$0xf] %vm1447_vm8, %v13878_v53  ;;  %v1236_v37 = vsel %vm1205_vm6, %v1233_v39, %v17015_v36  ;;  %v2544_v23 = vrot.slane %v16830_v34, 7 }
 0x14b   : > { %2373 = vrot.lane.b32.xlu1 %v16535_v49, %s15974_s20  ;;  %v13808_v49 = vpack.c.bf16 %v16572_v7, %v16572_v7  ;;  %v13922_v22 = vpack.c.bf16 %v2517_v6, %v2517_v6  ;;  %v17156_v54 = vsel %vm1278_vm4, %v17058_v17, %v17131_v45  ;;  %v15794_v6 = vld [vmem:[#allocation2 + $0x58] sm:$0xff]  ;;  %v17199_v7 = vrot.slane %v16750_v19, 7  ;;  %2278 = vst.msk [vmem:[#allocation4 + $0x88] sm:$0xf] %vm1447_vm8, %v17128_v32 }
 0x14c   : > { %2086 = vrot.lane.b32.xlu0 %v13782_v61, %s15976_s24 }
 0x14d   : > { %1459 = vst.msk [vmem:[#allocation4 + $0x84] sm:$0xf] %vm1447_vm8, %v13922_v22 }
 0x14f   : > { %1566 = vrot.lane.b32.xlu1 %v13808_v49, %s15974_s20 }
 0x150   : > { %2371 = vrot.lane.b32.xlu0 %v16553_v51, %s15974_s20  ;;  %v1889_v51 = vrot.slane %v17031_v58, 7 }
 0x152   : > { %v1890_v56 = vsel %vm1205_vm6, %v16987_v21, %v1889_v51  ;;  %v1892_v31 = vsel %vm1205_vm6, %v1889_v51, %v17096_v8  ;;  %v17117_v21 = vld [vmem:[#allocation2 + $0xd8] sm:$0xff]  ;;  %v13876_v51 = vpack.c.bf16 %v15794_v6, %v15794_v6  ;;  %v17186_v6 = vld [vmem:[#allocation2 + $0xb0] sm:$0xff] }
 0x153   : > { %2901 = vrot.lane.b32.xlu1 %v13808_v49, %s15976_s24  ;;  %v17105_v10 = vpack.c.bf16 %v1890_v56, %v1890_v56  ;;  %v17119_v52 = vpack.c.bf16 %v1892_v31, %v1892_v31  ;;  %v21960_v62 = vrot.slane %v17117_v21, 7  ;;  %v17144_v49 = vld [vmem:[#allocation2 + $0xc8] sm:$0xff]  ;;  %v1898_v56 = vsel %vm1205_vm6, %v17151_v35, %v1897_v11 }
 0x154   : > { %2729 = vrot.lane.b32.xlu0 %v13782_v61, %s15975_s13  ;;  %v17123_v61 = vsel %vm1278_vm4, %v1318_v63, %v16786_v33  ;;  %v1234_v33 = vsel %vm1205_vm6, %v1231_v60, %v1233_v39  ;;  %v17171_v38 = vrot.slane %v17144_v49, 7  ;;  %v17175_v41 = vpack.c.bf16 %v1898_v56, %v1898_v56  ;;  %2274 = vst.msk [vmem:[#allocation4 + $0x58] sm:$0xf] %vm1447_vm8, %v13876_v51 }
 0x155   : > { %1467 = vst.msk [vmem:[#allocation4 + $0xe4] sm:$0xf] %vm1447_vm8, %v17105_v10  ;;  %1468 = vst.msk [vmem:[#allocation4 + $0xf0] sm:$0xf] %vm1447_vm8, %v17119_v52  ;;  %v17158_v60 = vpack.c.bf16 %v1234_v33, %v1234_v33  ;;  %v17164_v24 = vsel %vm1205_vm6, %v1901_v40, %v21960_v62  ;;  %v1230_v31 = vsel %vm1205_vm6, %v1227_v18, %v1229_v30  ;;  %v2534_v33 = vrot.slane %v16726_v20, 7 }
 0x156   : > { %v17190_v62 = vsel %vm1205_vm6, %v1897_v11, %v17171_v38  ;;  %v17194_v51 = vsel %vm1205_vm6, %v17171_v38, %v1901_v40  ;;  %v17196_v56 = vpack.c.bf16 %v1230_v31, %v1230_v31  ;;  %1471 = vst.msk [vmem:[#allocation4 + $0x114] sm:$0xf] %vm1447_vm8, %v17175_v41  ;;  %v1965_v19 = vrot.slane %v17186_v6, 1 }
 0x157   : > { %2733 = vrot.lane.b32.xlu1 %v13922_v22, %s15975_s13  ;;  %1462 = vst.msk [vmem:[#allocation4 + $0xa8] sm:$0xf] %vm1447_vm8, %v17158_v60  ;;  %v17207_v20 = vsel %vm1205_vm6, %v2534_v33, %v17199_v7  ;;  %v17212_v30 = vsel %vm1205_vm6, %v2532_v59, %v2534_v33  ;;  %v2538_v18 = vrot.slane %v16752_v16, 7  ;;  %v2540_v40 = vrot.slane %v16808_v48, 7 }
 0x158   : > { %1572 = vrot.lane.b32.xlu0 %v17128_v32, %s15974_s20  ;;  %1460 = vst.msk [vmem:[#allocation4 + $0x90] sm:$0xf] %vm1447_vm8, %v17196_v56  ;;  %22053 = vst [vmem:[#allocation41_spill] sm:$0xff] %v17207_v20  ;;  %v17222_v11 = vsel %vm1278_vm4, %v1318_v63, %v1965_v19  ;;  %v17228_v59 = vsel %vm1278_vm4, %v1965_v19, %v17058_v17  ;;  %v17248_v48 = vpack.c.bf16 %v1236_v37, %v1236_v37  ;;  %v15795_v17 = vld [vmem:[#allocation2 + $0x60] sm:$0xff] }
 0x159   : > { %22054 = vst [vmem:[#allocation42_spill] sm:$0xff] %v17212_v30  ;;  %22055 = vst [vmem:[#allocation43_spill] sm:$0xff] %v17222_v11  ;;  %v17233_v31 = vsel %vm1205_vm6, %v2538_v18, %v2540_v40  ;;  %v17237_v16 = vsel %vm1205_vm6, %v17199_v7, %v2538_v18  ;;  %v13877_v63 = vpack.c.bf16 %v15795_v17, %v15795_v17  ;;  %v1971_v44 = vrot.slane %v17144_v49, 1 }
 0x15a   : > { %22056 = vst [vmem:[#allocation44_spill] sm:$0xff] %v17228_v59  ;;  %22057 = vst [vmem:[#allocation45_spill] sm:$0xff] %v17233_v31  ;;  %v13814_v33 = vpack.c.bf16 %v16675_v2, %v16675_v2  ;;  %v1973_v39 = vrot.slane %v17115_v46, 1  ;;  %v2546_v2 = vrot.slane %v16832_v25, 7  ;;  %v2548_v37 = vrot.slane %v16878_v26, 7  ;;  %v17410_v31 = vld [vmem:[#allocation2 + $0x108] sm:$0xff] }
 0x15b   : > { %2377 = vrot.lane.b32.xlu1 %v16631_v1, %s15974_s20  ;;  %22058 = vst [vmem:[#allocation46_spill] sm:$0xff] %v17237_v16  ;;  %1463 = vst.msk [vmem:[#allocation4 + $0xb4] sm:$0xf] %vm1447_vm8, %v17248_v48  ;;  %v1248_v26 = vsel %vm1205_vm6, %v17096_v8, %v17199_v7 }
 0x15c   : > { %2907 = vrot.lane.b32.xlu0 %v17128_v32, %s15976_s24  ;;  %2275 = vst.msk [vmem:[#allocation4 + $0x64] sm:$0xf] %vm1447_vm8, %v13877_v63  ;;  %v17282_v63 = vsel %vm1205_vm6, %v2546_v2, %v2548_v37  ;;  %v2550_v32 = vrot.slane %v16880_v29, 7 }
 0x15d   : > { %22064 = vst [vmem:[#allocation52_spill] sm:$0xff] %v17282_v63 }
 0x15e   : > { %v17310_v29 = vsel %vm1205_vm6, %v2548_v37, %v2550_v32 }
 0x15f   : > { %1739 = vrot.lane.b32.xlu1 %v16683_v27, %s15975_s13  ;;  %22068 = vst [vmem:[#allocation56_spill] sm:$0xff] %v17310_v29 }
 0x160   : > { %1733 = vrot.lane.b32.xlu0 %v16631_v1, %s15975_s13  ;;  %v2542_v1 = vrot.slane %v16810_v13, 7  ;;  %v15796_v13 = vld [vmem:[#allocation2 + $0x68] sm:$0xff] }
 0x161   : > { %v13809_v53 = vpack.c.bf16 %v15796_v13, %v15796_v13  ;;  %v13794_v13 = vpack.c.bf16 %v1248_v26, %v1248_v26 }
 0x162   : > { %v17254_v18 = vsel %vm1205_vm6, %v2540_v40, %v2542_v1  ;;  %v17262_v34 = vsel %vm1205_vm6, %v2542_v1, %v2544_v23  ;;  %v17272_v40 = vsel %vm1278_vm4, %v17131_v45, %v1971_v44  ;;  %v17279_v1 = vsel %vm1205_vm6, %v2544_v23, %v2546_v2  ;;  %v17299_v2 = vld [vmem:[#allocation2 + $0xe8] sm:$0xff] }
 0x163   : > { %2096 = vrot.lane.b32.xlu1 %v17158_v60, %s15976_s24  ;;  %v1555_v19 = vpop.permute.xlu1 %1554  ;;  %22059 = vst [vmem:[#allocation47_spill] sm:$0xff] %v17254_v18  ;;  %22060 = vst [vmem:[#allocation48_spill] sm:$0xff] %v17262_v34  ;;  %v2552_v23 = vrot.slane %v16903_v3, 7  ;;  %v17312_v3 = vld [vmem:[#allocation2 + $0xe0] sm:$0xff]  ;;  %v4620_v26 = vrot.slane %v17299_v2, 1  ;;  %v22081_v34 = vld [vmem:[#allocation34_spill] sm:$0xff] }
 0x164   : > { %2090 = vrot.lane.b32.xlu0 %v13922_v22, %s15976_s24  ;;  %1622 = vst.msk [vmem:[#allocation4 + $0x3c] sm:$0xf] %vm1616_vm7, %v1555_v19  ;;  %v17268_v22 = vsel %vm1278_vm4, %v1971_v44, %v1973_v39  ;;  %22062 = vst [vmem:[#allocation50_spill] sm:$0xff] %v17272_v40  ;;  %v17285_v19 = vrot.slane %v17117_v21, 1  ;;  %v4619_v37 = vrot.slane %v17312_v3, 1  ;;  %v22082_v59 = vrot.slane %v22081_v34, 1 }
 0x165   : > { %22061 = vst [vmem:[#allocation49_spill] sm:$0xff] %v17268_v22  ;;  %22063 = vst [vmem:[#allocation51_spill] sm:$0xff] %v17279_v1  ;;  %v17307_v1 = vsel %vm1205_vm6, %v2550_v32, %v2552_v23 }
 0x166   : > { %22065 = vst [vmem:[#allocation53_spill] sm:$0xff] %v17285_v19  ;;  %v17297_v44 = vsel %vm1278_vm4, %v1973_v39, %v17285_v19  ;;  %22067 = vst [vmem:[#allocation55_spill] sm:$0xff] %v17307_v1  ;;  %v17319_v39 = vpack.c.bf16 %v17115_v46, %v17115_v46 }
 0x167   : > { %1578 = vrot.lane.b32.xlu1 %v13814_v33, %s15974_s20  ;;  %v1557_v25 = vpop.permute.xlu0 %1556  ;;  %v1551_v17 = vpop.permute.xlu1 %1550  ;;  %22066 = vst [vmem:[#allocation54_spill] sm:$0xff] %v17297_v44  ;;  %1469 = vst.msk [vmem:[#allocation4 + $0xfc] sm:$0xf] %vm1447_vm8, %v13794_v13  ;;  %v15797_v13 = vld [vmem:[#allocation2 + $0x80] sm:$0xff] }
 0x168   : > { %1568 = vrot.lane.b32.xlu0 %v13809_v53, %s15974_s20  ;;  %1623 = vst.msk [vmem:[#allocation4 + $0x48] sm:$0xf] %vm1616_vm7, %v1557_v25  ;;  %1620 = vst.msk [vmem:[#allocation4 + $0x24] sm:$0xf] %vm1616_vm7, %v1551_v17  ;;  %v17301_v25 = vld [vmem:[#allocation2 + $0xf0] sm:$0xff]  ;;  %v17304_v17 = vld [vmem:[#allocation2 + $0x88] sm:$0xff]  ;;  %v17332_v29 = vpack.c.bf16 %v15797_v13, %v15797_v13  ;;  %v17347_v13 = vsel %vm1278_vm4, %v4619_v37, %v4620_v26 }
 0x169   : > { %22069 = vst [vmem:[#allocation57_spill] sm:$0xff] %v17319_v39  ;;  %v4622_v23 = vrot.slane %v17301_v25, 1  ;;  %v13882_v32 = vpack.c.bf16 %v17304_v17, %v17304_v17  ;;  %2289 = vst.msk [vmem:[#allocation4 + $0x10c] sm:$0xf] %vm1447_vm8, %v17319_v39  ;;  %v17357_v39 = vld [vmem:[#allocation2 + $0xf8] sm:$0xff]  ;;  %v4550_v18 = vrot.slane %v17301_v25, 7 }
 0x16a   : > { %22072 = vst [vmem:[#allocation60_spill] sm:$0xff] %v17347_v13  ;;  %2279 = vst.msk [vmem:[#allocation4 + $0x94] sm:$0xf] %vm1447_vm8, %v17332_v29  ;;  %v17375_v13 = vpack.c.bf16 %v17117_v21, %v17117_v21  ;;  %v4624_v44 = vrot.slane %v17357_v39, 1 }
 0x16b   : > { %2913 = vrot.lane.b32.xlu1 %v13814_v33, %s15976_s24  ;;  %v17314_v33 = vpop.permute.xlu1 %2891  ;;  %v17339_v46 = vsel %vm1278_vm4, %v4620_v26, %v4622_v23  ;;  %2280 = vst.msk [vmem:[#allocation4 + $0xa0] sm:$0xf] %vm1447_vm8, %v13882_v32  ;;  %v17364_v32 = vld [vmem:[#allocation2 + $0x110] sm:$0xff] }
 0x16c   : > { %2903 = vrot.lane.b32.xlu0 %v13809_v53, %s15976_s24  ;;  %v17323_v53 = vpack.c.bf16 %v17144_v49, %v17144_v49  ;;  %22071 = vst [vmem:[#allocation59_spill] sm:$0xff] %v17339_v46  ;;  %v1250_v49 = vsel %vm1205_vm6, %v17199_v7, %v17151_v35  ;;  %v17354_v46 = vrot.slane %v17312_v3, 7  ;;  %v4548_v7 = vrot.slane %v17299_v2, 7  ;;  %22073 = vst [vmem:[#allocation61_spill] sm:$0xff] %v17364_v32 }
 0x16d   : > { %22074 = vst [vmem:[#allocation62_spill] sm:$0xff] %v17375_v13  ;;  %v17391_v40 = vsel %vm1278_vm4, %v4622_v23, %v4624_v44  ;;  %2290 = vst.msk [vmem:[#allocation4 + $0x118] sm:$0xf] %vm1447_vm8, %v17375_v13  ;;  %v4552_v13 = vrot.slane %v17357_v39, 7 }
 0x16e   : > { %22070 = vst [vmem:[#allocation58_spill] sm:$0xff] %v17323_v53  ;;  %2288 = vst.msk [vmem:[#allocation4 + $0x100] sm:$0xf] %vm1447_vm8, %v17323_v53  ;;  %v17359_v53 = vld [vmem:[#allocation2 + $0x100] sm:$0xff]  ;;  %v17408_v16 = vsel %vm1205_vm6, %v4548_v7, %v4550_v18 }
 0x16f   : > { %1735 = vrot.lane.b32.xlu1 %v16633_v57, %s15975_s13  ;;  %v1718_v1 = vpop.permute.xlu0 %1717  ;;  %22077 = vst [vmem:[#allocation65_spill] sm:$0xff] %v17391_v40  ;;  %v17422_v34 = vsel %vm1205_vm6, %v4550_v18, %v4552_v13 }
 0x170   : > { %2739 = vrot.lane.b32.xlu0 %v17158_v60, %s15975_s13  ;;  %v13795_v60 = vpack.c.bf16 %v1250_v49, %v1250_v49  ;;  %1788 = vst.msk [vmem:[#allocation4 + $0x18] sm:$0xf] %vm1785_vm9, %v1718_v1  ;;  %v17371_v1 = vsel %vm1205_vm6, %v17354_v46, %v4548_v7 }
 0x172   : > { %v1724_v26 = vpop.permute.xlu1 %1723  ;;  %1470 = vst.msk [vmem:[#allocation4 + $0x108] sm:$0xf] %vm1447_vm8, %v13795_v60  ;;  %v4626_v60 = vrot.slane %v17359_v53, 1 }
 0x173   : > { %2092 = vrot.lane.b32.xlu1 %v17196_v56, %s15976_s24  ;;  %1791 = vst.msk [vmem:[#allocation4 + $0x3c] sm:$0xf] %vm1785_vm9, %v1724_v26  ;;  %v2075_v49 = vpop.permute.xlu0 %2074  ;;  %v5272_v26 = vrot.slane %v17364_v32, 1 }
 0x174   : > { %2383 = vrot.lane.b32.xlu0 %v16683_v27, %s15974_s20  ;;  %2147 = vst.msk [vmem:[#allocation4] sm:$0xf] %vm2146_vm10, %v2075_v49  ;;  %v17382_v27 = vsel %vm1278_vm4, %v17285_v19, %v4619_v37  ;;  %v17388_v63 = vsel %vm1278_vm4, %v4624_v44, %v4626_v60  ;;  %v22078_v49 = vld [vmem:[#allocation36_spill] sm:$0xff]  ;;  %v22079_v37 = vld [vmem:[#allocation33_spill] sm:$0xff] }
 0x175   : > { %22075 = vst [vmem:[#allocation63_spill] sm:$0xff] %v17382_v27  ;;  %22076 = vst [vmem:[#allocation64_spill] sm:$0xff] %v17388_v63  ;;  %v22080_v27 = vrot.slane %v22079_v37, 1  ;;  %v5275_v63 = vsel %vm1278_vm4, %v5272_v26, %v22082_v59  ;;  %v4554_v37 = vrot.slane %v17359_v53, 7 }
 0x176   : > { %v14184_v40 = vpack.c.bf16 %v5275_v63, %v5275_v63  ;;  %22083 = vst [vmem:[#allocation36_spill] sm:$0xff] %v17422_v34  ;;  %v4628_v63 = vrot.slane %v17410_v31, 1 }
 0x177   : > { %2737 = vrot.lane.b32.xlu1 %v17046_v14, %s15975_s13  ;;  %v17397_v22 = vpop.permute.xlu1 %2080  ;;  %v5273_v19 = vsel %vm1278_vm4, %v22080_v27, %v5272_v26  ;;  %v1553_v23 = vpop.permute.xlu0 %1552  ;;  %v17431_v27 = vld [vmem:[#allocation2 + $0x90] sm:$0xff] }
 0x178   : > { %1737 = vrot.lane.b32.xlu0 %v22078_v49, %s15975_s13  ;;  %v14183_v44 = vpack.c.bf16 %v5273_v19, %v5273_v19  ;;  %1621 = vst.msk [vmem:[#allocation4 + $0x30] sm:$0xf] %vm1616_vm7, %v1553_v23  ;;  %v17425_v19 = vld [vmem:[#allocation2 + $0x98] sm:$0xff]  ;;  %v17439_v18 = vsel %vm1278_vm4, %v4628_v63, %v5272_v26 }
 0x179   : > { %5774 = vst.msk [vmem:[#allocation4 + $0x2c] sm:$0xf] %vm1447_vm8, %v14184_v40  ;;  %v17429_v7 = vpack.c.bf16 %v17425_v19, %v17425_v19  ;;  %22084 = vst [vmem:[#allocation33_spill] sm:$0xff] %v17439_v18  ;;  %v17442_v40 = vsel %vm1278_vm4, %v4626_v60, %v4628_v63  ;;  %v17456_v60 = vsel %vm1205_vm6, %v4552_v13, %v4554_v37  ;;  %v17458_v63 = vld [vmem:[#allocation2 + $0x118] sm:$0xff] }
 0x17a   : > { %5773 = vst.msk [vmem:[#allocation4 + $0x20] sm:$0xf] %vm1447_vm8, %v14183_v44  ;;  %22085 = vst [vmem:[#allocation34_spill] sm:$0xff] %v17442_v40  ;;  %v4556_v44 = vrot.slane %v17410_v31, 7  ;;  %v17460_v40 = vld [vmem:[#allocation2 + $0x120] sm:$0xff] }
 0x17b   : > { %2381 = vrot.lane.b32.xlu1 %v22078_v49, %s15974_s20  ;;  %v17418_v59 = vpop.permute.xlu1 %2723  ;;  %v2368_v49 = vpop.permute.xlu0 %2367  ;;  %2282 = vst.msk [vmem:[#allocation4 + $0xb8] sm:$0xf] %vm1447_vm8, %v17429_v7  ;;  %22087 = vst [vmem:[#allocation67_spill] sm:$0xff] %v17456_v60  ;;  %v17539_v60 = vld [vmem:[#allocation2 + $0x138] sm:$0xff] }
 0x17c   : > { %2094 = vrot.lane.b32.xlu0 %v17046_v14, %s15976_s24  ;;  %v13883_v14 = vpack.c.bf16 %v17431_v27, %v17431_v27  ;;  %2437 = vst.msk [vmem:[#allocation4 + $0x1c] sm:$0xf] %vm1616_vm7, %v2368_v49  ;;  %v17453_v49 = vsel %vm1205_vm6, %v4554_v37, %v4556_v44  ;;  %22088 = vst [vmem:[#allocation68_spill] sm:$0xff] %v17458_v63  ;;  %v4634_v37 = vrot.slane %v17460_v40, 1 }
 0x17d   : > { %22086 = vst [vmem:[#allocation66_spill] sm:$0xff] %v17453_v49  ;;  %22089 = vst [vmem:[#allocation69_spill] sm:$0xff] %v17460_v40 }
 0x17e   : > { %2281 = vst.msk [vmem:[#allocation4 + $0xac] sm:$0xf] %vm1447_vm8, %v13883_v14  ;;  %v17464_v14 = vpack.c.bf16 %v17070_v12, %v17070_v12  ;;  %v4632_v12 = vrot.slane %v17458_v63, 1  ;;  %22099 = vst [vmem:[#allocation77_spill] sm:$0xff] %v17539_v60 }
 0x17f   : > { %1574 = vrot.lane.b32.xlu1 %v17332_v29, %s15974_s20  ;;  %v1563_v23 = vpop.permute.xlu1 %1562 }
 0x180   : > { %2735 = vrot.lane.b32.xlu0 %v17196_v56, %s15975_s13  ;;  %1626 = vst.msk [vmem:[#allocation4 + $0x6c] sm:$0xf] %vm1616_vm7, %v1563_v23  ;;  %v17468_v56 = vpack.c.bf16 %v17031_v58, %v17031_v58  ;;  %v17484_v58 = vpack.c.bf16 %v17039_v55, %v17039_v55  ;;  %v17492_v23 = vsel %vm1278_vm4, %v4632_v12, %v4634_v37  ;;  %v4560_v55 = vrot.slane %v17458_v63, 7 }
 0x181   : > { %v17474_v13 = vpop.permute.xlu0 %2897  ;;  %2284 = vst.msk [vmem:[#allocation4 + $0xd0] sm:$0xf] %vm1447_vm8, %v17464_v14  ;;  %22091 = vst [vmem:[#allocation71_spill] sm:$0xff] %v17492_v23  ;;  %v17495_v18 = vsel %vm1278_vm4, %v5272_v26, %v4632_v12  ;;  %v17509_v23 = vld [vmem:[#allocation2 + $0x128] sm:$0xff]  ;;  %v4509_v26 = vld [vmem:[#allocation2 + $0x130] sm:$0xff] }
 0x182   : > { %2283 = vst.msk [vmem:[#allocation4 + $0xc4] sm:$0xf] %vm1447_vm8, %v17468_v56  ;;  %22092 = vst [vmem:[#allocation72_spill] sm:$0xff] %v17495_v18  ;;  %v17513_v18 = vpack.c.bf16 %v17102_v0, %v17102_v0  ;;  %v4636_v0 = vrot.slane %v17509_v23, 1 }
 0x183   : > { %2909 = vrot.lane.b32.xlu1 %v17332_v29, %s15976_s24  ;;  %v13887_v29 = vpack.c.bf16 %v17186_v6, %v17186_v6  ;;  %2286 = vst.msk [vmem:[#allocation4 + $0xe8] sm:$0xf] %vm1447_vm8, %v17484_v58  ;;  %22094 = vst [vmem:[#allocation74_spill] sm:$0xff] %v17509_v23 }
 0x184   : > { %2379 = vrot.lane.b32.xlu0 %v16633_v57, %s15974_s20  ;;  %v17489_v57 = vrot.slane %v17364_v32, 7  ;;  %2287 = vst.msk [vmem:[#allocation4 + $0xf4] sm:$0xf] %vm1447_vm8, %v17513_v18 }
 0x185   : > { %2285 = vst.msk [vmem:[#allocation4 + $0xdc] sm:$0xf] %vm1447_vm8, %v13887_v29 }
 0x186   : > { %22090 = vst [vmem:[#allocation70_spill] sm:$0xff] %v17489_v57  ;;  %v17507_v49 = vsel %vm1205_vm6, %v4556_v44, %v17489_v57  ;;  %v17518_v32 = vsel %vm1205_vm6, %v17489_v57, %v4560_v55  ;;  %v22096_v44 = vld [vmem:[#allocation37_spill] sm:$0xff] }
 0x187   : > { %2741 = vrot.lane.b32.xlu1 %v17248_v48, %s15975_s13  ;;  %22093 = vst [vmem:[#allocation73_spill] sm:$0xff] %v17507_v49  ;;  %22095 = vst [vmem:[#allocation75_spill] sm:$0xff] %v17518_v32  ;;  %v4638_v49 = vrot.slane %v4509_v26, 1 }
 0x188   : > { %1580 = vrot.lane.b32.xlu0 %v17429_v7, %s15974_s20  ;;  %v1720_v12 = vpop.permute.xlu1 %1719  ;;  %v1722_v29 = vpop.permute.xlu0 %1721 }
 0x189   : > { %1789 = vst.msk [vmem:[#allocation4 + $0x24] sm:$0xf] %vm1785_vm9, %v1720_v12  ;;  %1790 = vst.msk [vmem:[#allocation4 + $0x30] sm:$0xf] %vm1785_vm9, %v1722_v29  ;;  %v4562_v12 = vrot.slane %v17460_v40, 7  ;;  %v17532_v32 = vsel %vm1278_vm4, %v4636_v0, %v4638_v49  ;;  %v4564_v29 = vrot.slane %v17509_v23, 7 }
 0x18a   : > { %2150 = vst.msk [vmem:[#allocation4 + $0x24] sm:$0xf] %vm2146_vm10, %v17397_v22  ;;  %22097 = vst [vmem:[#allocation37_spill] sm:$0xff] %v17532_v32  ;;  %v17535_v22 = vsel %vm1278_vm4, %v4634_v37, %v4636_v0 }
 0x18b   : > { %2385 = vrot.lane.b32.xlu1 %v22096_v44, %s15974_s20  ;;  %22098 = vst [vmem:[#allocation76_spill] sm:$0xff] %v17535_v22  ;;  %v17545_v40 = vsel %vm1205_vm6, %v4562_v12, %v4564_v29  ;;  %v17548_v32 = vsel %vm1205_vm6, %v4560_v55, %v4562_v12  ;;  %v4566_v12 = vrot.slane %v4509_v26, 7 }
 0x18c   : > { %1741 = vrot.lane.b32.xlu0 %v22096_v44, %s15975_s13  ;;  %v2077_v57 = vpop.permute.xlu1 %2076  ;;  %v2079_v34 = vpop.permute.xlu0 %2078  ;;  %v22100_v44 = vld [vmem:[#allocation40_spill] sm:$0xff]  ;;  %22102 = vst [vmem:[#allocation78_spill] sm:$0xff] %v17548_v32 }
 0x18d   : > { %2148 = vst.msk [vmem:[#allocation4 + $0xc] sm:$0xf] %vm2146_vm10, %v2077_v57  ;;  %2149 = vst.msk [vmem:[#allocation4 + $0x18] sm:$0xf] %vm2146_vm10, %v2079_v34  ;;  %v17553_v57 = vrot.slane %v17539_v60, 1  ;;  %v15800_v34 = vld [vmem:[#allocation2 + $0x88] sm:$0xff] }
 0x18e   : > { %22101 = vst [vmem:[#allocation40_spill] sm:$0xff] %v17545_v40  ;;  %v13813_v22 = vpack.c.bf16 %v15800_v34, %v15800_v34  ;;  %v17573_v34 = vld [vmem:[#allocation2 + $0x148] sm:$0xff]  ;;  %v4511_v40 = vld [vmem:[#allocation2 + $0x140] sm:$0xff] }
 0x18f   : > { %1747 = vrot.lane.b32.xlu1 %v22100_v44, %s15975_s13  ;;  %v17561_v55 = vsel %vm1278_vm4, %v4638_v49, %v17553_v57  ;;  %22106 = vst [vmem:[#allocation82_spill] sm:$0xff] %v17573_v34  ;;  %v4513_v49 = vld [vmem:[#allocation2 + $0x150] sm:$0xff] }
 0x190   : > { %2098 = vrot.lane.b32.xlu0 %v17248_v48, %s15976_s24  ;;  %v2366_v37 = vpop.permute.xlu1 %2365  ;;  %v2364_v0 = vpop.permute.xlu0 %2363  ;;  %22103 = vst [vmem:[#allocation79_spill] sm:$0xff] %v17561_v55  ;;  %v17564_v48 = vrot.slane %v17539_v60, 7  ;;  %v4646_v32 = vrot.slane %v4513_v49, 1 }
 0x191   : > { %2436 = vst.msk [vmem:[#allocation4 + $0x10] sm:$0xf] %vm1616_vm7, %v2366_v37  ;;  %2435 = vst.msk [vmem:[#allocation4 + $0x4] sm:$0xf] %vm1616_vm7, %v2364_v0  ;;  %v15801_v37 = vld [vmem:[#allocation2 + $0xb0] sm:$0xff] }
 0x192   : > { %22104 = vst [vmem:[#allocation80_spill] sm:$0xff] %v17564_v48  ;;  %2795 = vst.msk [vmem:[#allocation4 + $0x4] sm:$0xf] %vm1785_vm9, %v17418_v59  ;;  %v17571_v0 = vpack.c.bf16 %v15801_v37, %v15801_v37  ;;  %v17577_v26 = vsel %vm1205_vm6, %v4566_v12, %v17564_v48  ;;  %v1883_v59 = vrot.slane %v17304_v17, 7  ;;  %v21972_v37 = vrot.slane %v17573_v34, 1 }
 0x193   : > { %2104 = vrot.lane.b32.xlu1 %v17009_v4, %s15976_s24  ;;  %2963 = vst.msk [vmem:[#allocation4 + $0x4] sm:$0xf] %vm2146_vm10, %v17314_v33  ;;  %22107 = vst [vmem:[#allocation83_spill] sm:$0xff] %v17577_v26  ;;  %v17584_v33 = vsel %vm1205_vm6, %v4564_v29, %v4566_v12  ;;  %v4570_v26 = vrot.slane %v4511_v40, 7  ;;  %v17604_v40 = vld [vmem:[#allocation2 + $0x158] sm:$0xff]  ;;  %v3866_v12 = vld [vmem:[#allocation2 + $0x140] sm:$0xff] }
 0x194   : > { %1576 = vrot.lane.b32.xlu0 %v13813_v22, %s15974_s20  ;;  %v1559_v44 = vpop.permute.xlu1 %1558  ;;  %22105 = vst [vmem:[#allocation81_spill] sm:$0xff] %v17571_v0  ;;  %v17580_v55 = vpop.permute.xlu0 %2893  ;;  %22108 = vst [vmem:[#allocation84_spill] sm:$0xff] %v17584_v33  ;;  %v1884_v63 = vsel %vm1205_vm6, %v17015_v36, %v1883_v59  ;;  %v17597_v29 = vsel %vm1278_vm4, %v21972_v37, %v4646_v32  ;;  %v1955_v33 = vrot.slane %v17304_v17, 1 }
 0x195   : > { %1624 = vst.msk [vmem:[#allocation4 + $0x54] sm:$0xf] %vm1616_vm7, %v1559_v44  ;;  %v4572_v44 = vrot.slane %v17573_v34, 7  ;;  %22109 = vst [vmem:[#allocation85_spill] sm:$0xff] %v17597_v29  ;;  %v17611_v36 = vsel %vm1205_vm6, %v17564_v48, %v4570_v26  ;;  %v13858_v29 = vpack.c.bf16 %v1884_v63, %v1884_v63  ;;  %v3867_v34 = vld [vmem:[#allocation2 + $0x148] sm:$0xff]  ;;  %v21976_v63 = vrot.slane %v17431_v27, 1 }
 0x196   : > { %22112 = vst [vmem:[#allocation86_spill] sm:$0xff] %v17611_v36  ;;  %v22113_v36 = vld [vmem:[#allocation39_spill] sm:$0xff]  ;;  %v4002_v11 = vrot.slane %v3867_v34, 1 }
 0x197   : > { %1586 = vrot.lane.b32.xlu1 %v17571_v0, %s15974_s20 }
 0x198   : > { %2911 = vrot.lane.b32.xlu0 %v13813_v22, %s15976_s24  ;;  %v2370_v60 = vpop.permute.xlu1 %2369  ;;  %v1565_v23 = vpop.permute.xlu0 %1564  ;;  %v22110_v22 = vld [vmem:[#allocation38_spill] sm:$0xff] }
 0x199   : > { %2438 = vst.msk [vmem:[#allocation4 + $0x28] sm:$0xf] %vm1616_vm7, %v2370_v60  ;;  %1627 = vst.msk [vmem:[#allocation4 + $0x78] sm:$0xf] %vm1616_vm7, %v1565_v23  ;;  %v17607_v60 = vsel %vm1205_vm6, %v4570_v26, %v4572_v44  ;;  %v17615_v23 = vld [vmem:[#allocation2 + $0x160] sm:$0xff]  ;;  %v4648_v26 = vrot.slane %v17604_v40, 1 }
 0x19a   : > { %22111 = vst [vmem:[#allocation38_spill] sm:$0xff] %v17607_v60  ;;  %v4000_v60 = vrot.slane %v3866_v12, 1  ;;  %v4650_v48 = vrot.slane %v17615_v23, 1  ;;  %v3868_v12 = vld [vmem:[#allocation2 + $0x150] sm:$0xff] }
 0x19b   : > { %1743 = vrot.lane.b32.xlu1 %v22110_v22, %s15975_s13  ;;  %v17629_v20 = vsel %vm1278_vm4, %v4646_v32, %v4648_v26  ;;  %v4576_v32 = vrot.slane %v17604_v40, 7 }
 0x19c   : > { %2747 = vrot.lane.b32.xlu0 %v17009_v4, %s15975_s13  ;;  %v17613_v37 = vpop.permute.xlu1 %2895  ;;  %v17617_v22 = vpop.permute.xlu0 %2899  ;;  %v1886_v4 = vsel %vm1205_vm6, %v1883_v59, %v16994_v43  ;;  %v17633_v43 = vsel %vm1278_vm4, %v17553_v57, %v4000_v60  ;;  %v1958_v59 = vsel %vm1278_vm4, %v1955_v33, %v21976_v63  ;;  %v17643_v34 = vsel %vm1278_vm4, %v4000_v60, %v4002_v11  ;;  %v17653_v63 = vld [vmem:[#allocation2 + $0x168] sm:$0xff]  ;;  %v17655_v60 = vld [vmem:[#allocation2 + $0x170] sm:$0xff] }
 0x19d   : > { %v13859_v30 = vpack.c.bf16 %v1886_v4, %v1886_v4  ;;  %22114 = vst [vmem:[#allocation39_spill] sm:$0xff] %v17633_v43  ;;  %22115 = vst [vmem:[#allocation87_spill] sm:$0xff] %v17643_v34  ;;  %v3869_v43 = vld [vmem:[#allocation2 + $0x158] sm:$0xff]  ;;  %v4652_v40 = vrot.slane %v17653_v63, 1 }
 0x19e   : > { %v4006_v34 = vrot.slane %v3869_v43, 1 }
 0x19f   : > { %2100 = vrot.lane.b32.xlu1 %v13858_v29, %s15976_s24  ;;  %v17640_v29 = vsel %vm1278_vm4, %v4648_v26, %v4650_v48  ;;  %v13906_v26 = vpack.c.bf16 %v1958_v59, %v1958_v59  ;;  %v4654_v59 = vrot.slane %v17655_v60, 1 }
 0x1a0   : > { %1745 = vrot.lane.b32.xlu0 %v22113_v36, %s15975_s13  ;;  %v1732_v0 = vpop.permute.xlu1 %1731  ;;  %v4574_v36 = vrot.slane %v4513_v49, 7 }
 0x1a1   : > { %1795 = vst.msk [vmem:[#allocation4 + $0x6c] sm:$0xf] %vm1785_vm9, %v1732_v0  ;;  %v1726_v17 = vpop.permute.xlu0 %1725 }
 0x1a2   : > { %1792 = vst.msk [vmem:[#allocation4 + $0x48] sm:$0xf] %vm1785_vm9, %v1726_v17  ;;  %v17651_v0 = vsel %vm1205_vm6, %v4572_v44, %v4574_v36  ;;  %v17658_v17 = vsel %vm1205_vm6, %v4574_v36, %v4576_v32  ;;  %v4004_v44 = vrot.slane %v3868_v12, 1  ;;  %v3870_v12 = vld [vmem:[#allocation2 + $0x160] sm:$0xff] }
 0x1a3   : > { %2745 = vrot.lane.b32.xlu1 %v17042_v5, %s15975_s13  ;;  %22116 = vst [vmem:[#allocation88_spill] sm:$0xff] %v17651_v0  ;;  %22117 = vst [vmem:[#allocation89_spill] sm:$0xff] %v17658_v17  ;;  %v22118_v5 = vld [vmem:[#allocation35_spill] sm:$0xff]  ;;  %v17673_v17 = vsel %vm1278_vm4, %v4652_v40, %v4654_v59 }
 0x1a4   : > { %2102 = vrot.lane.b32.xlu0 %v13859_v30, %s15976_s24  ;;  %v1956_v30 = vsel %vm1278_vm4, %v22118_v5, %v1955_v33  ;;  %v17669_v36 = vsel %vm1278_vm4, %v4002_v11, %v4004_v44  ;;  %v17676_v33 = vsel %vm1278_vm4, %v4650_v48, %v4652_v40  ;;  %v4578_v11 = vrot.slane %v17615_v23, 7  ;;  %v17703_v40 = vld [vmem:[#allocation2 + $0x168] sm:$0xff] }
 0x1a5   : > { %v2089_v4 = vpop.permute.xlu1 %2088  ;;  %v2083_v49 = vpop.permute.xlu0 %2082  ;;  %v13930_v48 = vpack.c.bf16 %v17078_v50, %v17078_v50 }
 0x1a6   : > { %2151 = vst.msk [vmem:[#allocation4 + $0x30] sm:$0xf] %vm2146_vm10, %v2083_v49  ;;  %v17701_v23 = vsel %vm1205_vm6, %v4576_v32, %v4578_v11 }
 0x1a7   : > { %2389 = vrot.lane.b32.xlu1 %v13906_v26, %s15974_s20  ;;  %v13905_v26 = vpack.c.bf16 %v1956_v30, %v1956_v30  ;;  %v3970_v30 = vsel %vm1205_vm6, 0.0, %v17171_v38  ;;  %22119 = vst [vmem:[#allocation35_spill] sm:$0xff] %v17701_v23  ;;  %v13842_v38 = vpack.c.bf16 %v17083_v47, %v17083_v47 }
 0x1a8   : > { %2743 = vrot.lane.b32.xlu0 %v17044_v9, %s15975_s13  ;;  %v17682_v9 = vsel %vm1278_vm4, %v4004_v44, %v4006_v34  ;;  %v17696_v44 = vld [vmem:[#allocation2 + $0x178] sm:$0xff] }
 0x1a9   : > { %v1571_v0 = vpop.permute.xlu1 %1570  ;;  %v2726_v49 = vpop.permute.xlu0 %2725 }
 0x1aa   : > { %1630 = vst.msk [vmem:[#allocation4 + $0x9c] sm:$0xf] %vm1616_vm7, %v1571_v0  ;;  %v4580_v0 = vrot.slane %v17653_v63, 7  ;;  %v13839_v63 = vpack.c.bf16 %v17068_v28, %v17068_v28  ;;  %v17728_v28 = vpack.c.bf16 %v17312_v3, %v17312_v3 }
 0x1ab   : > { %2796 = vst.msk [vmem:[#allocation4 + $0x10] sm:$0xf] %vm1785_vm9, %v2726_v49  ;;  %1582 = vrot.lane.b32.xlu1 %v17468_v56, %s15974_s20  ;;  %v21977_v56 = vrot.slane %v17186_v6, 7  ;;  %v4008_v49 = vrot.slane %v3870_v12, 1  ;;  %v17736_v12 = vpack.c.bf16 %v17194_v51, %v17194_v51  ;;  %v4582_v51 = vrot.slane %v17655_v60, 7 }
 0x1ac   : > { %2964 = vst.msk [vmem:[#allocation4 + $0x10] sm:$0xf] %vm2146_vm10, %v17580_v55  ;;  %2387 = vrot.lane.b32.xlu0 %v13905_v26, %s15974_s20  ;;  %v17698_v55 = vld [vmem:[#allocation2 + $0x180] sm:$0xff]  ;;  %v17708_v50 = vsel %vm1205_vm6, %v4578_v11, %v4580_v0  ;;  %v4656_v11 = vrot.slane %v17696_v44, 1 }
 0x1ad   : > { %v17688_v43 = vpop.permute.xlu1 %2905  ;;  %v1561_v5 = vpop.permute.xlu0 %1560  ;;  %v1896_v32 = vsel %vm1205_vm6, %v21977_v56, %v17151_v35  ;;  %v17732_v35 = vpack.c.bf16 %v17299_v2, %v17299_v2  ;;  %v17763_v60 = vsel %vm1205_vm6, %v4580_v0, %v4582_v51 }
 0x1ae   : > { %1625 = vst.msk [vmem:[#allocation4 + $0x60] sm:$0xf] %vm1616_vm7, %v1561_v5  ;;  %v4658_v5 = vrot.slane %v17698_v55, 1  ;;  %v17747_v2 = vsel %vm1278_vm4, %v4654_v59, %v4656_v11  ;;  %v13864_v59 = vpack.c.bf16 %v1896_v32, %v1896_v32 }
 0x1af   : > { %2749 = vrot.lane.b32.xlu1 %v13930_v48, %s15975_s13  ;;  %v13989_v48 = vpack.c.bf16 %v3970_v30, %v3970_v30  ;;  %v17739_v30 = vsel %vm1278_vm4, %v4006_v34, %v4008_v49 }
 0x1b0   : > { %1588 = vrot.lane.b32.xlu0 %v17484_v58, %s15974_s20  ;;  %v4010_v58 = vrot.slane %v17703_v40, 1  ;;  %v3107_v40 = vld [vmem:[#allocation4] sm:$0xff]  ;;  %v17744_v3 = vsel %vm1278_vm4, %v4656_v11, %v4658_v5 }
 0x1b1   : > { %v1728_v26 = vpop.permute.xlu1 %1727  ;;  %v17724_v47 = vpop.permute.xlu0 %2731  ;;  %4139 = vst.msk [vmem:[#allocation4] sm:$0xf] %vm1447_vm8, %v13989_v48  ;;  %v3872_v48 = vld [vmem:[#allocation2 + $0x170] sm:$0xff] }
 0x1b2   : > { %1793 = vst.msk [vmem:[#allocation4 + $0x54] sm:$0xf] %vm1785_vm9, %v1728_v26  ;;  %v17750_v23 = vsel %vm1278_vm4, %v4008_v49, %v4010_v58  ;;  %v4520_v49 = vld [vmem:[#allocation2 + $0x188] sm:$0xff]  ;;  %v4521_v11 = vld [vmem:[#allocation2 + $0x190] sm:$0xff]  ;;  %v4012_v32 = vrot.slane %v3872_v48, 1 }
 0x1b3   : > { %2154 = vst.msk [vmem:[#allocation4 + $0x54] sm:$0xf] %vm2146_vm10, %v2089_v4  ;;  %1755 = vrot.lane.b32.xlu1 %v13842_v38, %s15975_s13  ;;  %v3109_v26 = vld [vmem:[#allocation4 + $0xc] sm:$0xff]  ;;  %v4584_v38 = vrot.slane %v17696_v44, 7  ;;  %v17775_v44 = vpack.c.bf16 %v17109_v42, %v17109_v42 }
 0x1b4   : > { %v15538_v56 = vld [vmem:[#allocation4 + $0x4] ss:$12 sps:$4 sm:$0xff]   ;;  %1749 = vrot.lane.b32.xlu0 %v13839_v63, %s15975_s13  ;;  %v12771_v34 = vcombine.low %v3107_v40, %v3109_v26  ;;  %4140 = vst.msk [vmem:[#allocation4 + $0xc] sm:$0xf] %vm1447_vm8, %v17736_v12  ;;  %v4660_v26 = vrot.slane %v4520_v49, 1  ;;  %v17787_v42 = vsel %vm1278_vm4, %v4010_v58, %v4012_v32  ;;  %v17801_v58 = vld [vmem:[#allocation2 + $0x198] sm:$0xff] }
 0x1b5   : > { %4956 = vst.msk [vmem:[#allocation4 + $0x10] sm:$0xf] %vm1447_vm8, %v17732_v35  ;;  %4955 = vst.msk [vmem:[#allocation4 + $0x4] sm:$0xf] %vm1447_vm8, %v17728_v28  ;;  %v2085_v4 = vpop.permute.xlu1 %2084  ;;  %3553 = vmatprep.mubr.bf16.mxu0 %v15538_v56  ;;  %v17769_v40 = vsel %vm1205_vm6, %v4582_v51, %v4584_v38  ;;  %v3873_v56 = vld [vmem:[#allocation2 + $0x178] sm:$0xff]  ;;  %v4586_v51 = vrot.slane %v17698_v55, 7 }
 0x1b6   : > { %2152 = vst.msk [vmem:[#allocation4 + $0x3c] sm:$0xf] %vm2146_vm10, %v2085_v4  ;;  %v2376_v63 = vpop.permute.xlu0 %2375  ;;  %3554 = vmatmul.mubr.bf16.vlgmr.msra.gmra.mxu0 %v12771_v34  ;;  %v4662_v4 = vrot.slane %v4521_v11, 1  ;;  %22120 = vst [vmem:[#allocation90_spill] sm:$0xff] %v17801_v58 }
 0x1b7   : > { %2441 = vst.msk [vmem:[#allocation4 + $0x4c] sm:$0xf] %vm1616_vm7, %v2376_v63  ;;  %2112 = vrot.lane.b32.xlu1 %v13864_v59, %s15976_s24  ;;  %v4014_v59 = vrot.slane %v3873_v56, 1  ;;  %v17804_v55 = vsel %vm1205_vm6, %v4584_v38, %v4586_v51  ;;  %v21979_v38 = vrot.slane %v17801_v58, 1 }
 0x1b8   : > { %2106 = vrot.lane.b32.xlu0 %v17105_v10, %s15976_s24  ;;  %v17784_v10 = vsel %vm1278_vm4, %v4658_v5, %v4660_v26  ;;  %v17793_v63 = vsel %vm1278_vm4, %v4660_v26, %v4662_v4  ;;  %v13841_v5 = vpack.c.bf16 %v17123_v61, %v17123_v61  ;;  %22121 = vst [vmem:[#allocation91_spill] sm:$0xff] %v17804_v55  ;;  %v17813_v26 = vld [vmem:[#allocation2 + $0x180] sm:$0xff] }
 0x1b9   : > { %v2728_v0 = vpop.permute.xlu1 %2727  ;;  %22123 = vst [vmem:[#allocation92_spill] sm:$0xff] %v17813_v26 }
 0x1ba   : > { %2797 = vst.msk [vmem:[#allocation4 + $0x1c] sm:$0xf] %vm1785_vm9, %v2728_v0  ;;  %v1730_v34 = vpop.permute.xlu0 %1729  ;;  %v4588_v0 = vrot.slane %v4520_v49, 7 }
 0x1bb   : > { %2965 = vst.msk [vmem:[#allocation4 + $0x1c] sm:$0xf] %vm2146_vm10, %v17613_v37  ;;  %1751 = vrot.lane.b32.xlu1 %v17775_v44, %s15975_s13  ;;  %v17796_v37 = vsel %vm1278_vm4, %v4012_v32, %v4014_v59 }
 0x1bc   : > { %1794 = vst.msk [vmem:[#allocation4 + $0x60] sm:$0xf] %vm1785_vm9, %v1730_v34  ;;  %1584 = vrot.lane.b32.xlu0 %v17464_v14, %s15974_s20  ;;  %v22122_v14 = vrot.slane %v17186_v6, 7  ;;  %v17817_v61 = vsel %vm1205_vm6, %v4586_v51, %v4588_v0  ;;  %v21978_v6 = vrot.slane %v17813_v26, 1  ;;  %v17831_v51 = vsel %vm1278_vm4, %v4662_v4, %v21979_v38  ;;  %v15830_v38 = vld [vmem:[#allocation2 + $0x168] sm:$0xff] }
 0x1bd   : > { %v2374_v48 = vpop.permute.xlu1 %2373  ;;  %22124 = vst [vmem:[#allocation93_spill] sm:$0xff] %v17831_v51 }
 0x1be   : > { %2440 = vst.msk [vmem:[#allocation4 + $0x40] sm:$0xf] %vm1616_vm7, %v2374_v48  ;;  %v2087_v56 = vpop.permute.xlu0 %2086  ;;  %v1894_v32 = vsel %vm1205_vm6, %v17096_v8, %v22122_v14  ;;  %v4592_v8 = vrot.slane %v17801_v58, 7 }
 0x1bf   : > { %2153 = vst.msk [vmem:[#allocation4 + $0x48] sm:$0xf] %vm2146_vm10, %v2087_v56  ;;  %2108 = vrot.lane.b32.xlu1 %v17119_v52, %s15976_s24  ;;  %v13863_v48 = vpack.c.bf16 %v1894_v32, %v1894_v32  ;;  %v1350_v52 = vsel %vm1278_vm4, %v17131_v45, 0.0  ;;  %v4590_v56 = vrot.slane %v4521_v11, 7  ;;  %v17839_v45 = vsel %vm1278_vm4, %v4014_v59, %v21978_v6 }
 0x1c0   : > { %1753 = vrot.lane.b32.xlu0 %v13841_v5, %s15975_s13  ;;  %22125 = vst [vmem:[#allocation94_spill] sm:$0xff] %v17839_v45  ;;  %v13844_v5 = vpack.c.bf16 %v1350_v52, %v1350_v52  ;;  %v13868_v59 = vpack.c.bf16 %v17164_v24, %v17164_v24  ;;  %v13866_v24 = vpack.c.bf16 %v17190_v62, %v17190_v62  ;;  %v15802_v62 = vld [vmem:[#allocation2 + $0xa0] sm:$0xff] }
 0x1c1   : > { %v1567_v49 = vpop.permute.xlu1 %1566  ;;  %v17844_v14 = vsel %vm1205_vm6, %v4590_v56, %v4592_v8  ;;  %v17847_v11 = vsel %vm1205_vm6, %v4588_v0, %v4590_v56  ;;  %v1959_v8 = vrot.slane %v17425_v19, 1  ;;  %v17893_v56 = vpack.c.bf16 %v17410_v31, %v17410_v31  ;;  %v15831_v45 = vld [vmem:[#allocation2 + $0x160] sm:$0xff] }
 0x1c2   : > { %1628 = vst.msk [vmem:[#allocation4 + $0x84] sm:$0xf] %vm1616_vm7, %v1567_v49  ;;  %v2372_v34 = vpop.permute.xlu0 %2371  ;;  %22126 = vst [vmem:[#allocation95_spill] sm:$0xff] %v17844_v14  ;;  %v17875_v49 = vpack.c.bf16 %v17357_v39, %v17357_v39  ;;  %v13954_v39 = vpack.c.bf16 %v15802_v62, %v15802_v62  ;;  %v17897_v19 = vpack.c.bf16 %v17408_v16, %v17408_v16  ;;  %v22129_v16 = vrot.slane %v17431_v27, 1 }
 0x1c3   : > { %2439 = vst.msk [vmem:[#allocation4 + $0x34] sm:$0xf] %vm1616_vm7, %v2372_v34  ;;  %1590 = vrot.lane.b32.xlu1 %v17513_v18, %s15974_s20  ;;  %22127 = vst [vmem:[#allocation96_spill] sm:$0xff] %v17847_v11  ;;  %v1962_v31 = vsel %vm1278_vm4, %v1959_v8, %v17052_v15  ;;  %v14102_v11 = vpack.c.bf16 %v15830_v38, %v15830_v38 }
 0x1c4   : > { %2799 = vst.msk [vmem:[#allocation4 + $0x34] sm:$0xf] %vm1785_vm9, %v17724_v47  ;;  %2110 = vrot.lane.b32.xlu0 %v13863_v48, %s15976_s24  ;;  %v17851_v47 = vpack.c.bf16 %v17156_v54, %v17156_v54  ;;  %v22128_v54 = vrot.slane %v17117_v21, 7  ;;  %v14087_v48 = vpack.c.bf16 %v17301_v25, %v17301_v25  ;;  %v13908_v27 = vpack.c.bf16 %v1962_v31, %v1962_v31 }
 0x1c5   : > { %2967 = vst.msk [vmem:[#allocation4 + $0x34] sm:$0xf] %vm2146_vm10, %v17617_v22  ;;  %v2902_v18 = vpop.permute.xlu1 %2901 }
 0x1c6   : > { %v2730_v4 = vpop.permute.xlu0 %2729  ;;  %v3905_v32 = vsel %vm1205_vm6, %v22128_v54, %v17354_v46  ;;  %4144 = vst.msk [vmem:[#allocation4 + $0x3c] sm:$0xf] %vm1447_vm8, %v17897_v19 }
 0x1c7   : > { %2798 = vst.msk [vmem:[#allocation4 + $0x28] sm:$0xf] %vm1785_vm9, %v2730_v4  ;;  %1759 = vrot.lane.b32.xlu1 %v13844_v5, %s15975_s13  ;;  %v13992_v21 = vpack.c.bf16 %v3905_v32, %v3905_v32 }
 0x1c8   : > { %2966 = vst.msk [vmem:[#allocation4 + $0x28] sm:$0xf] %vm2146_vm10, %v17474_v13  ;;  %1757 = vrot.lane.b32.xlu0 %v17851_v47, %s15975_s13 }
 0x1c9   : > { %v2734_v22 = vpop.permute.xlu1 %2733 }
 0x1ca   : > { %2800 = vst.msk [vmem:[#allocation4 + $0x40] sm:$0xf] %vm1785_vm9, %v2734_v22  ;;  %v1573_v0 = vpop.permute.xlu0 %1572 }
 0x1cb   : > { %2968 = vst.msk [vmem:[#allocation4 + $0x40] sm:$0xf] %vm2146_vm10, %v2902_v18  ;;  %2120 = vrot.lane.b32.xlu1 %v13868_v59, %s15976_s24  ;;  %v14089_v18 = vpack.c.bf16 %v17359_v53, %v17359_v53 }
 0x1cc   : > { %1631 = vst.msk [vmem:[#allocation4 + $0xa8] sm:$0xf] %vm1616_vm7, %v1573_v0  ;;  %2114 = vrot.lane.b32.xlu0 %v17175_v41, %s15976_s24  ;;  %v15542_v41 = vld [vmem:[#allocation4 + $0x18] ss:$12 sps:$4 sm:$0xff]  }
 0x1cd   : > { %v2378_v13 = vpop.permute.xlu1 %2377  ;;  %4142 = vst.msk [vmem:[#allocation4 + $0x24] sm:$0xf] %vm1447_vm8, %v13992_v21  ;;  %4141 = vst.msk [vmem:[#allocation4 + $0x18] sm:$0xf] %vm1447_vm8, %v13868_v59  ;;  %v22131_v21 = vld [vmem:[#allocation42_spill] sm:$0xff] }
 0x1ce   : > { %2442 = vst.msk [vmem:[#allocation4 + $0x58] sm:$0xf] %vm1616_vm7, %v2378_v13  ;;  %v17878_v34 = vpop.permute.xlu0 %2907  ;;  %v22130_v13 = vld [vmem:[#allocation41_spill] sm:$0xff] }
 0x1cf   : > { %2116 = vrot.lane.b32.xlu1 %v13866_v24, %s15976_s24  ;;  %v15540_v52 = vld [vmem:[#allocation4 + $0x1c] ss:$12 sps:$4 sm:$0xff]   ;;  %v13932_v24 = vpack.c.bf16 %v22130_v13, %v22130_v13 }
 0x1d0   : > { %2118 = vrot.lane.b32.xlu0 %v17736_v12, %s15976_s24  ;;  %4958 = vst.msk [vmem:[#allocation4 + $0x28] sm:$0xf] %vm1447_vm8, %v17875_v49  ;;  %4957 = vst.msk [vmem:[#allocation4 + $0x1c] sm:$0xf] %vm1447_vm8, %v14087_v48  ;;  %3561 = vmatprep.mubr.bf16.mxu0 %v15540_v52  ;;  %v17901_v12 = vpack.c.bf16 %v17371_v1, %v17371_v1  ;;  %v1960_v1 = vsel %vm1278_vm4, %v22129_v16, %v1959_v8  ;;  %v15803_v8 = vld [vmem:[#allocation2 + $0xa8] sm:$0xff]  ;;  %v22134_v16 = vld [vmem:[#allocation45_spill] sm:$0xff] }
 0x1d1   : > { %v1740_v25 = vpop.permute.xlu1 %1739  ;;  %3562 = vmatmul.mubr.bf16.gmra.mxu0 %v15542_v41  ;;  %v13907_v59 = vpack.c.bf16 %v1960_v1, %v1960_v1  ;;  %v13931_v48 = vpack.c.bf16 %v22131_v21, %v22131_v21  ;;  %v13955_v62 = vpack.c.bf16 %v15803_v8, %v15803_v8  ;;  %v13934_v1 = vpack.c.bf16 %v22134_v16, %v22134_v16  ;;  %v15807_v16 = vld [vmem:[#allocation2 + $0xc8] sm:$0xff] }
 0x1d2   : > { %1799 = vst.msk [vmem:[#allocation4 + $0x9c] sm:$0xf] %vm1785_vm9, %v1740_v25  ;;  %v1734_v5 = vpop.permute.xlu0 %1733  ;;  %v15543_v4 = vld [vmem:[#allocation4 + $0x34] ss:$12 sps:$4 sm:$0xff]  }
 0x1d3   : > { %1796 = vst.msk [vmem:[#allocation4 + $0x78] sm:$0xf] %vm1785_vm9, %v1734_v5  ;;  %2917 = vrot.lane.b32.xlu1 %v13954_v39, %s15976_s24  ;;  %3569 = vmatprep.mubr.bf16.mxu0 %v15543_v4  ;;  %v22132_v39 = vld [vmem:[#allocation81_spill] sm:$0xff] }
 0x1d4   : > { %4143 = vst.msk [vmem:[#allocation4 + $0x30] sm:$0xf] %vm1447_vm8, %v17901_v12  ;;  %4960 = vst.msk [vmem:[#allocation4 + $0x40] sm:$0xf] %vm1447_vm8, %v17893_v56  ;;  %2915 = vrot.lane.b32.xlu0 %v17429_v7, %s15976_s24 }
 0x1d5   : > { %4959 = vst.msk [vmem:[#allocation4 + $0x34] sm:$0xf] %vm1447_vm8, %v14089_v18  ;;  %v2097_v15 = vpop.permute.xlu1 %2096  ;;  %v22133_v18 = vld [vmem:[#allocation43_spill] sm:$0xff] }
 0x1d6   : > { %v2091_v22 = vpop.permute.xlu0 %2090  ;;  %v13910_v5 = vpack.c.bf16 %v22133_v18, %v22133_v18  ;;  %v15806_v18 = vld [vmem:[#allocation2 + $0xd0] sm:$0xff] }
 0x1d7   : > { %2155 = vst.msk [vmem:[#allocation4 + $0x60] sm:$0xf] %vm2146_vm10, %v2091_v22  ;;  %2393 = vrot.lane.b32.xlu1 %v13908_v27, %s15974_s20  ;;  %v22135_v27 = vld [vmem:[#allocation46_spill] sm:$0xff] }
 0x1d8   : > { %2391 = vrot.lane.b32.xlu0 %v13907_v59, %s15974_s20  ;;  %v13933_v22 = vpack.c.bf16 %v22135_v27, %v22135_v27  ;;  %v15804_v59 = vld [vmem:[#allocation2 + $0xc0] sm:$0xff] }
 0x1d9   : > { %v1579_v32 = vpop.permute.xlu1 %1578 }
 0x1da   : > { %1634 = vst.msk [vmem:[#allocation4 + $0xcc] sm:$0xf] %vm1616_vm7, %v1579_v32  ;;  %v1569_v7 = vpop.permute.xlu0 %1568 }
 0x1db   : > { %v3117_v53 = vld [vmem:[#allocation4 + $0x3c] sm:$0xff]  ;;  %1629 = vst.msk [vmem:[#allocation4 + $0x90] sm:$0xf] %vm1616_vm7, %v1569_v7  ;;  %2753 = vrot.lane.b32.xlu1 %v13932_v24, %s15975_s13 }
 0x1dc   : > { %v3115_v0 = vld [vmem:[#allocation4 + $0x30] sm:$0xff]  ;;  %2751 = vrot.lane.b32.xlu0 %v13931_v48, %s15975_s13  ;;  %v22136_v7 = vld [vmem:[#allocation44_spill] sm:$0xff] }
 0x1dd   : > { %v12777_v54 = vcombine.low %v3115_v0, %v3117_v53  ;;  %v17933_v52 = vpop.permute.xlu1 %2913  ;;  %v13958_v0 = vpack.c.bf16 %v15804_v59, %v15804_v59  ;;  %v13911_v21 = vpack.c.bf16 %v22136_v7, %v22136_v7  ;;  %v22137_v48 = vld [vmem:[#allocation48_spill] sm:$0xff] }
 0x1de   : > { %v2904_v41 = vpop.permute.xlu0 %2903  ;;  %v13936_v8 = vpack.c.bf16 %v22137_v48, %v22137_v48  ;;  %v22145_v48 = vld [vmem:[#allocation52_spill] sm:$0xff] }
 0x1df   : > { %3570 = vmatmul.mubr.bf16.gmra.mxu0 %v12777_v54  ;;  %2921 = vrot.lane.b32.xlu1 %v22132_v39, %s15976_s24  ;;  %v15805_v54 = vld [vmem:[#allocation2 + $0xb8] sm:$0xff]  ;;  %v22138_v39 = vld [vmem:[#allocation47_spill] sm:$0xff] }
 0x1e0   : > { %2919 = vrot.lane.b32.xlu0 %v13955_v62, %s15976_s24  ;;  %v13957_v32 = vpack.c.bf16 %v15805_v54, %v15805_v54 }
 0x1e1   : > { %v1736_v25 = vpop.permute.xlu1 %1735 }
 0x1e2   : > { %1797 = vst.msk [vmem:[#allocation4 + $0x84] sm:$0xf] %vm1785_vm9, %v1736_v25  ;;  %v2740_v4 = vpop.permute.xlu0 %2739  ;;  %v13935_v25 = vpack.c.bf16 %v22138_v39, %v22138_v39  ;;  %v22146_v39 = vld [vmem:[#allocation51_spill] sm:$0xff] }
 0x1e3   : > { %2158 = vst.msk [vmem:[#allocation4 + $0x84] sm:$0xf] %vm2146_vm10, %v2097_v15  ;;  %2397 = vrot.lane.b32.xlu1 %v13910_v5, %s15974_s20  ;;  %v13960_v5 = vpack.c.bf16 %v15806_v18, %v15806_v18 }
 0x1e4   : > { %2395 = vrot.lane.b32.xlu0 %v17775_v44, %s15974_s20 }
 0x1e5   : > { %v2093_v31 = vpop.permute.xlu1 %2092 }
 0x1e6   : > { %2156 = vst.msk [vmem:[#allocation4 + $0x6c] sm:$0xf] %vm2146_vm10, %v2093_v31  ;;  %v2384_v53 = vpop.permute.xlu0 %2383 }
 0x1e7   : > { %2445 = vst.msk [vmem:[#allocation4 + $0x7c] sm:$0xf] %vm1616_vm7, %v2384_v53  ;;  %2757 = vrot.lane.b32.xlu1 %v13934_v1, %s15975_s13  ;;  %v13959_v1 = vpack.c.bf16 %v15807_v16, %v15807_v16  ;;  %v22139_v53 = vld [vmem:[#allocation49_spill] sm:$0xff] }
 0x1e8   : > { %2755 = vrot.lane.b32.xlu0 %v13933_v22, %s15975_s13  ;;  %v17983_v27 = vpack.c.bf16 %v22139_v53, %v22139_v53  ;;  %v22140_v22 = vld [vmem:[#allocation50_spill] sm:$0xff]  ;;  %v22149_v53 = vld [vmem:[#allocation73_spill] sm:$0xff] }
 0x1e9   : > { %v2738_v15 = vpop.permute.xlu1 %2737 }
 0x1ea   : > { %2802 = vst.msk [vmem:[#allocation4 + $0x58] sm:$0xf] %vm1785_vm9, %v2738_v15  ;;  %v1738_v44 = vpop.permute.xlu0 %1737  ;;  %v13913_v15 = vpack.c.bf16 %v22140_v22, %v22140_v22  ;;  %v18032_v22 = vpack.c.bf16 %v22149_v53, %v22149_v53  ;;  %v15554_v53 = vld [vmem:[%s21892_s4 + $0x78] sm:$0xff]  }
 0x1eb   : > { %2970 = vst.msk [vmem:[#allocation4 + $0x58] sm:$0xf] %vm2146_vm10, %v17688_v43  ;;  %2925 = vrot.lane.b32.xlu1 %v13958_v0, %s15976_s24  ;;  %v22141_v0 = vld [vmem:[#allocation68_spill] sm:$0xff]  ;;  %14768 = vmatprep.subr.bf16.mxu1 %v15554_v53  ;;  %v22156_v53 = vld [vmem:[#allocation58_spill] sm:$0xff] }
 0x1ec   : > { %1798 = vst.msk [vmem:[#allocation4 + $0x90] sm:$0xf] %vm1785_vm9, %v1738_v44  ;;  %2923 = vrot.lane.b32.xlu0 %v13957_v32, %s15976_s24  ;;  %v17990_v44 = vpack.c.bf16 %v22141_v0, %v22141_v0 }
 0x1ed   : > { %v2382_v13 = vpop.permute.xlu1 %2381 }
 0x1ee   : > { %2444 = vst.msk [vmem:[#allocation4 + $0x70] sm:$0xf] %vm1616_vm7, %v2382_v13  ;;  %v2095_v24 = vpop.permute.xlu0 %2094  ;;  %v22144_v13 = vld [vmem:[#allocation61_spill] sm:$0xff] }
 0x1ef   : > { %2157 = vst.msk [vmem:[#allocation4 + $0x78] sm:$0xf] %vm2146_vm10, %v2095_v24  ;;  %2401 = vrot.lane.b32.xlu1 %v17851_v47, %s15974_s20  ;;  %v14091_v24 = vpack.c.bf16 %v22144_v13, %v22144_v13 }
 0x1f0   : > { %2399 = vrot.lane.b32.xlu0 %v13911_v21, %s15974_s20  ;;  %v15547_v21 = vld [vmem:[#allocation4 + $0x48] ss:$12 sps:$4 sm:$0xff]  }
 0x1f1   : > { %v1575_v43 = vpop.permute.xlu1 %1574 }
 0x1f2   : > { %1632 = vst.msk [vmem:[#allocation4 + $0xb4] sm:$0xf] %vm1616_vm7, %v1575_v43  ;;  %v2736_v62 = vpop.permute.xlu0 %2735 }
 0x1f3   : > { %2801 = vst.msk [vmem:[#allocation4 + $0x4c] sm:$0xf] %vm1785_vm9, %v2736_v62  ;;  %2761 = vrot.lane.b32.xlu1 %v13936_v8, %s15975_s13  ;;  %v13938_v8 = vpack.c.bf16 %v22145_v48, %v22145_v48 }
 0x1f4   : > { %2969 = vst.msk [vmem:[#allocation4 + $0x4c] sm:$0xf] %vm2146_vm10, %v2904_v41  ;;  %2759 = vrot.lane.b32.xlu0 %v13935_v25, %s15975_s13  ;;  %v13937_v25 = vpack.c.bf16 %v22146_v39, %v22146_v39 }
 0x1f5   : > { %v2910_v47 = vpop.permute.xlu1 %2909 }
 0x1f6   : > { %v2380_v31 = vpop.permute.xlu0 %2379 }
 0x1f7   : > { %2443 = vst.msk [vmem:[#allocation4 + $0x64] sm:$0xf] %vm1616_vm7, %v2380_v31  ;;  %2929 = vrot.lane.b32.xlu1 %v13960_v5, %s15976_s24  ;;  %v22147_v31 = vld [vmem:[#allocation69_spill] sm:$0xff] }
 0x1f8   : > { %2803 = vst.msk [vmem:[#allocation4 + $0x64] sm:$0xf] %vm1785_vm9, %v2740_v4  ;;  %2927 = vrot.lane.b32.xlu0 %v13959_v1, %s15976_s24  ;;  %v22142_v4 = vld [vmem:[#allocation67_spill] sm:$0xff]  ;;  %v18024_v16 = vpack.c.bf16 %v22147_v31, %v22147_v31  ;;  %v22148_v1 = vld [vmem:[#allocation74_spill] sm:$0xff]  ;;  %v22154_v31 = vld [vmem:[#allocation56_spill] sm:$0xff] }
 0x1f9   : > { %2971 = vst.msk [vmem:[#allocation4 + $0x64] sm:$0xf] %vm2146_vm10, %v17878_v34  ;;  %v2742_v41 = vpop.permute.xlu1 %2741  ;;  %v17994_v54 = vpack.c.bf16 %v22142_v4, %v22142_v4  ;;  %v22143_v34 = vld [vmem:[#allocation36_spill] sm:$0xff]  ;;  %v15809_v4 = vld [vmem:[#allocation2 + $0xd8] sm:$0xff] }
 0x1fa   : > { %2804 = vst.msk [vmem:[#allocation4 + $0x70] sm:$0xf] %vm1785_vm9, %v2742_v41  ;;  %v1581_v59 = vpop.permute.xlu0 %1580  ;;  %v17998_v32 = vpack.c.bf16 %v22143_v34, %v22143_v34  ;;  %v18028_v41 = vpack.c.bf16 %v22148_v1, %v22148_v1  ;;  %v13961_v34 = vpack.c.bf16 %v15809_v4, %v15809_v4  ;;  %v13939_v1 = vpack.c.bf16 %v22154_v31, %v22154_v31  ;;  %v22155_v31 = vld [vmem:[#allocation57_spill] sm:$0xff] }
 0x1fb   : > { %2972 = vst.msk [vmem:[#allocation4 + $0x70] sm:$0xf] %vm2146_vm10, %v2910_v47  ;;  %2405 = vrot.lane.b32.xlu1 %v17983_v27, %s15974_s20  ;;  %v15545_v7 = vld [vmem:[#allocation4 + $0x4c] ss:$12 sps:$4 sm:$0xff]   ;;  %v15808_v47 = vld [vmem:[#allocation2 + $0xe0] sm:$0xff] }
 0x1fc   : > { %1635 = vst.msk [vmem:[#allocation4 + $0xd8] sm:$0xf] %vm1616_vm7, %v1581_v59  ;;  %2403 = vrot.lane.b32.xlu0 %v13913_v15, %s15974_s20  ;;  %3577 = vmatprep.mubr.bf16.mxu0 %v15545_v7  ;;  %v13962_v18 = vpack.c.bf16 %v15808_v47, %v15808_v47  ;;  %v22150_v15 = vld [vmem:[#allocation66_spill] sm:$0xff]  ;;  %v22151_v7 = vld [vmem:[#allocation53_spill] sm:$0xff]  ;;  %v22153_v47 = vld [vmem:[#allocation55_spill] sm:$0xff] }
 0x1fd   : > { %4146 = vst.msk [vmem:[#allocation4 + $0x54] sm:$0xf] %vm1447_vm8, %v17994_v54  ;;  %4145 = vst.msk [vmem:[#allocation4 + $0x48] sm:$0xf] %vm1447_vm8, %v17998_v32  ;;  %v2386_v43 = vpop.permute.xlu1 %2385  ;;  %3578 = vmatmul.mubr.bf16.gmra.mxu0 %v15547_v21  ;;  %v18036_v59 = vpack.c.bf16 %v22150_v15, %v22150_v15  ;;  %v2001_v21 = vsel %vm1278_vm4, %v22151_v7, 0.0  ;;  %v15555_v15 = vld [vmem:[%s21892_s4 + $0x38] sm:$0xff]  }
 0x1fe   : > { %4962 = vst.msk [vmem:[#allocation4 + $0x58] sm:$0xf] %vm1447_vm8, %v17990_v44  ;;  %4961 = vst.msk [vmem:[#allocation4 + $0x4c] sm:$0xf] %vm1447_vm8, %v14091_v24  ;;  %v1742_v62 = vpop.permute.xlu0 %1741  ;;  %v15550_v24 = vld [vmem:[#allocation4 + $0x60] ss:$12 sps:$4 sm:$0xff]   ;;  %v13916_v48 = vpack.c.bf16 %v2001_v21, %v2001_v21  ;;  %14769 = vmatpush3.bf16.msra.mxu1 %v15555_v15 }
 0x1ff   : > { %2446 = vst.msk [vmem:[#allocation4 + $0x88] sm:$0xf] %vm1616_vm7, %v2386_v43  ;;  %2765 = vrot.lane.b32.xlu1 %v13938_v8, %s15975_s13  ;;  %v15811_v21 = vld [vmem:[#allocation2 + $0xe8] sm:$0xff] }
 0x200   : > { %1800 = vst.msk [vmem:[#allocation4 + $0xa8] sm:$0xf] %vm1785_vm9, %v1742_v62  ;;  %2763 = vrot.lane.b32.xlu0 %v13937_v25, %s15975_s13  ;;  %v22152_v62 = vld [vmem:[#allocation54_spill] sm:$0xff] }
 0x201   : > { %v1748_v5 = vpop.permute.xlu1 %1747  ;;  %4148 = vst.msk [vmem:[#allocation4 + $0x6c] sm:$0xf] %vm1447_vm8, %v18032_v22  ;;  %4147 = vst.msk [vmem:[#allocation4 + $0x60] sm:$0xf] %vm1447_vm8, %v18036_v59  ;;  %v18054_v39 = vpack.c.bf16 %v22152_v62, %v22152_v62  ;;  %v15558_v62 = vld [vmem:[%s21892_s4 + $0x68] sm:$0xff]  }
 0x202   : > { %1803 = vst.msk [vmem:[#allocation4 + $0xcc] sm:$0xf] %vm1785_vm9, %v1748_v5  ;;  %v2099_v0 = vpop.permute.xlu0 %2098  ;;  %v15548_v13 = vld [vmem:[#allocation4 + $0x64] ss:$12 sps:$4 sm:$0xff]  }
 0x203   : > { %2159 = vst.msk [vmem:[#allocation4 + $0x90] sm:$0xf] %vm2146_vm10, %v2099_v0  ;;  %2933 = vrot.lane.b32.xlu1 %v13962_v18, %s15976_s24  ;;  %3585 = vmatprep.mubr.bf16.mxu0 %v15548_v13  ;;  %v13940_v18 = vpack.c.bf16 %v22153_v47, %v22153_v47  ;;  %v15556_v0 = vld [vmem:[%s21892_s4 + $0x70] sm:$0xff]  }
 0x204   : > { %4964 = vst.msk [vmem:[#allocation4 + $0x70] sm:$0xf] %vm1447_vm8, %v18028_v41  ;;  %4963 = vst.msk [vmem:[#allocation4 + $0x64] sm:$0xf] %vm1447_vm8, %v18024_v16  ;;  %2931 = vrot.lane.b32.xlu0 %v13961_v34, %s15976_s24  ;;  %v15810_v34 = vld [vmem:[#allocation2 + $0xf0] sm:$0xff]  ;;  %14770 = vmatprep.subr.bf16.mxu1 %v15556_v0  ;;  %v22157_v0 = vld [vmem:[#allocation59_spill] sm:$0xff] }
 0x205   : > { %v2105_v43 = vpop.permute.xlu1 %2104  ;;  %3586 = vmatmul.mubr.bf16.gmra.mxu0 %v15550_v24  ;;  %v13964_v13 = vpack.c.bf16 %v15810_v34, %v15810_v34  ;;  %v15559_v24 = vld [vmem:[%s21892_s4 + $0x88] sm:$0xff]  }
 0x206   : > { %v1577_v8 = vpop.permute.xlu0 %1576  ;;  %15338 = vmatprep.subr.bf16.mxu0 %v15559_v24 }
 0x207   : > { %1633 = vst.msk [vmem:[#allocation4 + $0xc0] sm:$0xf] %vm1616_vm7, %v1577_v8  ;;  %2409 = vrot.lane.b32.xlu1 %v13916_v48, %s15974_s20  ;;  %v13963_v48 = vpack.c.bf16 %v15811_v21, %v15811_v21  ;;  %v15557_v8 = vld [vmem:[%s21892_s4 + $0x30] sm:$0xff]   ;;  %15339 = vmatpush3.bf16.msra.mxu0 %v15559_v24  ;;  %v18113_v21 = vld [vmem:[#allocation2 + $0x100] sm:$0xff] }
 0x208   : > { %2407 = vrot.lane.b32.xlu0 %v18054_v39, %s15974_s20  ;;  %14771 = vmatpush3.bf16.msra.mxu1 %v15557_v8  ;;  %v15564_v8 = vld [vmem:[%s21892_s4 + $0x20] sm:$0xff]  }
 0x209   : > { %v1587_v25 = vpop.permute.xlu1 %1586  ;;  %14772 = vmatprep.subr.bf16.mxu1 %v15558_v62  ;;  %v15813_v62 = vld [vmem:[#allocation2 + $0xf8] sm:$0xff] }
 0x20a   : > { %1638 = vst.msk [vmem:[#allocation4 + $0xfc] sm:$0xf] %vm1616_vm7, %v1587_v25  ;;  %v2912_v5 = vpop.permute.xlu0 %2911 }
 0x20b   : > { %2769 = vrot.lane.b32.xlu1 %v13940_v18, %s15975_s13  ;;  %v15563_v18 = vld [vmem:[%s21892_s4 + $0x80] sm:$0xff]  }
 0x20c   : > { %2767 = vrot.lane.b32.xlu0 %v13939_v1, %s15975_s13  ;;  %v15562_v1 = vld [vmem:[%s21892_s4 + $0x60] sm:$0xff]   ;;  %15340 = vmatprep.subr.bf16.mxu0 %v15563_v18 }
 0x20d   : > { %v1744_v4 = vpop.permute.xlu1 %1743  ;;  %15341 = vmatpush3.bf16.msra.mxu0 %v15563_v18 }
 0x20e   : > { %1801 = vst.msk [vmem:[#allocation4 + $0xb4] sm:$0xf] %vm1785_vm9, %v1744_v4  ;;  %v2748_v7 = vpop.permute.xlu0 %2747  ;;  %v18106_v4 = vpack.c.bf16 %v22157_v0, %v22157_v0  ;;  %v4618_v0 = vsel %vm1205_vm6, 0.0, %v17354_v46 }
 0x20f   : > { %2162 = vst.msk [vmem:[#allocation4 + $0xb4] sm:$0xf] %vm2146_vm10, %v2105_v43  ;;  %2937 = vrot.lane.b32.xlu1 %v13964_v13, %s15976_s24  ;;  %v15560_v43 = vld [vmem:[%s21892_s4 + $0x28] sm:$0xff]  }
 0x210   : > { %2935 = vrot.lane.b32.xlu0 %v13963_v48, %s15976_s24  ;;  %v22158_v13 = vld [vmem:[#allocation60_spill] sm:$0xff]  ;;  %v5196_v48 = vrot.slane %v18113_v21, 7  ;;  %14773 = vmatpush3.bf16.msra.mxu1 %v15560_v43 }
 0x211   : > { %v2101_v25 = vpop.permute.xlu1 %2100  ;;  %v18111_v24 = vpack.c.bf16 %v22158_v13, %v22158_v13  ;;  %14774 = vmatprep.subr.bf16.mxu1 %v15562_v1  ;;  %v15814_v13 = vld [vmem:[#allocation2 + $0x130] sm:$0xff] }
 0x212   : > { %2160 = vst.msk [vmem:[#allocation4 + $0x9c] sm:$0xf] %vm2146_vm10, %v2101_v25  ;;  %v1746_v47 = vpop.permute.xlu0 %1745  ;;  %v5195_v25 = vrot.slane %v15813_v62, 7 }
 0x213   : > { %1802 = vst.msk [vmem:[#allocation4 + $0xc0] sm:$0xf] %vm1785_vm9, %v1746_v47  ;;  %4237 = vrot.lane.b32.xlu1 %v22155_v31, %s15974_s20 }
 0x214   : > { %4235 = vrot.lane.b32.xlu0 %v22156_v53, %s15974_s20  ;;  %v5197_v18 = vsel %vm1205_vm6, %v5195_v25, %v5196_v48  ;;  %14775 = vmatpush3.bf16.msra.mxu1 %v15564_v8  ;;  %v18151_v8 = vpack.c.bf16 %v15814_v13, %v15814_v13 }
 0x215   : > { %v2746_v15 = vpop.permute.xlu1 %2745  ;;  %v14134_v1 = vpack.c.bf16 %v5197_v18, %v5197_v18 }
 0x216   : > { %2806 = vst.msk [vmem:[#allocation4 + $0x88] sm:$0xf] %vm1785_vm9, %v2746_v15  ;;  %v2103_v34 = vpop.permute.xlu0 %2102 }
 0x217   : > { %2974 = vst.msk [vmem:[#allocation4 + $0x88] sm:$0xf] %vm2146_vm10, %v17933_v52  ;;  %2161 = vst.msk [vmem:[#allocation4 + $0xa8] sm:$0xf] %vm2146_vm10, %v2103_v34  ;;  %5053 = vrot.lane.b32.xlu1 %v18106_v4, %s15974_s20  ;;  %v5266_v52 = vsel %vm1205_vm6, 0.0, %v5195_v25  ;;  %v14061_v34 = vpack.c.bf16 %v4618_v0, %v4618_v0  ;;  %v22159_v25 = vld [vmem:[#allocation77_spill] sm:$0xff]  ;;  %v14158_v0 = vpack.c.bf16 %v18113_v21, %v18113_v21 }
 0x218   : > { %5051 = vrot.lane.b32.xlu0 %v18111_v24, %s15974_s20  ;;  %v14133_v15 = vpack.c.bf16 %v5266_v52, %v5266_v52 }
 0x219   : > { %v2390_v47 = vpop.permute.xlu1 %2389 }
 0x21a   : > { %2448 = vst.msk [vmem:[#allocation4 + $0xa0] sm:$0xf] %vm1616_vm7, %v2390_v47  ;;  %v2744_v43 = vpop.permute.xlu0 %2743  ;;  %v18155_v47 = vpack.c.bf16 %v22159_v25, %v22159_v25  ;;  %v15576_v25 = vld [vmem:[%s21892_s4] sm:$0xff]  }
 0x21b   : > { %2805 = vst.msk [vmem:[#allocation4 + $0x7c] sm:$0xf] %vm1785_vm9, %v2744_v43  ;;  %4405 = vrot.lane.b32.xlu1 %v18054_v39, %s15975_s13  ;;  %v15565_v39 = vld [vmem:[%s21892_s4 + $0x58] sm:$0xff]  }
 0x21c   : > { %2973 = vst.msk [vmem:[#allocation4 + $0x7c] sm:$0xf] %vm2146_vm10, %v2912_v5  ;;  %4403 = vrot.lane.b32.xlu0 %v17983_v27, %s15975_s13  ;;  %v15567_v27 = vld [vmem:[%s21892_s4 + $0x18] sm:$0xff]   ;;  %14776 = vmatprep.subr.bf16.mxu1 %v15565_v39 }
 0x21d   : > { %v1583_v31 = vpop.permute.xlu1 %1582  ;;  %14777 = vmatpush3.bf16.msra.mxu1 %v15567_v27  ;;  %v22160_v43 = vld [vmem:[#allocation78_spill] sm:$0xff]  ;;  %v14157_v27 = vpack.c.bf16 %v15813_v62, %v15813_v62  ;;  %v15575_v62 = vld [vmem:[%s21892_s4 + $0x40] sm:$0xff]  }
 0x21e   : > { %1636 = vst.msk [vmem:[#allocation4 + $0xe4] sm:$0xf] %vm1616_vm7, %v1583_v31  ;;  %v2388_v53 = vpop.permute.xlu0 %2387  ;;  %v18159_v18 = vpack.c.bf16 %v22160_v43, %v22160_v43  ;;  %v22162_v43 = vld [vmem:[#allocation62_spill] sm:$0xff] }
 0x21f   : > { %2447 = vst.msk [vmem:[#allocation4 + $0x94] sm:$0xf] %vm1616_vm7, %v2388_v53  ;;  %5413 = vrot.lane.b32.xlu1 %v14134_v1, %s15975_s13  ;;  %v15553_v1 = vld [vmem:[#allocation4 + $0x78] ss:$12 sps:$4 sm:$0xff]  }
 0x220   : > { %2807 = vst.msk [vmem:[#allocation4 + $0x94] sm:$0xf] %vm1785_vm9, %v2748_v7  ;;  %5411 = vrot.lane.b32.xlu0 %v14133_v15, %s15975_s13  ;;  %v22161_v7 = vld [vmem:[#allocation75_spill] sm:$0xff]  ;;  %v15569_v53 = vld [vmem:[%s21892_s4 + $0x50] sm:$0xff]  }
 0x221   : > { %v2750_v5 = vpop.permute.xlu1 %2749  ;;  %v18163_v52 = vpack.c.bf16 %v22161_v7, %v22161_v7  ;;  %v15570_v15 = vld [vmem:[%s21892_s4 + $0x10] sm:$0xff]   ;;  %4150 = vst.msk [vmem:[#allocation4 + $0x84] sm:$0xf] %vm1447_vm8, %v18159_v18  ;;  %14778 = vmatprep.subr.bf16.mxu1 %v15569_v53 }
 0x222   : > { %2808 = vst.msk [vmem:[#allocation4 + $0xa0] sm:$0xf] %vm1785_vm9, %v2750_v5  ;;  %v1589_v46 = vpop.permute.xlu0 %1588  ;;  %14779 = vmatpush3.bf16.msra.mxu1 %v15570_v15  ;;  %v15571_v5 = vld [vmem:[%s21892_s4 + $0x48] sm:$0xff]   ;;  %v22164_v53 = vld [vmem:[#allocation65_spill] sm:$0xff] }
 0x223   : > { %1639 = vst.msk [vmem:[#allocation4 + $0x108] sm:$0xf] %vm1616_vm7, %v1589_v46  ;;  %4765 = vrot.lane.b32.xlu1 %v17901_v12, %s15976_s24  ;;  %v15551_v31 = vld [vmem:[#allocation4 + $0x7c] ss:$12 sps:$4 sm:$0xff]   ;;  %14780 = vmatprep.subr.bf16.mxu1 %v15571_v5  ;;  %v18213_v15 = vpack.c.bf16 %v22164_v53, %v22164_v53  ;;  %v22165_v5 = vld [vmem:[#allocation63_spill] sm:$0xff] }
 0x224   : > { %4763 = vrot.lane.b32.xlu0 %v14061_v34, %s15976_s24  ;;  %4149 = vst.msk [vmem:[#allocation4 + $0x78] sm:$0xf] %vm1447_vm8, %v18163_v52  ;;  %4966 = vst.msk [vmem:[#allocation4 + $0x88] sm:$0xf] %vm1447_vm8, %v18155_v47  ;;  %3593 = vmatprep.mubr.bf16.mxu0 %v15551_v31  ;;  %v15573_v34 = vld [vmem:[%s21892_s4 + $0x8] sm:$0xff]  }
 0x225   : > { %4965 = vst.msk [vmem:[#allocation4 + $0x7c] sm:$0xf] %vm1447_vm8, %v18151_v8  ;;  %v1756_v12 = vpop.permute.xlu1 %1755  ;;  %3594 = vmatmul.mubr.bf16.gmra.mxu0 %v15553_v1  ;;  %v22163_v31 = vld [vmem:[#allocation64_spill] sm:$0xff] }
 0x226   : > { %1807 = vst.msk [vmem:[#allocation4 + $0xfc] sm:$0xf] %vm1785_vm9, %v1756_v12  ;;  %v1750_v39 = vpop.permute.xlu0 %1749  ;;  %14781 = vmatpush3.bf16.msra.mxu1 %v15573_v34  ;;  %v18208_v1 = vpack.c.bf16 %v22163_v31, %v22163_v31  ;;  %v15815_v12 = vld [vmem:[#allocation2 + $0x108] sm:$0xff]  ;;  %v14039_v34 = vpack.c.bf16 %v22165_v5, %v22165_v5 }
 0x227   : > { %1804 = vst.msk [vmem:[#allocation4 + $0xd8] sm:$0xf] %vm1785_vm9, %v1750_v39  ;;  %5581 = vrot.lane.b32.xlu1 %v14158_v0, %s15976_s24  ;;  %14782 = vmatprep.subr.bf16.mxu1 %v15575_v62  ;;  %v5198_v0 = vrot.slane %v15815_v12, 7 }
 0x228   : > { %5579 = vrot.lane.b32.xlu0 %v14157_v27, %s15976_s24 }
 0x229   : > { %v2113_v46 = vpop.permute.xlu1 %2112 }
 0x22a   : > { %v2107_v13 = vpop.permute.xlu0 %2106  ;;  %14783 = vmatpush3.bf16.msra.mxu1 %v15576_v25 }
 0x22b   : > { %2163 = vst.msk [vmem:[#allocation4 + $0xc0] sm:$0xf] %vm2146_vm10, %v2107_v13  ;;  %4241 = vrot.lane.b32.xlu1 %v17728_v28, %s15974_s20  ;;  %v22166_v13 = vld [vmem:[#allocation70_spill] sm:$0xff] }
 0x22c   : > { %4239 = vrot.lane.b32.xlu0 %v22162_v43, %s15974_s20  ;;  %v5201_v62 = vsel %vm1205_vm6, %v5198_v0, %v22166_v13 }
 0x22d   : > { %v1752_v7 = vpop.permute.xlu1 %1751  ;;  %v14136_v43 = vpack.c.bf16 %v5201_v62, %v5201_v62 }
 0x22e   : > { %1805 = vst.msk [vmem:[#allocation4 + $0xe4] sm:$0xf] %vm1785_vm9, %v1752_v7  ;;  %v1585_v28 = vpop.permute.xlu0 %1584 }
 0x22f   : > { %2166 = vst.msk [vmem:[#allocation4 + $0xe4] sm:$0xf] %vm2146_vm10, %v2113_v46  ;;  %5057 = vrot.lane.b32.xlu1 %v18208_v1, %s15974_s20  ;;  %v5199_v46 = vsel %vm1205_vm6, %v5196_v48, %v5198_v0  ;;  %v15816_v48 = vld [vmem:[#allocation2 + $0x110] sm:$0xff] }
 0x230   : > { %1637 = vst.msk [vmem:[#allocation4 + $0xf0] sm:$0xf] %vm1616_vm7, %v1585_v28  ;;  %5055 = vrot.lane.b32.xlu0 %v18213_v15, %s15974_s20  ;;  %v14135_v31 = vpack.c.bf16 %v5199_v46, %v5199_v46  ;;  %v18243_v53 = vpack.c.bf16 %v15816_v48, %v15816_v48 }
 0x231   : > { %v2109_v39 = vpop.permute.xlu1 %2108 }
 0x232   : > { %2164 = vst.msk [vmem:[#allocation4 + $0xcc] sm:$0xf] %vm2146_vm10, %v2109_v39  ;;  %v1754_v27 = vpop.permute.xlu0 %1753  ;;  %v14159_v39 = vpack.c.bf16 %v15815_v12, %v15815_v12 }
 0x233   : > { %1806 = vst.msk [vmem:[#allocation4 + $0xf0] sm:$0xf] %vm1785_vm9, %v1754_v27  ;;  %4409 = vrot.lane.b32.xlu1 %v18111_v24, %s15975_s13 }
 0x234   : > { %4407 = vrot.lane.b32.xlu0 %v14039_v34, %s15975_s13  ;;  %v22167_v34 = vld [vmem:[#allocation33_spill] sm:$0xff] }
 0x235   : > { %v1591_v25 = vpop.permute.xlu1 %1590  ;;  %v18257_v62 = vpack.c.bf16 %v22167_v34, %v22167_v34 }
 0x236   : > { %1640 = vst.msk [vmem:[#allocation4 + $0x114] sm:$0xf] %vm1616_vm7, %v1591_v25  ;;  %v2111_v7 = vpop.permute.xlu0 %2110  ;;  %v22168_v25 = vld [vmem:[#allocation34_spill] sm:$0xff] }
 0x237   : > { %2165 = vst.msk [vmem:[#allocation4 + $0xd8] sm:$0xf] %vm2146_vm10, %v2111_v7  ;;  %5417 = vrot.lane.b32.xlu1 %v14136_v43, %s15975_s13  ;;  %v18262_v43 = vpack.c.bf16 %v22168_v25, %v22168_v25  ;;  %v18264_v7 = vld [vmem:[#allocation2 + $0x120] sm:$0xff]  ;;  %v22170_v25 = vld [vmem:[#allocation40_spill] sm:$0xff] }
 0x238   : > { %5415 = vrot.lane.b32.xlu0 %v14135_v31, %s15975_s13  ;;  %v5204_v31 = vrot.slane %v18264_v7, 7 }
 0x239   : > { %v1760_v28 = vpop.permute.xlu1 %1759 }
 0x23a   : > { %1809 = vst.msk [vmem:[#allocation4 + $0x114] sm:$0xf] %vm1785_vm9, %v1760_v28  ;;  %v1758_v24 = vpop.permute.xlu0 %1757 }
 0x23b   : > { %1808 = vst.msk [vmem:[#allocation4 + $0x108] sm:$0xf] %vm1785_vm9, %v1758_v24  ;;  %4769 = vrot.lane.b32.xlu1 %v17998_v32, %s15976_s24  ;;  %v15817_v32 = vld [vmem:[#allocation2 + $0xf0] sm:$0xff] }
 0x23c   : > { %4767 = vrot.lane.b32.xlu0 %v17897_v19, %s15976_s24  ;;  %v14018_v5 = vpack.c.bf16 %v15817_v32, %v15817_v32  ;;  %v22169_v32 = vld [vmem:[#allocation84_spill] sm:$0xff] }
 0x23d   : > { %v2121_v21 = vpop.permute.xlu1 %2120 }
 0x23e   : > { %2170 = vst.msk [vmem:[#allocation4 + $0x114] sm:$0xf] %vm2146_vm10, %v2121_v21  ;;  %v2115_v0 = vpop.permute.xlu0 %2114 }
 0x23f   : > { %2167 = vst.msk [vmem:[#allocation4 + $0xf0] sm:$0xf] %vm2146_vm10, %v2115_v0  ;;  %5585 = vrot.lane.b32.xlu1 %v18243_v53, %s15976_s24 }
 0x240   : > { %5583 = vrot.lane.b32.xlu0 %v14159_v39, %s15976_s24  ;;  %v15820_v39 = vld [vmem:[#allocation2 + $0x148] sm:$0xff] }
 0x241   : > { %v2117_v27 = vpop.permute.xlu1 %2116 }
 0x242   : > { %2168 = vst.msk [vmem:[#allocation4 + $0xfc] sm:$0xf] %vm2146_vm10, %v2117_v27  ;;  %v2119_v19 = vpop.permute.xlu0 %2118  ;;  %v14098_v27 = vpack.c.bf16 %v15820_v39, %v15820_v39 }
 0x243   : > { %2169 = vst.msk [vmem:[#allocation4 + $0x108] sm:$0xf] %vm2146_vm10, %v2119_v19  ;;  %4245 = vrot.lane.b32.xlu1 %v14018_v5, %s15974_s20  ;;  %v18285_v5 = vpack.c.bf16 %v22169_v32, %v22169_v32 }
 0x244   : > { %4243 = vrot.lane.b32.xlu0 %v17732_v35, %s15974_s20  ;;  %v15819_v35 = vld [vmem:[#allocation2 + $0x118] sm:$0xff] }
 0x245   : > { %v2918_v12 = vpop.permute.xlu1 %2917  ;;  %v5202_v28 = vrot.slane %v15819_v35, 7 }
 0x246   : > { %2976 = vst.msk [vmem:[#allocation4 + $0xa0] sm:$0xf] %vm2146_vm10, %v2918_v12  ;;  %v2916_v46 = vpop.permute.xlu0 %2915  ;;  %v18287_v12 = vld [vmem:[#allocation2 + $0x140] sm:$0xff] }
 0x247   : > { %2975 = vst.msk [vmem:[#allocation4 + $0x94] sm:$0xf] %vm2146_vm10, %v2916_v46  ;;  %5061 = vrot.lane.b32.xlu1 %v18257_v62, %s15974_s20  ;;  %v5205_v48 = vsel %vm1205_vm6, %v5202_v28, %v5204_v31  ;;  %v5203_v0 = vsel %vm1205_vm6, %v22166_v13, %v5202_v28  ;;  %v14097_v34 = vpack.c.bf16 %v18287_v12, %v18287_v12 }
 0x248   : > { %5059 = vrot.lane.b32.xlu0 %v18262_v43, %s15974_s20  ;;  %v18293_v13 = vpack.c.bf16 %v22170_v25, %v22170_v25 }
 0x249   : > { %v2394_v24 = vpop.permute.xlu1 %2393 }
 0x24a   : > { %2450 = vst.msk [vmem:[#allocation4 + $0xb8] sm:$0xf] %vm1616_vm7, %v2394_v24  ;;  %v2392_v21 = vpop.permute.xlu0 %2391  ;;  %v14137_v24 = vpack.c.bf16 %v5203_v0, %v5203_v0 }
 0x24b   : > { %2449 = vst.msk [vmem:[#allocation4 + $0xac] sm:$0xf] %vm1616_vm7, %v2392_v21  ;;  %4413 = vrot.lane.b32.xlu1 %v18213_v15, %s15975_s13  ;;  %v14138_v15 = vpack.c.bf16 %v5205_v48, %v5205_v48 }
 0x24c   : > { %4411 = vrot.lane.b32.xlu0 %v18106_v4, %s15975_s13 }
 0x24d   : > { %v3133_v19 = vld [vmem:[#allocation4 + $0x9c] sm:$0xff]  ;;  %v2754_v46 = vpop.permute.xlu1 %2753 }
 0x24e   : > { %4968 = vst.msk [vmem:[#allocation4 + $0xa0] sm:$0xf] %vm1447_vm8, %v14098_v27  ;;  %v3131_v28 = vld [vmem:[#allocation4 + $0x90] sm:$0xff]  ;;  %v2752_v4 = vpop.permute.xlu0 %2751  ;;  %4152 = vst.msk [vmem:[#allocation4 + $0x9c] sm:$0xf] %vm1447_vm8, %v18285_v5 }
 0x24f   : > { %2810 = vst.msk [vmem:[#allocation4 + $0xb8] sm:$0xf] %vm1785_vm9, %v2754_v46  ;;  %2809 = vst.msk [vmem:[#allocation4 + $0xac] sm:$0xf] %vm1785_vm9, %v2752_v4  ;;  %5421 = vrot.lane.b32.xlu1 %v14138_v15, %s15975_s13  ;;  %v12790_v21 = vcombine.high %v3131_v28, %v3133_v19  ;;  %v12789_v48 = vcombine.low %v3131_v28, %v3133_v19  ;;  %v18305_v27 = vld [vmem:[#allocation2 + $0x140] sm:$0xff]  ;;  %v22171_v46 = vld [vmem:[#allocation80_spill] sm:$0xff]  ;;  %v14161_v28 = vpack.c.bf16 %v15819_v35, %v15819_v35 }
 0x250   : > { %4967 = vst.msk [vmem:[#allocation4 + $0x94] sm:$0xf] %vm1447_vm8, %v14097_v34  ;;  %4151 = vst.msk [vmem:[#allocation4 + $0x90] sm:$0xf] %vm1447_vm8, %v18293_v13  ;;  %5419 = vrot.lane.b32.xlu0 %v14137_v24, %s15975_s13  ;;  %v3928_v0 = vrot.slane %v18305_v27, 7  ;;  %v14162_v34 = vpack.c.bf16 %v18264_v7, %v18264_v7  ;;  %v15823_v4 = vld [vmem:[#allocation2 + $0x158] sm:$0xff] }
 0x251   : > { %3601 = vmatprep.mubr.bf16.mxu0 %v12790_v21  ;;  %v2922_v39 = vpop.permute.xlu1 %2921  ;;  %v15824_v21 = vld [vmem:[#allocation2 + $0x150] sm:$0xff] }
 0x252   : > { %2978 = vst.msk [vmem:[#allocation4 + $0xb8] sm:$0xf] %vm2146_vm10, %v2922_v39  ;;  %v2920_v32 = vpop.permute.xlu0 %2919  ;;  %3602 = vmatmul.mubr.bf16.gmra.mxu0 %v12789_v48  ;;  %v3929_v15 = vsel %vm1205_vm6, %v22171_v46, %v3928_v0  ;;  %v14099_v48 = vpack.c.bf16 %v15824_v21, %v15824_v21  ;;  %v22172_v46 = vld [vmem:[#allocation83_spill] sm:$0xff] }
 0x253   : > { %2977 = vst.msk [vmem:[#allocation4 + $0xac] sm:$0xf] %vm2146_vm10, %v2920_v32  ;;  %4773 = vrot.lane.b32.xlu1 %v18036_v59, %s15976_s24  ;;  %v14100_v59 = vpack.c.bf16 %v15823_v4, %v15823_v4  ;;  %v15825_v32 = vld [vmem:[#allocation2 + $0x100] sm:$0xff] }
 0x254   : > { %4771 = vrot.lane.b32.xlu0 %v17994_v54, %s15976_s24  ;;  %v14004_v54 = vpack.c.bf16 %v3929_v15, %v3929_v15  ;;  %v14020_v6 = vpack.c.bf16 %v15825_v32, %v15825_v32  ;;  %v22173_v4 = vld [vmem:[#allocation71_spill] sm:$0xff]  ;;  %v18354_v32 = vld [vmem:[#allocation2 + $0x150] sm:$0xff] }
 0x255   : > { %v2398_v19 = vpop.permute.xlu1 %2397 }
 0x256   : > { %2452 = vst.msk [vmem:[#allocation4 + $0xd0] sm:$0xf] %vm1616_vm7, %v2398_v19  ;;  %v2396_v25 = vpop.permute.xlu0 %2395  ;;  %v18324_v19 = vpack.c.bf16 %v22172_v46, %v22172_v46  ;;  %v3932_v46 = vrot.slane %v18354_v32, 7 }
 0x257   : > { %2451 = vst.msk [vmem:[#allocation4 + $0xc4] sm:$0xf] %vm1616_vm7, %v2396_v25  ;;  %5589 = vrot.lane.b32.xlu1 %v14162_v34, %s15976_s24 }
 0x258   : > { %5587 = vrot.lane.b32.xlu0 %v14161_v28, %s15976_s24 }
 0x259   : > { %v3137_v24 = vld [vmem:[#allocation4 + $0xb4] sm:$0xff]  ;;  %v2758_v39 = vpop.permute.xlu1 %2757 }
 0x25a   : > { %4970 = vst.msk [vmem:[#allocation4 + $0xb8] sm:$0xf] %vm1447_vm8, %v14100_v59  ;;  %v3135_v35 = vld [vmem:[#allocation4 + $0xa8] sm:$0xff]  ;;  %v2756_v34 = vpop.permute.xlu0 %2755  ;;  %4154 = vst.msk [vmem:[#allocation4 + $0xb4] sm:$0xf] %vm1447_vm8, %v14004_v54  ;;  %v18338_v59 = vpack.c.bf16 %v22173_v4, %v22173_v4  ;;  %v18340_v54 = vld [vmem:[#allocation2 + $0x148] sm:$0xff] }
 0x25b   : > { %2812 = vst.msk [vmem:[#allocation4 + $0xd0] sm:$0xf] %vm1785_vm9, %v2758_v39  ;;  %2811 = vst.msk [vmem:[#allocation4 + $0xc4] sm:$0xf] %vm1785_vm9, %v2756_v34  ;;  %4249 = vrot.lane.b32.xlu1 %v14020_v6, %s15974_s20  ;;  %v12793_v15 = vcombine.high %v3135_v35, %v3137_v24  ;;  %v12792_v25 = vcombine.low %v3135_v35, %v3137_v24  ;;  %v3930_v21 = vrot.slane %v18340_v54, 7  ;;  %v22174_v24 = vld [vmem:[#allocation72_spill] sm:$0xff] }
 0x25c   : > { %4969 = vst.msk [vmem:[#allocation4 + $0xac] sm:$0xf] %vm1447_vm8, %v14099_v48  ;;  %4153 = vst.msk [vmem:[#allocation4 + $0xa8] sm:$0xf] %vm1447_vm8, %v18324_v19  ;;  %4247 = vrot.lane.b32.xlu0 %v17875_v49, %s15974_s20  ;;  %v18346_v48 = vpack.c.bf16 %v22174_v24, %v22174_v24  ;;  %v18348_v39 = vld [vmem:[#allocation2 + $0x128] sm:$0xff]  ;;  %v18359_v35 = vld [vmem:[#allocation2 + $0x130] sm:$0xff] }
 0x25d   : > { %3609 = vmatprep.mubr.bf16.mxu0 %v12793_v15  ;;  %v2926_v28 = vpop.permute.xlu1 %2925  ;;  %v5206_v49 = vrot.slane %v18348_v39, 7  ;;  %v21980_v34 = vrot.slane %v18359_v35, 7 }
 0x25e   : > { %2980 = vst.msk [vmem:[#allocation4 + $0xd0] sm:$0xf] %vm2146_vm10, %v2926_v28  ;;  %v2924_v6 = vpop.permute.xlu0 %2923  ;;  %3610 = vmatmul.mubr.bf16.gmra.mxu0 %v12792_v25  ;;  %v3933_v25 = vsel %vm1205_vm6, %v3930_v21, %v3932_v46 }
 0x25f   : > { %2979 = vst.msk [vmem:[#allocation4 + $0xc4] sm:$0xf] %vm2146_vm10, %v2924_v6  ;;  %5065 = vrot.lane.b32.xlu1 %v18338_v59, %s15974_s20  ;;  %v5209_v4 = vsel %vm1205_vm6, %v5206_v49, %v21980_v34  ;;  %v3931_v6 = vsel %vm1205_vm6, %v3928_v0, %v3930_v21  ;;  %v5207_v24 = vsel %vm1205_vm6, %v5204_v31, %v5206_v49  ;;  %v15833_v49 = vld [vmem:[#allocation2 + $0x158] sm:$0xff] }
 0x260   : > { %5063 = vrot.lane.b32.xlu0 %v18346_v48, %s15974_s20  ;;  %v14101_v34 = vpack.c.bf16 %v15831_v45, %v15831_v45  ;;  %v14140_v0 = vpack.c.bf16 %v5209_v4, %v5209_v4  ;;  %v14005_v21 = vpack.c.bf16 %v3931_v6, %v3931_v6  ;;  %v14139_v7 = vpack.c.bf16 %v5207_v24, %v5207_v24 }
 0x261   : > { %v2402_v15 = vpop.permute.xlu1 %2401  ;;  %v14163_v24 = vpack.c.bf16 %v18348_v39, %v18348_v39 }
 0x262   : > { %2454 = vst.msk [vmem:[#allocation4 + $0xe8] sm:$0xf] %vm1616_vm7, %v2402_v15  ;;  %v2400_v28 = vpop.permute.xlu0 %2399  ;;  %v14006_v15 = vpack.c.bf16 %v3933_v25, %v3933_v25  ;;  %v14164_v25 = vpack.c.bf16 %v18359_v35, %v18359_v35 }
 0x263   : > { %2453 = vst.msk [vmem:[#allocation4 + $0xdc] sm:$0xf] %vm1616_vm7, %v2400_v28  ;;  %4417 = vrot.lane.b32.xlu1 %v18262_v43, %s15975_s13 }
 0x264   : > { %4415 = vrot.lane.b32.xlu0 %v18208_v1, %s15975_s13  ;;  %v18384_v1 = vld [vmem:[#allocation2 + $0x160] sm:$0xff] }
 0x265   : > { %v3141_v14 = vld [vmem:[#allocation4 + $0xcc] sm:$0xff]  ;;  %v2762_v26 = vpop.permute.xlu1 %2761 }
 0x266   : > { %4972 = vst.msk [vmem:[#allocation4 + $0xd0] sm:$0xf] %vm1447_vm8, %v14102_v11  ;;  %v3139_v28 = vld [vmem:[#allocation4 + $0xc0] sm:$0xff]  ;;  %v2760_v43 = vpop.permute.xlu0 %2759  ;;  %4156 = vst.msk [vmem:[#allocation4 + $0xcc] sm:$0xf] %vm1447_vm8, %v14006_v15 }
 0x267   : > { %2814 = vst.msk [vmem:[#allocation4 + $0xe8] sm:$0xf] %vm1785_vm9, %v2762_v26  ;;  %2813 = vst.msk [vmem:[#allocation4 + $0xdc] sm:$0xf] %vm1785_vm9, %v2760_v43  ;;  %5425 = vrot.lane.b32.xlu1 %v14140_v0, %s15975_s13  ;;  %v12796_v38 = vcombine.high %v3139_v28, %v3141_v14  ;;  %v12795_v45 = vcombine.low %v3139_v28, %v3141_v14  ;;  %v3936_v26 = vrot.slane %v18384_v1, 7  ;;  %v15835_v28 = vld [vmem:[#allocation2 + $0x170] sm:$0xff] }
 0x268   : > { %4971 = vst.msk [vmem:[#allocation4 + $0xc4] sm:$0xf] %vm1447_vm8, %v14101_v34  ;;  %4155 = vst.msk [vmem:[#allocation4 + $0xc0] sm:$0xf] %vm1447_vm8, %v14005_v21  ;;  %5423 = vrot.lane.b32.xlu0 %v14139_v7, %s15975_s13  ;;  %v3934_v34 = vrot.slane %v15833_v49, 7  ;;  %v14103_v43 = vpack.c.bf16 %v15835_v28, %v15835_v28 }
 0x269   : > { %3617 = vmatprep.mubr.bf16.mxu0 %v12796_v38  ;;  %v2930_v11 = vpop.permute.xlu1 %2929 }
 0x26a   : > { %2982 = vst.msk [vmem:[#allocation4 + $0xe8] sm:$0xf] %vm2146_vm10, %v2930_v11  ;;  %v2928_v31 = vpop.permute.xlu0 %2927  ;;  %3618 = vmatmul.mubr.bf16.gmra.mxu0 %v12795_v45  ;;  %v3937_v4 = vsel %vm1205_vm6, %v3934_v34, %v3936_v26  ;;  %v3935_v15 = vsel %vm1205_vm6, %v3932_v46, %v3934_v34  ;;  %v22175_v34 = vld [vmem:[#allocation37_spill] sm:$0xff] }
 0x26b   : > { %2981 = vst.msk [vmem:[#allocation4 + $0xdc] sm:$0xf] %vm2146_vm10, %v2928_v31  ;;  %4777 = vrot.lane.b32.xlu1 %v18163_v52, %s15976_s24  ;;  %v14008_v0 = vpack.c.bf16 %v3937_v4, %v3937_v4  ;;  %v14007_v38 = vpack.c.bf16 %v3935_v15, %v3935_v15  ;;  %v18413_v31 = vpop.f32.mrf.mxu1 }
 0x26c   : > { %4775 = vrot.lane.b32.xlu0 %v18032_v22, %s15976_s24  ;;  %v15834_v22 = vld [vmem:[#allocation2 + $0x178] sm:$0xff] }
 0x26d   : > { %v2406_v14 = vpop.permute.xlu1 %2405  ;;  %v14104_v52 = vpack.c.bf16 %v15834_v22, %v15834_v22  ;;  %v18426_v22 = vld [vmem:[#allocation2 + $0x140] sm:$0xff] }
 0x26e   : > { %2456 = vst.msk [vmem:[#allocation4 + $0x100] sm:$0xf] %vm1616_vm7, %v2406_v14  ;;  %v2404_v6 = vpop.permute.xlu0 %2403  ;;  %v18419_v14 = vpack.c.bf16 %v22175_v34, %v22175_v34 }
 0x26f   : > { %2455 = vst.msk [vmem:[#allocation4 + $0xf4] sm:$0xf] %vm1616_vm7, %v2404_v6  ;;  %5593 = vrot.lane.b32.xlu1 %v14164_v25, %s15976_s24  ;;  %v15836_v25 = vld [vmem:[#allocation2 + $0x168] sm:$0xff] }
 0x270   : > { %5591 = vrot.lane.b32.xlu0 %v14163_v24, %s15976_s24  ;;  %v3938_v4 = vrot.slane %v15836_v25, 7  ;;  %v22176_v24 = vld [vmem:[#allocation76_spill] sm:$0xff] }
 0x271   : > { %v3145_v21 = vld [vmem:[#allocation4 + $0xe4] sm:$0xff]  ;;  %v2766_v7 = vpop.permute.xlu1 %2765  ;;  %v18424_v15 = vpack.c.bf16 %v22176_v24, %v22176_v24 }
 0x272   : > { %4974 = vst.msk [vmem:[#allocation4 + $0xe8] sm:$0xf] %vm1447_vm8, %v14104_v52  ;;  %v3143_v45 = vld [vmem:[#allocation4 + $0xd8] sm:$0xff]  ;;  %v2764_v39 = vpop.permute.xlu0 %2763  ;;  %4158 = vst.msk [vmem:[#allocation4 + $0xe4] sm:$0xf] %vm1447_vm8, %v14008_v0  ;;  %v18432_v52 = vld [vmem:[#allocation2 + $0x138] sm:$0xff]  ;;  %v3939_v25 = vsel %vm1205_vm6, %v3936_v26, %v3938_v4 }
 0x273   : > { %2816 = vst.msk [vmem:[#allocation4 + $0x100] sm:$0xf] %vm1785_vm9, %v2766_v7  ;;  %2815 = vst.msk [vmem:[#allocation4 + $0xf4] sm:$0xf] %vm1785_vm9, %v2764_v39  ;;  %4253 = vrot.lane.b32.xlu1 %v18243_v53, %s15974_s20  ;;  %v12799_v46 = vcombine.high %v3143_v45, %v3145_v21  ;;  %v12798_v11 = vcombine.low %v3143_v45, %v3145_v21  ;;  %v5210_v0 = vrot.slane %v18432_v52, 7  ;;  %v18435_v21 = vld [vmem:[#allocation2 + $0x170] sm:$0xff] }
 0x274   : > { %4973 = vst.msk [vmem:[#allocation4 + $0xdc] sm:$0xf] %vm1447_vm8, %v14103_v43  ;;  %4157 = vst.msk [vmem:[#allocation4 + $0xd8] sm:$0xf] %vm1447_vm8, %v14007_v38  ;;  %4251 = vrot.lane.b32.xlu0 %v17893_v56, %s15974_s20  ;;  %v21983_v56 = vrot.slane %v18426_v22, 7  ;;  %v21982_v28 = vrot.slane %v18435_v21, 7  ;;  %v3684_v43 = vpop.f32.mrf.mxu1  ;;  %v14009_v55 = vpack.c.bf16 %v3939_v25, %v3939_v25 }
 0x275   : > { %3625 = vmatprep.mubr.bf16.mxu0 %v12799_v46  ;;  %v2934_v49 = vpop.permute.xlu1 %2933  ;;  %v18443_v7 = vld [vmem:[%s21893_s5] ss:$0 sm:$0xff] }
 0x276   : > { %2984 = vst.msk [vmem:[#allocation4 + $0x100] sm:$0xf] %vm2146_vm10, %v2934_v49  ;;  %v2932_v53 = vpop.permute.xlu0 %2931  ;;  %3626 = vmatmul.mubr.bf16.gmra.mxu0 %v12798_v11  ;;  %v14682_v6 = vpop.f32.mrf.mxu0  ;;  %v3941_v46 = vsel %vm1205_vm6, %v3938_v4, %v21982_v28  ;;  %v5213_v34 = vsel %vm1205_vm6, %v5210_v0, %v21983_v56  ;;  %v15841_v56 = vld [vmem:[#allocation2 + $0x180] sm:$0xff] }
 0x277   : > { %2983 = vst.msk [vmem:[#allocation4 + $0xf4] sm:$0xf] %vm2146_vm10, %v2932_v53  ;;  %5069 = vrot.lane.b32.xlu1 %v18419_v14, %s15974_s20  ;;  %v14105_v51 = vpack.c.bf16 %v15841_v56, %v15841_v56  ;;  %v14010_v26 = vpack.c.bf16 %v3941_v46, %v3941_v46 }
 0x278   : > { %5067 = vrot.lane.b32.xlu0 %v18424_v15, %s15974_s20  ;;  %v14683_v38 = vpop.f32.mrf.mxu0 }
 0x279   : > { %v14684_v45 = vadd.f32 %v14683_v38, %v14682_v6  ;;  %v2410_v39 = vpop.permute.xlu1 %2409  ;;  %v22177_v6 = vrot.slane %v18359_v35, 7  ;;  %v18462_v38 = vpop.f32.mrf.mxu1 }
 0x27a   : > { %2458 = vst.msk [vmem:[#allocation4 + $0x118] sm:$0xf] %vm1616_vm7, %v2410_v39  ;;  %v2408_v11 = vpop.permute.xlu0 %2407  ;;  %v14685_v49 = vpop.f32.mrf.mxu0  ;;  %v15840_v39 = vld [vmem:[#allocation2 + $0x188] sm:$0xff] }
 0x27b   : > { %v3556_v53 = vadd.f32 %v14684_v45, %v18443_v7  ;;  %2457 = vst.msk [vmem:[#allocation4 + $0x10c] sm:$0xf] %vm1616_vm7, %v2408_v11  ;;  %4421 = vrot.lane.b32.xlu1 %v18346_v48, %s15975_s13  ;;  %v5211_v24 = vsel %vm1205_vm6, %v22177_v6, %v5210_v0  ;;  %v14106_v28 = vpack.c.bf16 %v15840_v39, %v15840_v39  ;;  %v15843_v39 = vld [vmem:[#allocation2 + $0x178] sm:$0xff] }
 0x27c   : > { %4419 = vrot.lane.b32.xlu0 %v18257_v62, %s15975_s13  ;;  %v14686_v1 = vpop.f32.mrf.mxu0  ;;  %v14142_v48 = vpack.c.bf16 %v5213_v34, %v5213_v34  ;;  %v14141_v6 = vpack.c.bf16 %v5211_v24, %v5211_v24 }
 0x27d   : > { %v3149_v4 = vld [vmem:[#allocation4 + $0xfc] sm:$0xff]  ;;  %v3685_v45 = vadd.f32 %v3684_v43, %v3556_v53  ;;  %v14687_v11 = vadd.f32 %v14686_v1, %v14685_v49  ;;  %v2770_v58 = vpop.permute.xlu1 %2769  ;;  %v3942_v1 = vrot.slane %v15843_v39, 7 }
 0x27e   : > { %4976 = vst.msk [vmem:[#allocation4 + $0x100] sm:$0xf] %vm1447_vm8, %v14106_v28  ;;  %v3147_v35 = vld [vmem:[#allocation4 + $0xf0] sm:$0xff]  ;;  %v2768_v0 = vpop.permute.xlu0 %2767  ;;  %4160 = vst.msk [vmem:[#allocation4 + $0xfc] sm:$0xf] %vm1447_vm8, %v14010_v26  ;;  %v3687_v28 = vpop.f32.mrf.mxu1 }
 0x27f   : > { %2818 = vst.msk [vmem:[#allocation4 + $0x118] sm:$0xf] %vm1785_vm9, %v2770_v58  ;;  %v3779_v62 = vmax.f32 %v3685_v45, 0.0  ;;  %v3559_v56 = vadd.f32 %v14687_v11, %v18443_v7  ;;  %2817 = vst.msk [vmem:[#allocation4 + $0x10c] sm:$0xf] %vm1785_vm9, %v2768_v0  ;;  %5429 = vrot.lane.b32.xlu1 %v14142_v48, %s15975_s13  ;;  %v12802_v43 = vcombine.high %v3147_v35, %v3149_v4  ;;  %v22178_v58 = vld [vmem:[#allocation10_spill] sm:$0xff] }
 0x280   : > { %4975 = vst.msk [vmem:[#allocation4 + $0xf4] sm:$0xf] %vm1447_vm8, %v14105_v51  ;;  %v12801_v46 = vcombine.low %v3147_v35, %v3149_v4  ;;  %4159 = vst.msk [vmem:[#allocation4 + $0xf0] sm:$0xf] %vm1447_vm8, %v14009_v55  ;;  %5427 = vrot.lane.b32.xlu0 %v14141_v6, %s15975_s13  ;;  %v15842_v51 = vld [vmem:[#allocation2 + $0x180] sm:$0xff]  ;;  %v22179_v55 = vld [vmem:[#allocation12_spill] sm:$0xff]  ;;  %v14166_v11 = vpack.c.bf16 %v18426_v22, %v18426_v22  ;;  %v14165_v0 = vpack.c.bf16 %v18432_v52, %v18432_v52 }
 0x281   : > { %v3803_v49 = vmul.f32 %v3779_v62, %v22178_v58  ;;  %v3688_v34 = vadd.f32 %v3687_v28, %v3559_v56  ;;  %3633 = vmatprep.mubr.bf16.mxu0 %v12802_v43  ;;  %v2938_v25 = vpop.permute.xlu1 %2937  ;;  %v3944_v53 = vrot.slane %v15842_v51, 7  ;;  %v4642_v6 = vrot.slane %v18287_v12, 1  ;;  %v15844_v62 = vld [vmem:[#allocation2 + $0x198] sm:$0xff]  ;;  %v15845_v28 = vld [vmem:[#allocation2 + $0x190] sm:$0xff] }
 0x282   : > { %2986 = vst.msk [vmem:[#allocation4 + $0x118] sm:$0xf] %vm2146_vm10, %v2938_v25  ;;  %v2936_v24 = vpop.permute.xlu0 %2935  ;;  %3634 = vmatmul.mubr.bf16.gmra.mxu0 %v12801_v46  ;;  %v14108_v56 = vpack.c.bf16 %v15844_v62, %v15844_v62  ;;  %v14107_v52 = vpack.c.bf16 %v15845_v28, %v15845_v28  ;;  %v22182_v62 = vrot.slane %v18426_v22, 7 }
 0x283   : > { %3827 = vst.msk [vmem:[#allocation3 + $0x20] sm:$0xff] %vm340_vm5, %v3803_v49  ;;  %v3780_v26 = vmax.f32 %v3688_v34, 0.0  ;;  %4781 = vrot.lane.b32.xlu1 %v18293_v13, %s15976_s24  ;;  %v3945_v48 = vsel %vm1205_vm6, %v3942_v1, %v3944_v53  ;;  %v22180_v13 = vrot.slane %v18435_v21, 7  ;;  %v4643_v51 = vsel %vm1278_vm4, %v17553_v57, %v4642_v6 }
 0x284   : > { %2985 = vst.msk [vmem:[#allocation4 + $0x10c] sm:$0xf] %vm2146_vm10, %v2936_v24  ;;  %4779 = vrot.lane.b32.xlu0 %v18159_v18, %s15976_s24  ;;  %v14012_v43 = vpack.c.bf16 %v3945_v48, %v3945_v48  ;;  %v14120_v57 = vpack.c.bf16 %v4643_v51, %v4643_v51 }
 0x285   : > { %v3804_v4 = vmul.f32 %v3780_v26, %v22179_v55  ;;  %v4238_v45 = vpop.permute.xlu1 %4237  ;;  %v3943_v18 = vsel %vm1205_vm6, %v22180_v13, %v3942_v1  ;;  %v15561_v1 = vld [vmem:[#allocation4 + $0x8] ss:$12 sps:$4 sm:$0xff]  }
 0x286   : > { %4308 = vst.msk [vmem:[#allocation4 + $0xc] sm:$0xf] %vm1616_vm7, %v4238_v45  ;;  %v4236_v35 = vpop.permute.xlu0 %4235  ;;  %v14011_v34 = vpack.c.bf16 %v3943_v18, %v3943_v18 }
 0x287   : > { %3828 = vst.msk [vmem:[#allocation3 + $0x28] sm:$0xff] %vm340_vm5, %v3804_v4  ;;  %5597 = vrot.lane.b32.xlu1 %v14166_v11, %s15976_s24  ;;  %v22181_v4 = vld [vmem:[#allocation79_spill] sm:$0xff] }
 0x288   : > { %4307 = vst.msk [vmem:[#allocation4] sm:$0xf] %vm1616_vm7, %v4236_v35  ;;  %5595 = vrot.lane.b32.xlu0 %v14165_v0, %s15976_s24  ;;  %v18515_v45 = vpack.c.bf16 %v22181_v4, %v22181_v4 }
 0x289   : > { %v3153_v46 = vld [vmem:[#allocation4 + $0x114] sm:$0xff]  ;;  %v5054_v49 = vpop.permute.xlu1 %5053 }
 0x28a   : > { %4978 = vst.msk [vmem:[#allocation4 + $0x118] sm:$0xf] %vm1447_vm8, %v14108_v56  ;;  %v5052_v25 = vpop.permute.xlu0 %5051  ;;  %4162 = vst.msk [vmem:[#allocation4 + $0x114] sm:$0xf] %vm1447_vm8, %v14012_v43 }
 0x28b   : > { %v3151_v21 = vld [vmem:[#allocation4 + $0x108] sm:$0xff]  ;;  %5124 = vst.msk [vmem:[#allocation4 + $0x10] sm:$0xf] %vm1616_vm7, %v5054_v49  ;;  %5123 = vst.msk [vmem:[#allocation4 + $0x4] sm:$0xf] %vm1616_vm7, %v5052_v25  ;;  %4257 = vrot.lane.b32.xlu1 %v18024_v16, %s15974_s20  ;;  %v18517_v16 = vld [vmem:[#allocation2 + $0x148] sm:$0xff] }
 0x28c   : > { %4977 = vst.msk [vmem:[#allocation4 + $0x10c] sm:$0xf] %vm1447_vm8, %v14107_v52  ;;  %v12805_v53 = vcombine.high %v3151_v21, %v3153_v46  ;;  %v12804_v24 = vcombine.low %v3151_v21, %v3153_v46  ;;  %4161 = vst.msk [vmem:[#allocation4 + $0x108] sm:$0xf] %vm1447_vm8, %v14011_v34  ;;  %4255 = vrot.lane.b32.xlu0 %v17990_v44, %s15974_s20  ;;  %v5214_v11 = vrot.slane %v18517_v16, 7  ;;  %v18525_v44 = vld [vmem:[#allocation2 + $0x150] sm:$0xff] }
 0x28d   : > { %v4406_v39 = vpop.permute.xlu1 %4405  ;;  %v5216_v48 = vrot.slane %v18525_v44, 7  ;;  %v15566_v46 = vld [vmem:[#allocation4 + $0x20] ss:$12 sps:$4 sm:$0xff]   ;;  %v15568_v49 = vld [vmem:[#allocation4 + $0x38] ss:$12 sps:$4 sm:$0xff]  }
 0x28e   : > { %3641 = vmatprep.mubr.bf16.mxu0 %v12805_v53  ;;  %4476 = vst.msk [vmem:[#allocation4 + $0xc] sm:$0xf] %vm1785_vm9, %v4406_v39  ;;  %v4404_v26 = vpop.permute.xlu0 %4403  ;;  %v5215_v56 = vsel %vm1205_vm6, %v22182_v62, %v5214_v11 }
 0x28f   : > { %3642 = vmatmul.mubr.bf16.gmra.mxu0 %v12804_v24  ;;  %4475 = vst.msk [vmem:[#allocation4] sm:$0xf] %vm1785_vm9, %v4404_v26  ;;  %5073 = vrot.lane.b32.xlu1 %v14120_v57, %s15974_s20  ;;  %v5217_v18 = vsel %vm1205_vm6, %v5214_v11, %v5216_v48 }
 0x290   : > { %15342 = vmatprep.mubr.msk.bf16.mxu0 %vm332_vm3, %v15561_v1  ;;  %5071 = vrot.lane.b32.xlu0 %v18515_v45, %s15974_s20  ;;  %v14144_v34 = vpack.c.bf16 %v5217_v18, %v5217_v18 }
 0x291   : > { %v5414_v35 = vpop.permute.xlu1 %5413  ;;  %v14688_v13 = vpop.f32.mrf.mxu0 }
 0x292   : > { %5484 = vst.msk [vmem:[#allocation4 + $0x10] sm:$0xf] %vm1785_vm9, %v5414_v35  ;;  %v5412_v0 = vpop.permute.xlu0 %5411 }
 0x293   : > { %5483 = vst.msk [vmem:[#allocation4 + $0x4] sm:$0xf] %vm1785_vm9, %v5412_v0  ;;  %4425 = vrot.lane.b32.xlu1 %v18424_v15, %s15975_s13  ;;  %v14689_v43 = vpop.f32.mrf.mxu0  ;;  %v14143_v15 = vpack.c.bf16 %v5215_v56, %v5215_v56  ;;  %v22183_v0 = vld [vmem:[#allocation9_spill] sm:$0xff] }
 0x294   : > { %4423 = vrot.lane.b32.xlu0 %v18338_v59, %s15975_s13  ;;  %v14690_v28 = vadd.f32 %v14689_v43, %v14688_v13  ;;  %v18546_v59 = vpop.f32.mrf.mxu1  ;;  %v15574_v43 = vld [vmem:[#allocation4 + $0x68] ss:$12 sps:$4 sm:$0xff]  }
 0x295   : > { %v4766_v52 = vpop.permute.xlu1 %4765  ;;  %v14691_v25 = vpop.f32.mrf.mxu0 }
 0x296   : > { %4836 = vst.msk [vmem:[#allocation4 + $0xc] sm:$0xf] %vm2146_vm10, %v4766_v52  ;;  %v4764_v21 = vpop.permute.xlu0 %4763  ;;  %v3564_v22 = vadd.f32 %v14690_v28, %v18443_v7  ;;  %v3700_v11 = vpop.f32.mrf.mxu1 }
 0x297   : > { %15343 = vmatmul.mubr.msk.bf16.vlgmr.msra.gmra.mxu0 %vm332_vm3, %v15566_v46  ;;  %4835 = vst.msk [vmem:[#allocation4] sm:$0xf] %vm2146_vm10, %v4764_v21  ;;  %5433 = vrot.lane.b32.xlu1 %v14144_v34, %s15975_s13  ;;  %v14692_v51 = vpop.f32.mrf.mxu0  ;;  %v14168_v46 = vpack.c.bf16 %v18525_v44, %v18525_v44  ;;  %v22184_v21 = vld [vmem:[#allocation11_spill] sm:$0xff] }
 0x298   : > { %15346 = vmatprep.mubr.msk.bf16.mxu0 %vm332_vm3, %v15568_v49  ;;  %5431 = vrot.lane.b32.xlu0 %v14143_v15, %s15975_s13  ;;  %v3693_v53 = vadd.f32 %v18413_v31, %v3564_v22  ;;  %v14693_v24 = vadd.f32 %v14692_v51, %v14691_v25  ;;  %v15572_v31 = vld [vmem:[#allocation4 + $0x50] ss:$12 sps:$4 sm:$0xff]   ;;  %v18570_v49 = vpop.f32.mrf.mxu1 }
 0x299   : > { %v5582_v39 = vpop.permute.xlu1 %5581 }
 0x29a   : > { %5652 = vst.msk [vmem:[#allocation4 + $0x10] sm:$0xf] %vm2146_vm10, %v5582_v39  ;;  %v5580_v1 = vpop.permute.xlu0 %5579  ;;  %v3781_v26 = vmax.f32 %v3693_v53, 0.0  ;;  %v3567_v4 = vadd.f32 %v14693_v24, %v18443_v7 }
 0x29b   : > { %5651 = vst.msk [vmem:[#allocation4 + $0x4] sm:$0xf] %vm2146_vm10, %v5580_v1  ;;  %4785 = vrot.lane.b32.xlu1 %v18324_v19, %s15976_s24 }
 0x29c   : > { %4783 = vrot.lane.b32.xlu0 %v18285_v5, %s15976_s24  ;;  %v3805_v13 = vmul.f32 %v3781_v26, %v22183_v0  ;;  %v3696_v18 = vadd.f32 %v18462_v38, %v3567_v4  ;;  %v14167_v5 = vpack.c.bf16 %v18517_v16, %v18517_v16 }
 0x29d   : > { %v4242_v56 = vpop.permute.xlu1 %4241 }
 0x29e   : > { %4310 = vst.msk [vmem:[#allocation4 + $0x24] sm:$0xf] %vm1616_vm7, %v4242_v56  ;;  %v4240_v28 = vpop.permute.xlu0 %4239  ;;  %v3782_v52 = vmax.f32 %v3696_v18, 0.0  ;;  %v15577_v53 = vld [vmem:[#allocation4] ss:$12 sps:$4 sm:$0xff]  }
 0x29f   : > { %v14694_v57 = vpop.f32.mrf.mxu0  ;;  %15347 = vmatmul.mubr.msk.bf16.gmra.mxu0 %vm332_vm3, %v15572_v31  ;;  %3829 = vst.msk [vmem:[#allocation3 + $0x30] sm:$0xff] %vm340_vm5, %v3805_v13  ;;  %5601 = vrot.lane.b32.xlu1 %v14168_v46, %s15976_s24  ;;  %v22187_v31 = vld [vmem:[#allocation14_spill] sm:$0xff]  ;;  %v15581_v56 = vld [vmem:[#allocation4 + $0x98] ss:$12 sps:$4 sm:$0xff]   ;;  %v18592_v46 = vld [vmem:[#allocation2 + $0x160] sm:$0xff] }
 0x2a0   : > { %4309 = vst.msk [vmem:[#allocation4 + $0x18] sm:$0xf] %vm1616_vm7, %v4240_v28  ;;  %15350 = vmatprep.mubr.msk.bf16.mxu0 %vm332_vm3, %v15574_v43  ;;  %5599 = vrot.lane.b32.xlu0 %v14167_v5, %s15976_s24  ;;  %v3806_v25 = vmul.f32 %v3782_v52, %v22184_v21  ;;  %v22188_v43 = vld [vmem:[#allocation85_spill] sm:$0xff] }
 0x2a1   : > { %v14695_v35 = vpop.f32.mrf.mxu0  ;;  %v5058_v22 = vpop.permute.xlu1 %5057  ;;  %v22189_v52 = vld [vmem:[#allocation13_spill] sm:$0xff] }
 0x2a2   : > { %v14696_v62 = vadd.f32 %v14695_v35, %v14694_v57  ;;  %5126 = vst.msk [vmem:[#allocation4 + $0x28] sm:$0xf] %vm1616_vm7, %v5058_v22  ;;  %v5056_v51 = vpop.permute.xlu0 %5055  ;;  %v15579_v24 = vld [vmem:[#allocation4 + $0x4] ss:$12 sps:$4 sm:$0xff]   ;;  %v22185_v57 = vld [vmem:[#allocation82_spill] sm:$0xff] }
 0x2a3   : > { %v14697_v19 = vpop.f32.mrf.mxu0  ;;  %3830 = vst.msk [vmem:[#allocation3 + $0x38] sm:$0xff] %vm340_vm5, %v3806_v25  ;;  %4261 = vrot.lane.b32.xlu1 %v18151_v8, %s15974_s20  ;;  %v22186_v26 = vrot.slane %v22185_v57, 1  ;;  %6235 = vmatprep.mubr.bf16.mxu1 %v15579_v24  ;;  %v15580_v35 = vld [vmem:[#allocation4 + $0x80] ss:$12 sps:$4 sm:$0xff]   ;;  %v14122_v8 = vpack.c.bf16 %v22188_v43, %v22188_v43  ;;  %v15582_v22 = vld [vmem:[#allocation4 + $0xb0] ss:$12 sps:$4 sm:$0xff]   ;;  %v14028_v43 = vpack.c.bf16 %v18305_v27, %v18305_v27 }
 0x2a4   : > { %v3572_v38 = vadd.f32 %v14696_v62, %v18443_v7  ;;  %5125 = vst.msk [vmem:[#allocation4 + $0x1c] sm:$0xf] %vm1616_vm7, %v5056_v51  ;;  %4259 = vrot.lane.b32.xlu0 %v18028_v41, %s15974_s20  ;;  %6236 = vmatmul.mubr.bf16.vlgmr.msra.gmra.mxu1 %v15577_v53  ;;  %v5220_v41 = vrot.slane %v18592_v46, 7  ;;  %v15583_v53 = vld [vmem:[#allocation4 + $0xc8] ss:$12 sps:$4 sm:$0xff]  }
 0x2a5   : > { %v14698_v34 = vpop.f32.mrf.mxu0  ;;  %v4645_v4 = vsel %vm1278_vm4, %v4642_v6, %v22186_v26  ;;  %v4410_v62 = vpop.permute.xlu1 %4409  ;;  %v22191_v57 = vld [vmem:[#allocation86_spill] sm:$0xff] }
 0x2a6   : > { %v3701_v15 = vadd.f32 %v3700_v11, %v3572_v38  ;;  %v14699_v16 = vadd.f32 %v14698_v34, %v14697_v19  ;;  %v3703_v11 = vpop.f32.mrf.mxu1  ;;  %4478 = vst.msk [vmem:[#allocation4 + $0x24] sm:$0xf] %vm1785_vm9, %v4410_v62  ;;  %v4408_v12 = vpop.permute.xlu0 %4407  ;;  %v14121_v6 = vpack.c.bf16 %v4645_v4, %v4645_v4  ;;  %v15849_v19 = vld [vmem:[#allocation2 + $0x158] sm:$0xff]  ;;  %v14073_v26 = vpack.c.bf16 %v22191_v57, %v22191_v57 }
 0x2a7   : > { %15351 = vmatmul.mubr.msk.bf16.gmra.mxu0 %vm332_vm3, %v15580_v35  ;;  %4477 = vst.msk [vmem:[#allocation4 + $0x18] sm:$0xf] %vm1785_vm9, %v4408_v12  ;;  %5077 = vrot.lane.b32.xlu1 %v14122_v8, %s15974_s20  ;;  %v5218_v5 = vrot.slane %v15849_v19, 7  ;;  %v15584_v4 = vld [vmem:[#allocation4 + $0xe0] ss:$12 sps:$4 sm:$0xff]   ;;  %v14169_v62 = vpack.c.bf16 %v15849_v19, %v15849_v19 }
 0x2a8   : > { %v3783_v39 = vmax.f32 %v3701_v15, 0.0  ;;  %v3575_v1 = vadd.f32 %v14699_v16, %v18443_v7  ;;  %15354 = vmatprep.mubr.msk.bf16.mxu0 %vm332_vm3, %v15581_v56  ;;  %5075 = vrot.lane.b32.xlu0 %v14121_v6, %s15974_s20  ;;  %v15585_v35 = vld [vmem:[#allocation4 + $0xf8] ss:$12 sps:$4 sm:$0xff]  }
 0x2a9   : > { %v5418_v34 = vpop.permute.xlu1 %5417  ;;  %v5221_v15 = vsel %vm1205_vm6, %v5218_v5, %v5220_v41  ;;  %v5219_v16 = vsel %vm1205_vm6, %v5216_v48, %v5218_v5  ;;  %v7135_v5 = vld [vmem:[#allocation3 + $0x20] sm:$0xff] }
 0x2aa   : > { %v3807_v13 = vmul.f32 %v3783_v39, %v22187_v31  ;;  %v3704_v18 = vadd.f32 %v3703_v11, %v3575_v1  ;;  %5486 = vst.msk [vmem:[#allocation4 + $0x28] sm:$0xf] %vm1785_vm9, %v5418_v34  ;;  %v5416_v25 = vpop.permute.xlu0 %5415  ;;  %v14146_v24 = vpack.c.bf16 %v5221_v15, %v5221_v15  ;;  %v14145_v1 = vpack.c.bf16 %v5219_v16, %v5219_v16  ;;  %v18646_v34 = vld [vmem:[#allocation3 + $0x28] sm:$0xff] }
 0x2ab   : > { %5485 = vst.msk [vmem:[#allocation4 + $0x1c] sm:$0xf] %vm1785_vm9, %v5416_v25  ;;  %4429 = vrot.lane.b32.xlu1 %v18515_v45, %s15975_s13  ;;  %v14124_v15 = vpack.c.bf16 %v17640_v29, %v17640_v29  ;;  %v18650_v16 = vrot.slane %v7135_v5, 7 }
 0x2ac   : > { %3831 = vst.msk [vmem:[#allocation3 + $0x40] sm:$0xff] %vm340_vm5, %v3807_v13  ;;  %v3784_v28 = vmax.f32 %v3704_v18, 0.0  ;;  %4427 = vrot.lane.b32.xlu0 %v18419_v14, %s15975_s13  ;;  %v22190_v14 = vld [vmem:[#allocation38_spill] sm:$0xff]  ;;  %v14170_v13 = vpack.c.bf16 %v18592_v46, %v18592_v46 }
 0x2ad   : > { %v4770_v51 = vpop.permute.xlu1 %4769  ;;  %v14074_v44 = vpack.c.bf16 %v22190_v14, %v22190_v14 }
 0x2ae   : > { %v3808_v38 = vmul.f32 %v3784_v28, %v22189_v52  ;;  %4838 = vst.msk [vmem:[#allocation4 + $0x24] sm:$0xf] %vm2146_vm10, %v4770_v51  ;;  %v4768_v39 = vpop.permute.xlu0 %4767 }
 0x2af   : > { %15355 = vmatmul.mubr.msk.bf16.gmra.mxu0 %vm332_vm3, %v15582_v22  ;;  %4837 = vst.msk [vmem:[#allocation4 + $0x18] sm:$0xf] %vm2146_vm10, %v4768_v39  ;;  %5437 = vrot.lane.b32.xlu1 %v14146_v24, %s15975_s13  ;;  %v7184_v22 = vrot.slane %v18646_v34, 7  ;;  %v18656_v24 = vld [vmem:[#allocation2 + $0x170] sm:$0xff] }
 0x2b0   : > { %3832 = vst.msk [vmem:[#allocation3 + $0x48] sm:$0xff] %vm340_vm5, %v3808_v38  ;;  %15358 = vmatprep.mubr.msk.bf16.mxu0 %vm332_vm3, %v15583_v53  ;;  %5435 = vrot.lane.b32.xlu0 %v14145_v1, %s15975_s13  ;;  %v18643_v38 = vld [vmem:[#allocation2 + $0x168] sm:$0xff]  ;;  %v14123_v53 = vpack.c.bf16 %v17629_v20, %v17629_v20  ;;  %v5224_v39 = vrot.slane %v18656_v24, 7  ;;  %v18667_v1 = vld [vmem:[#allocation3 + $0x18] sm:$0xff]  ;;  %v22192_v20 = vld [vmem:[#allocation87_spill] sm:$0xff] }
 0x2b1   : > { %v5586_v45 = vpop.permute.xlu1 %5585  ;;  %v5222_v27 = vrot.slane %v18643_v38, 7  ;;  %v18665_v29 = vsel %vm1205_vm6, %v18650_v16, %v7184_v22  ;;  %v14052_v14 = vpack.c.bf16 %v22192_v20, %v22192_v20 }
 0x2b2   : > { %5654 = vst.msk [vmem:[#allocation4 + $0x28] sm:$0xf] %vm2146_vm10, %v5586_v45  ;;  %v5584_v48 = vpop.permute.xlu0 %5583 }
 0x2b3   : > { %5653 = vst.msk [vmem:[#allocation4 + $0x1c] sm:$0xf] %vm2146_vm10, %v5584_v48  ;;  %4789 = vrot.lane.b32.xlu1 %v14074_v44, %s15976_s24  ;;  %v5225_v44 = vsel %vm1205_vm6, %v5222_v27, %v5224_v39 }
 0x2b4   : > { %4787 = vrot.lane.b32.xlu0 %v14073_v26, %s15976_s24  ;;  %v14301_v26 = vpack.c.bf16 %v7135_v5, %v7135_v5 }
 0x2b5   : > { %v4246_v11 = vpop.permute.xlu1 %4245 }
 0x2b6   : > { %4312 = vst.msk [vmem:[#allocation4 + $0x3c] sm:$0xf] %vm1616_vm7, %v4246_v11  ;;  %v4244_v18 = vpop.permute.xlu0 %4243 }
 0x2b7   : > { %15359 = vmatmul.mubr.msk.bf16.gmra.mxu0 %vm332_vm3, %v15584_v4  ;;  %4311 = vst.msk [vmem:[#allocation4 + $0x30] sm:$0xf] %vm1616_vm7, %v4244_v18  ;;  %5605 = vrot.lane.b32.xlu1 %v14170_v13, %s15976_s24  ;;  %v21985_v4 = vrot.slane %v18667_v1, 7  ;;  %v22193_v13 = vld [vmem:[#allocation39_spill] sm:$0xff] }
 0x2b8   : > { %15362 = vmatprep.mubr.msk.bf16.mxu0 %vm332_vm3, %v15585_v35  ;;  %5603 = vrot.lane.b32.xlu0 %v14169_v62, %s15976_s24  ;;  %v14051_v18 = vpack.c.bf16 %v22193_v13, %v22193_v13  ;;  %v21986_v62 = vrot.slane %v18667_v1, 1  ;;  %7591 = vst.msk [vmem:[#allocation5 + $0x8] sm:$0xf] %vm6821_vm11, %v14301_v26 }
 0x2b9   : > { %v5062_v56 = vpop.permute.xlu1 %5061  ;;  %v5801_v8 = vld [vmem:[#allocation4 + $0x24] sm:$0xff]  ;;  %v6587_v46 = vsel %vm1205_vm6, %v21985_v4, %v18650_v16 }
 0x2ba   : > { %5128 = vst.msk [vmem:[#allocation4 + $0x40] sm:$0xf] %vm1616_vm7, %v5062_v56  ;;  %v5060_v12 = vpop.permute.xlu0 %5059  ;;  %v5799_v6 = vld [vmem:[#allocation4 + $0x18] sm:$0xff]  ;;  %v6658_v56 = vrot.slane %v7135_v5, 1  ;;  %v14302_v5 = vpack.c.bf16 %v18646_v34, %v18646_v34  ;;  %v19189_v4 = vld [vmem:[#allocation2 + $0x1b0] sm:$0xff] }
 0x2bb   : > { %v15586_v28 = vld [vmem:[#allocation4 + $0x1c] ss:$12 sps:$4 sm:$0xff]   ;;  %5127 = vst.msk [vmem:[#allocation4 + $0x34] sm:$0xf] %vm1616_vm7, %v5060_v12  ;;  %4265 = vrot.lane.b32.xlu1 %v14028_v43, %s15974_s20  ;;  %v13056_v19 = vcombine.low %v5799_v6, %v5801_v8  ;;  %v5223_v8 = vsel %vm1205_vm6, %v5220_v41, %v5222_v27  ;;  %v7256_v12 = vrot.slane %v18646_v34, 1  ;;  %v18688_v6 = vpop.f32.mrf.mxu1 }
 0x2bc   : > { %4263 = vrot.lane.b32.xlu0 %v18155_v47, %s15974_s20  ;;  %6243 = vmatprep.mubr.bf16.mxu1 %v15586_v28  ;;  %7592 = vst.msk [vmem:[#allocation5 + $0x1c] sm:$0xf] %vm6821_vm11, %v14302_v5  ;;  %v6659_v20 = vsel %vm1278_vm4, %v21986_v62, %v6658_v56 }
 0x2bd   : > { %v4414_v25 = vpop.permute.xlu1 %4413  ;;  %6244 = vmatmul.mubr.bf16.gmra.mxu1 %v13056_v19  ;;  %v14700_v47 = vpop.f32.mrf.mxu0  ;;  %v14148_v19 = vpack.c.bf16 %v5225_v44, %v5225_v44 }
 0x2be   : > { %4480 = vst.msk [vmem:[#allocation4 + $0x3c] sm:$0xf] %vm1785_vm9, %v4414_v25  ;;  %v4412_v51 = vpop.permute.xlu0 %4411 }
 0x2bf   : > { %4479 = vst.msk [vmem:[#allocation4 + $0x30] sm:$0xf] %vm1785_vm9, %v4412_v51  ;;  %5081 = vrot.lane.b32.xlu1 %v14124_v15, %s15974_s20  ;;  %v14701_v45 = vpop.f32.mrf.mxu0  ;;  %v7257_v15 = vsel %vm1278_vm4, %v6658_v56, %v7256_v12  ;;  %v14208_v51 = vpack.c.bf16 %v6587_v46, %v6587_v46 }
 0x2c0   : > { %5079 = vrot.lane.b32.xlu0 %v14123_v53, %s15974_s20  ;;  %v14702_v48 = vadd.f32 %v14701_v45, %v14700_v47  ;;  %v14147_v45 = vpack.c.bf16 %v5223_v8, %v5223_v8  ;;  %v18714_v26 = vpack.c.bf16 %v7257_v15, %v7257_v15  ;;  %v22194_v8 = vld [vmem:[#allocation16_spill] sm:$0xff] }
 0x2c1   : > { %v5422_v57 = vpop.permute.xlu1 %5421  ;;  %v14703_v35 = vpop.f32.mrf.mxu0  ;;  %6825 = vst.msk [vmem:[#allocation5 + $0x3c] sm:$0xf] %vm6821_vm11, %v14208_v51  ;;  %v22196_v51 = vld [vmem:[#allocation88_spill] sm:$0xff] }
 0x2c2   : > { %5488 = vst.msk [vmem:[#allocation4 + $0x40] sm:$0xf] %vm1785_vm9, %v5422_v57  ;;  %v5420_v11 = vpop.permute.xlu0 %5419  ;;  %v3580_v43 = vadd.f32 %v14702_v48, %v18443_v7  ;;  %v18709_v48 = vld [vmem:[#allocation3 + $0x38] sm:$0xff]  ;;  %v18711_v57 = vld [vmem:[#allocation3 + $0x40] sm:$0xff] }
 0x2c3   : > { %5487 = vst.msk [vmem:[#allocation4 + $0x34] sm:$0xf] %vm1785_vm9, %v5420_v11  ;;  %4433 = vrot.lane.b32.xlu1 %v14052_v14, %s15975_s13  ;;  %v14704_v28 = vpop.f32.mrf.mxu0  ;;  %v14255_v11 = vpack.c.bf16 %v6659_v20, %v6659_v20  ;;  %v7903_v56 = vrot.slane %v18709_v48, 1 }
 0x2c4   : > { %4431 = vrot.lane.b32.xlu0 %v14051_v18, %s15975_s13  ;;  %v3709_v41 = vadd.f32 %v18546_v59, %v3580_v43  ;;  %v14705_v27 = vadd.f32 %v14704_v28, %v14703_v35  ;;  %v18707_v59 = vld [vmem:[#allocation3 + $0x30] sm:$0xff]  ;;  %v3716_v35 = vpop.f32.mrf.mxu1  ;;  %v7904_v43 = vrot.slane %v18711_v57, 1  ;;  %7114 = vst.msk [vmem:[#allocation5 + $0x40] sm:$0xf] %vm6821_vm11, %v18714_v26 }
 0x2c5   : > { %v4774_v25 = vpop.permute.xlu1 %4773  ;;  %v14706_v53 = vpop.f32.mrf.mxu0  ;;  %v7258_v18 = vrot.slane %v18707_v59, 1  ;;  %7113 = vst.msk [vmem:[#allocation5 + $0x2c] sm:$0xf] %vm6821_vm11, %v14255_v11  ;;  %v18749_v11 = vpack.c.bf16 %v18665_v29, %v18665_v29 }
 0x2c6   : > { %4840 = vst.msk [vmem:[#allocation4 + $0x3c] sm:$0xf] %vm2146_vm10, %v4774_v25  ;;  %v4772_v47 = vpop.permute.xlu0 %4771  ;;  %v3785_v14 = vmax.f32 %v3709_v41, 0.0  ;;  %v3583_v44 = vadd.f32 %v14705_v27, %v18443_v7  ;;  %v22195_v41 = vld [vmem:[#allocation89_spill] sm:$0xff] }
 0x2c7   : > { %4839 = vst.msk [vmem:[#allocation4 + $0x30] sm:$0xf] %vm2146_vm10, %v4772_v47  ;;  %5441 = vrot.lane.b32.xlu1 %v14148_v19, %s15975_s13  ;;  %v14707_v13 = vpop.f32.mrf.mxu0  ;;  %v14076_v27 = vpack.c.bf16 %v22195_v41, %v22195_v41  ;;  %v14075_v47 = vpack.c.bf16 %v22196_v51, %v22196_v51  ;;  %v14172_v41 = vpack.c.bf16 %v18656_v24, %v18656_v24  ;;  %v22198_v51 = vld [vmem:[#allocation18_spill] sm:$0xff] }
 0x2c8   : > { %5439 = vrot.lane.b32.xlu0 %v14147_v45, %s15975_s13  ;;  %v3809_v28 = vmul.f32 %v3785_v14, %v22194_v8  ;;  %v3712_v19 = vadd.f32 %v18570_v49, %v3583_v44  ;;  %v14708_v5 = vadd.f32 %v14707_v13, %v14706_v53  ;;  %v18733_v49 = vsel %vm1278_vm4, %v7256_v12, %v7258_v18  ;;  %v18744_v44 = vpop.f32.mrf.mxu1  ;;  %v22197_v13 = vld [vmem:[#allocation15_spill] sm:$0xff] }
 0x2c9   : > { %v5590_v46 = vpop.permute.xlu1 %5589  ;;  %v14709_v15 = vpop.f32.mrf.mxu0  ;;  %v7905_v53 = vsel %vm1278_vm4, %v7903_v56, %v7904_v43  ;;  %6826 = vst.msk [vmem:[#allocation5 + $0x50] sm:$0xf] %vm6821_vm11, %v18749_v11 }
 0x2ca   : > { %5656 = vst.msk [vmem:[#allocation4 + $0x40] sm:$0xf] %vm2146_vm10, %v5590_v46  ;;  %v5588_v25 = vpop.permute.xlu0 %5587  ;;  %v3786_v45 = vmax.f32 %v3712_v19, 0.0  ;;  %v3588_v20 = vadd.f32 %v14708_v5, %v18443_v7  ;;  %v18742_v14 = vpack.c.bf16 %v7905_v53, %v7905_v53 }
 0x2cb   : > { %3833 = vst.msk [vmem:[#allocation3 + $0x50] sm:$0xff] %vm340_vm5, %v3809_v28  ;;  %4793 = vrot.lane.b32.xlu1 %v14076_v27, %s15976_s24  ;;  %v14710_v12 = vpop.f32.mrf.mxu0 }
 0x2cc   : > { %5655 = vst.msk [vmem:[#allocation4 + $0x34] sm:$0xf] %vm2146_vm10, %v5588_v25  ;;  %4791 = vrot.lane.b32.xlu0 %v14075_v47, %s15976_s24  ;;  %v3810_v28 = vmul.f32 %v3786_v45, %v22197_v13  ;;  %v3717_v19 = vadd.f32 %v3716_v35, %v3588_v20  ;;  %v14711_v46 = vadd.f32 %v14710_v12, %v14709_v15  ;;  %v3719_v15 = vpop.f32.mrf.mxu1 }
 0x2cd   : > { %v4250_v5 = vpop.permute.xlu1 %4249  ;;  %8359 = vst.msk [vmem:[#allocation5 + $0x10] sm:$0xf] %vm6821_vm11, %v18742_v14  ;;  %v14171_v25 = vpack.c.bf16 %v18643_v38, %v18643_v38  ;;  %v14030_v38 = vpack.c.bf16 %v18354_v32, %v18354_v32  ;;  %v18777_v32 = vrot.slane %v18709_v48, 7  ;;  %7117 = vst.msk [vmem:[#allocation5 + $0x7c] sm:$0xf] %vm6821_vm11, %v18742_v14 }
 0x2ce   : > { %4314 = vst.msk [vmem:[#allocation4 + $0x54] sm:$0xf] %vm1616_vm7, %v4250_v5  ;;  %v4248_v27 = vpop.permute.xlu0 %4247  ;;  %v3787_v29 = vmax.f32 %v3717_v19, 0.0  ;;  %v3591_v35 = vadd.f32 %v14711_v46, %v18443_v7  ;;  %v14029_v7 = vpack.c.bf16 %v18340_v54, %v18340_v54  ;;  %v18783_v54 = vsel %vm1278_vm4, %v7258_v18, %v7903_v56  ;;  %v18798_v56 = vld [vmem:[#allocation2 + $0x180] sm:$0xff] }
 0x2cf   : > { %3834 = vst.msk [vmem:[#allocation3 + $0x58] sm:$0xff] %vm340_vm5, %v3810_v28  ;;  %5609 = vrot.lane.b32.xlu1 %v14172_v41, %s15976_s24  ;;  %v7186_v41 = vrot.slane %v18707_v59, 7  ;;  %v14125_v18 = vpack.c.bf16 %v17676_v33, %v17676_v33  ;;  %v14054_v33 = vpack.c.bf16 %v17682_v9, %v17682_v9  ;;  %v18823_v9 = vld [vmem:[#allocation3 + $0x48] sm:$0xff] }
 0x2d0   : > { %4313 = vst.msk [vmem:[#allocation4 + $0x48] sm:$0xf] %vm1616_vm7, %v4248_v27  ;;  %5607 = vrot.lane.b32.xlu0 %v14171_v25, %s15976_s24  ;;  %v3811_v47 = vmul.f32 %v3787_v29, %v22198_v51  ;;  %v3720_v53 = vadd.f32 %v3719_v15, %v3591_v35  ;;  %v22199_v27 = vld [vmem:[#allocation17_spill] sm:$0xff]  ;;  %v14126_v35 = vpack.c.bf16 %v17673_v17, %v17673_v17  ;;  %v18804_v17 = vld [vmem:[#allocation2 + $0x178] sm:$0xff] }
 0x2d1   : > { %v5066_v45 = vpop.permute.xlu1 %5065  ;;  %v5805_v20 = vld [vmem:[#allocation4 + $0x3c] sm:$0xff]  ;;  %v18790_v15 = vsel %vm1205_vm6, %v7186_v41, %v18777_v32  ;;  %v5226_v34 = vrot.slane %v18804_v17, 7 }
 0x2d2   : > { %5130 = vst.msk [vmem:[#allocation4 + $0x58] sm:$0xf] %vm1616_vm7, %v5066_v45  ;;  %v5064_v12 = vpop.permute.xlu0 %5063  ;;  %v3788_v46 = vmax.f32 %v3720_v53, 0.0  ;;  %v5228_v45 = vrot.slane %v18798_v56, 7 }
 0x2d3   : > { %v5803_v28 = vld [vmem:[#allocation4 + $0x30] sm:$0xff]  ;;  %3835 = vst.msk [vmem:[#allocation3 + $0x60] sm:$0xff] %vm340_vm5, %v3811_v47  ;;  %4269 = vrot.lane.b32.xlu1 %v14030_v38, %s15974_s20  ;;  %v7187_v47 = vsel %vm1205_vm6, %v7184_v22, %v7186_v41  ;;  %v14303_v41 = vpack.c.bf16 %v18707_v59, %v18707_v59  ;;  %v7190_v59 = vrot.slane %v18711_v57, 7 }
 0x2d4   : > { %v15588_v19 = vld [vmem:[#allocation4 + $0x34] ss:$12 sps:$4 sm:$0xff]   ;;  %5129 = vst.msk [vmem:[#allocation4 + $0x4c] sm:$0xf] %vm1616_vm7, %v5064_v12  ;;  %v13059_v5 = vcombine.low %v5803_v28, %v5805_v20  ;;  %4267 = vrot.lane.b32.xlu0 %v14029_v7, %s15974_s20  ;;  %v3812_v25 = vmul.f32 %v3788_v46, %v22199_v27  ;;  %v14053_v20 = vpack.c.bf16 %v17669_v36, %v17669_v36  ;;  %v18821_v28 = vld [vmem:[#allocation3 + $0x50] sm:$0xff] }
 0x2d5   : > { %6251 = vmatprep.mubr.bf16.mxu1 %v15588_v19  ;;  %v4418_v29 = vpop.permute.xlu1 %4417  ;;  %v5229_v12 = vsel %vm1205_vm6, %v5226_v34, %v5228_v45  ;;  %v5227_v7 = vsel %vm1205_vm6, %v5224_v39, %v5226_v34  ;;  %v7908_v36 = vrot.slane %v18821_v28, 1  ;;  %v7906_v19 = vrot.slane %v18823_v9, 1  ;;  %7593 = vst.msk [vmem:[#allocation5 + $0x30] sm:$0xf] %vm6821_vm11, %v14303_v41 }
 0x2d6   : > { %6252 = vmatmul.mubr.bf16.gmra.mxu1 %v13059_v5  ;;  %4482 = vst.msk [vmem:[#allocation4 + $0x54] sm:$0xf] %vm1785_vm9, %v4418_v29  ;;  %v4416_v53 = vpop.permute.xlu0 %4415  ;;  %v14150_v5 = vpack.c.bf16 %v5229_v12, %v5229_v12  ;;  %v18845_v34 = vld [vmem:[#allocation3 + $0x58] sm:$0xff] }
 0x2d7   : > { %3836 = vst.msk [vmem:[#allocation3 + $0x68] sm:$0xff] %vm340_vm5, %v3812_v25  ;;  %5085 = vrot.lane.b32.xlu1 %v14126_v35, %s15974_s20  ;;  %v14149_v25 = vpack.c.bf16 %v5227_v7, %v5227_v7  ;;  %v7907_v39 = vsel %vm1278_vm4, %v7904_v43, %v7906_v19  ;;  %v7909_v29 = vsel %vm1278_vm4, %v7906_v19, %v7908_v36  ;;  %v7910_v7 = vrot.slane %v18845_v34, 1  ;;  %v22200_v19 = vld [vmem:[#allocation35_spill] sm:$0xff] }
 0x2d8   : > { %4481 = vst.msk [vmem:[#allocation4 + $0x48] sm:$0xf] %vm1785_vm9, %v4416_v53  ;;  %5083 = vrot.lane.b32.xlu0 %v14125_v18, %s15974_s20  ;;  %v18837_v35 = vpack.c.bf16 %v7907_v39, %v7907_v39  ;;  %v18839_v53 = vpack.c.bf16 %v7909_v29, %v7909_v29  ;;  %v7192_v18 = vrot.slane %v18823_v9, 7  ;;  %v18879_v39 = vpack.c.bf16 %v18733_v49, %v18733_v49 }
 0x2d9   : > { %v5426_v22 = vpop.permute.xlu1 %5425  ;;  %v7911_v41 = vsel %vm1278_vm4, %v7908_v36, %v7910_v7  ;;  %v14305_v49 = vpack.c.bf16 %v18711_v57, %v18711_v57 }
 0x2da   : > { %5490 = vst.msk [vmem:[#allocation4 + $0x58] sm:$0xf] %vm1785_vm9, %v5426_v22  ;;  %v5424_v38 = vpop.permute.xlu0 %5423  ;;  %v18847_v43 = vld [vmem:[#allocation3 + $0x60] sm:$0xff]  ;;  %v14304_v22 = vpack.c.bf16 %v18709_v48, %v18709_v48  ;;  %v7193_v12 = vsel %vm1205_vm6, %v7190_v59, %v7192_v18  ;;  %v18882_v29 = vpack.c.bf16 %v7911_v41, %v7911_v41 }
 0x2db   : > { %5489 = vst.msk [vmem:[#allocation4 + $0x4c] sm:$0xf] %vm1785_vm9, %v5424_v38  ;;  %4437 = vrot.lane.b32.xlu1 %v14054_v33, %s15975_s13  ;;  %v14078_v38 = vpack.c.bf16 %v17708_v50, %v17708_v50  ;;  %v14077_v50 = vpack.c.bf16 %v22200_v19, %v22200_v19 }
 0x2dc   : > { %4435 = vrot.lane.b32.xlu0 %v14053_v20, %s15975_s13  ;;  %8361 = vst.msk [vmem:[#allocation5 + $0x38] sm:$0xf] %vm6821_vm11, %v18839_v53  ;;  %8360 = vst.msk [vmem:[#allocation5 + $0x24] sm:$0xf] %vm6821_vm11, %v18837_v35  ;;  %v7191_v20 = vsel %vm1205_vm6, %v18777_v32, %v7190_v59 }
 0x2dd   : > { %v4778_v46 = vpop.permute.xlu1 %4777  ;;  %7594 = vst.msk [vmem:[#allocation5 + $0x44] sm:$0xf] %vm6821_vm11, %v14304_v22  ;;  %7115 = vst.msk [vmem:[#allocation5 + $0x54] sm:$0xf] %vm6821_vm11, %v18879_v39  ;;  %v18909_v57 = vpack.c.bf16 %v7191_v20, %v7191_v20 }
 0x2de   : > { %4842 = vst.msk [vmem:[#allocation4 + $0x54] sm:$0xf] %vm2146_vm10, %v4778_v46  ;;  %v4776_v24 = vpop.permute.xlu0 %4775  ;;  %v14174_v46 = vpack.c.bf16 %v18798_v56, %v18798_v56 }
 0x2df   : > { %4841 = vst.msk [vmem:[#allocation4 + $0x48] sm:$0xf] %vm2146_vm10, %v4776_v24  ;;  %5445 = vrot.lane.b32.xlu1 %v14150_v5, %s15975_s13  ;;  %v7912_v5 = vrot.slane %v18847_v43, 1  ;;  %v7902_v24 = vsel %vm1205_vm6, 0.0, %v18777_v32 }
 0x2e0   : > { %5443 = vrot.lane.b32.xlu0 %v14149_v25, %s15975_s13  ;;  %v18875_v25 = vpack.c.bf16 %v7187_v47, %v7187_v47  ;;  %v14349_v22 = vpack.c.bf16 %v7902_v24, %v7902_v24  ;;  %8362 = vst.msk [vmem:[#allocation5 + $0x4c] sm:$0xf] %vm6821_vm11, %v18882_v29  ;;  %7595 = vst.msk [vmem:[#allocation5 + $0x58] sm:$0xf] %vm6821_vm11, %v14305_v49 }
 0x2e1   : > { %v5594_v33 = vpop.permute.xlu1 %5593  ;;  %v7913_v59 = vsel %vm1278_vm4, %v7910_v7, %v7912_v5  ;;  %v18903_v7 = vpack.c.bf16 %v18790_v15, %v18790_v15  ;;  %v14306_v15 = vpack.c.bf16 %v18823_v9, %v18823_v9  ;;  %8072 = vst.msk [vmem:[#allocation5 + $0x20] sm:$0xf] %vm6821_vm11, %v18909_v57  ;;  %6829 = vst.msk [vmem:[#allocation5 + $0x8c] sm:$0xf] %vm6821_vm11, %v18909_v57  ;;  %v7198_v9 = vrot.slane %v18847_v43, 7 }
 0x2e2   : > { %5658 = vst.msk [vmem:[#allocation4 + $0x58] sm:$0xf] %vm2146_vm10, %v5594_v33  ;;  %v5592_v48 = vpop.permute.xlu0 %5591  ;;  %v18887_v36 = vpack.c.bf16 %v7913_v59, %v7913_v59  ;;  %v15855_v59 = vld [vmem:[#allocation2 + $0x158] sm:$0xff] }
 0x2e3   : > { %5657 = vst.msk [vmem:[#allocation4 + $0x4c] sm:$0xf] %vm2146_vm10, %v5592_v48  ;;  %4797 = vrot.lane.b32.xlu1 %v14078_v38, %s15976_s24  ;;  %v14173_v38 = vpack.c.bf16 %v18804_v17, %v18804_v17  ;;  %v18915_v48 = vpack.c.bf16 %v18783_v54, %v18783_v54 }
 0x2e4   : > { %4795 = vrot.lane.b32.xlu0 %v14077_v50, %s15976_s24  ;;  %6827 = vst.msk [vmem:[#allocation5 + $0x64] sm:$0xf] %vm6821_vm11, %v18875_v25  ;;  %8071 = vst.msk [vmem:[#allocation5 + $0xc] sm:$0xf] %vm6821_vm11, %v14349_v22  ;;  %v14031_v22 = vpack.c.bf16 %v15855_v59, %v15855_v59 }
 0x2e5   : > { %v4254_v33 = vpop.permute.xlu1 %4253  ;;  %v14712_v47 = vpop.f32.mrf.mxu0  ;;  %8363 = vst.msk [vmem:[#allocation5 + $0x60] sm:$0xf] %vm6821_vm11, %v18887_v36  ;;  %6828 = vst.msk [vmem:[#allocation5 + $0x78] sm:$0xf] %vm6821_vm11, %v18903_v7 }
 0x2e6   : > { %4316 = vst.msk [vmem:[#allocation4 + $0x6c] sm:$0xf] %vm1616_vm7, %v4254_v33  ;;  %v4252_v32 = vpop.permute.xlu0 %4251 }
 0x2e7   : > { %4315 = vst.msk [vmem:[#allocation4 + $0x60] sm:$0xf] %vm1616_vm7, %v4252_v32  ;;  %5613 = vrot.lane.b32.xlu1 %v14174_v46, %s15976_s24  ;;  %v14713_v17 = vpop.f32.mrf.mxu0  ;;  %v15854_v46 = vld [vmem:[#allocation2 + $0x160] sm:$0xff] }
 0x2e8   : > { %5611 = vrot.lane.b32.xlu0 %v14173_v38, %s15976_s24  ;;  %v14714_v19 = vadd.f32 %v14713_v17, %v14712_v47  ;;  %v14032_v20 = vpack.c.bf16 %v15854_v46, %v15854_v46  ;;  %7116 = vst.msk [vmem:[#allocation5 + $0x68] sm:$0xf] %vm6821_vm11, %v18915_v48  ;;  %7596 = vst.msk [vmem:[#allocation5 + $0x6c] sm:$0xf] %vm6821_vm11, %v14306_v15  ;;  %v18932_v32 = vld [vmem:[%s21893_s5] ss:$0 sm:$0xff]  ;;  %v18937_v17 = vpack.c.bf16 %v7193_v12, %v7193_v12 }
 0x2e9   : > { %v5070_v50 = vpop.permute.xlu1 %5069  ;;  %v5809_v41 = vld [vmem:[#allocation4 + $0x54] sm:$0xff]  ;;  %v14715_v24 = vpop.f32.mrf.mxu0  ;;  %7118 = vst.msk [vmem:[#allocation5 + $0x90] sm:$0xf] %vm6821_vm11, %v18837_v35  ;;  %7119 = vst.msk [vmem:[#allocation5 + $0xa4] sm:$0xf] %vm6821_vm11, %v18839_v53 }
 0x2ea   : > { %5132 = vst.msk [vmem:[#allocation4 + $0x70] sm:$0xf] %vm1616_vm7, %v5070_v50  ;;  %v5068_v54 = vpop.permute.xlu0 %5067  ;;  %v5807_v33 = vld [vmem:[#allocation4 + $0x48] sm:$0xff]  ;;  %v3596_v47 = vadd.f32 %v18932_v32, %v14714_v19  ;;  %v14128_v19 = vpack.c.bf16 %v17744_v3, %v17744_v3 }
 0x2eb   : > { %v15590_v49 = vld [vmem:[#allocation4 + $0x4c] ss:$12 sps:$4 sm:$0xff]   ;;  %5131 = vst.msk [vmem:[#allocation4 + $0x64] sm:$0xf] %vm1616_vm7, %v5068_v54  ;;  %4273 = vrot.lane.b32.xlu1 %v14032_v20, %s15974_s20  ;;  %v13062_v38 = vcombine.low %v5807_v33, %v5809_v41  ;;  %v14716_v15 = vpop.f32.mrf.mxu0  ;;  %v14127_v20 = vpack.c.bf16 %v17747_v2, %v17747_v2 }
 0x2ec   : > { %4271 = vrot.lane.b32.xlu0 %v14031_v22, %s15974_s20  ;;  %6259 = vmatprep.mubr.bf16.mxu1 %v15590_v49  ;;  %v3725_v50 = vadd.f32 %v18688_v6, %v3596_v47  ;;  %v14717_v46 = vadd.f32 %v14716_v15, %v14715_v24  ;;  %8073 = vst.msk [vmem:[#allocation5 + $0x34] sm:$0xf] %vm6821_vm11, %v18937_v17  ;;  %6830 = vst.msk [vmem:[#allocation5 + $0xa0] sm:$0xf] %vm6821_vm11, %v18937_v17  ;;  %v18952_v41 = vld [vmem:[#allocation2 + $0x188] sm:$0xff]  ;;  %v18961_v24 = vld [vmem:[#allocation2 + $0x190] sm:$0xff] }
 0x2ed   : > { %v4422_v59 = vpop.permute.xlu1 %4421  ;;  %6260 = vmatmul.mubr.bf16.gmra.mxu1 %v13062_v38  ;;  %v5230_v6 = vrot.slane %v18952_v41, 7  ;;  %v5232_v2 = vrot.slane %v18961_v24, 7  ;;  %v22201_v22 = vld [vmem:[#allocation20_spill] sm:$0xff]  ;;  %v14056_v38 = vpack.c.bf16 %v17750_v23, %v17750_v23  ;;  %7120 = vst.msk [vmem:[#allocation5 + $0xb8] sm:$0xf] %vm6821_vm11, %v18882_v29 }
 0x2ee   : > { %4484 = vst.msk [vmem:[#allocation4 + $0x6c] sm:$0xf] %vm1785_vm9, %v4422_v59  ;;  %v4420_v12 = vpop.permute.xlu0 %4419  ;;  %v3789_v3 = vmax.f32 %v3725_v50, 0.0  ;;  %v3599_v54 = vadd.f32 %v18932_v32, %v14717_v46  ;;  %v14055_v50 = vpack.c.bf16 %v17739_v30, %v17739_v30  ;;  %v7194_v59 = vrot.slane %v18821_v28, 7 }
 0x2ef   : > { %4483 = vst.msk [vmem:[#allocation4 + $0x60] sm:$0xf] %vm1785_vm9, %v4420_v12  ;;  %5089 = vrot.lane.b32.xlu1 %v14128_v19, %s15974_s20  ;;  %v5233_v46 = vsel %vm1205_vm6, %v5230_v6, %v5232_v2  ;;  %v7196_v19 = vrot.slane %v18845_v34, 7  ;;  %v5231_v23 = vsel %vm1205_vm6, %v5228_v45, %v5230_v6 }
 0x2f0   : > { %5087 = vrot.lane.b32.xlu0 %v14127_v20, %s15974_s20  ;;  %v3813_v33 = vmul.f32 %v3789_v3, %v22201_v22  ;;  %v3728_v49 = vadd.f32 %v18744_v44, %v3599_v54  ;;  %v18986_v30 = vsel %vm1205_vm6, %v7192_v18, %v7194_v59  ;;  %v22202_v20 = vld [vmem:[#allocation19_spill] sm:$0xff]  ;;  %v14151_v56 = vpack.c.bf16 %v5231_v23, %v5231_v23 }
 0x2f1   : > { %v5430_v47 = vpop.permute.xlu1 %5429  ;;  %v18989_v12 = vsel %vm1205_vm6, %v7194_v59, %v7196_v19  ;;  %v19015_v23 = vsel %vm1205_vm6, %v7196_v19, %v7198_v9  ;;  %v14176_v19 = vpack.c.bf16 %v18961_v24, %v18961_v24  ;;  %7121 = vst.msk [vmem:[#allocation5 + $0xcc] sm:$0xf] %vm6821_vm11, %v18887_v36 }
 0x2f2   : > { %5492 = vst.msk [vmem:[#allocation4 + $0x70] sm:$0xf] %vm1785_vm9, %v5430_v47  ;;  %v5428_v15 = vpop.permute.xlu0 %5427  ;;  %v3790_v44 = vmax.f32 %v3728_v49, 0.0  ;;  %v18993_v47 = vld [vmem:[#allocation3 + $0x68] sm:$0xff] }
 0x2f3   : > { %3837 = vst.msk [vmem:[#allocation3 + $0x70] sm:$0xff] %vm340_vm5, %v3813_v33  ;;  %4441 = vrot.lane.b32.xlu1 %v14056_v38, %s15975_s13  ;;  %v14152_v33 = vpack.c.bf16 %v5233_v46, %v5233_v46  ;;  %v7914_v45 = vrot.slane %v18993_v47, 1  ;;  %v7200_v18 = vrot.slane %v18993_v47, 7  ;;  %v14080_v38 = vpack.c.bf16 %v17769_v40, %v17769_v40 }
 0x2f4   : > { %5491 = vst.msk [vmem:[#allocation4 + $0x64] sm:$0xf] %vm1785_vm9, %v5428_v15  ;;  %4439 = vrot.lane.b32.xlu0 %v14055_v50, %s15975_s13  ;;  %v3814_v3 = vmul.f32 %v3790_v44, %v22202_v20  ;;  %v14079_v46 = vpack.c.bf16 %v17763_v60, %v17763_v60  ;;  %v22216_v20 = vld [vmem:[#allocation24_spill] sm:$0xff] }
 0x2f5   : > { %v4782_v54 = vpop.permute.xlu1 %4781  ;;  %v7915_v15 = vsel %vm1278_vm4, %v7912_v5, %v7914_v45  ;;  %v19020_v40 = vsel %vm1205_vm6, %v7198_v9, %v7200_v18  ;;  %v15859_v9 = vld [vmem:[#allocation2 + $0x170] sm:$0xff] }
 0x2f6   : > { %4844 = vst.msk [vmem:[#allocation4 + $0x6c] sm:$0xf] %vm2146_vm10, %v4782_v54  ;;  %v4780_v49 = vpop.permute.xlu0 %4779  ;;  %v19010_v59 = vpack.c.bf16 %v7915_v15, %v7915_v15  ;;  %v15860_v15 = vld [vmem:[#allocation2 + $0x168] sm:$0xff] }
 0x2f7   : > { %3838 = vst.msk [vmem:[#allocation3 + $0x78] sm:$0xff] %vm340_vm5, %v3814_v3  ;;  %5449 = vrot.lane.b32.xlu1 %v14152_v33, %s15975_s13  ;;  %v14175_v33 = vpack.c.bf16 %v18952_v41, %v18952_v41  ;;  %v14033_v41 = vpack.c.bf16 %v15860_v15, %v15860_v15  ;;  %v14057_v15 = vpack.c.bf16 %v17787_v42, %v17787_v42 }
 0x2f8   : > { %4843 = vst.msk [vmem:[#allocation4 + $0x60] sm:$0xf] %vm2146_vm10, %v4780_v49  ;;  %5447 = vrot.lane.b32.xlu0 %v14151_v56, %s15975_s13 }
 0x2f9   : > { %v5598_v6 = vpop.permute.xlu1 %5597  ;;  %8364 = vst.msk [vmem:[#allocation5 + $0x74] sm:$0xf] %vm6821_vm11, %v19010_v59  ;;  %7122 = vst.msk [vmem:[#allocation5 + $0xe0] sm:$0xf] %vm6821_vm11, %v19010_v59 }
 0x2fa   : > { %5660 = vst.msk [vmem:[#allocation4 + $0x70] sm:$0xf] %vm2146_vm10, %v5598_v6  ;;  %v5596_v50 = vpop.permute.xlu0 %5595  ;;  %v19012_v44 = vld [vmem:[#allocation3 + $0x70] sm:$0xff] }
 0x2fb   : > { %5659 = vst.msk [vmem:[#allocation4 + $0x64] sm:$0xf] %vm2146_vm10, %v5596_v50  ;;  %4801 = vrot.lane.b32.xlu1 %v14080_v38, %s15976_s24  ;;  %v7916_v5 = vrot.slane %v19012_v44, 1 }
 0x2fc   : > { %4799 = vrot.lane.b32.xlu0 %v14079_v46, %s15976_s24 }
 0x2fd   : > { %v4258_v60 = vpop.permute.xlu1 %4257  ;;  %v7917_v3 = vsel %vm1278_vm4, %v7914_v45, %v7916_v5  ;;  %v14034_v45 = vpack.c.bf16 %v15859_v9, %v15859_v9 }
 0x2fe   : > { %4318 = vst.msk [vmem:[#allocation4 + $0x84] sm:$0xf] %vm1616_vm7, %v4258_v60  ;;  %v4256_v54 = vpop.permute.xlu0 %4255  ;;  %v19034_v49 = vpack.c.bf16 %v7917_v3, %v7917_v3  ;;  %v14130_v3 = vpack.c.bf16 %v17793_v63, %v17793_v63  ;;  %v14307_v63 = vpack.c.bf16 %v18821_v28, %v18821_v28  ;;  %v14308_v28 = vpack.c.bf16 %v18845_v34, %v18845_v34 }
 0x2ff   : > { %4317 = vst.msk [vmem:[#allocation4 + $0x78] sm:$0xf] %vm1616_vm7, %v4256_v54  ;;  %5617 = vrot.lane.b32.xlu1 %v14176_v19, %s15976_s24 }
 0x300   : > { %5615 = vrot.lane.b32.xlu0 %v14175_v33, %s15976_s24  ;;  %8365 = vst.msk [vmem:[#allocation5 + $0x88] sm:$0xf] %vm6821_vm11, %v19034_v49  ;;  %v14129_v33 = vpack.c.bf16 %v17784_v10, %v17784_v10  ;;  %v14058_v10 = vpack.c.bf16 %v17796_v37, %v17796_v37  ;;  %7597 = vst.msk [vmem:[#allocation5 + $0x80] sm:$0xf] %vm6821_vm11, %v14307_v63  ;;  %v19080_v37 = vpack.c.bf16 %v18986_v30, %v18986_v30 }
 0x301   : > { %v5074_v56 = vpop.permute.xlu1 %5073  ;;  %v5813_v6 = vld [vmem:[#allocation4 + $0x6c] sm:$0xff]  ;;  %7598 = vst.msk [vmem:[#allocation5 + $0x94] sm:$0xf] %vm6821_vm11, %v14308_v28  ;;  %7123 = vst.msk [vmem:[#allocation5 + $0xf4] sm:$0xf] %vm6821_vm11, %v19034_v49 }
 0x302   : > { %5134 = vst.msk [vmem:[#allocation4 + $0x88] sm:$0xf] %vm1616_vm7, %v5074_v56  ;;  %v5072_v38 = vpop.permute.xlu0 %5071  ;;  %v5811_v50 = vld [vmem:[#allocation4 + $0x60] sm:$0xff]  ;;  %v19050_v56 = vld [vmem:[#allocation2 + $0x198] sm:$0xff] }
 0x303   : > { %v15592_v46 = vld [vmem:[#allocation4 + $0x64] ss:$12 sps:$4 sm:$0xff]   ;;  %5133 = vst.msk [vmem:[#allocation4 + $0x7c] sm:$0xf] %vm1616_vm7, %v5072_v38  ;;  %4277 = vrot.lane.b32.xlu1 %v14034_v45, %s15974_s20  ;;  %v13065_v60 = vcombine.low %v5811_v50, %v5813_v6  ;;  %v5234_v9 = vrot.slane %v19050_v56, 7 }
 0x304   : > { %4275 = vrot.lane.b32.xlu0 %v14033_v41, %s15974_s20  ;;  %6267 = vmatprep.mubr.bf16.mxu1 %v15592_v46  ;;  %v19053_v45 = vld [vmem:[#allocation2 + $0x1a0] sm:$0xff]  ;;  %8074 = vst.msk [vmem:[#allocation5 + $0x48] sm:$0xf] %vm6821_vm11, %v19080_v37  ;;  %6831 = vst.msk [vmem:[#allocation5 + $0xb4] sm:$0xf] %vm6821_vm11, %v19080_v37 }
 0x305   : > { %v4426_v19 = vpop.permute.xlu1 %4425  ;;  %6268 = vmatmul.mubr.bf16.gmra.mxu1 %v13065_v60  ;;  %v21989_v6 = vrot.slane %v19053_v45, 7  ;;  %v5235_v46 = vsel %vm1205_vm6, %v5232_v2, %v5234_v9  ;;  %v19072_v60 = vld [vmem:[#allocation3 + $0x78] sm:$0xff] }
 0x306   : > { %4486 = vst.msk [vmem:[#allocation4 + $0x84] sm:$0xf] %vm1785_vm9, %v4426_v19  ;;  %v4424_v54 = vpop.permute.xlu0 %4423  ;;  %v21988_v42 = vrot.slane %v19072_v60, 1  ;;  %v14153_v19 = vpack.c.bf16 %v5235_v46, %v5235_v46 }
 0x307   : > { %4485 = vst.msk [vmem:[#allocation4 + $0x78] sm:$0xf] %vm1785_vm9, %v4424_v54  ;;  %5093 = vrot.lane.b32.xlu1 %v14130_v3, %s15974_s20  ;;  %v5237_v50 = vsel %vm1205_vm6, %v5234_v9, %v21989_v6  ;;  %v7202_v54 = vrot.slane %v19012_v44, 7  ;;  %v19106_v9 = vpop.f32.mrf.mxu1 }
 0x308   : > { %5091 = vrot.lane.b32.xlu0 %v14129_v33, %s15974_s20  ;;  %v14154_v2 = vpack.c.bf16 %v5237_v50, %v5237_v50  ;;  %v7919_v3 = vsel %vm1278_vm4, %v7916_v5, %v21988_v42  ;;  %v21987_v33 = vrot.slane %v19072_v60, 7  ;;  %v19104_v5 = vpack.c.bf16 %v18989_v12, %v18989_v12  ;;  %v22204_v50 = vld [vmem:[#allocation91_spill] sm:$0xff] }
 0x309   : > { %v5434_v38 = vpop.permute.xlu1 %5433  ;;  %v19095_v34 = vpack.c.bf16 %v7919_v3, %v7919_v3  ;;  %v19114_v63 = vsel %vm1205_vm6, %v7200_v18, %v7202_v54  ;;  %v14082_v12 = vpack.c.bf16 %v17817_v61, %v17817_v61  ;;  %v14081_v46 = vpack.c.bf16 %v22204_v50, %v22204_v50  ;;  %v3732_v28 = vpop.f32.mrf.mxu1 }
 0x30a   : > { %5494 = vst.msk [vmem:[#allocation4 + $0x88] sm:$0xf] %vm1785_vm9, %v5434_v38  ;;  %v5432_v41 = vpop.permute.xlu0 %5431  ;;  %v19119_v38 = vsel %vm1205_vm6, %v7202_v54, %v21987_v33  ;;  %v14178_v61 = vpack.c.bf16 %v19053_v45, %v19053_v45  ;;  %v14177_v54 = vpack.c.bf16 %v19050_v56, %v19050_v56  ;;  %v19167_v56 = vpack.c.bf16 %v19020_v40, %v19020_v40 }
 0x30b   : > { %5493 = vst.msk [vmem:[#allocation4 + $0x7c] sm:$0xf] %vm1785_vm9, %v5432_v41  ;;  %4445 = vrot.lane.b32.xlu1 %v14058_v10, %s15975_s13  ;;  %22203 = vst [vmem:[#allocation41_spill] sm:$0xff] %v19095_v34 }
 0x30c   : > { %4443 = vrot.lane.b32.xlu0 %v14057_v15, %s15975_s13  ;;  %8366 = vst.msk [vmem:[#allocation5 + $0x9c] sm:$0xf] %vm6821_vm11, %v19095_v34  ;;  %8075 = vst.msk [vmem:[#allocation5 + $0x5c] sm:$0xf] %vm6821_vm11, %v19104_v5  ;;  %v14309_v15 = vpack.c.bf16 %v18847_v43, %v18847_v43  ;;  %v19140_v43 = vpack.c.bf16 %v19015_v23, %v19015_v23 }
 0x30d   : > { %v4786_v24 = vpop.permute.xlu1 %4785  ;;  %6832 = vst.msk [vmem:[#allocation5 + $0xc8] sm:$0xf] %vm6821_vm11, %v19104_v5  ;;  %8077 = vst.msk [vmem:[#allocation5 + $0x84] sm:$0xf] %vm6821_vm11, %v19167_v56 }
 0x30e   : > { %4846 = vst.msk [vmem:[#allocation4 + $0x84] sm:$0xf] %vm2146_vm10, %v4786_v24  ;;  %v4784_v30 = vpop.permute.xlu0 %4783 }
 0x30f   : > { %4845 = vst.msk [vmem:[#allocation4 + $0x78] sm:$0xf] %vm2146_vm10, %v4784_v30  ;;  %5453 = vrot.lane.b32.xlu1 %v14154_v2, %s15975_s13  ;;  %v14310_v2 = vpack.c.bf16 %v18993_v47, %v18993_v47 }
 0x310   : > { %5451 = vrot.lane.b32.xlu0 %v14153_v19, %s15975_s13  ;;  %7599 = vst.msk [vmem:[#allocation5 + $0xa8] sm:$0xf] %vm6821_vm11, %v14309_v15  ;;  %8076 = vst.msk [vmem:[#allocation5 + $0x70] sm:$0xf] %vm6821_vm11, %v19140_v43  ;;  %v19169_v15 = vpop.f32.mrf.mxu1 }
 0x311   : > { %v5602_v10 = vpop.permute.xlu1 %5601  ;;  %6833 = vst.msk [vmem:[#allocation5 + $0xdc] sm:$0xf] %vm6821_vm11, %v19140_v43  ;;  %7600 = vst.msk [vmem:[#allocation5 + $0xbc] sm:$0xf] %vm6821_vm11, %v14310_v2 }
 0x312   : > { %5662 = vst.msk [vmem:[#allocation4 + $0x88] sm:$0xf] %vm2146_vm10, %v5602_v10  ;;  %v5600_v18 = vpop.permute.xlu0 %5599  ;;  %v14718_v41 = vpop.f32.mrf.mxu0  ;;  %v15606_v10 = vld [vmem:[%s21894_s6 + $0x78] sm:$0xff]  }
 0x313   : > { %5661 = vst.msk [vmem:[#allocation4 + $0x7c] sm:$0xf] %vm2146_vm10, %v5600_v18  ;;  %4805 = vrot.lane.b32.xlu1 %v14082_v12, %s15976_s24  ;;  %v15607_v12 = vld [vmem:[%s21894_s6 + $0x38] sm:$0xff]   ;;  %14870 = vmatprep.subr.bf16.mxu0 %v15606_v10 }
 0x314   : > { %4803 = vrot.lane.b32.xlu0 %v14081_v46, %s15976_s24  ;;  %v14719_v24 = vpop.f32.mrf.mxu0  ;;  %14871 = vmatpush3.bf16.msra.mxu0 %v15607_v12  ;;  %6834 = vst.msk [vmem:[#allocation5 + $0xf0] sm:$0xf] %vm6821_vm11, %v19167_v56  ;;  %7124 = vst.msk [vmem:[#allocation5 + $0x108] sm:$0xf] %vm6821_vm11, %v19095_v34 }
 0x315   : > { %v14720_v19 = vadd.f32 %v14719_v24, %v14718_v41  ;;  %v4262_v3 = vpop.permute.xlu1 %4261  ;;  %v15863_v24 = vld [vmem:[#allocation2 + $0x180] sm:$0xff] }
 0x316   : > { %4320 = vst.msk [vmem:[#allocation4 + $0x9c] sm:$0xf] %vm1616_vm7, %v4262_v3  ;;  %v4260_v23 = vpop.permute.xlu0 %4259  ;;  %v14721_v30 = vpop.f32.mrf.mxu0  ;;  %v14036_v2 = vpack.c.bf16 %v15863_v24, %v15863_v24 }
 0x317   : > { %v3604_v47 = vadd.f32 %v18932_v32, %v14720_v19  ;;  %4319 = vst.msk [vmem:[#allocation4 + $0x90] sm:$0xf] %vm1616_vm7, %v4260_v23  ;;  %5621 = vrot.lane.b32.xlu1 %v14178_v61, %s15976_s24  ;;  %v15864_v19 = vld [vmem:[#allocation2 + $0x178] sm:$0xff]  ;;  %v3735_v24 = vpop.f32.mrf.mxu1 }
 0x318   : > { %5619 = vrot.lane.b32.xlu0 %v14177_v54, %s15976_s24  ;;  %v14722_v18 = vpop.f32.mrf.mxu0 }
 0x319   : > { %v3733_v41 = vadd.f32 %v3732_v28, %v3604_v47  ;;  %v14723_v50 = vadd.f32 %v14722_v18, %v14721_v30  ;;  %v5078_v46 = vpop.permute.xlu1 %5077  ;;  %v5817_v61 = vld [vmem:[#allocation4 + $0x84] sm:$0xff]  ;;  %v14035_v28 = vpack.c.bf16 %v15864_v19, %v15864_v19 }
 0x31a   : > { %5136 = vst.msk [vmem:[#allocation4 + $0xa0] sm:$0xf] %vm1616_vm7, %v5078_v46  ;;  %v5076_v40 = vpop.permute.xlu0 %5075  ;;  %v5815_v3 = vld [vmem:[#allocation4 + $0x78] sm:$0xff]  ;;  %v22205_v30 = vld [vmem:[#allocation90_spill] sm:$0xff] }
 0x31b   : > { %v15594_v23 = vld [vmem:[#allocation4 + $0x7c] ss:$12 sps:$4 sm:$0xff]   ;;  %v22206_v54 = vrot.slane %v22205_v30, 1  ;;  %v3791_v47 = vmax.f32 %v3733_v41, 0.0  ;;  %v3607_v12 = vadd.f32 %v18932_v32, %v14723_v50  ;;  %5135 = vst.msk [vmem:[#allocation4 + $0x94] sm:$0xf] %vm1616_vm7, %v5076_v40  ;;  %4281 = vrot.lane.b32.xlu1 %v14036_v2, %s15974_s20  ;;  %v13068_v18 = vcombine.low %v5815_v3, %v5817_v61 }
 0x31c   : > { %4279 = vrot.lane.b32.xlu0 %v14035_v28, %s15974_s20  ;;  %6275 = vmatprep.mubr.bf16.mxu1 %v15594_v23  ;;  %v19186_v46 = vld [vmem:[#allocation2 + $0x1a8] sm:$0xff]  ;;  %v5240_v30 = vrot.slane %v19189_v4, 7  ;;  %v22207_v41 = vld [vmem:[#allocation22_spill] sm:$0xff]  ;;  %v22208_v28 = vld [vmem:[#allocation93_spill] sm:$0xff] }
 0x31d   : > { %v4690_v10 = vsel %vm1278_vm4, %v22206_v54, 0.0  ;;  %v5238_v19 = vrot.slane %v19186_v46, 7  ;;  %v3815_v54 = vmul.f32 %v3791_v47, %v22207_v41  ;;  %v3736_v50 = vadd.f32 %v3735_v24, %v3607_v12  ;;  %v4430_v62 = vpop.permute.xlu1 %4429  ;;  %6276 = vmatmul.mubr.bf16.gmra.mxu1 %v13068_v18  ;;  %v22209_v23 = vld [vmem:[#allocation92_spill] sm:$0xff]  ;;  %v22211_v47 = vld [vmem:[#allocation21_spill] sm:$0xff] }
 0x31e   : > { %v14132_v40 = vpack.c.bf16 %v4690_v10, %v4690_v10  ;;  %4488 = vst.msk [vmem:[#allocation4 + $0x9c] sm:$0xf] %vm1785_vm9, %v4430_v62  ;;  %v4428_v2 = vpop.permute.xlu0 %4427  ;;  %v14724_v61 = vpop.f32.mrf.mxu0  ;;  %v14131_v3 = vpack.c.bf16 %v22208_v28, %v22208_v28  ;;  %v22210_v33 = vrot.slane %v22209_v23, 1  ;;  %v22212_v23 = vrot.slane %v19053_v45, 7 }
 0x31f   : > { %3839 = vst.msk [vmem:[#allocation3 + $0x80] sm:$0xff] %vm340_vm5, %v3815_v54  ;;  %v3792_v6 = vmax.f32 %v3736_v50, 0.0  ;;  %v5241_v62 = vsel %vm1205_vm6, %v5238_v19, %v5240_v30  ;;  %v15609_v30 = vld [vmem:[%s21894_s6 + $0x70] sm:$0xff]  }
 0x320   : > { %v4042_v42 = vsel %vm1278_vm4, %v22210_v33, 0.0  ;;  %4487 = vst.msk [vmem:[#allocation4 + $0x90] sm:$0xf] %vm1785_vm9, %v4428_v2  ;;  %5097 = vrot.lane.b32.xlu1 %v14132_v40, %s15974_s20  ;;  %5095 = vrot.lane.b32.xlu0 %v14131_v3, %s15974_s20  ;;  %v14725_v10 = vpop.f32.mrf.mxu0  ;;  %v5239_v33 = vsel %vm1205_vm6, %v22212_v23, %v5238_v19  ;;  %v22213_v2 = vld [vmem:[#allocation94_spill] sm:$0xff]  ;;  %v15608_v3 = vld [vmem:[#allocation4 + $0x110] ss:$12 sps:$4 sm:$0xff]  }
 0x321   : > { %v3816_v12 = vmul.f32 %v3792_v6, %v22211_v47  ;;  %v14726_v18 = vadd.f32 %v14725_v10, %v14724_v61  ;;  %v5438_v24 = vpop.permute.xlu1 %5437  ;;  %v14060_v28 = vpack.c.bf16 %v4042_v42, %v4042_v42  ;;  %v14059_v40 = vpack.c.bf16 %v22213_v2, %v22213_v2  ;;  %v15610_v6 = vld [vmem:[%s21894_s6 + $0x30] sm:$0xff]   ;;  %15363 = vmatmul.mubr.msk.bf16.gmra.mxu0 %vm332_vm3, %v15608_v3  ;;  %v19224_v2 = vld [vmem:[#allocation3 + $0x10] sm:$0xff]  ;;  %v22214_v3 = vld [vmem:[#allocation95_spill] sm:$0xff]  ;;  %s14637_s20 = sshll.u32 %s16046_s9, 12 }
 0x322   : > { %5496 = vst.msk [vmem:[#allocation4 + $0xa0] sm:$0xf] %vm1785_vm9, %v5438_v24  ;;  %v5436_v54 = vpop.permute.xlu0 %5435  ;;  %v14727_v50 = vpop.f32.mrf.mxu0  ;;  %v14156_v42 = vpack.c.bf16 %v5241_v62, %v5241_v62  ;;  %v14155_v61 = vpack.c.bf16 %v5239_v33, %v5239_v33  ;;  %14872 = vmatprep.subr.bf16.mxu0 %v15609_v30  ;;  %v15611_v62 = vld [vmem:[%s21894_s6 + $0xf8] sm:$0xff]   ;;  %v14084_v30 = vpack.c.bf16 %v22214_v3, %v22214_v3  ;;  %v15616_v3 = vld [vmem:[%s21894_s6 + $0x60] sm:$0xff]   ;;  %s21841_s23 = scalar_lea.hbm %s21896_s8, %s14637_s20 }
 0x323   : > { %3840 = vst.msk [vmem:[#allocation3 + $0x88] sm:$0xff] %vm340_vm5, %v3816_v12  ;;  %v3612_v45 = vadd.f32 %v18932_v32, %v14726_v18  ;;  %v19226_v12 = vld [vmem:[#allocation3 + $0x8] sm:$0xff]  ;;  %14873 = vmatpush3.bf16.msra.mxu0 %v15610_v6  ;;  %14958 = vmatprep.subr.bf16.mxu1 %v15611_v62  ;;  %v15618_v62 = vld [vmem:[%s21894_s6 + $0xb0] sm:$0xff]  }
 0x324   : > { %5495 = vst.msk [vmem:[#allocation4 + $0x94] sm:$0xf] %vm1785_vm9, %v5436_v54  ;;  %4449 = vrot.lane.b32.xlu1 %v14060_v28, %s15975_s13  ;;  %4447 = vrot.lane.b32.xlu0 %v14059_v40, %s15975_s13  ;;  %v14728_v19 = vpop.f32.mrf.mxu0  ;;  %v6581_v33 = vrot.slane %v19226_v12, 7  ;;  %v21990_v54 = vrot.slane %v19224_v2, 7 }
 0x325   : > { %v3741_v10 = vadd.f32 %v19106_v9, %v3612_v45  ;;  %v14729_v24 = vadd.f32 %v14728_v19, %v14727_v50  ;;  %v4790_v23 = vpop.permute.xlu1 %4789  ;;  %v15612_v9 = vld [vmem:[%s21894_s6 + $0x68] sm:$0xff]   ;;  %v15614_v19 = vld [vmem:[%s21894_s6 + $0xb8] sm:$0xff]  }
 0x326   : > { %4848 = vst.msk [vmem:[#allocation4 + $0x9c] sm:$0xf] %vm2146_vm10, %v4790_v23  ;;  %v4788_v18 = vpop.permute.xlu0 %4787  ;;  %v19229_v28 = vld [vmem:[#allocation3 + $0x80] sm:$0xff]  ;;  %v15613_v45 = vld [vmem:[%s21894_s6 + $0x28] sm:$0xff]   ;;  %v6583_v47 = vsel %vm1205_vm6, %v6581_v33, %v21990_v54  ;;  %14874 = vmatprep.subr.bf16.mxu0 %v15612_v9  ;;  %14959 = vmatpush3.bf16.msra.mxu1 %v15614_v19  ;;  %v6652_v13 = vsel %vm1205_vm6, 0.0, %v6581_v33  ;;  %v15617_v9 = vld [vmem:[%s21894_s6 + $0x20] sm:$0xff]  }
 0x327   : > { %v3793_v50 = vmax.f32 %v3741_v10, 0.0  ;;  %v3615_v40 = vadd.f32 %v18932_v32, %v14729_v24  ;;  %4847 = vst.msk [vmem:[#allocation4 + $0x90] sm:$0xf] %vm2146_vm10, %v4788_v18  ;;  %v7920_v6 = vrot.slane %v19229_v28, 1  ;;  %v15615_v10 = vld [vmem:[%s21894_s6 + $0xf0] sm:$0xff]   ;;  %v19254_v24 = vpop.f32.mrf.mxu1  ;;  %v7206_v18 = vrot.slane %v19229_v28, 7  ;;  %14875 = vmatpush3.bf16.msra.mxu0 %v15613_v45 }
 0x328   : > { %5457 = vrot.lane.b32.xlu1 %v14156_v42, %s15975_s13  ;;  %5455 = vrot.lane.b32.xlu0 %v14155_v61, %s15975_s13  ;;  %v22215_v42 = vld [vmem:[#allocation96_spill] sm:$0xff]  ;;  %v14206_v33 = vpack.c.bf16 %v6583_v47, %v6583_v47  ;;  %v14180_v45 = vpack.c.bf16 %v19189_v4, %v19189_v4  ;;  %v15620_v47 = vld [vmem:[%s21894_s6 + $0x58] sm:$0xff]   ;;  %v14205_v4 = vpack.c.bf16 %v6652_v13, %v6652_v13  ;;  %v22221_v19 = vld [vmem:[#allocation23_spill] sm:$0xff] }
 0x329   : > { %v14083_v23 = vpack.c.bf16 %v22215_v42, %v22215_v42  ;;  %v3817_v22 = vmul.f32 %v3793_v50, %v22216_v20  ;;  %v3744_v61 = vadd.f32 %v19169_v15, %v3615_v40  ;;  %v5606_v27 = vpop.permute.xlu1 %5605  ;;  %v22217_v42 = vrot.slane %v19072_v60, 1  ;;  %14960 = vmatprep.subr.bf16.mxu1 %v15615_v10  ;;  %14876 = vmatprep.subr.bf16.mxu0 %v15616_v3  ;;  %v3748_v10 = vpop.f32.mrf.mxu1 }
 0x32a   : > { %5664 = vst.msk [vmem:[#allocation4 + $0xa0] sm:$0xf] %vm2146_vm10, %v5606_v27  ;;  %v5604_v54 = vpop.permute.xlu0 %5603  ;;  %v14730_v41 = vpop.f32.mrf.mxu0  ;;  %v19279_v15 = vld [vmem:[#allocation3 + $0x88] sm:$0xff]  ;;  %v22218_v40 = vrot.slane %v19072_v60, 7  ;;  %v15619_v27 = vld [vmem:[%s21894_s6 + $0xe8] sm:$0xff]   ;;  %v22220_v3 = vrot.slane %v19224_v2, 1  ;;  %14961 = vmatpush3.bf16.msra.mxu1 %v15618_v62 }
 0x32b   : > { %v7921_v51 = vsel %vm1278_vm4, %v22217_v42, %v7920_v6  ;;  %3841 = vst.msk [vmem:[#allocation3 + $0x90] sm:$0xff] %vm340_vm5, %v3817_v22  ;;  %v14179_v22 = vpack.c.bf16 %v19186_v46, %v19186_v46  ;;  %v22222_v46 = vrot.slane %v19279_v15, 1  ;;  %14877 = vmatpush3.bf16.msra.mxu0 %v15617_v9  ;;  %14962 = vmatprep.subr.bf16.mxu1 %v15619_v27  ;;  %v19343_v62 = vpop.f32.mrf.mxu1 }
 0x32c   : > { %v19277_v50 = vpack.c.bf16 %v7921_v51, %v7921_v51  ;;  %v19284_v42 = vsel %vm1205_vm6, %v22218_v40, %v7206_v18  ;;  %v3794_v51 = vmax.f32 %v3744_v61, 0.0  ;;  %5663 = vst.msk [vmem:[#allocation4 + $0x94] sm:$0xf] %vm2146_vm10, %v5604_v54  ;;  %4809 = vrot.lane.b32.xlu1 %v14084_v30, %s15976_s24  ;;  %4807 = vrot.lane.b32.xlu0 %v14083_v23, %s15976_s24  ;;  %v14731_v40 = vpop.f32.mrf.mxu0  ;;  %v22219_v30 = vrot.slane %v18667_v1, 1 }
 0x32d   : > { %6823 = vst.msk [vmem:[#allocation5 + $0x14] sm:$0xf] %vm6821_vm11, %v14206_v33  ;;  %v14732_v20 = vadd.f32 %v14731_v40, %v14730_v41  ;;  %v4266_v8 = vpop.permute.xlu1 %4265  ;;  %v7923_v52 = vsel %vm1278_vm4, %v7920_v6, %v22222_v46  ;;  %v15622_v33 = vld [vmem:[%s21894_s6 + $0xa8] sm:$0xff]   ;;  %6822 = vst.msk [vmem:[#allocation5] sm:$0xf] %vm6821_vm11, %v14205_v4  ;;  %v15621_v6 = vld [vmem:[%s21894_s6 + $0x18] sm:$0xff]   ;;  %14878 = vmatprep.subr.bf16.mxu0 %v15620_v47  ;;  %v14311_v27 = vpack.c.bf16 %v19012_v44, %v19012_v44 }
 0x32e   : > { %8367 = vst.msk [vmem:[#allocation5 + $0xb0] sm:$0xf] %vm6821_vm11, %v19277_v50  ;;  %v6657_v61 = vsel %vm1278_vm4, %v22220_v3, %v22219_v30  ;;  %v3818_v23 = vmul.f32 %v3794_v51, %v22221_v19  ;;  %v4264_v54 = vpop.permute.xlu0 %4263  ;;  %v14733_v31 = vpop.f32.mrf.mxu0  ;;  %v19321_v21 = vpack.c.bf16 %v7923_v52, %v7923_v52  ;;  %v22223_v51 = vrot.slane %v19279_v15, 7  ;;  %14963 = vmatpush3.bf16.msra.mxu1 %v15622_v33  ;;  %v15623_v46 = vld [vmem:[%s21894_s6 + $0xe0] sm:$0xff]   ;;  %v15625_v33 = vld [vmem:[%s21894_s6 + $0x10] sm:$0xff]  }
 0x32f   : > { %v14254_v13 = vpack.c.bf16 %v6657_v61, %v6657_v61  ;;  %4322 = vst.msk [vmem:[#allocation4 + $0xb4] sm:$0xf] %vm1616_vm7, %v4266_v8  ;;  %v3620_v8 = vadd.f32 %v18932_v32, %v14732_v20  ;;  %4321 = vst.msk [vmem:[#allocation4 + $0xa8] sm:$0xf] %vm1616_vm7, %v4264_v54  ;;  %v14230_v52 = vpack.c.bf16 %v19224_v2, %v19224_v2  ;;  %14879 = vmatpush3.bf16.msra.mxu0 %v15621_v6 }
 0x330   : > { %v19326_v41 = vsel %vm1205_vm6, %v7206_v18, %v22223_v51  ;;  %3842 = vst.msk [vmem:[#allocation3 + $0x98] sm:$0xff] %vm340_vm5, %v3818_v23  ;;  %5625 = vrot.lane.b32.xlu1 %v14180_v45, %s15976_s24  ;;  %v19340_v18 = vsel %vm1205_vm6, 0.0, %v18650_v16  ;;  %5623 = vrot.lane.b32.xlu0 %v14179_v22, %s15976_s24  ;;  %v14734_v9 = vpop.f32.mrf.mxu0  ;;  %v14229_v20 = vpack.c.bf16 %v19226_v12, %v19226_v12  ;;  %v6653_v61 = vrot.slane %v19226_v12, 1  ;;  %v15624_v12 = vld [vmem:[%s21894_s6 + $0x50] sm:$0xff]   ;;  %s15977_s24 = smov [#allocation6]  }
 0x331   : > { %7112 = vst.msk [vmem:[#allocation5 + $0x18] sm:$0xf] %vm6821_vm11, %v14254_v13  ;;  %8368 = vst.msk [vmem:[#allocation5 + $0xc4] sm:$0xf] %vm6821_vm11, %v19321_v21  ;;  %v3749_v45 = vadd.f32 %v3748_v10, %v3620_v8  ;;  %v14735_v16 = vadd.f32 %v14734_v9, %v14733_v31  ;;  %v5082_v40 = vpop.permute.xlu1 %5081  ;;  %v5821_v47 = vld [vmem:[#allocation4 + $0x9c] sm:$0xff]  ;;  %v14277_v30 = vpack.c.bf16 %v19340_v18, %v19340_v18  ;;  %v3751_v13 = vpop.f32.mrf.mxu1  ;;  %v22224_v6 = vrot.slane %v19224_v2, 1 }
 0x332   : > { %5138 = vst.msk [vmem:[#allocation4 + $0xb8] sm:$0xf] %vm1616_vm7, %v5082_v40  ;;  %v5080_v54 = vpop.permute.xlu0 %5079  ;;  %v19355_v3 = vld [vmem:[#allocation3 + $0x90] sm:$0xff]  ;;  %v15629_v18 = vld [vmem:[%s21894_s6 + $0xd8] sm:$0xff]   ;;  %v19385_v9 = vpack.c.bf16 %v19114_v63, %v19114_v63  ;;  %v22226_v40 = vrot.slane %v19279_v15, 1  ;;  %14964 = vmatprep.subr.bf16.mxu1 %v15623_v46  ;;  %14880 = vmatprep.subr.bf16.mxu0 %v15624_v12  ;;  %s15913_s26 = sshll.u32 %s15977_s24, 4  ;;  %s15914_s26 = int_to_ptr.vmem [resolvable:$false] %s15913_s26 }
 0x333   : > { %v5819_v4 = vld [vmem:[#allocation4 + $0x90] sm:$0xff]  ;;  %7601 = vst.msk [vmem:[#allocation5 + $0xd0] sm:$0xf] %vm6821_vm11, %v14311_v27  ;;  %v3795_v44 = vmax.f32 %v3749_v45, 0.0  ;;  %v3623_v31 = vadd.f32 %v18932_v32, %v14735_v16  ;;  %v7924_v23 = vrot.slane %v19355_v3, 1  ;;  %v7210_v51 = vrot.slane %v19355_v3, 7  ;;  %14881 = vmatpush3.bf16.msra.mxu0 %v15625_v33 }
 0x334   : > { %v15596_v22 = vld [vmem:[#allocation4 + $0x94] ss:$12 sps:$4 sm:$0xff]   ;;  %5137 = vst.msk [vmem:[#allocation4 + $0xac] sm:$0xf] %vm1616_vm7, %v5080_v54  ;;  %6920 = vrot.lane.b32.xlu1 %v14230_v52, %s15975_s13  ;;  %v13071_v10 = vcombine.low %v5819_v4, %v5821_v47  ;;  %6918 = vrot.lane.b32.xlu0 %v14229_v20, %s15975_s13  ;;  %v6655_v8 = vsel %vm1278_vm4, %v6653_v61, %v22224_v6  ;;  %v22225_v20 = vld [vmem:[#allocation26_spill] sm:$0xff]  ;;  %v15630_v54 = vld [vmem:[%s21894_s6 + $0x48] sm:$0xff]  }
 0x335   : > { %6283 = vmatprep.mubr.bf16.mxu1 %v15596_v22  ;;  %v15626_v52 = vld [vmem:[%s21894_s6 + $0xa0] sm:$0xff]   ;;  %v3819_v27 = vmul.f32 %v3795_v44, %v22225_v20  ;;  %v3752_v45 = vadd.f32 %v3751_v13, %v3623_v31  ;;  %v4434_v16 = vpop.permute.xlu1 %4433  ;;  %v7925_v47 = vsel %vm1278_vm4, %v22226_v40, %v7924_v23  ;;  %v22227_v44 = vrot.slane %v19279_v15, 7  ;;  %v15632_v46 = vld [vmem:[%s21894_s6 + $0x98] sm:$0xff]   ;;  %8078 = vst.msk [vmem:[#allocation5 + $0x98] sm:$0xf] %vm6821_vm11, %v19385_v9  ;;  %v15631_v6 = vld [vmem:[%s21894_s6 + $0x8] sm:$0xff]  }
 0x336   : > { %6284 = vmatmul.mubr.bf16.gmra.mxu1 %v13071_v10  ;;  %4490 = vst.msk [vmem:[#allocation4 + $0xb4] sm:$0xf] %vm1785_vm9, %v4434_v16  ;;  %v4432_v4 = vpop.permute.xlu0 %4431  ;;  %v14736_v22 = vpop.f32.mrf.mxu0  ;;  %v19395_v63 = vpack.c.bf16 %v7925_v47, %v7925_v47  ;;  %v14253_v10 = vpack.c.bf16 %v6655_v8, %v6655_v8  ;;  %14882 = vmatprep.subr.bf16.mxu0 %v15630_v54 }
 0x337   : > { %v19397_v61 = vld [vmem:[#allocation3 + $0x98] sm:$0xff]  ;;  %v19402_v31 = vsel %vm1205_vm6, %v22227_v44, %v7210_v51  ;;  %14965 = vmatpush3.bf16.msra.mxu1 %v15626_v52  ;;  %6835 = vst.msk [vmem:[#allocation5 + $0x104] sm:$0xf] %vm6821_vm11, %v19385_v9  ;;  %v3796_v13 = vmax.f32 %v3752_v45, 0.0  ;;  %v19432_v40 = vpack.c.bf16 %v19119_v38, %v19119_v38  ;;  %14883 = vmatpush3.bf16.msra.mxu0 %v15631_v6  ;;  %7125 = vst.msk [vmem:[#allocation5 + $0x11c] sm:$0xf] %vm6821_vm11, %v19277_v50 }
 0x338   : > { %3843 = vst.msk [vmem:[#allocation3 + $0xa0] sm:$0xff] %vm340_vm5, %v3819_v27  ;;  %7401 = vrot.lane.b32.xlu1 %v18749_v11, %s15975_s13  ;;  %v7926_v12 = vrot.slane %v19397_v61, 1  ;;  %7399 = vrot.lane.b32.xlu0 %v14277_v30, %s15975_s13  ;;  %v14737_v8 = vpop.f32.mrf.mxu0  ;;  %v7212_v52 = vrot.slane %v19397_v61, 7  ;;  %v14312_v11 = vpack.c.bf16 %v19072_v60, %v19072_v60  ;;  %v22228_v27 = vld [vmem:[#allocation25_spill] sm:$0xff] }
 0x339   : > { %4489 = vst.msk [vmem:[#allocation4 + $0xa8] sm:$0xf] %vm1785_vm9, %v4432_v4  ;;  %14966 = vmatprep.subr.bf16.mxu1 %v15629_v18  ;;  %v3820_v33 = vmul.f32 %v3796_v13, %v22228_v27  ;;  %v14738_v45 = vadd.f32 %v14737_v8, %v14736_v22  ;;  %v5442_v16 = vpop.permute.xlu1 %5441  ;;  %v15634_v38 = vld [vmem:[%s21894_s6 + $0xd0] sm:$0xff]   ;;  %v15867_v13 = vld [vmem:[#allocation3 + $0x40] sm:$0xff] }
 0x33a   : > { %8369 = vst.msk [vmem:[#allocation5 + $0xd8] sm:$0xf] %vm6821_vm11, %v19395_v63  ;;  %7111 = vst.msk [vmem:[#allocation5 + $0x4] sm:$0xf] %vm6821_vm11, %v14253_v10  ;;  %v7927_v30 = vsel %vm1278_vm4, %v7924_v23, %v7926_v12  ;;  %v5440_v47 = vpop.permute.xlu0 %5439  ;;  %v14739_v18 = vpop.f32.mrf.mxu0  ;;  %v19440_v60 = vsel %vm1205_vm6, %v7210_v51, %v7212_v52  ;;  %v15633_v23 = vld [vmem:[%s21894_s6 + $0x40] sm:$0xff]   ;;  %v15636_v22 = vld [vmem:[%s21894_s6 + $0x90] sm:$0xff]   ;;  %v19471_v6 = vpack.c.bf16 %v15867_v13, %v15867_v13 }
 0x33b   : > { %5498 = vst.msk [vmem:[#allocation4 + $0xb8] sm:$0xf] %vm1785_vm9, %v5442_v16  ;;  %v19435_v4 = vpack.c.bf16 %v7927_v30, %v7927_v30  ;;  %14967 = vmatpush3.bf16.msra.mxu1 %v15632_v46  ;;  %v3628_v54 = vadd.f32 %v18932_v32, %v14738_v45  ;;  %5497 = vst.msk [vmem:[#allocation4 + $0xac] sm:$0xf] %vm1785_vm9, %v5440_v47  ;;  %v15635_v51 = vld [vmem:[%s21894_s6] sm:$0xff]   ;;  %14884 = vmatprep.subr.bf16.mxu0 %v15633_v23  ;;  %v22229_v45 = vrot.slane %v18667_v1, 7 }
 0x33c   : > { %7602 = vst.msk [vmem:[#allocation5 + $0xe4] sm:$0xf] %vm6821_vm11, %v14312_v11  ;;  %7689 = vrot.lane.b32.xlu1 %v18879_v39, %s15975_s13  ;;  %8079 = vst.msk [vmem:[#allocation5 + $0xac] sm:$0xf] %vm6821_vm11, %v19432_v40  ;;  %7687 = vrot.lane.b32.xlu0 %v18714_v26, %s15975_s13  ;;  %v14740_v44 = vpop.f32.mrf.mxu0  ;;  %v15868_v26 = vld [vmem:[#allocation3 + $0x38] sm:$0xff]  ;;  %v22230_v16 = vrot.slane %v19224_v2, 7  ;;  %v19499_v2 = vpop.f32.mrf.mxu1 }
 0x33d   : > { %3844 = vst.msk [vmem:[#allocation3 + $0xa8] sm:$0xff] %vm340_vm5, %v3820_v33  ;;  %v3757_v39 = vadd.f32 %v19254_v24, %v3628_v54  ;;  %v14741_v10 = vadd.f32 %v14740_v44, %v14739_v18  ;;  %v4794_v46 = vpop.permute.xlu1 %4793  ;;  %14968 = vmatprep.subr.bf16.mxu1 %v15634_v38  ;;  %v19476_v11 = vpack.c.bf16 %v15868_v26, %v15868_v26  ;;  %v15637_v24 = vld [vmem:[%s21894_s6 + $0xc8] sm:$0xff]   ;;  %v15639_v1 = vld [vmem:[%s21894_s6 + $0xc0] sm:$0xff]   ;;  %v15869_v54 = vld [vmem:[#allocation3 + $0x18] sm:$0xff] }
 0x33e   : > { %6836 = vst.msk [vmem:[#allocation5 + $0x118] sm:$0xf] %vm6821_vm11, %v19432_v40  ;;  %8370 = vst.msk [vmem:[#allocation5 + $0xec] sm:$0xf] %vm6821_vm11, %v19435_v4  ;;  %v4792_v8 = vpop.permute.xlu0 %4791  ;;  %v6585_v30 = vsel %vm1205_vm6, %v22230_v16, %v22229_v45  ;;  %v15638_v47 = vld [vmem:[%s21894_s6 + $0x88] sm:$0xff]   ;;  %14885 = vmatpush3.bf16.msra.mxu0 %v15635_v51  ;;  %v15870_v13 = vld [vmem:[#allocation3 + $0x20] sm:$0xff] }
 0x33f   : > { %4850 = vst.msk [vmem:[#allocation4 + $0xb4] sm:$0xf] %vm2146_vm10, %v4794_v46  ;;  %v19478_v33 = vld [vmem:[#allocation3 + $0xa0] sm:$0xff]  ;;  %14969 = vmatpush3.bf16.msra.mxu1 %v15636_v22  ;;  %v3797_v18 = vmax.f32 %v3757_v39, 0.0  ;;  %v3631_v23 = vadd.f32 %v18932_v32, %v14741_v10  ;;  %4849 = vst.msk [vmem:[#allocation4 + $0xa8] sm:$0xf] %vm2146_vm10, %v4792_v8  ;;  %v14231_v22 = vpack.c.bf16 %v15869_v54, %v15869_v54 }
 0x340   : > { %8169 = vrot.lane.b32.xlu1 %v19471_v6, %s15975_s13  ;;  %v7928_v38 = vrot.slane %v19478_v33, 1  ;;  %8167 = vrot.lane.b32.xlu0 %v19476_v11, %s15975_s13  ;;  %v14207_v32 = vpack.c.bf16 %v6585_v30, %v6585_v30  ;;  %v7214_v44 = vrot.slane %v19478_v33, 7  ;;  %v22231_v39 = vld [vmem:[#allocation28_spill] sm:$0xff]  ;;  %v14232_v8 = vpack.c.bf16 %v15870_v13, %v15870_v13  ;;  %7126 = vst.msk [vmem:[#allocation5 + $0x130] sm:$0xf] %vm6821_vm11, %v19321_v21 }
 0x341   : > { %14970 = vmatprep.subr.bf16.mxu1 %v15637_v24  ;;  %v3821_v10 = vmul.f32 %v3797_v18, %v22231_v39  ;;  %v3760_v46 = vadd.f32 %v19343_v62, %v3631_v23  ;;  %v5610_v51 = vpop.permute.xlu1 %5609  ;;  %v15640_v18 = vld [vmem:[%s21894_s6 + $0x80] sm:$0xff]   ;;  %7127 = vst.msk [vmem:[#allocation5 + $0x144] sm:$0xf] %vm6821_vm11, %v19395_v63  ;;  %7128 = vst.msk [vmem:[#allocation5 + $0x158] sm:$0xf] %vm6821_vm11, %v19435_v4 }
 0x342   : > { %v7929_v26 = vsel %vm1278_vm4, %v7926_v12, %v7928_v38  ;;  %5666 = vst.msk [vmem:[#allocation4 + $0xb8] sm:$0xf] %vm2146_vm10, %v5610_v51  ;;  %v5608_v45 = vpop.permute.xlu0 %5607  ;;  %v14742_v16 = vpop.f32.mrf.mxu0  ;;  %v19518_v62 = vsel %vm1205_vm6, %v7212_v52, %v7214_v44 }
 0x343   : > { %v19510_v54 = vpack.c.bf16 %v7929_v26, %v7929_v26  ;;  %6824 = vst.msk [vmem:[#allocation5 + $0x28] sm:$0xf] %vm6821_vm11, %v14207_v32  ;;  %14971 = vmatpush3.bf16.msra.mxu1 %v15638_v47  ;;  %v3798_v30 = vmax.f32 %v3760_v46, 0.0  ;;  %v3764_v47 = vpop.f32.mrf.mxu1  ;;  %v22232_v32 = vld [vmem:[#allocation27_spill] sm:$0xff] }
 0x344   : > { %v19512_v24 = vld [vmem:[#allocation3 + $0xa8] sm:$0xff]  ;;  %3845 = vst.msk [vmem:[#allocation3 + $0xb0] sm:$0xff] %vm340_vm5, %v3821_v10  ;;  %6924 = vrot.lane.b32.xlu1 %v14232_v8, %s15975_s13  ;;  %14972 = vmatprep.subr.bf16.mxu1 %v15639_v1  ;;  %v14743_v23 = vpop.f32.mrf.mxu0 }
 0x345   : > { %5665 = vst.msk [vmem:[#allocation4 + $0xac] sm:$0xf] %vm2146_vm10, %v5608_v45  ;;  %v7930_v12 = vrot.slane %v19512_v24, 1  ;;  %6922 = vrot.lane.b32.xlu0 %v14231_v22, %s15975_s13  ;;  %v21991_v52 = vrot.slane %v19512_v24, 7  ;;  %v3822_v10 = vmul.f32 %v3798_v30, %v22232_v32  ;;  %v14744_v46 = vadd.f32 %v14743_v23, %v14742_v16  ;;  %v4270_v51 = vpop.permute.xlu1 %4269  ;;  %v19545_v45 = vld [vmem:[%s21893_s5] ss:$0 sm:$0xff]  ;;  %v19551_v16 = vpop.f32.mrf.mxu1 }
 0x346   : > { %8371 = vst.msk [vmem:[#allocation5 + $0x100] sm:$0xf] %vm6821_vm11, %v19510_v54  ;;  %v4268_v1 = vpop.permute.xlu0 %4267  ;;  %v14745_v8 = vpop.f32.mrf.mxu0  ;;  %7129 = vst.msk [vmem:[#allocation5 + $0x16c] sm:$0xf] %vm6821_vm11, %v19510_v54 }
 0x347   : > { %v7931_v13 = vsel %vm1278_vm4, %v7928_v38, %v7930_v12  ;;  %4324 = vst.msk [vmem:[#allocation4 + $0xcc] sm:$0xf] %vm1616_vm7, %v4270_v51  ;;  %v19539_v22 = vsel %vm1205_vm6, %v7214_v44, %v21991_v52  ;;  %14973 = vmatpush3.bf16.msra.mxu1 %v15640_v18  ;;  %v3636_v38 = vadd.f32 %v19545_v45, %v14744_v46  ;;  %4323 = vst.msk [vmem:[#allocation4 + $0xc0] sm:$0xf] %vm1616_vm7, %v4268_v1 }
 0x348   : > { %v19534_v26 = vpack.c.bf16 %v7931_v13, %v7931_v13  ;;  %3846 = vst.msk [vmem:[#allocation3 + $0xb8] sm:$0xff] %vm340_vm5, %v3822_v10  ;;  %7405 = vrot.lane.b32.xlu1 %v18903_v7, %s15975_s13  ;;  %v14746_v30 = vpop.f32.mrf.mxu0 }
 0x349   : > { %7403 = vrot.lane.b32.xlu0 %v18875_v25, %s15975_s13  ;;  %v3765_v44 = vadd.f32 %v3764_v47, %v3636_v38  ;;  %v14747_v18 = vadd.f32 %v14746_v30, %v14745_v8  ;;  %v5086_v23 = vpop.permute.xlu1 %5085  ;;  %v5825_v10 = vld [vmem:[#allocation4 + $0xb4] sm:$0xff]  ;;  %v3767_v8 = vpop.f32.mrf.mxu1  ;;  %v22233_v38 = vld [vmem:[#allocation30_spill] sm:$0xff] }
 0x34a   : > { %8372 = vst.msk [vmem:[#allocation5 + $0x114] sm:$0xf] %vm6821_vm11, %v19534_v26  ;;  %v5084_v46 = vpop.permute.xlu0 %5083  ;;  %7130 = vst.msk [vmem:[#allocation5 + $0x180] sm:$0xf] %vm6821_vm11, %v19534_v26 }
 0x34b   : > { %5140 = vst.msk [vmem:[#allocation4 + $0xd0] sm:$0xf] %vm1616_vm7, %v5086_v23  ;;  %v19558_v1 = vld [vmem:[#allocation3 + $0xb0] sm:$0xff]  ;;  %v3799_v7 = vmax.f32 %v3765_v44, 0.0  ;;  %v3639_v52 = vadd.f32 %v19545_v45, %v14747_v18  ;;  %5139 = vst.msk [vmem:[#allocation4 + $0xc4] sm:$0xf] %vm1616_vm7, %v5084_v46 }
 0x34c   : > { %v5823_v51 = vld [vmem:[#allocation4 + $0xa8] sm:$0xff]  ;;  %7693 = vrot.lane.b32.xlu1 %v18742_v14, %s15975_s13  ;;  %v7932_v47 = vrot.slane %v19558_v1, 1  ;;  %v15872_v44 = vld [vmem:[#allocation3 + $0x50] sm:$0xff]  ;;  %v7218_v19 = vrot.slane %v19558_v1, 7 }
 0x34d   : > { %v15598_v13 = vld [vmem:[#allocation4 + $0xac] ss:$12 sps:$4 sm:$0xff]   ;;  %v13074_v25 = vcombine.low %v5823_v51, %v5825_v10  ;;  %7691 = vrot.lane.b32.xlu0 %v18915_v48, %s15975_s13  ;;  %v3823_v30 = vmul.f32 %v3799_v7, %v22233_v38  ;;  %v3768_v23 = vadd.f32 %v3767_v8, %v3639_v52  ;;  %v4438_v32 = vpop.permute.xlu1 %4437  ;;  %v19568_v18 = vpack.c.bf16 %v15872_v44, %v15872_v44  ;;  %v15873_v51 = vld [vmem:[#allocation3 + $0x48] sm:$0xff] }
 0x34e   : > { %6291 = vmatprep.mubr.bf16.mxu1 %v15598_v13  ;;  %v7933_v46 = vsel %vm1278_vm4, %v7930_v12, %v7932_v47  ;;  %4492 = vst.msk [vmem:[#allocation4 + $0xcc] sm:$0xf] %vm1785_vm9, %v4438_v32  ;;  %v4436_v14 = vpop.permute.xlu0 %4435  ;;  %v19572_v39 = vpack.c.bf16 %v15873_v51, %v15873_v51  ;;  %v22234_v13 = vld [vmem:[#allocation29_spill] sm:$0xff]  ;;  %v15875_v51 = vld [vmem:[#allocation3 + $0x28] sm:$0xff] }
 0x34f   : > { %6292 = vmatmul.mubr.bf16.gmra.mxu1 %v13074_v25  ;;  %v14748_v10 = vpop.f32.mrf.mxu0  ;;  %v19574_v27 = vpack.c.bf16 %v7933_v46, %v7933_v46  ;;  %v19576_v48 = vld [vmem:[#allocation3 + $0xb8] sm:$0xff]  ;;  %3847 = vst.msk [vmem:[#allocation3 + $0xc0] sm:$0xff] %vm340_vm5, %v3823_v30  ;;  %v3800_v52 = vmax.f32 %v3768_v23, 0.0  ;;  %v15874_v30 = vld [vmem:[#allocation3 + $0x30] sm:$0xff]  ;;  %v14233_v38 = vpack.c.bf16 %v15875_v51, %v15875_v51 }
 0x350   : > { %4491 = vst.msk [vmem:[#allocation4 + $0xc0] sm:$0xf] %vm1785_vm9, %v4436_v14  ;;  %8173 = vrot.lane.b32.xlu1 %v19568_v18, %s15975_s13  ;;  %v7934_v12 = vrot.slane %v19576_v48, 1  ;;  %v14234_v23 = vpack.c.bf16 %v15874_v30, %v15874_v30  ;;  %v7220_v34 = vrot.slane %v19576_v48, 7 }
 0x351   : > { %v14749_v32 = vpop.f32.mrf.mxu0  ;;  %8171 = vrot.lane.b32.xlu0 %v19572_v39, %s15975_s13  ;;  %8373 = vst.msk [vmem:[#allocation5 + $0x128] sm:$0xf] %vm6821_vm11, %v19574_v27  ;;  %v3824_v7 = vmul.f32 %v3800_v52, %v22234_v13  ;;  %v5446_v8 = vpop.permute.xlu1 %5445  ;;  %v22235_v52 = vrot.slane %v19512_v24, 7  ;;  %7131 = vst.msk [vmem:[#allocation5 + $0x194] sm:$0xf] %vm6821_vm11, %v19574_v27 }
 0x352   : > { %v14750_v25 = vadd.f32 %v14749_v32, %v14748_v10  ;;  %v7935_v44 = vsel %vm1278_vm4, %v7932_v47, %v7934_v12  ;;  %5500 = vst.msk [vmem:[#allocation4 + $0xd0] sm:$0xf] %vm1785_vm9, %v5446_v8  ;;  %v5444_v46 = vpop.permute.xlu0 %5443  ;;  %v19607_v8 = vsel %vm1205_vm6, %v7218_v19, %v7220_v34 }
 0x353   : > { %v14751_v14 = vpop.f32.mrf.mxu0  ;;  %v19590_v20 = vpack.c.bf16 %v7935_v44, %v7935_v44  ;;  %3848 = vst.msk [vmem:[#allocation3 + $0xc8] sm:$0xff] %vm340_vm5, %v3824_v7  ;;  %v19604_v32 = vsel %vm1205_vm6, %v22235_v52, %v7218_v19 }
 0x354   : > { %v3644_v10 = vadd.f32 %v19545_v45, %v14750_v25  ;;  %5499 = vst.msk [vmem:[#allocation4 + $0xc4] sm:$0xf] %vm1785_vm9, %v5444_v46  ;;  %6928 = vrot.lane.b32.xlu1 %v14234_v23, %s15975_s13 }
 0x355   : > { %v14752_v47 = vpop.f32.mrf.mxu0  ;;  %6926 = vrot.lane.b32.xlu0 %v14233_v38, %s15975_s13  ;;  %8374 = vst.msk [vmem:[#allocation5 + $0x13c] sm:$0xf] %vm6821_vm11, %v19590_v20  ;;  %v4798_v30 = vpop.permute.xlu1 %4797  ;;  %7132 = vst.msk [vmem:[#allocation5 + $0x1a8] sm:$0xf] %vm6821_vm11, %v19590_v20 }
 0x356   : > { %v3773_v7 = vadd.f32 %v19499_v2, %v3644_v10  ;;  %v14753_v25 = vadd.f32 %v14752_v47, %v14751_v14  ;;  %4852 = vst.msk [vmem:[#allocation4 + $0xcc] sm:$0xf] %vm2146_vm10, %v4798_v30  ;;  %v4796_v23 = vpop.permute.xlu0 %4795  ;;  %v19611_v44 = vld [vmem:[#allocation3 + $0xc0] sm:$0xff]  ;;  %v22236_v2 = vld [vmem:[#allocation32_spill] sm:$0xff] }
 0x357   : > { %4851 = vst.msk [vmem:[#allocation4 + $0xc0] sm:$0xf] %vm2146_vm10, %v4796_v23  ;;  %v19618_v19 = vrot.slane %v19611_v44, 1 }
 0x358   : > { %v3801_v38 = vmax.f32 %v3773_v7, 0.0  ;;  %v3647_v46 = vadd.f32 %v19545_v45, %v14753_v25  ;;  %7409 = vrot.lane.b32.xlu1 %v18937_v17, %s15975_s13 }
 0x359   : > { %7407 = vrot.lane.b32.xlu0 %v18909_v57, %s15975_s13  ;;  %v5614_v10 = vpop.permute.xlu1 %5613  ;;  %v7937_v47 = vsel %vm1278_vm4, %v7934_v12, %v19618_v19  ;;  %v22237_v12 = vld [vmem:[#allocation31_spill] sm:$0xff] }
 0x35a   : > { %v3825_v14 = vmul.f32 %v3801_v38, %v22236_v2  ;;  %v3776_v51 = vadd.f32 %v19551_v16, %v3647_v46  ;;  %5668 = vst.msk [vmem:[#allocation4 + $0xd0] sm:$0xf] %vm2146_vm10, %v5614_v10  ;;  %v5612_v52 = vpop.permute.xlu0 %5611  ;;  %v19627_v7 = vld [vmem:[#allocation3 + $0xc8] sm:$0xff]  ;;  %v19629_v17 = vpack.c.bf16 %v7937_v47, %v7937_v47  ;;  %v14313_v16 = vpack.c.bf16 %v19229_v28, %v19229_v28  ;;  %v15876_v38 = vld [vmem:[#allocation3 + $0x60] sm:$0xff] }
 0x35b   : > { %5667 = vst.msk [vmem:[#allocation4 + $0xc4] sm:$0xf] %vm2146_vm10, %v5612_v52  ;;  %v9600_v57 = vrot.slane %v19627_v7, 1  ;;  %v19643_v46 = vpack.c.bf16 %v15876_v38, %v15876_v38  ;;  %v7222_v28 = vrot.slane %v19611_v44, 7  ;;  %v19659_v47 = vrot.slane %v19627_v7, 7 }
 0x35c   : > { %3849 = vst.msk [vmem:[#allocation3 + $0xd0] sm:$0xff] %vm340_vm5, %v3825_v14  ;;  %v3802_v25 = vmax.f32 %v3776_v51, 0.0  ;;  %7697 = vrot.lane.b32.xlu1 %v18839_v53, %s15975_s13  ;;  %v15877_v51 = vld [vmem:[#allocation3 + $0x58] sm:$0xff]  ;;  %v19663_v52 = vpack.c.bf16 %v19284_v42, %v19284_v42 }
 0x35d   : > { %7695 = vrot.lane.b32.xlu0 %v18837_v35, %s15975_s13  ;;  %8375 = vst.msk [vmem:[#allocation5 + $0x150] sm:$0xf] %vm6821_vm11, %v19629_v17  ;;  %v4274_v23 = vpop.permute.xlu1 %4273  ;;  %v7939_v53 = vsel %vm1278_vm4, %v19618_v19, %v9600_v57  ;;  %v19648_v35 = vpack.c.bf16 %v15877_v51, %v15877_v51  ;;  %7603 = vst.msk [vmem:[#allocation5 + $0xf8] sm:$0xf] %vm6821_vm11, %v14313_v16  ;;  %v19676_v38 = vsel %vm1205_vm6, %v7222_v28, %v19659_v47 }
 0x35e   : > { %v3826_v30 = vmul.f32 %v3802_v25, %v22237_v12  ;;  %4326 = vst.msk [vmem:[#allocation4 + $0xe4] sm:$0xf] %vm1616_vm7, %v4274_v23  ;;  %v4272_v14 = vpop.permute.xlu0 %4271  ;;  %v19650_v10 = vpack.c.bf16 %v7939_v53, %v7939_v53  ;;  %v14314_v25 = vpack.c.bf16 %v19279_v15, %v19279_v15  ;;  %v19672_v23 = vsel %vm1205_vm6, %v7220_v34, %v7222_v28 }
 0x35f   : > { %4325 = vst.msk [vmem:[#allocation4 + $0xd8] sm:$0xf] %vm1616_vm7, %v4272_v14  ;;  %v19688_v14 = vpop.f32.mrf.mxu0 }
 0x360   : > { %3850 = vst.msk [vmem:[#allocation3 + $0xd8] sm:$0xff] %vm340_vm5, %v3826_v30  ;;  %8177 = vrot.lane.b32.xlu1 %v19643_v46, %s15975_s13 }
 0x361   : > { %8175 = vrot.lane.b32.xlu0 %v19648_v35, %s15975_s13  ;;  %8376 = vst.msk [vmem:[#allocation5 + $0x164] sm:$0xf] %vm6821_vm11, %v19650_v10  ;;  %v5090_v16 = vpop.permute.xlu1 %5089  ;;  %v5829_v30 = vld [vmem:[#allocation4 + $0xcc] sm:$0xff]  ;;  %8080 = vst.msk [vmem:[#allocation5 + $0xc0] sm:$0xf] %vm6821_vm11, %v19663_v52 }
 0x362   : > { %6837 = vst.msk [vmem:[#allocation5 + $0x12c] sm:$0xf] %vm6821_vm11, %v19663_v52  ;;  %v5088_v15 = vpop.permute.xlu0 %5087  ;;  %v5827_v42 = vld [vmem:[#allocation4 + $0xc0] sm:$0xff]  ;;  %7604 = vst.msk [vmem:[#allocation5 + $0x10c] sm:$0xf] %vm6821_vm11, %v14314_v25 }
 0x363   : > { %5142 = vst.msk [vmem:[#allocation4 + $0xe8] sm:$0xf] %vm1616_vm7, %v5090_v16  ;;  %v15600_v53 = vld [vmem:[#allocation4 + $0xc4] ss:$12 sps:$4 sm:$0xff]   ;;  %v19685_v34 = vld [vmem:[#allocation3 + $0xd0] sm:$0xff]  ;;  %v13077_v51 = vcombine.low %v5827_v42, %v5829_v30  ;;  %v19698_v16 = vpack.c.bf16 %v19326_v41, %v19326_v41 }
 0x364   : > { %5141 = vst.msk [vmem:[#allocation4 + $0xdc] sm:$0xf] %vm1616_vm7, %v5088_v15  ;;  %6932 = vrot.lane.b32.xlu1 %v19471_v6, %s15975_s13  ;;  %v19694_v28 = vrot.slane %v19685_v34, 1  ;;  %6299 = vmatprep.mubr.bf16.mxu1 %v15600_v53  ;;  %v14784_v12 = vpop.f32.mrf.mxu1 }
 0x365   : > { %6930 = vrot.lane.b32.xlu0 %v19476_v11, %s15975_s13  ;;  %v4442_v25 = vpop.permute.xlu1 %4441  ;;  %6300 = vmatmul.mubr.bf16.gmra.mxu1 %v13077_v51  ;;  %8081 = vst.msk [vmem:[#allocation5 + $0xd4] sm:$0xf] %vm6821_vm11, %v19698_v16  ;;  %6838 = vst.msk [vmem:[#allocation5 + $0x140] sm:$0xf] %vm6821_vm11, %v19698_v16  ;;  %v6366_v11 = vpop.f32.mrf.mxu0  ;;  %v14315_v51 = vpack.c.bf16 %v19355_v3, %v19355_v3 }
 0x366   : > { %v9602_v15 = vsel %vm1278_vm4, %v9600_v57, %v19694_v28  ;;  %4494 = vst.msk [vmem:[#allocation4 + $0xe4] sm:$0xf] %vm1785_vm9, %v4442_v25  ;;  %v4440_v41 = vpop.permute.xlu0 %4439  ;;  %v14785_v57 = vpop.f32.mrf.mxu1 }
 0x367   : > { %v19709_v6 = vld [vmem:[#allocation3 + $0xd8] sm:$0xff]  ;;  %v19711_v30 = vpack.c.bf16 %v9602_v15, %v9602_v15  ;;  %4493 = vst.msk [vmem:[#allocation4 + $0xd8] sm:$0xf] %vm1785_vm9, %v4440_v41  ;;  %v14786_v53 = vadd.f32 %v14785_v57, %v14784_v12 }
 0x368   : > { %7413 = vrot.lane.b32.xlu1 %v19104_v5, %s15975_s13  ;;  %v21993_v42 = vrot.slane %v19709_v6, 1  ;;  %v14787_v15 = vpop.f32.mrf.mxu1  ;;  %7605 = vst.msk [vmem:[#allocation5 + $0x120] sm:$0xf] %vm6821_vm11, %v14315_v51  ;;  %v14316_v51 = vpack.c.bf16 %v19397_v61, %v19397_v61  ;;  %7133 = vst.msk [vmem:[#allocation5 + $0x1bc] sm:$0xf] %vm6821_vm11, %v19629_v17 }
 0x369   : > { %7411 = vrot.lane.b32.xlu0 %v19080_v37, %s15975_s13  ;;  %8377 = vst.msk [vmem:[#allocation5 + $0x178] sm:$0xf] %vm6821_vm11, %v19711_v30  ;;  %v5450_v25 = vpop.permute.xlu1 %5449  ;;  %v6238_v5 = vadd.f32 %v19545_v45, %v14786_v53  ;;  %v19734_v37 = vpop.f32.mrf.mxu0 }
 0x36a   : > { %v9604_v41 = vsel %vm1278_vm4, %v19694_v28, %v21993_v42  ;;  %5502 = vst.msk [vmem:[#allocation4 + $0xe8] sm:$0xf] %vm1785_vm9, %v5450_v25  ;;  %v5448_v12 = vpop.permute.xlu0 %5447  ;;  %v14788_v3 = vpop.f32.mrf.mxu1  ;;  %v19741_v42 = vpack.c.bf16 %v19402_v31, %v19402_v31 }
 0x36b   : > { %v19731_v57 = vpack.c.bf16 %v9604_v41, %v9604_v41  ;;  %5501 = vst.msk [vmem:[#allocation4 + $0xdc] sm:$0xf] %vm1785_vm9, %v5448_v12  ;;  %v6367_v53 = vadd.f32 %v6366_v11, %v6238_v5  ;;  %v14789_v2 = vadd.f32 %v14788_v3, %v14787_v15  ;;  %v15878_v41 = vld [vmem:[#allocation3 + $0x70] sm:$0xff]  ;;  %v15879_v11 = vld [vmem:[#allocation3 + $0x68] sm:$0xff]  ;;  %v6369_v61 = vpop.f32.mrf.mxu0  ;;  %v19765_v5 = vpack.c.bf16 %v19440_v60, %v19440_v60 }
 0x36c   : > { %7701 = vrot.lane.b32.xlu1 %v18887_v36, %s15975_s13  ;;  %v19749_v12 = vpack.c.bf16 %v15878_v41, %v15878_v41  ;;  %8082 = vst.msk [vmem:[#allocation5 + $0xe8] sm:$0xf] %vm6821_vm11, %v19741_v42  ;;  %6839 = vst.msk [vmem:[#allocation5 + $0x154] sm:$0xf] %vm6821_vm11, %v19741_v42  ;;  %v19757_v15 = vpack.c.bf16 %v15879_v11, %v15879_v11 }
 0x36d   : > { %7699 = vrot.lane.b32.xlu0 %v18882_v29, %s15975_s13  ;;  %8378 = vst.msk [vmem:[#allocation5 + $0x18c] sm:$0xf] %vm6821_vm11, %v19731_v57  ;;  %v4802_v25 = vpop.permute.xlu1 %4801  ;;  %v6461_v36 = vmax.f32 %v6367_v53, 0.0  ;;  %v6241_v31 = vadd.f32 %v19545_v45, %v14789_v2  ;;  %7606 = vst.msk [vmem:[#allocation5 + $0x134] sm:$0xf] %vm6821_vm11, %v14316_v51 }
 0x36e   : > { %4854 = vst.msk [vmem:[#allocation4 + $0xe4] sm:$0xf] %vm2146_vm10, %v4802_v25  ;;  %v4800_v29 = vpop.permute.xlu0 %4799  ;;  %v19788_v25 = vpack.c.bf16 %v19478_v33, %v19478_v33  ;;  %v19804_v33 = vpack.c.bf16 %v19518_v62, %v19518_v62 }
 0x36f   : > { %4853 = vst.msk [vmem:[#allocation4 + $0xd8] sm:$0xf] %vm2146_vm10, %v4800_v29  ;;  %v6485_v2 = vmul.f32 %v6461_v36, %v22178_v58  ;;  %v6370_v3 = vadd.f32 %v6369_v61, %v6241_v31  ;;  %v14318_v29 = vpack.c.bf16 %v19512_v24, %v19512_v24 }
 0x370   : > { %8181 = vrot.lane.b32.xlu1 %v19749_v12, %s15975_s13  ;;  %8083 = vst.msk [vmem:[#allocation5 + $0xfc] sm:$0xf] %vm6821_vm11, %v19765_v5  ;;  %6840 = vst.msk [vmem:[#allocation5 + $0x168] sm:$0xf] %vm6821_vm11, %v19765_v5 }
 0x371   : > { %8179 = vrot.lane.b32.xlu0 %v19757_v15, %s15975_s13  ;;  %v5618_v53 = vpop.permute.xlu1 %5617  ;;  %6509 = vst.msk [vmem:[#allocation3 + $0xe0] sm:$0xff] %vm340_vm5, %v6485_v2  ;;  %v6462_v60 = vmax.f32 %v6370_v3, 0.0 }
 0x372   : > { %5670 = vst.msk [vmem:[#allocation4 + $0xe8] sm:$0xf] %vm2146_vm10, %v5618_v53  ;;  %v5616_v51 = vpop.permute.xlu0 %5615 }
 0x373   : > { %5669 = vst.msk [vmem:[#allocation4 + $0xdc] sm:$0xf] %vm2146_vm10, %v5616_v51  ;;  %v6486_v58 = vmul.f32 %v6462_v60, %v22179_v55  ;;  %v19798_v55 = vrot.slane %v19685_v34, 7 }
 0x374   : > { %6936 = vrot.lane.b32.xlu1 %v19568_v18, %s15975_s13  ;;  %7607 = vst.msk [vmem:[#allocation5 + $0x148] sm:$0xf] %vm6821_vm11, %v19788_v25  ;;  %8084 = vst.msk [vmem:[#allocation5 + $0x110] sm:$0xf] %vm6821_vm11, %v19804_v33 }
 0x375   : > { %6934 = vrot.lane.b32.xlu0 %v19572_v39, %s15975_s13  ;;  %v4278_v41 = vpop.permute.xlu1 %4277  ;;  %6510 = vst.msk [vmem:[#allocation3 + $0xe8] sm:$0xff] %vm340_vm5, %v6486_v58  ;;  %v19800_v39 = vld [vmem:[#allocation3 + $0xd8] sm:$0xff]  ;;  %v19817_v2 = vsel %vm1205_vm6, %v19659_v47, %v19798_v55  ;;  %v22238_v58 = vrot.slane %v19709_v6, 1 }
 0x376   : > { %4328 = vst.msk [vmem:[#allocation4 + $0xfc] sm:$0xf] %vm1616_vm7, %v4278_v41  ;;  %v4276_v36 = vpop.permute.xlu0 %4275  ;;  %v7228_v18 = vrot.slane %v19800_v39, 7  ;;  %v7300_v31 = vrot.slane %v19800_v39, 1 }
 0x377   : > { %4327 = vst.msk [vmem:[#allocation4 + $0xf0] sm:$0xf] %vm1616_vm7, %v4276_v36 }
 0x378   : > { %7417 = vrot.lane.b32.xlu1 %v19167_v56, %s15975_s13  ;;  %v19812_v61 = vld [vmem:[#allocation3 + $0xe0] sm:$0xff]  ;;  %6841 = vst.msk [vmem:[#allocation5 + $0x17c] sm:$0xf] %vm6821_vm11, %v19804_v33  ;;  %v19829_v53 = vsel %vm1205_vm6, %v19798_v55, %v7228_v18  ;;  %7608 = vst.msk [vmem:[#allocation5 + $0x15c] sm:$0xf] %vm6821_vm11, %v14318_v29  ;;  %v19839_v51 = vsel %vm1278_vm4, %v19694_v28, %v7300_v31 }
 0x379   : > { %7415 = vrot.lane.b32.xlu0 %v19140_v43, %s15975_s13  ;;  %v5094_v56 = vpop.permute.xlu1 %5093  ;;  %v5833_v11 = vld [vmem:[#allocation4 + $0xe4] sm:$0xff]  ;;  %v9605_v3 = vrot.slane %v19812_v61, 1 }
 0x37a   : > { %5144 = vst.msk [vmem:[#allocation4 + $0x100] sm:$0xf] %vm1616_vm7, %v5094_v56  ;;  %v5092_v43 = vpop.permute.xlu0 %5091  ;;  %v5831_v24 = vld [vmem:[#allocation4 + $0xd8] sm:$0xff]  ;;  %v15880_v29 = vld [vmem:[#allocation3 + $0x80] sm:$0xff] }
 0x37b   : > { %v15602_v62 = vld [vmem:[#allocation4 + $0xdc] ss:$12 sps:$4 sm:$0xff]   ;;  %5143 = vst.msk [vmem:[#allocation4 + $0xf4] sm:$0xf] %vm1616_vm7, %v5092_v43  ;;  %v13080_v60 = vcombine.low %v5831_v24, %v5833_v11  ;;  %v9606_v41 = vsel %vm1278_vm4, %v22238_v58, %v9605_v3  ;;  %v15881_v43 = vld [vmem:[#allocation3 + $0x78] sm:$0xff] }
 0x37c   : > { %7705 = vrot.lane.b32.xlu1 %v19034_v49, %s15975_s13  ;;  %6307 = vmatprep.mubr.bf16.mxu1 %v15602_v62  ;;  %v19846_v49 = vpack.c.bf16 %v15880_v29, %v15880_v29  ;;  %v19848_v56 = vld [vmem:[#allocation3 + $0xe8] sm:$0xff]  ;;  %v19850_v11 = vpack.c.bf16 %v9606_v41, %v9606_v41  ;;  %v19858_v62 = vpack.c.bf16 %v19539_v22, %v19539_v22 }
 0x37d   : > { %7703 = vrot.lane.b32.xlu0 %v19010_v59, %s15975_s13  ;;  %v4446_v36 = vpop.permute.xlu1 %4445  ;;  %v14790_v18 = vpop.f32.mrf.mxu1  ;;  %6308 = vmatmul.mubr.bf16.gmra.mxu1 %v13080_v60  ;;  %v19853_v59 = vpack.c.bf16 %v15881_v43, %v15881_v43  ;;  %v9607_v24 = vrot.slane %v19848_v56, 1  ;;  %v19876_v22 = vpack.c.bf16 %v19558_v1, %v19558_v1  ;;  %v19885_v43 = vrot.slane %v19812_v61, 7 }
 0x37e   : > { %4496 = vst.msk [vmem:[#allocation4 + $0xfc] sm:$0xf] %vm1785_vm9, %v4446_v36  ;;  %v4444_v28 = vpop.permute.xlu0 %4443 }
 0x37f   : > { %4495 = vst.msk [vmem:[#allocation4 + $0xf0] sm:$0xf] %vm1785_vm9, %v4444_v28  ;;  %v14791_v60 = vpop.f32.mrf.mxu1  ;;  %v9608_v41 = vsel %vm1278_vm4, %v9605_v3, %v9607_v24 }
 0x380   : > { %8185 = vrot.lane.b32.xlu1 %v19846_v49, %s15975_s13  ;;  %8379 = vst.msk [vmem:[#allocation5 + $0x1a0] sm:$0xf] %vm6821_vm11, %v19850_v11  ;;  %v14792_v58 = vadd.f32 %v14791_v60, %v14790_v18  ;;  %8085 = vst.msk [vmem:[#allocation5 + $0x124] sm:$0xf] %vm6821_vm11, %v19858_v62  ;;  %v19880_v29 = vpack.c.bf16 %v9608_v41, %v9608_v41  ;;  %v10129_v60 = vrot.slane %v19848_v56, 7 }
 0x381   : > { %8183 = vrot.lane.b32.xlu0 %v19853_v59, %s15975_s13  ;;  %6842 = vst.msk [vmem:[#allocation5 + $0x190] sm:$0xf] %vm6821_vm11, %v19858_v62  ;;  %v5454_v36 = vpop.permute.xlu1 %5453  ;;  %v14793_v18 = vpop.f32.mrf.mxu1  ;;  %7609 = vst.msk [vmem:[#allocation5 + $0x170] sm:$0xf] %vm6821_vm11, %v19876_v22 }
 0x382   : > { %v6246_v28 = vadd.f32 %v19545_v45, %v14792_v58  ;;  %5504 = vst.msk [vmem:[#allocation4 + $0x100] sm:$0xf] %vm1785_vm9, %v5454_v36  ;;  %v5452_v3 = vpop.permute.xlu0 %5451  ;;  %v19897_v58 = vpack.c.bf16 %v19604_v32, %v19604_v32  ;;  %v14320_v32 = vpack.c.bf16 %v19576_v48, %v19576_v48 }
 0x383   : > { %5503 = vst.msk [vmem:[#allocation4 + $0xf4] sm:$0xf] %vm1785_vm9, %v5452_v3  ;;  %v14794_v1 = vpop.f32.mrf.mxu1  ;;  %v19906_v3 = vsel %vm1205_vm6, %v19885_v43, %v10129_v60 }
 0x384   : > { %6940 = vrot.lane.b32.xlu1 %v19643_v46, %s15975_s13  ;;  %8380 = vst.msk [vmem:[#allocation5 + $0x1b4] sm:$0xf] %vm6821_vm11, %v19880_v29  ;;  %v6375_v41 = vadd.f32 %v19688_v14, %v6246_v28  ;;  %v14795_v36 = vadd.f32 %v14794_v1, %v14793_v18  ;;  %8086 = vst.msk [vmem:[#allocation5 + $0x138] sm:$0xf] %vm6821_vm11, %v19897_v58  ;;  %v19926_v1 = vpack.c.bf16 %v19607_v8, %v19607_v8  ;;  %v22240_v8 = vld [vmem:[#allocation41_spill] sm:$0xff] }
 0x385   : > { %6938 = vrot.lane.b32.xlu0 %v19648_v35, %s15975_s13  ;;  %v4806_v46 = vpop.permute.xlu1 %4805  ;;  %6843 = vst.msk [vmem:[#allocation5 + $0x1a4] sm:$0xf] %vm6821_vm11, %v19897_v58  ;;  %7610 = vst.msk [vmem:[#allocation5 + $0x184] sm:$0xf] %vm6821_vm11, %v14320_v32  ;;  %v15882_v32 = vld [vmem:[#allocation3 + $0x90] sm:$0xff] }
 0x386   : > { %v6463_v14 = vmax.f32 %v6375_v41, 0.0  ;;  %v6249_v18 = vadd.f32 %v19545_v45, %v14795_v36  ;;  %4856 = vst.msk [vmem:[#allocation4 + $0xfc] sm:$0xf] %vm2146_vm10, %v4806_v46  ;;  %v4804_v35 = vpop.permute.xlu0 %4803 }
 0x387   : > { %4855 = vst.msk [vmem:[#allocation4 + $0xf0] sm:$0xf] %vm2146_vm10, %v4804_v35 }
 0x388   : > { %7421 = vrot.lane.b32.xlu1 %v19432_v40, %s15975_s13  ;;  %v6487_v28 = vmul.f32 %v6463_v14, %v22183_v0  ;;  %v6378_v48 = vadd.f32 %v19734_v37, %v6249_v18  ;;  %8087 = vst.msk [vmem:[#allocation5 + $0x14c] sm:$0xf] %vm6821_vm11, %v19926_v1  ;;  %6844 = vst.msk [vmem:[#allocation5 + $0x1b8] sm:$0xf] %vm6821_vm11, %v19926_v1  ;;  %v22239_v0 = vld [vmem:[#allocation11_spill] sm:$0xff]  ;;  %v19946_v37 = vpack.c.bf16 %v19611_v44, %v19611_v44 }
 0x389   : > { %7419 = vrot.lane.b32.xlu0 %v19385_v9, %s15975_s13  ;;  %v5622_v41 = vpop.permute.xlu1 %5621  ;;  %v19948_v14 = vpack.c.bf16 %v15882_v32, %v15882_v32  ;;  %v15883_v18 = vld [vmem:[#allocation3 + $0x88] sm:$0xff]  ;;  %v19963_v44 = vpack.c.bf16 %v19672_v23, %v19672_v23 }
 0x38a   : > { %6511 = vst.msk [vmem:[#allocation3 + $0xf0] sm:$0xff] %vm340_vm5, %v6487_v28  ;;  %v6464_v40 = vmax.f32 %v6378_v48, 0.0  ;;  %v5620_v36 = vpop.permute.xlu0 %5619  ;;  %v19952_v35 = vpack.c.bf16 %v15883_v18, %v15883_v18  ;;  %v6724_v28 = vsel %vm1278_vm4, %v19618_v19, 0.0 }
 0x38b   : > { %5672 = vst.msk [vmem:[#allocation4 + $0x100] sm:$0xf] %vm2146_vm10, %v5622_v41  ;;  %5671 = vst.msk [vmem:[#allocation4 + $0xf4] sm:$0xf] %vm2146_vm10, %v5620_v36  ;;  %v14276_v48 = vpack.c.bf16 %v6724_v28, %v6724_v28  ;;  %v14322_v41 = vpack.c.bf16 %v19627_v7, %v19627_v7 }
 0x38c   : > { %7709 = vrot.lane.b32.xlu1 %v19277_v50, %s15975_s13  ;;  %v6488_v9 = vmul.f32 %v6464_v40, %v22239_v0  ;;  %7611 = vst.msk [vmem:[#allocation5 + $0x198] sm:$0xf] %vm6821_vm11, %v19946_v37  ;;  %8088 = vst.msk [vmem:[#allocation5 + $0x160] sm:$0xf] %vm6821_vm11, %v19963_v44 }
 0x38d   : > { %7707 = vrot.lane.b32.xlu0 %v22240_v8, %s15975_s13  ;;  %v4282_v46 = vpop.permute.xlu1 %4281  ;;  %6845 = vst.msk [vmem:[#allocation5 + $0x1cc] sm:$0xf] %vm6821_vm11, %v19963_v44  ;;  %7134 = vst.msk [vmem:[#allocation5 + $0x1d0] sm:$0xf] %vm6821_vm11, %v14276_v48 }
 0x38e   : > { %6512 = vst.msk [vmem:[#allocation3 + $0xf8] sm:$0xff] %vm340_vm5, %v6488_v9  ;;  %v4280_v50 = vpop.permute.xlu0 %4279 }
 0x38f   : > { %4330 = vst.msk [vmem:[#allocation4 + $0x114] sm:$0xf] %vm1616_vm7, %v4282_v46  ;;  %4329 = vst.msk [vmem:[#allocation4 + $0x108] sm:$0xf] %vm1616_vm7, %v4280_v50  ;;  %v19986_v46 = vpop.f32.mrf.mxu0  ;;  %v19993_v50 = vpack.c.bf16 %v19676_v38, %v19676_v38 }
 0x390   : > { %8189 = vrot.lane.b32.xlu1 %v19948_v14, %s15975_s13  ;;  %7612 = vst.msk [vmem:[#allocation5 + $0x1ac] sm:$0xf] %vm6821_vm11, %v14322_v41 }
 0x391   : > { %8187 = vrot.lane.b32.xlu0 %v19952_v35, %s15975_s13  ;;  %v19969_v0 = vld [vmem:[#allocation3 + $0xf0] sm:$0xff]  ;;  %8089 = vst.msk [vmem:[#allocation5 + $0x174] sm:$0xf] %vm6821_vm11, %v19993_v50 }
 0x392   : > { %v5098_v40 = vpop.permute.xlu1 %5097  ;;  %v5837_v36 = vld [vmem:[#allocation4 + $0xfc] sm:$0xff]  ;;  %v5096_v19 = vpop.permute.xlu0 %5095  ;;  %v5835_v23 = vld [vmem:[#allocation4 + $0xf0] sm:$0xff]  ;;  %v19980_v9 = vrot.slane %v19969_v0, 1  ;;  %v19983_v8 = vrot.slane %v19969_v0, 7 }
 0x393   : > { %5146 = vst.msk [vmem:[#allocation4 + $0x118] sm:$0xf] %vm1616_vm7, %v5098_v40  ;;  %v15604_v7 = vld [vmem:[#allocation4 + $0xf4] ss:$12 sps:$4 sm:$0xff]   ;;  %5145 = vst.msk [vmem:[#allocation4 + $0x10c] sm:$0xf] %vm1616_vm7, %v5096_v19  ;;  %v13083_v32 = vcombine.low %v5835_v23, %v5837_v36  ;;  %v6382_v40 = vpop.f32.mrf.mxu0 }
 0x394   : > { %6944 = vrot.lane.b32.xlu1 %v19749_v12, %s15975_s13  ;;  %6315 = vmatprep.mubr.bf16.mxu1 %v15604_v7  ;;  %v9610_v18 = vsel %vm1278_vm4, %v9607_v24, %v19980_v9  ;;  %v7974_v28 = vsel %vm1278_vm4, %v19980_v9, 0.0  ;;  %v20007_v12 = vsel %vm1205_vm6, %v10129_v60, %v19983_v8 }
 0x395   : > { %6942 = vrot.lane.b32.xlu0 %v19757_v15, %s15975_s13  ;;  %6316 = vmatmul.mubr.bf16.gmra.mxu1 %v13083_v32  ;;  %v20009_v41 = vpack.c.bf16 %v9610_v18, %v9610_v18  ;;  %v14420_v15 = vpack.c.bf16 %v7974_v28, %v7974_v28  ;;  %v14323_v18 = vpack.c.bf16 %v19685_v34, %v19685_v34 }
 0x396   : > { %v4450_v38 = vpop.permute.xlu1 %4449  ;;  %v14796_v48 = vpop.f32.mrf.mxu1 }
 0x397   : > { %4498 = vst.msk [vmem:[#allocation4 + $0x114] sm:$0xf] %vm1785_vm9, %v4450_v38  ;;  %v4448_v24 = vpop.permute.xlu0 %4447 }
 0x398   : > { %4497 = vst.msk [vmem:[#allocation4 + $0x108] sm:$0xf] %vm1785_vm9, %v4448_v24  ;;  %v14797_v36 = vpop.f32.mrf.mxu1  ;;  %7425 = vrot.lane.b32.xlu1 %v19698_v16, %s15975_s13  ;;  %v20026_v16 = vpop.f32.mrf.mxu0  ;;  %v14324_v24 = vpack.c.bf16 %v19800_v39, %v19800_v39  ;;  %v15658_v39 = vld [vmem:[%s21894_s6 + $0x110] sm:$0xff]  }
 0x399   : > { %8381 = vst.msk [vmem:[#allocation5 + $0x1c8] sm:$0xf] %vm6821_vm11, %v20009_v41  ;;  %8382 = vst.msk [vmem:[#allocation5 + $0x1dc] sm:$0xf] %vm6821_vm11, %v14420_v15  ;;  %v14798_v60 = vadd.f32 %v14797_v36, %v14796_v48  ;;  %7423 = vrot.lane.b32.xlu0 %v19663_v52, %s15975_s13  ;;  %v20035_v48 = vpack.c.bf16 %v19817_v2, %v19817_v2  ;;  %v7870_v15 = vrot.slane %v19709_v6, 7 }
 0x39a   : > { %v5458_v19 = vpop.permute.xlu1 %5457  ;;  %v14799_v23 = vpop.f32.mrf.mxu1  ;;  %7613 = vst.msk [vmem:[#allocation5 + $0x1c0] sm:$0xf] %vm6821_vm11, %v14323_v18  ;;  %7614 = vst.msk [vmem:[#allocation5 + $0x1d4] sm:$0xf] %vm6821_vm11, %v14324_v24 }
 0x39b   : > { %v6254_v7 = vadd.f32 %v19545_v45, %v14798_v60  ;;  %5506 = vst.msk [vmem:[#allocation4 + $0x118] sm:$0xf] %vm1785_vm9, %v5458_v19  ;;  %v5456_v32 = vpop.permute.xlu0 %5455  ;;  %v15884_v60 = vld [vmem:[#allocation3 + $0x98] sm:$0xff]  ;;  %v7871_v2 = vsel %vm1205_vm6, %v19798_v55, %v7870_v15  ;;  %v6385_v19 = vpop.f32.mrf.mxu0 }
 0x39c   : > { %5505 = vst.msk [vmem:[#allocation4 + $0x10c] sm:$0xf] %vm1785_vm9, %v5456_v32  ;;  %v14800_v28 = vpop.f32.mrf.mxu1  ;;  %7713 = vrot.lane.b32.xlu1 %v19395_v63, %s15975_s13 }
 0x39d   : > { %v6383_v38 = vadd.f32 %v6382_v40, %v6254_v7  ;;  %v14801_v52 = vadd.f32 %v14800_v28, %v14799_v23  ;;  %7711 = vrot.lane.b32.xlu0 %v19321_v21, %s15975_s13  ;;  %v20043_v21 = vpack.c.bf16 %v15884_v60, %v15884_v60  ;;  %8090 = vst.msk [vmem:[#allocation5 + $0x188] sm:$0xf] %vm6821_vm11, %v20035_v48  ;;  %v22241_v23 = vld [vmem:[#allocation14_spill] sm:$0xff] }
 0x39e   : > { %v4810_v34 = vpop.permute.xlu1 %4809 }
 0x39f   : > { %v6465_v36 = vmax.f32 %v6383_v38, 0.0  ;;  %v6257_v63 = vadd.f32 %v19545_v45, %v14801_v52  ;;  %4858 = vst.msk [vmem:[#allocation4 + $0x114] sm:$0xf] %vm2146_vm10, %v4810_v34  ;;  %v4808_v40 = vpop.permute.xlu0 %4807  ;;  %v20054_v45 = vpack.c.bf16 %v7871_v2, %v7871_v2  ;;  %v22242_v38 = vld [vmem:[#allocation13_spill] sm:$0xff] }
 0x3a0   : > { %4857 = vst.msk [vmem:[#allocation4 + $0x108] sm:$0xf] %vm2146_vm10, %v4808_v40  ;;  %8193 = vrot.lane.b32.xlu1 %v19788_v25, %s15975_s13 }
 0x3a1   : > { %v6489_v7 = vmul.f32 %v6465_v36, %v22241_v23  ;;  %v6386_v32 = vadd.f32 %v6385_v19, %v6257_v63  ;;  %8191 = vrot.lane.b32.xlu0 %v20043_v21, %s15975_s13  ;;  %8091 = vst.msk [vmem:[#allocation5 + $0x19c] sm:$0xf] %vm6821_vm11, %v20054_v45  ;;  %v15885_v23 = vld [vmem:[#allocation3 + $0xa8] sm:$0xff] }
 0x3a2   : > { %v5626_v18 = vpop.permute.xlu1 %5625 }
 0x3a3   : > { %6513 = vst.msk [vmem:[#allocation3 + $0x100] sm:$0xff] %vm340_vm5, %v6489_v7  ;;  %v6466_v55 = vmax.f32 %v6386_v32, 0.0  ;;  %v5624_v28 = vpop.permute.xlu0 %5623  ;;  %v20086_v7 = vpack.c.bf16 %v15885_v23, %v15885_v23  ;;  %v9599_v32 = vsel %vm1205_vm6, 0.0, %v19659_v47  ;;  %v7873_v47 = vsel %vm1205_vm6, %v7870_v15, %v19885_v43 }
 0x3a4   : > { %5674 = vst.msk [vmem:[#allocation4 + $0x118] sm:$0xf] %vm2146_vm10, %v5626_v18  ;;  %5673 = vst.msk [vmem:[#allocation4 + $0x10c] sm:$0xf] %vm2146_vm10, %v5624_v28  ;;  %6948 = vrot.lane.b32.xlu1 %v19846_v49, %s15975_s13  ;;  %v20114_v6 = vpack.c.bf16 %v7873_v47, %v7873_v47 }
 0x3a5   : > { %v6490_v52 = vmul.f32 %v6466_v55, %v22242_v38  ;;  %6946 = vrot.lane.b32.xlu0 %v19853_v59, %s15975_s13 }
 0x3a6   : > { %v6921_v34 = vpop.permute.xlu1 %6920  ;;  %8092 = vst.msk [vmem:[#allocation5 + $0x1b0] sm:$0xf] %vm6821_vm11, %v20114_v6 }
 0x3a7   : > { %6514 = vst.msk [vmem:[#allocation3 + $0x108] sm:$0xff] %vm340_vm5, %v6490_v52  ;;  %v6919_v24 = vpop.permute.xlu0 %6918 }
 0x3a8   : > { %6992 = vst.msk [vmem:[#allocation5 + $0x14] sm:$0xf] %vm6990_vm12, %v6921_v34  ;;  %6991 = vst.msk [vmem:[#allocation5] sm:$0xf] %vm6990_vm12, %v6919_v24  ;;  %7429 = vrot.lane.b32.xlu1 %v19765_v5, %s15975_s13  ;;  %v14421_v34 = vpack.c.bf16 %v9599_v32, %v9599_v32 }
 0x3a9   : > { %7427 = vrot.lane.b32.xlu0 %v19741_v42, %s15975_s13 }
 0x3aa   : > { %v7402_v49 = vpop.permute.xlu1 %7401  ;;  %v20083_v2 = vld [vmem:[#allocation3 + $0x100] sm:$0xff] }
 0x3ab   : > { %v5841_v36 = vld [vmem:[#allocation4 + $0x114] sm:$0xff]  ;;  %7472 = vst.msk [vmem:[#allocation5 + $0x18] sm:$0xf] %vm6990_vm12, %v7402_v49  ;;  %v7400_v63 = vpop.permute.xlu0 %7399  ;;  %v5839_v59 = vld [vmem:[#allocation4 + $0x108] sm:$0xff]  ;;  %v10777_v55 = vrot.slane %v20083_v2, 7 }
 0x3ac   : > { %v15627_v40 = vld [vmem:[#allocation4 + $0x10c] ss:$12 sps:$4 sm:$0xff]   ;;  %7471 = vst.msk [vmem:[#allocation5 + $0x4] sm:$0xf] %vm6990_vm12, %v7400_v63  ;;  %7717 = vrot.lane.b32.xlu1 %v19510_v54, %s15975_s13  ;;  %v13086_v60 = vcombine.low %v5839_v59, %v5841_v36  ;;  %v20107_v49 = vld [vmem:[%s21893_s5] ss:$0 sm:$0xff] }
 0x3ad   : > { %7715 = vrot.lane.b32.xlu0 %v19435_v4, %s15975_s13  ;;  %6323 = vmatprep.mubr.bf16.mxu1 %v15627_v40  ;;  %v14802_v5 = vpop.f32.mrf.mxu1  ;;  %v20093_v4 = vld [vmem:[#allocation3 + $0xf8] sm:$0xff] }
 0x3ae   : > { %6324 = vmatmul.mubr.bf16.gmra.mxu1 %v13086_v60  ;;  %v7690_v42 = vpop.permute.xlu1 %7689  ;;  %v20111_v63 = vrot.slane %v20093_v4, 7 }
 0x3af   : > { %v7688_v19 = vpop.permute.xlu0 %7687  ;;  %7760 = vst.msk [vmem:[#allocation5 + $0x1c] sm:$0xf] %vm6990_vm12, %v7690_v42  ;;  %v14803_v54 = vpop.f32.mrf.mxu1 }
 0x3b0   : > { %7759 = vst.msk [vmem:[#allocation5 + $0x8] sm:$0xf] %vm6990_vm12, %v7688_v19  ;;  %8197 = vrot.lane.b32.xlu1 %v19876_v22, %s15975_s13  ;;  %v14804_v18 = vadd.f32 %v14803_v54, %v14802_v5  ;;  %v10778_v5 = vsel %vm1205_vm6, %v20111_v63, %v10777_v55  ;;  %v10847_v23 = vsel %vm1205_vm6, 0.0, %v20111_v63 }
 0x3b1   : > { %8195 = vrot.lane.b32.xlu0 %v20086_v7, %s15975_s13  ;;  %v14805_v38 = vpop.f32.mrf.mxu1  ;;  %v20137_v54 = vpack.c.bf16 %v10778_v5, %v10778_v5  ;;  %v14565_v47 = vpack.c.bf16 %v10847_v23, %v10847_v23  ;;  %v20185_v5 = vld [vmem:[#allocation3 + $0x100] sm:$0xff] }
 0x3b2   : > { %v8386_v28 = vld [vmem:[#allocation5 + $0x14] sm:$0xff]  ;;  %v8170_v52 = vpop.permute.xlu1 %8169  ;;  %v6262_v36 = vadd.f32 %v20107_v49, %v14804_v18 }
 0x3b3   : > { %10057 = vst.msk [vmem:[#allocation5 + $0x18] sm:$0xf] %vm6821_vm11, %v19731_v57  ;;  %v8383_v24 = vld [vmem:[#allocation5] sm:$0xff]  ;;  %v8168_v59 = vpop.permute.xlu0 %8167  ;;  %9769 = vst.msk [vmem:[#allocation5 + $0x14] sm:$0xf] %vm6821_vm11, %v20035_v48  ;;  %v14806_v57 = vpop.f32.mrf.mxu1  ;;  %v22243_v18 = vld [vmem:[#allocation16_spill] sm:$0xff] }
 0x3b4   : > { %8240 = vst.msk [vmem:[#allocation5 + $0x20] sm:$0xf] %vm6990_vm12, %v8170_v52  ;;  %8239 = vst.msk [vmem:[#allocation5 + $0xc] sm:$0xf] %vm6990_vm12, %v8168_v59  ;;  %6952 = vrot.lane.b32.xlu1 %v19948_v14, %s15975_s13  ;;  %v13337_v15 = vcombine.high %v8383_v24, %v8386_v28  ;;  %v13336_v40 = vcombine.low %v8383_v24, %v8386_v28  ;;  %v6391_v60 = vadd.f32 %v19986_v46, %v6262_v36  ;;  %v22244_v36 = vld [vmem:[#allocation15_spill] sm:$0xff] }
 0x3b5   : > { %10056 = vst.msk [vmem:[#allocation5 + $0x4] sm:$0xf] %vm6821_vm11, %v19711_v30  ;;  %9768 = vst.msk [vmem:[#allocation5] sm:$0xf] %vm6821_vm11, %v14421_v34  ;;  %v14807_v42 = vadd.f32 %v14806_v57, %v14805_v38  ;;  %6950 = vrot.lane.b32.xlu0 %v19952_v35, %s15975_s13  ;;  %v20144_v35 = vpack.c.bf16 %v19906_v3, %v19906_v3  ;;  %v14518_v52 = vpack.c.bf16 %v19848_v56, %v19848_v56 }
 0x3b6   : > { %9117 = vmatprep.mubr.bf16.mxu0 %v13337_v15  ;;  %v6925_v14 = vpop.permute.xlu1 %6924  ;;  %v6467_v19 = vmax.f32 %v6391_v60, 0.0  ;;  %v20179_v60 = vld [vmem:[#allocation3 + $0x108] sm:$0xff] }
 0x3b7   : > { %v6265_v46 = vadd.f32 %v20107_v49, %v14807_v42  ;;  %9118 = vmatmul.mubr.bf16.vlgmr.msra.gmra.mxu0 %v13336_v40  ;;  %v6923_v32 = vpop.permute.xlu0 %6922  ;;  %6994 = vst.msk [vmem:[#allocation5 + $0x3c] sm:$0xf] %vm6990_vm12, %v6925_v14  ;;  %v15887_v40 = vld [vmem:[#allocation3 + $0xb8] sm:$0xff] }
 0x3b8   : > { %6993 = vst.msk [vmem:[#allocation5 + $0x28] sm:$0xf] %vm6990_vm12, %v6923_v32  ;;  %7433 = vrot.lane.b32.xlu1 %v19858_v62, %s15975_s13  ;;  %v6491_v28 = vmul.f32 %v6467_v19, %v22243_v18  ;;  %v20154_v62 = vpack.c.bf16 %v19812_v61, %v19812_v61  ;;  %v10851_v18 = vrot.slane %v20179_v60, 1 }
 0x3b9   : > { %v6394_v38 = vadd.f32 %v20026_v16, %v6265_v46  ;;  %7431 = vrot.lane.b32.xlu0 %v19804_v33, %s15975_s13  ;;  %8093 = vst.msk [vmem:[#allocation5 + $0x1c4] sm:$0xf] %vm6821_vm11, %v20144_v35  ;;  %v10779_v46 = vrot.slane %v20179_v60, 7 }
 0x3ba   : > { %v7406_v24 = vpop.permute.xlu1 %7405  ;;  %6515 = vst.msk [vmem:[#allocation3 + $0x110] sm:$0xff] %vm340_vm5, %v6491_v28 }
 0x3bb   : > { %v8387_v34 = vld [vmem:[#allocation5 + $0x1c] sm:$0xff]  ;;  %v8384_v3 = vld [vmem:[#allocation5 + $0x8] sm:$0xff]  ;;  %v6468_v33 = vmax.f32 %v6394_v38, 0.0  ;;  %7474 = vst.msk [vmem:[#allocation5 + $0x40] sm:$0xf] %vm6990_vm12, %v7406_v24  ;;  %v7404_v56 = vpop.permute.xlu0 %7403 }
 0x3bc   : > { %11017 = vst.msk [vmem:[#allocation5 + $0x20] sm:$0xf] %vm6821_vm11, %v20137_v54  ;;  %10537 = vst.msk [vmem:[#allocation5 + $0x1c] sm:$0xf] %vm6821_vm11, %v14518_v52  ;;  %7721 = vrot.lane.b32.xlu1 %v19574_v27, %s15975_s13  ;;  %v13339_v61 = vcombine.high %v8384_v3, %v8387_v34  ;;  %v13338_v16 = vcombine.low %v8384_v3, %v8387_v34  ;;  %v20174_v27 = vpack.c.bf16 %v15887_v40, %v15887_v40  ;;  %v20198_v52 = vpop.f32.mrf.mxu0 }
 0x3bd   : > { %11016 = vst.msk [vmem:[#allocation5 + $0xc] sm:$0xf] %vm6821_vm11, %v14565_v47  ;;  %10536 = vst.msk [vmem:[#allocation5 + $0x8] sm:$0xf] %vm6821_vm11, %v20154_v62  ;;  %v6492_v59 = vmul.f32 %v6468_v33, %v22244_v36  ;;  %7719 = vrot.lane.b32.xlu0 %v19534_v26, %s15975_s13  ;;  %v20183_v26 = vld [vmem:[#allocation3 + $0xf8] sm:$0xff]  ;;  %v10207_v3 = vrot.slane %v20185_v5, 1 }
 0x3be   : > { %7473 = vst.msk [vmem:[#allocation5 + $0x2c] sm:$0xf] %vm6990_vm12, %v7404_v56  ;;  %9238 = vmatprep.mubr.bf16.mxu1 %v13339_v61  ;;  %v7694_v57 = vpop.permute.xlu1 %7693  ;;  %v10205_v24 = vrot.slane %v20183_v26, 1 }
 0x3bf   : > { %6516 = vst.msk [vmem:[#allocation3 + $0x118] sm:$0xff] %vm340_vm5, %v6492_v59  ;;  %9239 = vmatmul.mubr.bf16.vlgmr.msra.gmra.mxu1 %v13338_v16  ;;  %v7692_v15 = vpop.permute.xlu0 %7691  ;;  %v10780_v16 = vsel %vm1205_vm6, %v10777_v55, %v10779_v46  ;;  %v20232_v59 = vld [vmem:[#allocation5 + $0x38] ss:$20 sps:$4 sm:$0xff]  }
 0x3c0   : > { %7762 = vst.msk [vmem:[#allocation5 + $0x44] sm:$0xf] %vm6990_vm12, %v7694_v57  ;;  %7761 = vst.msk [vmem:[#allocation5 + $0x30] sm:$0xf] %vm6990_vm12, %v7692_v15  ;;  %8201 = vrot.lane.b32.xlu1 %v19946_v37, %s15975_s13  ;;  %v6398_v57 = vpop.f32.mrf.mxu0  ;;  %v20240_v55 = vsel %vm1278_vm4, %v10205_v24, %v10207_v3 }
 0x3c1   : > { %8199 = vrot.lane.b32.xlu0 %v20174_v27, %s15975_s13  ;;  %v20187_v14 = vld [vmem:[#allocation3 + $0x110] sm:$0xff] }
 0x3c2   : > { %v8392_v42 = vld [vmem:[#allocation5 + $0x3c] sm:$0xff]  ;;  %v8174_v19 = vpop.permute.xlu1 %8173  ;;  %v10781_v32 = vrot.slane %v20187_v14, 7  ;;  %v10853_v28 = vrot.slane %v20187_v14, 1 }
 0x3c3   : > { %10059 = vst.msk [vmem:[#allocation5 + $0x40] sm:$0xf] %vm6821_vm11, %v19880_v29  ;;  %v8172_v38 = vpop.permute.xlu0 %8171  ;;  %9771 = vst.msk [vmem:[#allocation5 + $0x3c] sm:$0xf] %vm6821_vm11, %v20114_v6 }
 0x3c4   : > { %8242 = vst.msk [vmem:[#allocation5 + $0x48] sm:$0xf] %vm6990_vm12, %v8174_v19  ;;  %8241 = vst.msk [vmem:[#allocation5 + $0x34] sm:$0xf] %vm6990_vm12, %v8172_v38  ;;  %6956 = vrot.lane.b32.xlu1 %v19788_v25, %s15975_s13  ;;  %v10854_v6 = vsel %vm1278_vm4, %v10851_v18, %v10853_v28  ;;  %v10782_v25 = vsel %vm1205_vm6, %v10779_v46, %v10781_v32  ;;  %v20251_v46 = vpack.c.bf16 %v10780_v16, %v10780_v16 }
 0x3c5   : > { %v8389_v23 = vld [vmem:[#allocation5 + $0x28] sm:$0xff]  ;;  %6954 = vrot.lane.b32.xlu0 %v20043_v21, %s15975_s13  ;;  %v14808_v33 = vpop.f32.mrf.mxu1  ;;  %v20244_v40 = vpack.c.bf16 %v10782_v25, %v10782_v25  ;;  %v20263_v25 = vpop.f32.mrf.mxu0  ;;  %v20272_v16 = vpack.c.bf16 %v20007_v12, %v20007_v12 }
 0x3c6   : > { %10058 = vst.msk [vmem:[#allocation5 + $0x2c] sm:$0xf] %vm6821_vm11, %v19850_v11  ;;  %v13342_v47 = vcombine.high %v8389_v23, %v8392_v42  ;;  %v13341_v34 = vcombine.low %v8389_v23, %v8392_v42  ;;  %9770 = vst.msk [vmem:[#allocation5 + $0x28] sm:$0xf] %vm6821_vm11, %v20054_v45  ;;  %v20217_v11 = vpack.c.bf16 %v10854_v6, %v10854_v6  ;;  %v6929_v56 = vpop.permute.xlu1 %6928  ;;  %v20219_v61 = vld [vmem:[#allocation3 + $0x118] sm:$0xff]  ;;  %v10848_v23 = vrot.slane %v20093_v4, 1 }
 0x3c7   : > { %v20223_v45 = vsel %vm1278_vm4, %v19980_v9, %v10205_v24  ;;  %v6927_v21 = vpop.permute.xlu0 %6926  ;;  %6996 = vst.msk [vmem:[#allocation5 + $0x64] sm:$0xf] %vm6990_vm12, %v6929_v56  ;;  %v20230_v36 = vrot.slane %v20219_v61, 1  ;;  %v14809_v15 = vpop.f32.mrf.mxu1  ;;  %v20257_v24 = vpack.c.bf16 %v19969_v0, %v19969_v0 }
 0x3c8   : > { %9125 = vmatprep.mubr.bf16.mxu0 %v13342_v47  ;;  %6995 = vst.msk [vmem:[#allocation5 + $0x50] sm:$0xf] %vm6990_vm12, %v6927_v21  ;;  %7437 = vrot.lane.b32.xlu1 %v19926_v1, %s15975_s13  ;;  %v14810_v42 = vadd.f32 %v14809_v15, %v14808_v33  ;;  %v9612_v12 = vsel %vm1278_vm4, %v19980_v9, %v10848_v23  ;;  %v6401_v9 = vpop.f32.mrf.mxu0 }
 0x3c9   : > { %9126 = vmatmul.mubr.bf16.gmra.mxu0 %v13341_v34  ;;  %11306 = vst.msk [vmem:[#allocation5 + $0x38] sm:$0xf] %vm6821_vm11, %v20217_v11  ;;  %7435 = vrot.lane.b32.xlu0 %v19897_v58, %s15975_s13  ;;  %v10856_v19 = vsel %vm1278_vm4, %v10853_v28, %v20230_v36  ;;  %v14811_v38 = vpop.f32.mrf.mxu1  ;;  %8094 = vst.msk [vmem:[#allocation5 + $0x1d8] sm:$0xf] %vm6821_vm11, %v20272_v16 }
 0x3ca   : > { %v7410_v47 = vpop.permute.xlu1 %7409  ;;  %v20253_v34 = vpack.c.bf16 %v10856_v19, %v10856_v19  ;;  %v6270_v6 = vadd.f32 %v20107_v49, %v14810_v42  ;;  %v15888_v19 = vld [vmem:[#allocation3 + $0xd0] sm:$0xff] }
 0x3cb   : > { %v8393_v1 = vld [vmem:[#allocation5 + $0x44] sm:$0xff]  ;;  %v8390_v58 = vld [vmem:[#allocation5 + $0x30] sm:$0xff]  ;;  %v7408_v28 = vpop.permute.xlu0 %7407  ;;  %7476 = vst.msk [vmem:[#allocation5 + $0x68] sm:$0xf] %vm6990_vm12, %v7410_v47  ;;  %v14812_v33 = vpop.f32.mrf.mxu1 }
 0x3cc   : > { %11019 = vst.msk [vmem:[#allocation5 + $0x48] sm:$0xf] %vm6821_vm11, %v20244_v40  ;;  %11018 = vst.msk [vmem:[#allocation5 + $0x34] sm:$0xf] %vm6821_vm11, %v20251_v46  ;;  %7725 = vrot.lane.b32.xlu1 %v19629_v17, %s15975_s13  ;;  %v13344_v0 = vcombine.high %v8390_v58, %v8393_v1  ;;  %v13343_v56 = vcombine.low %v8390_v58, %v8393_v1  ;;  %v6399_v21 = vadd.f32 %v6398_v57, %v6270_v6  ;;  %v15889_v47 = vld [vmem:[#allocation3 + $0xc8] sm:$0xff]  ;;  %v22245_v6 = vld [vmem:[#allocation18_spill] sm:$0xff] }
 0x3cd   : > { %7475 = vst.msk [vmem:[#allocation5 + $0x54] sm:$0xf] %vm6990_vm12, %v7408_v28  ;;  %v14813_v15 = vadd.f32 %v14812_v33, %v14811_v38  ;;  %7723 = vrot.lane.b32.xlu0 %v19590_v20, %s15975_s13  ;;  %v14520_v17 = vpack.c.bf16 %v20183_v26, %v20183_v26  ;;  %v20286_v1 = vpack.c.bf16 %v15888_v19, %v15888_v19 }
 0x3ce   : > { %11307 = vst.msk [vmem:[#allocation5 + $0x4c] sm:$0xf] %vm6821_vm11, %v20253_v34  ;;  %10538 = vst.msk [vmem:[#allocation5 + $0x30] sm:$0xf] %vm6821_vm11, %v20257_v24  ;;  %9246 = vmatprep.mubr.bf16.mxu1 %v13344_v0  ;;  %v7698_v42 = vpop.permute.xlu1 %7697  ;;  %v6469_v57 = vmax.f32 %v6399_v21, 0.0  ;;  %v20292_v58 = vpack.c.bf16 %v15889_v47, %v15889_v47  ;;  %v14474_v33 = vpack.c.bf16 %v9612_v12, %v9612_v12 }
 0x3cf   : > { %v6273_v38 = vadd.f32 %v20107_v49, %v14813_v15  ;;  %9247 = vmatmul.mubr.bf16.gmra.mxu1 %v13343_v56  ;;  %v7696_v20 = vpop.permute.xlu0 %7695  ;;  %7764 = vst.msk [vmem:[#allocation5 + $0x6c] sm:$0xf] %vm6990_vm12, %v7698_v42  ;;  %v20304_v42 = vrot.slane %v20219_v61, 7 }
 0x3d0   : > { %10539 = vst.msk [vmem:[#allocation5 + $0x44] sm:$0xf] %vm6821_vm11, %v14520_v17  ;;  %8205 = vrot.lane.b32.xlu1 %v20286_v1, %s15975_s13  ;;  %v6493_v28 = vmul.f32 %v6469_v57, %v22245_v6  ;;  %v20332_v6 = vld [vmem:[#allocation3 + $0x110] sm:$0xff] }
 0x3d1   : > { %7763 = vst.msk [vmem:[#allocation5 + $0x58] sm:$0xf] %vm6990_vm12, %v7696_v20  ;;  %v6402_v0 = vadd.f32 %v6401_v9, %v6273_v38  ;;  %8203 = vrot.lane.b32.xlu0 %v20292_v58, %s15975_s13  ;;  %v22246_v38 = vld [vmem:[#allocation17_spill] sm:$0xff]  ;;  %v10784_v9 = vsel %vm1205_vm6, %v10781_v32, %v20304_v42 }
 0x3d2   : > { %v8398_v56 = vld [vmem:[#allocation5 + $0x64] sm:$0xff]  ;;  %v8178_v21 = vpop.permute.xlu1 %8177  ;;  %6517 = vst.msk [vmem:[#allocation3 + $0x120] sm:$0xff] %vm340_vm5, %v6493_v28  ;;  %v20334_v28 = vpack.c.bf16 %v10784_v9, %v10784_v9 }
 0x3d3   : > { %10061 = vst.msk [vmem:[#allocation5 + $0x68] sm:$0xf] %vm6821_vm11, %v14474_v33  ;;  %v6470_v17 = vmax.f32 %v6402_v0, 0.0  ;;  %v8176_v19 = vpop.permute.xlu0 %8175  ;;  %9773 = vst.msk [vmem:[#allocation5 + $0x64] sm:$0xf] %vm6821_vm11, %v20272_v16 }
 0x3d4   : > { %v8395_v15 = vld [vmem:[#allocation5 + $0x50] sm:$0xff]  ;;  %8244 = vst.msk [vmem:[#allocation5 + $0x70] sm:$0xf] %vm6990_vm12, %v8178_v21  ;;  %8243 = vst.msk [vmem:[#allocation5 + $0x5c] sm:$0xf] %vm6990_vm12, %v8176_v19  ;;  %6960 = vrot.lane.b32.xlu1 %v19876_v22, %s15975_s13 }
 0x3d5   : > { %10060 = vst.msk [vmem:[#allocation5 + $0x54] sm:$0xf] %vm6821_vm11, %v20009_v41  ;;  %v13347_v12 = vcombine.high %v8395_v15, %v8398_v56  ;;  %v13346_v57 = vcombine.low %v8395_v15, %v8398_v56  ;;  %9772 = vst.msk [vmem:[#allocation5 + $0x50] sm:$0xf] %vm6821_vm11, %v20144_v35  ;;  %v6494_v20 = vmul.f32 %v6470_v17, %v22246_v38  ;;  %6958 = vrot.lane.b32.xlu0 %v20086_v7, %s15975_s13  ;;  %v20330_v7 = vld [vmem:[#allocation3 + $0x108] sm:$0xff] }
 0x3d6   : > { %v6933_v47 = vpop.permute.xlu1 %6932  ;;  %v10849_v56 = vrot.slane %v20083_v2, 1  ;;  %v10209_v19 = vrot.slane %v20330_v7, 1  ;;  %v10211_v2 = vrot.slane %v20332_v6, 1 }
 0x3d7   : > { %9132 = vmatprep.mubr.bf16.mxu0 %v13347_v12  ;;  %6518 = vst.msk [vmem:[#allocation3 + $0x128] sm:$0xff] %vm340_vm5, %v6494_v20  ;;  %v6931_v22 = vpop.permute.xlu0 %6930  ;;  %v15649_v12 = vld [vmem:[%s21894_s6 + $0x78] sm:$0xff]  }
 0x3d8   : > { %6998 = vst.msk [vmem:[#allocation5 + $0x8c] sm:$0xf] %vm6990_vm12, %v6933_v47  ;;  %9133 = vmatmul.mubr.bf16.gmra.mxu0 %v13346_v57  ;;  %6997 = vst.msk [vmem:[#allocation5 + $0x78] sm:$0xf] %vm6990_vm12, %v6931_v22  ;;  %7441 = vrot.lane.b32.xlu1 %v19993_v50, %s15975_s13  ;;  %v15650_v57 = vld [vmem:[%s21894_s6 + $0x38] sm:$0xff]   ;;  %v9616_v47 = vsel %vm1278_vm4, %v10849_v56, %v10851_v18  ;;  %v9614_v60 = vsel %vm1278_vm4, %v10848_v23, %v10849_v56  ;;  %v15653_v23 = vld [vmem:[%s21894_s6 + $0x30] sm:$0xff]  }
 0x3d9   : > { %7439 = vrot.lane.b32.xlu0 %v19963_v44, %s15975_s13  ;;  %v20336_v33 = vld [vmem:[#allocation3 + $0x120] sm:$0xff]  ;;  %15062 = vmatprep.subr.bf16.mxu1 %v15649_v12  ;;  %v14521_v56 = vpack.c.bf16 %v20185_v5, %v20185_v5  ;;  %v14475_v12 = vpack.c.bf16 %v9614_v60, %v9614_v60 }
 0x3da   : > { %v7414_v0 = vpop.permute.xlu1 %7413  ;;  %v10785_v15 = vrot.slane %v20336_v33, 7  ;;  %15063 = vmatpush3.bf16.msra.mxu1 %v15650_v57 }
 0x3db   : > { %v8399_v32 = vld [vmem:[#allocation5 + $0x6c] sm:$0xff]  ;;  %v8396_v21 = vld [vmem:[#allocation5 + $0x58] sm:$0xff]  ;;  %v7412_v17 = vpop.permute.xlu0 %7411  ;;  %7478 = vst.msk [vmem:[#allocation5 + $0x90] sm:$0xf] %vm6990_vm12, %v7414_v0  ;;  %v15652_v0 = vld [vmem:[%s21894_s6 + $0x70] sm:$0xff]  }
 0x3dc   : > { %11020 = vst.msk [vmem:[#allocation5 + $0x5c] sm:$0xf] %vm6821_vm11, %v20334_v28  ;;  %7729 = vrot.lane.b32.xlu1 %v19711_v30, %s15975_s13  ;;  %v13349_v44 = vcombine.high %v8396_v21, %v8399_v32  ;;  %v13348_v50 = vcombine.low %v8396_v21, %v8399_v32  ;;  %v10786_v38 = vsel %vm1205_vm6, %v20304_v42, %v10785_v15  ;;  %v15651_v30 = vld [vmem:[%s21894_s6 + $0x118] sm:$0xff]   ;;  %v15890_v21 = vld [vmem:[#allocation3 + $0xd8] sm:$0xff]  ;;  %10540 = vst.msk [vmem:[#allocation5 + $0x58] sm:$0xf] %vm6821_vm11, %v14521_v56 }
 0x3dd   : > { %7477 = vst.msk [vmem:[#allocation5 + $0x7c] sm:$0xf] %vm6990_vm12, %v7412_v17  ;;  %7727 = vrot.lane.b32.xlu0 %v19650_v10, %s15975_s13  ;;  %v20363_v20 = vpack.c.bf16 %v10786_v38, %v10786_v38  ;;  %v14814_v9 = vpop.f32.mrf.mxu1  ;;  %v20371_v32 = vsel %vm1278_vm4, %v10207_v3, %v10209_v19  ;;  %v20376_v10 = vsel %vm1278_vm4, %v10209_v19, %v10211_v2  ;;  %v20421_v56 = vld [vmem:[#allocation5 + $0x10] ss:$20 sps:$4 sm:$0xff]  }
 0x3de   : > { %9253 = vmatprep.mubr.bf16.mxu1 %v13349_v44  ;;  %v7702_v22 = vpop.permute.xlu1 %7701  ;;  %v20385_v3 = vpack.c.bf16 %v15890_v21, %v15890_v21  ;;  %v20387_v17 = vld [vmem:[#allocation3 + $0x128] sm:$0xff]  ;;  %v9540_v44 = vsel %vm1205_vm6, %v19983_v8, %v20111_v63  ;;  %v14300_v63 = vpack.c.bf16 %v19829_v53, %v19829_v53  ;;  %15366 = vmatprep.subr.bf16.mxu0 %v15651_v30  ;;  %v15656_v53 = vld [vmem:[%s21894_s6 + $0x68] sm:$0xff]  }
 0x3df   : > { %v7700_v18 = vpop.permute.xlu0 %7699  ;;  %9254 = vmatmul.mubr.bf16.gmra.mxu1 %v13348_v50  ;;  %7766 = vst.msk [vmem:[#allocation5 + $0x94] sm:$0xf] %vm6990_vm12, %v7702_v22  ;;  %v14815_v4 = vpop.f32.mrf.mxu1  ;;  %v14476_v50 = vpack.c.bf16 %v9616_v47, %v9616_v47  ;;  %v10787_v57 = vrot.slane %v20387_v17, 7  ;;  %15367 = vmatpush3.bf16.msra.mxu0 %v15651_v30  ;;  %v14427_v21 = vpack.c.bf16 %v9540_v44, %v9540_v44  ;;  %v15657_v44 = vld [vmem:[%s21894_s6 + $0x28] sm:$0xff]  }
 0x3e0   : > { %11021 = vst.msk [vmem:[#allocation5 + $0x70] sm:$0xf] %vm6821_vm11, %v20363_v20  ;;  %8209 = vrot.lane.b32.xlu1 %v20154_v62, %s15975_s13  ;;  %v14816_v19 = vadd.f32 %v14815_v4, %v14814_v9  ;;  %15064 = vmatprep.subr.bf16.mxu1 %v15652_v0  ;;  %11304 = vst.msk [vmem:[#allocation5 + $0x10] sm:$0xf] %vm6821_vm11, %v14475_v12 }
 0x3e1   : > { %7765 = vst.msk [vmem:[#allocation5 + $0x80] sm:$0xf] %vm6990_vm12, %v7700_v18  ;;  %8207 = vrot.lane.b32.xlu0 %v20385_v3, %s15975_s13  ;;  %v14817_v22 = vpop.f32.mrf.mxu1  ;;  %15065 = vmatpush3.bf16.msra.mxu1 %v15653_v23  ;;  %v10788_v23 = vsel %vm1205_vm6, %v10785_v15, %v10787_v57  ;;  %v10215_v15 = vrot.slane %v20336_v33, 1 }
 0x3e2   : > { %v8404_v38 = vld [vmem:[#allocation5 + $0x8c] sm:$0xff]  ;;  %v8182_v18 = vpop.permute.xlu1 %8181  ;;  %v6278_v9 = vadd.f32 %v20107_v49, %v14816_v19  ;;  %15066 = vmatprep.subr.bf16.mxu1 %v15656_v53  ;;  %15368 = vmatprep.subr.bf16.mxu0 %v15658_v39  ;;  %11305 = vst.msk [vmem:[#allocation5 + $0x24] sm:$0xf] %vm6821_vm11, %v14476_v50 }
 0x3e3   : > { %10063 = vst.msk [vmem:[#allocation5 + $0x90] sm:$0xf] %vm6821_vm11, %v14476_v50  ;;  %v8180_v4 = vpop.permute.xlu0 %8179  ;;  %v14818_v30 = vpop.f32.mrf.mxu1  ;;  %9775 = vst.msk [vmem:[#allocation5 + $0x8c] sm:$0xf] %vm6821_vm11, %v20137_v54  ;;  %v22247_v54 = vld [vmem:[#allocation20_spill] sm:$0xff]  ;;  %15369 = vmatpush3.bf16.msra.mxu0 %v15658_v39 }
 0x3e4   : > { %v8401_v47 = vld [vmem:[#allocation5 + $0x78] sm:$0xff]  ;;  %8246 = vst.msk [vmem:[#allocation5 + $0x98] sm:$0xf] %vm6990_vm12, %v8182_v18  ;;  %8245 = vst.msk [vmem:[#allocation5 + $0x84] sm:$0xf] %vm6990_vm12, %v8180_v4  ;;  %6964 = vrot.lane.b32.xlu1 %v19946_v37, %s15975_s13  ;;  %v6407_v19 = vadd.f32 %v20198_v52, %v6278_v9  ;;  %v14819_v18 = vadd.f32 %v14818_v30, %v14817_v22  ;;  %v20431_v37 = vsel %vm1278_vm4, %v10211_v2, %v20230_v36 }
 0x3e5   : > { %10062 = vst.msk [vmem:[#allocation5 + $0x7c] sm:$0xf] %vm6821_vm11, %v14475_v12  ;;  %v13352_v0 = vcombine.high %v8401_v47, %v8404_v38  ;;  %v13351_v60 = vcombine.low %v8401_v47, %v8404_v38  ;;  %9774 = vst.msk [vmem:[#allocation5 + $0x78] sm:$0xf] %vm6821_vm11, %v14427_v21  ;;  %6962 = vrot.lane.b32.xlu0 %v20174_v27, %s15975_s13  ;;  %v7326_v27 = vsel %vm1278_vm4, %v7300_v31, 0.0  ;;  %v15659_v31 = vld [vmem:[%s21894_s6 + $0x60] sm:$0xff]   ;;  %15067 = vmatpush3.bf16.msra.mxu1 %v15657_v44 }
 0x3e6   : > { %v6937_v52 = vpop.permute.xlu1 %6936  ;;  %v14522_v2 = vpack.c.bf16 %v20330_v7, %v20330_v7  ;;  %v6471_v38 = vmax.f32 %v6407_v19, 0.0  ;;  %v6281_v12 = vadd.f32 %v20107_v49, %v14819_v18  ;;  %v10216_v9 = vsel %vm1278_vm4, %v20230_v36, %v10215_v15  ;;  %15068 = vmatprep.subr.bf16.mxu1 %v15659_v31  ;;  %v15660_v19 = vld [vmem:[%s21894_s6 + $0x20] sm:$0xff]   ;;  %v15663_v18 = vld [vmem:[%s21894_s6 + $0x108] sm:$0xff]   ;;  %v15668_v31 = vld [vmem:[%s21894_s6 + $0x50] sm:$0xff]  }
 0x3e7   : > { %9139 = vmatprep.mubr.bf16.mxu0 %v13352_v0  ;;  %v6935_v22 = vpop.permute.xlu0 %6934  ;;  %7000 = vst.msk [vmem:[#allocation5 + $0xb4] sm:$0xf] %vm6990_vm12, %v6937_v52  ;;  %v20465_v4 = vpack.c.bf16 %v10788_v23, %v10788_v23  ;;  %v14348_v30 = vpack.c.bf16 %v7326_v27, %v7326_v27  ;;  %v10859_v36 = vrot.slane %v20387_v17, 1  ;;  %v15664_v52 = vld [vmem:[%s21894_s6 + $0x58] sm:$0xff]   ;;  %15370 = vmatprep.subr.bf16.mxu0 %v15663_v18 }
 0x3e8   : > { %9140 = vmatmul.mubr.bf16.gmra.mxu0 %v13351_v60  ;;  %6999 = vst.msk [vmem:[#allocation5 + $0xa0] sm:$0xf] %vm6990_vm12, %v6935_v22  ;;  %7445 = vrot.lane.b32.xlu1 %v14300_v63, %s15975_s13  ;;  %v6495_v21 = vmul.f32 %v6471_v38, %v22247_v54  ;;  %v6410_v47 = vadd.f32 %v20263_v25, %v6281_v12  ;;  %v15667_v38 = vld [vmem:[%s21894_s6 + $0x100] sm:$0xff]  }
 0x3e9   : > { %10541 = vst.msk [vmem:[#allocation5 + $0x6c] sm:$0xf] %vm6821_vm11, %v14522_v2  ;;  %7443 = vrot.lane.b32.xlu0 %v20035_v48, %s15975_s13  ;;  %v14347_v48 = vpack.c.bf16 %v19839_v51, %v19839_v51  ;;  %v22248_v51 = vld [vmem:[#allocation19_spill] sm:$0xff]  ;;  %15069 = vmatpush3.bf16.msra.mxu1 %v15660_v19  ;;  %v15666_v2 = vld [vmem:[%s21894_s6 + $0x18] sm:$0xff]   ;;  %v10860_v54 = vsel %vm1278_vm4, %v10215_v15, %v10859_v36  ;;  %v15669_v15 = vld [vmem:[%s21894_s6 + $0x10] sm:$0xff]  }
 0x3ea   : > { %v7418_v63 = vpop.permute.xlu1 %7417  ;;  %6519 = vst.msk [vmem:[#allocation3 + $0x130] sm:$0xff] %vm340_vm5, %v6495_v21  ;;  %v6472_v25 = vmax.f32 %v6410_v47, 0.0  ;;  %v15891_v22 = vld [vmem:[#allocation3 + $0xe8] sm:$0xff]  ;;  %15070 = vmatprep.subr.bf16.mxu1 %v15664_v52  ;;  %15371 = vmatpush3.bf16.msra.mxu0 %v15663_v18  ;;  %v20510_v47 = vpack.c.bf16 %v10216_v9, %v10216_v9  ;;  %v10199_v18 = vsel %vm1205_vm6, 0.0, %v19885_v43  ;;  %v15673_v43 = vld [vmem:[%s21894_s6 + $0x8] sm:$0xff]  }
 0x3eb   : > { %v8405_v53 = vld [vmem:[#allocation5 + $0x94] sm:$0xff]  ;;  %v8402_v0 = vld [vmem:[#allocation5 + $0x80] sm:$0xff]  ;;  %v7416_v60 = vpop.permute.xlu0 %7415  ;;  %7480 = vst.msk [vmem:[#allocation5 + $0xb8] sm:$0xf] %vm6990_vm12, %v7418_v63  ;;  %v20495_v39 = vpack.c.bf16 %v15891_v22, %v15891_v22  ;;  %15372 = vmatprep.subr.bf16.mxu0 %v15667_v38 }
 0x3ec   : > { %11022 = vst.msk [vmem:[#allocation5 + $0x84] sm:$0xf] %vm6821_vm11, %v20465_v4  ;;  %7733 = vrot.lane.b32.xlu1 %v14348_v30, %s15975_s13  ;;  %v13354_v50 = vcombine.high %v8402_v0, %v8405_v53  ;;  %v13353_v44 = vcombine.low %v8402_v0, %v8405_v53  ;;  %v6496_v23 = vmul.f32 %v6472_v25, %v22248_v51  ;;  %v20508_v21 = vld [vmem:[#allocation5 + $0x60] ss:$20 sps:$4 sm:$0xff]  }
 0x3ed   : > { %7479 = vst.msk [vmem:[#allocation5 + $0xa4] sm:$0xf] %vm6990_vm12, %v7416_v60  ;;  %7731 = vrot.lane.b32.xlu0 %v14347_v48, %s15975_s13  ;;  %v20512_v53 = vpack.c.bf16 %v10860_v54, %v10860_v54  ;;  %15071 = vmatpush3.bf16.msra.mxu1 %v15666_v2  ;;  %v10133_v48 = vrot.slane %v20183_v26, 7 }
 0x3ee   : > { %9260 = vmatprep.mubr.bf16.mxu1 %v13354_v50  ;;  %v7706_v27 = vpop.permute.xlu1 %7705  ;;  %6520 = vst.msk [vmem:[#allocation3 + $0x138] sm:$0xff] %vm340_vm5, %v6496_v23  ;;  %15072 = vmatprep.subr.bf16.mxu1 %v15668_v31  ;;  %v15670_v50 = vld [vmem:[%s21894_s6 + $0x48] sm:$0xff]  }
 0x3ef   : > { %v7704_v12 = vpop.permute.xlu0 %7703  ;;  %9261 = vmatmul.mubr.bf16.gmra.mxu1 %v13353_v44  ;;  %7768 = vst.msk [vmem:[#allocation5 + $0xbc] sm:$0xf] %vm6990_vm12, %v7706_v27  ;;  %v20531_v44 = vpop.f32.mrf.mxu0  ;;  %15373 = vmatpush3.bf16.msra.mxu0 %v15667_v38 }
 0x3f0   : > { %7767 = vst.msk [vmem:[#allocation5 + $0xa8] sm:$0xf] %vm6990_vm12, %v7704_v12  ;;  %8213 = vrot.lane.b32.xlu1 %v20257_v24, %s15975_s13  ;;  %v14523_v12 = vpack.c.bf16 %v20332_v6, %v20332_v6 }
 0x3f1   : > { %8211 = vrot.lane.b32.xlu0 %v20495_v39, %s15975_s13  ;;  %v20514_v63 = vld [vmem:[#allocation3 + $0x130] sm:$0xff]  ;;  %11308 = vst.msk [vmem:[#allocation5 + $0x60] sm:$0xf] %vm6821_vm11, %v20510_v47  ;;  %11309 = vst.msk [vmem:[#allocation5 + $0x74] sm:$0xf] %vm6821_vm11, %v20512_v53  ;;  %15073 = vmatpush3.bf16.msra.mxu1 %v15669_v15  ;;  %v6414_v2 = vpop.f32.mrf.mxu0 }
 0x3f2   : > { %v8410_v30 = vld [vmem:[#allocation5 + $0xb4] sm:$0xff]  ;;  %v8186_v0 = vpop.permute.xlu1 %8185  ;;  %v10789_v25 = vrot.slane %v20514_v63, 7  ;;  %15074 = vmatprep.subr.bf16.mxu1 %v15670_v50  ;;  %10542 = vst.msk [vmem:[#allocation5 + $0x80] sm:$0xf] %vm6821_vm11, %v14523_v12 }
 0x3f3   : > { %10065 = vst.msk [vmem:[#allocation5 + $0xb8] sm:$0xf] %vm6821_vm11, %v20253_v34  ;;  %v8184_v9 = vpop.permute.xlu0 %8183  ;;  %9777 = vst.msk [vmem:[#allocation5 + $0xb4] sm:$0xf] %vm6821_vm11, %v20244_v40 }
 0x3f4   : > { %v8407_v60 = vld [vmem:[#allocation5 + $0xa0] sm:$0xff]  ;;  %8248 = vst.msk [vmem:[#allocation5 + $0xc0] sm:$0xf] %vm6990_vm12, %v8186_v0  ;;  %8247 = vst.msk [vmem:[#allocation5 + $0xac] sm:$0xf] %vm6990_vm12, %v8184_v9  ;;  %9866 = vrot.lane.b32.xlu1 %v20286_v1, %s15975_s13  ;;  %v10790_v51 = vsel %vm1205_vm6, %v10787_v57, %v10789_v25  ;;  %v10134_v57 = vsel %vm1205_vm6, %v19983_v8, %v10133_v48 }
 0x3f5   : > { %10064 = vst.msk [vmem:[#allocation5 + $0xa4] sm:$0xf] %vm6821_vm11, %v20217_v11  ;;  %v13357_v34 = vcombine.high %v8407_v60, %v8410_v30  ;;  %v13356_v19 = vcombine.low %v8407_v60, %v8410_v30  ;;  %9776 = vst.msk [vmem:[#allocation5 + $0xa0] sm:$0xf] %vm6821_vm11, %v20251_v46  ;;  %9864 = vrot.lane.b32.xlu0 %v20292_v58, %s15975_s13  ;;  %v20547_v11 = vpack.c.bf16 %v10790_v51, %v10790_v51  ;;  %v20549_v23 = vld [vmem:[#allocation3 + $0x138] sm:$0xff] }
 0x3f6   : > { %v14820_v1 = vpop.f32.mrf.mxu1  ;;  %v6941_v52 = vpop.permute.xlu1 %6940  ;;  %v10791_v46 = vrot.slane %v20549_v23, 7  ;;  %v14493_v58 = vpack.c.bf16 %v10199_v18, %v10199_v18  ;;  %v14496_v15 = vpack.c.bf16 %v10134_v57, %v10134_v57  ;;  %15075 = vmatpush3.bf16.msra.mxu1 %v15673_v43  ;;  %v10863_v60 = vrot.slane %v20549_v23, 1 }
 0x3f7   : > { %9147 = vmatprep.mubr.bf16.mxu0 %v13357_v34  ;;  %v6939_v27 = vpop.permute.xlu0 %6938  ;;  %7002 = vst.msk [vmem:[#allocation5 + $0xdc] sm:$0xf] %vm6990_vm12, %v6941_v52  ;;  %v15674_v34 = vld [vmem:[%s21894_s6 + $0x40] sm:$0xff]   ;;  %v20584_v18 = vpop.f32.mrf.mxu0  ;;  %v14524_v43 = vpack.c.bf16 %v20219_v61, %v20219_v61 }
 0x3f8   : > { %9148 = vmatmul.mubr.bf16.gmra.mxu0 %v13356_v19  ;;  %11023 = vst.msk [vmem:[#allocation5 + $0x98] sm:$0xf] %vm6821_vm11, %v20547_v11  ;;  %v14821_v38 = vpop.f32.mrf.mxu1  ;;  %10346 = vrot.lane.b32.xlu1 %v20144_v35, %s15975_s13  ;;  %v10792_v22 = vsel %vm1205_vm6, %v10789_v25, %v10791_v46  ;;  %v10861_v35 = vrot.slane %v20514_v63, 1  ;;  %v15675_v19 = vld [vmem:[%s21894_s6] sm:$0xff]  }
 0x3f9   : > { %7001 = vst.msk [vmem:[#allocation5 + $0xc8] sm:$0xf] %vm6990_vm12, %v6939_v27  ;;  %v14822_v31 = vadd.f32 %v14821_v38, %v14820_v1  ;;  %10344 = vrot.lane.b32.xlu0 %v14493_v58, %s15975_s13  ;;  %v20571_v8 = vpack.c.bf16 %v10792_v22, %v10792_v22  ;;  %15076 = vmatprep.subr.bf16.mxu1 %v15674_v34  ;;  %v10135_v38 = vrot.slane %v20185_v5, 7 }
 0x3fa   : > { %v14823_v54 = vpop.f32.mrf.mxu1  ;;  %v7422_v30 = vpop.permute.xlu1 %7421  ;;  %15077 = vmatpush3.bf16.msra.mxu1 %v15675_v19  ;;  %10543 = vst.msk [vmem:[#allocation5 + $0x94] sm:$0xf] %vm6821_vm11, %v14524_v43  ;;  %v10862_v40 = vsel %vm1278_vm4, %v10859_v36, %v10861_v35  ;;  %v10864_v5 = vsel %vm1278_vm4, %v10861_v35, %v10863_v60  ;;  %v22250_v19 = vld [vmem:[#allocation21_spill] sm:$0xff]  ;;  %v10139_v43 = vrot.slane %v20332_v6, 7 }
 0x3fb   : > { %v8411_v0 = vld [vmem:[#allocation5 + $0xbc] sm:$0xff]  ;;  %v8408_v9 = vld [vmem:[#allocation5 + $0xa8] sm:$0xff]  ;;  %v6286_v50 = vadd.f32 %v20107_v49, %v14822_v31  ;;  %v7420_v25 = vpop.permute.xlu0 %7419  ;;  %7482 = vst.msk [vmem:[#allocation5 + $0xe0] sm:$0xf] %vm6990_vm12, %v7422_v30  ;;  %v20617_v36 = vpack.c.bf16 %v10864_v5, %v10864_v5  ;;  %v10136_v34 = vsel %vm1205_vm6, %v10133_v48, %v10135_v38 }
 0x3fc   : > { %11024 = vst.msk [vmem:[#allocation5 + $0xac] sm:$0xf] %vm6821_vm11, %v20571_v8  ;;  %v14824_v51 = vpop.f32.mrf.mxu1  ;;  %9870 = vrot.lane.b32.xlu1 %v20154_v62, %s15975_s13  ;;  %v13359_v1 = vcombine.high %v8408_v9, %v8411_v0  ;;  %v13358_v52 = vcombine.low %v8408_v9, %v8411_v0  ;;  %v10137_v62 = vrot.slane %v20330_v7, 7  ;;  %v20610_v7 = vpack.c.bf16 %v10862_v40, %v10862_v40  ;;  %v15893_v40 = vld [vmem:[#allocation3 + $0xf8] sm:$0xff] }
 0x3fd   : > { %7481 = vst.msk [vmem:[#allocation5 + $0xcc] sm:$0xf] %vm6990_vm12, %v7420_v25  ;;  %v6415_v27 = vadd.f32 %v6414_v2, %v6286_v50  ;;  %v14825_v58 = vadd.f32 %v14824_v51, %v14823_v54  ;;  %9868 = vrot.lane.b32.xlu0 %v20385_v3, %s15975_s13  ;;  %v6417_v3 = vpop.f32.mrf.mxu0  ;;  %v20615_v54 = vld [vmem:[#allocation5 + $0x88] ss:$20 sps:$4 sm:$0xff]   ;;  %v14497_v26 = vpack.c.bf16 %v10136_v34, %v10136_v34 }
 0x3fe   : > { %9268 = vmatprep.mubr.bf16.mxu1 %v13359_v1  ;;  %v7710_v57 = vpop.permute.xlu1 %7709  ;;  %11310 = vst.msk [vmem:[#allocation5 + $0x88] sm:$0xf] %vm6821_vm11, %v20610_v7  ;;  %11311 = vst.msk [vmem:[#allocation5 + $0x9c] sm:$0xf] %vm6821_vm11, %v20617_v36  ;;  %v10142_v5 = vsel %vm1205_vm6, %v10139_v43, %v20304_v42  ;;  %v20673_v42 = vld [vmem:[#allocation3 + $0x1b0] sm:$0xff] }
 0x3ff   : > { %v6473_v12 = vmax.f32 %v6415_v27, 0.0  ;;  %v6289_v61 = vadd.f32 %v20107_v49, %v14825_v58  ;;  %v7708_v2 = vpop.permute.xlu0 %7707  ;;  %9269 = vmatmul.mubr.bf16.gmra.mxu1 %v13358_v52  ;;  %7770 = vst.msk [vmem:[#allocation5 + $0xe4] sm:$0xf] %vm6990_vm12, %v7710_v57  ;;  %v22249_v49 = vld [vmem:[#allocation22_spill] sm:$0xff] }
 0x400   : > { %7769 = vst.msk [vmem:[#allocation5 + $0xd0] sm:$0xf] %vm6990_vm12, %v7708_v2  ;;  %10350 = vrot.lane.b32.xlu1 %v14496_v15, %s15975_s13  ;;  %v15892_v27 = vld [vmem:[#allocation3 + $0x100] sm:$0xff] }
 0x401   : > { %v6497_v22 = vmul.f32 %v6473_v12, %v22249_v49  ;;  %v6418_v31 = vadd.f32 %v6417_v3, %v6289_v61  ;;  %10348 = vrot.lane.b32.xlu0 %v20272_v16, %s15975_s13  ;;  %v10138_v16 = vsel %vm1205_vm6, %v10135_v38, %v10137_v62  ;;  %v20653_v58 = vpack.c.bf16 %v15892_v27, %v15892_v27 }
 0x402   : > { %v8416_v30 = vld [vmem:[#allocation5 + $0xdc] sm:$0xff]  ;;  %v8190_v0 = vpop.permute.xlu1 %8189  ;;  %v14498_v52 = vpack.c.bf16 %v10138_v16, %v10138_v16  ;;  %v10140_v38 = vsel %vm1205_vm6, %v10137_v62, %v10139_v43  ;;  %v20658_v3 = vpack.c.bf16 %v15893_v40, %v15893_v40  ;;  %v15694_v43 = vld [vmem:[%s21894_s6 + $0xf8] sm:$0xff]  }
 0x403   : > { %6521 = vst.msk [vmem:[#allocation3 + $0x140] sm:$0xff] %vm340_vm5, %v6497_v22  ;;  %v6474_v35 = vmax.f32 %v6418_v31, 0.0  ;;  %v8188_v9 = vpop.permute.xlu0 %8187  ;;  %15150 = vmatprep.subr.bf16.mxu0 %v15694_v43 }
 0x404   : > { %v8413_v15 = vld [vmem:[#allocation5 + $0xc8] sm:$0xff]  ;;  %10067 = vst.msk [vmem:[#allocation5 + $0xe0] sm:$0xf] %vm6821_vm11, %v20512_v53  ;;  %9874 = vrot.lane.b32.xlu1 %v20257_v24, %s15975_s13  ;;  %9779 = vst.msk [vmem:[#allocation5 + $0xdc] sm:$0xf] %vm6821_vm11, %v20363_v20 }
 0x405   : > { %8250 = vst.msk [vmem:[#allocation5 + $0xe8] sm:$0xf] %vm6990_vm12, %v8190_v0  ;;  %8249 = vst.msk [vmem:[#allocation5 + $0xd4] sm:$0xf] %vm6990_vm12, %v8188_v9  ;;  %v13362_v50 = vcombine.high %v8413_v15, %v8416_v30  ;;  %v13361_v25 = vcombine.low %v8413_v15, %v8416_v30  ;;  %v6498_v51 = vmul.f32 %v6474_v35, %v22250_v19  ;;  %9872 = vrot.lane.b32.xlu0 %v20495_v39, %s15975_s13  ;;  %v20649_v39 = vld [vmem:[#allocation3 + $0x1a8] sm:$0xff] }
 0x406   : > { %10066 = vst.msk [vmem:[#allocation5 + $0xcc] sm:$0xf] %vm6821_vm11, %v20510_v47  ;;  %9778 = vst.msk [vmem:[#allocation5 + $0xc8] sm:$0xf] %vm6821_vm11, %v20334_v28  ;;  %v6945_v1 = vpop.permute.xlu1 %6944  ;;  %v20647_v28 = vld [vmem:[#allocation3 + $0x1a0] sm:$0xff]  ;;  %v10891_v31 = vrot.slane %v20649_v39, 1  ;;  %v14499_v30 = vpack.c.bf16 %v10140_v38, %v10140_v38  ;;  %v20671_v0 = vpack.c.bf16 %v20187_v14, %v20187_v14 }
 0x407   : > { %9154 = vmatprep.mubr.bf16.mxu0 %v13362_v50  ;;  %6522 = vst.msk [vmem:[#allocation3 + $0x148] sm:$0xff] %vm340_vm5, %v6498_v51  ;;  %v6943_v24 = vpop.permute.xlu0 %6942  ;;  %v21994_v62 = vrot.slane %v20647_v28, 1  ;;  %v14500_v50 = vpack.c.bf16 %v10142_v5, %v10142_v5 }
 0x408   : > { %7004 = vst.msk [vmem:[#allocation5 + $0x104] sm:$0xf] %vm6990_vm12, %v6945_v1  ;;  %9155 = vmatmul.mubr.bf16.gmra.mxu0 %v13361_v25  ;;  %7003 = vst.msk [vmem:[#allocation5 + $0xf0] sm:$0xf] %vm6990_vm12, %v6943_v24  ;;  %10354 = vrot.lane.b32.xlu1 %v14498_v52, %s15975_s13  ;;  %v10893_v25 = vrot.slane %v20673_v42, 1 }
 0x409   : > { %10352 = vrot.lane.b32.xlu0 %v14497_v26, %s15975_s13  ;;  %v10892_v24 = vsel %vm1278_vm4, %v21994_v62, %v10891_v31  ;;  %v20707_v26 = vpack.c.bf16 %v20336_v33, %v20336_v33 }
 0x40a   : > { %v20651_v48 = vld [vmem:[#allocation3 + $0x140] sm:$0xff]  ;;  %v7426_v6 = vpop.permute.xlu1 %7425 }
 0x40b   : > { %v10865_v12 = vrot.slane %v20651_v48, 1  ;;  %v7424_v2 = vpop.permute.xlu0 %7423  ;;  %7484 = vst.msk [vmem:[#allocation5 + $0x108] sm:$0xf] %vm6990_vm12, %v7426_v6  ;;  %v10793_v19 = vrot.slane %v20651_v48, 7 }
 0x40c   : > { %v8417_v57 = vld [vmem:[#allocation5 + $0xe4] sm:$0xff]  ;;  %v8414_v61 = vld [vmem:[#allocation5 + $0xd0] sm:$0xff]  ;;  %7483 = vst.msk [vmem:[#allocation5 + $0xf4] sm:$0xf] %vm6990_vm12, %v7424_v2  ;;  %9878 = vrot.lane.b32.xlu1 %v20653_v58, %s15975_s13 }
 0x40d   : > { %v13364_v49 = vcombine.high %v8414_v61, %v8417_v57  ;;  %v13363_v22 = vcombine.low %v8414_v61, %v8417_v57  ;;  %9876 = vrot.lane.b32.xlu0 %v20658_v3, %s15975_s13  ;;  %v10866_v15 = vsel %vm1278_vm4, %v10863_v60, %v10865_v12  ;;  %v20691_v60 = vld [vmem:[#allocation5 + $0xb0] ss:$20 sps:$4 sm:$0xff]   ;;  %10544 = vst.msk [vmem:[#allocation5 + $0xa8] sm:$0xf] %vm6821_vm11, %v20707_v26 }
 0x40e   : > { %v20678_v35 = vld [vmem:[#allocation3 + $0x148] sm:$0xff]  ;;  %v7714_v16 = vpop.permute.xlu1 %7713  ;;  %v20681_v34 = vpack.c.bf16 %v10866_v15, %v10866_v15 }
 0x40f   : > { %9275 = vmatprep.mubr.bf16.mxu1 %v13364_v49  ;;  %v14826_v9 = vpop.f32.mrf.mxu1  ;;  %v20685_v14 = vrot.slane %v20678_v35, 7  ;;  %v20688_v51 = vrot.slane %v20678_v35, 1  ;;  %v7712_v1 = vpop.permute.xlu0 %7711  ;;  %7772 = vst.msk [vmem:[#allocation5 + $0x10c] sm:$0xf] %vm6990_vm12, %v7714_v16  ;;  %v20727_v49 = vld [vmem:[%s21893_s5] ss:$0 sm:$0xff] }
 0x410   : > { %9276 = vmatmul.mubr.bf16.gmra.mxu1 %v13363_v22  ;;  %7771 = vst.msk [vmem:[#allocation5 + $0xf8] sm:$0xf] %vm6990_vm12, %v7712_v1  ;;  %10358 = vrot.lane.b32.xlu1 %v14500_v50, %s15975_s13 }
 0x411   : > { %v14827_v52 = vpop.f32.mrf.mxu1  ;;  %11312 = vst.msk [vmem:[#allocation5 + $0xb0] sm:$0xf] %vm6821_vm11, %v20681_v34  ;;  %v10796_v6 = vsel %vm1205_vm6, %v10793_v19, %v20685_v14  ;;  %10356 = vrot.lane.b32.xlu0 %v14499_v30, %s15975_s13  ;;  %v10868_v57 = vsel %vm1278_vm4, %v10865_v12, %v20688_v51  ;;  %v15895_v30 = vld [vmem:[#allocation3 + $0x108] sm:$0xff] }
 0x412   : > { %v14828_v27 = vadd.f32 %v14827_v52, %v14826_v9  ;;  %v20716_v38 = vpack.c.bf16 %v10796_v6, %v10796_v6  ;;  %v8422_v61 = vld [vmem:[#allocation5 + $0x104] sm:$0xff]  ;;  %v8194_v40 = vpop.permute.xlu1 %8193  ;;  %v20718_v5 = vpack.c.bf16 %v10868_v57, %v10868_v57  ;;  %v20731_v15 = vpack.c.bf16 %v15895_v30, %v15895_v30  ;;  %v20742_v52 = vld [vmem:[#allocation5 + $0x1a0] ss:$20 sps:$4 sm:$0xff]  }
 0x413   : > { %v14829_v2 = vpop.f32.mrf.mxu1  ;;  %v8419_v33 = vld [vmem:[#allocation5 + $0xf0] sm:$0xff]  ;;  %10069 = vst.msk [vmem:[#allocation5 + $0x108] sm:$0xf] %vm6821_vm11, %v20617_v36  ;;  %v8192_v22 = vpop.permute.xlu0 %8191  ;;  %v14634_v9 = vpack.c.bf16 %v10892_v24, %v10892_v24  ;;  %v20755_v57 = vpack.c.bf16 %v20387_v17, %v20387_v17  ;;  %9781 = vst.msk [vmem:[#allocation5 + $0x104] sm:$0xf] %vm6821_vm11, %v20547_v11 }
 0x414   : > { %v6294_v12 = vadd.f32 %v20727_v49, %v14828_v27  ;;  %8252 = vst.msk [vmem:[#allocation5 + $0x110] sm:$0xf] %vm6990_vm12, %v8194_v40  ;;  %8251 = vst.msk [vmem:[#allocation5 + $0xfc] sm:$0xf] %vm6990_vm12, %v8192_v22  ;;  %9882 = vrot.lane.b32.xlu1 %v20671_v0, %s15975_s13  ;;  %v13367_v50 = vcombine.high %v8419_v33, %v8422_v61  ;;  %v13366_v1 = vcombine.low %v8419_v33, %v8422_v61  ;;  %v22251_v40 = vld [vmem:[#allocation24_spill] sm:$0xff] }
 0x415   : > { %11026 = vst.msk [vmem:[#allocation5 + $0xd4] sm:$0xf] %vm6821_vm11, %v20716_v38  ;;  %10068 = vst.msk [vmem:[#allocation5 + $0xf4] sm:$0xf] %vm6821_vm11, %v20610_v7  ;;  %v14830_v16 = vpop.f32.mrf.mxu1  ;;  %9880 = vrot.lane.b32.xlu0 %v20731_v15, %s15975_s13  ;;  %v10919_v27 = vsel %vm1278_vm4, %v10893_v25, 0.0 }
 0x416   : > { %11313 = vst.msk [vmem:[#allocation5 + $0xc4] sm:$0xf] %vm6821_vm11, %v20718_v5  ;;  %v6423_v43 = vadd.f32 %v20531_v44, %v6294_v12  ;;  %v14831_v24 = vadd.f32 %v14830_v16, %v14829_v2  ;;  %11325 = vst.msk [vmem:[#allocation5 + $0x1b4] sm:$0xf] %vm6821_vm11, %v14634_v9  ;;  %9161 = vmatprep.mubr.bf16.mxu0 %v13367_v50  ;;  %v6949_v6 = vpop.permute.xlu1 %6948  ;;  %v10894_v12 = vsel %vm1278_vm4, %v10891_v31, %v10893_v25  ;;  %v20775_v9 = vld [vmem:[#allocation5 + $0x1c8] ss:$20 sps:$4 sm:$0xff]  }
 0x417   : > { %v6947_v2 = vpop.permute.xlu0 %6946  ;;  %7006 = vst.msk [vmem:[#allocation5 + $0x12c] sm:$0xf] %vm6990_vm12, %v6949_v6  ;;  %9162 = vmatmul.mubr.bf16.gmra.mxu0 %v13366_v1  ;;  %v14635_v16 = vpack.c.bf16 %v10894_v12, %v10894_v12  ;;  %v14636_v50 = vpack.c.bf16 %v10919_v27, %v10919_v27  ;;  %v22252_v25 = vld [vmem:[#allocation23_spill] sm:$0xff] }
 0x418   : > { %v6475_v44 = vmax.f32 %v6423_v43, 0.0  ;;  %v6297_v61 = vadd.f32 %v20727_v49, %v14831_v24  ;;  %7005 = vst.msk [vmem:[#allocation5 + $0x118] sm:$0xf] %vm6990_vm12, %v6947_v2  ;;  %10362 = vrot.lane.b32.xlu1 %v20465_v4, %s15975_s13  ;;  %v20800_v2 = vpack.c.bf16 %v20514_v63, %v20514_v63 }
 0x419   : > { %10545 = vst.msk [vmem:[#allocation5 + $0xbc] sm:$0xf] %vm6821_vm11, %v20755_v57  ;;  %10360 = vrot.lane.b32.xlu0 %v20363_v20, %s15975_s13  ;;  %9780 = vst.msk [vmem:[#allocation5 + $0xf0] sm:$0xf] %vm6821_vm11, %v20465_v4  ;;  %v15896_v20 = vld [vmem:[#allocation3 + $0x118] sm:$0xff] }
 0x41a   : > { %v6499_v33 = vmul.f32 %v6475_v44, %v22251_v40  ;;  %v6426_v17 = vadd.f32 %v20584_v18, %v6297_v61  ;;  %v7430_v22 = vpop.permute.xlu1 %7429  ;;  %v20779_v43 = vpack.c.bf16 %v15896_v20, %v15896_v20  ;;  %11326 = vst.msk [vmem:[#allocation5 + $0x1c8] sm:$0xf] %vm6821_vm11, %v14635_v16  ;;  %11327 = vst.msk [vmem:[#allocation5 + $0x1dc] sm:$0xf] %vm6821_vm11, %v14636_v50 }
 0x41b   : > { %v8423_v30 = vld [vmem:[#allocation5 + $0x10c] sm:$0xff]  ;;  %v7428_v1 = vpop.permute.xlu0 %7427  ;;  %7486 = vst.msk [vmem:[#allocation5 + $0x130] sm:$0xf] %vm6990_vm12, %v7430_v22  ;;  %v8420_v39 = vld [vmem:[#allocation5 + $0xf8] sm:$0xff]  ;;  %v20809_v22 = vpop.f32.mrf.mxu0 }
 0x41c   : > { %6523 = vst.msk [vmem:[#allocation3 + $0x150] sm:$0xff] %vm340_vm5, %v6499_v33  ;;  %v6476_v18 = vmax.f32 %v6426_v17, 0.0  ;;  %v15641_v31 = vld [vmem:[#allocation5 + $0xfc] ss:$20 sps:$4 sm:$0xff]   ;;  %9886 = vrot.lane.b32.xlu1 %v20707_v26, %s15975_s13  ;;  %v13368_v4 = vcombine.low %v8420_v39, %v8423_v30  ;;  %v10152_v30 = vsel %vm1205_vm6, %v10791_v46, %v10793_v19 }
 0x41d   : > { %7485 = vst.msk [vmem:[#allocation5 + $0x11c] sm:$0xf] %vm6990_vm12, %v7428_v1  ;;  %9884 = vrot.lane.b32.xlu0 %v20779_v43, %s15975_s13  ;;  %9282 = vmatprep.mubr.bf16.mxu1 %v15641_v31  ;;  %v20830_v46 = vpack.c.bf16 %v10152_v30, %v10152_v30 }
 0x41e   : > { %v6500_v24 = vmul.f32 %v6476_v18, %v22252_v25  ;;  %9283 = vmatmul.mubr.bf16.gmra.mxu1 %v13368_v4  ;;  %v7718_v6 = vpop.permute.xlu1 %7717  ;;  %v6430_v25 = vpop.f32.mrf.mxu0  ;;  %10546 = vst.msk [vmem:[#allocation5 + $0xd0] sm:$0xf] %vm6821_vm11, %v20800_v2 }
 0x41f   : > { %v7716_v27 = vpop.permute.xlu0 %7715  ;;  %7774 = vst.msk [vmem:[#allocation5 + $0x134] sm:$0xf] %vm6990_vm12, %v7718_v6  ;;  %v20837_v6 = vld [vmem:[#allocation5 + $0xd8] ss:$20 sps:$4 sm:$0xff]  }
 0x420   : > { %6524 = vst.msk [vmem:[#allocation3 + $0x158] sm:$0xff] %vm340_vm5, %v6500_v24  ;;  %10366 = vrot.lane.b32.xlu1 %v20571_v8, %s15975_s13 }
 0x421   : > { %7773 = vst.msk [vmem:[#allocation5 + $0x120] sm:$0xf] %vm6990_vm12, %v7716_v27  ;;  %10364 = vrot.lane.b32.xlu0 %v20547_v11, %s15975_s13 }
 0x422   : > { %v8428_v44 = vld [vmem:[#allocation5 + $0x12c] sm:$0xff]  ;;  %v8198_v61 = vpop.permute.xlu1 %8197  ;;  %11025 = vst.msk [vmem:[#allocation5 + $0xc0] sm:$0xf] %vm6821_vm11, %v20830_v46 }
 0x423   : > { %v20802_v40 = vld [vmem:[#allocation3 + $0x150] sm:$0xff]  ;;  %10071 = vst.msk [vmem:[#allocation5 + $0x130] sm:$0xf] %vm6821_vm11, %v20718_v5  ;;  %v8196_v12 = vpop.permute.xlu0 %8195  ;;  %9783 = vst.msk [vmem:[#allocation5 + $0x12c] sm:$0xf] %vm6821_vm11, %v20830_v46 }
 0x424   : > { %v20804_v33 = vld [vmem:[#allocation3 + $0x150] sm:$0xff]  ;;  %8254 = vst.msk [vmem:[#allocation5 + $0x138] sm:$0xf] %vm6990_vm12, %v8198_v61  ;;  %8253 = vst.msk [vmem:[#allocation5 + $0x124] sm:$0xf] %vm6990_vm12, %v8196_v12  ;;  %9890 = vrot.lane.b32.xlu1 %v20800_v2, %s15975_s13  ;;  %v10227_v50 = vrot.slane %v20802_v40, 1 }
 0x425   : > { %v8425_v17 = vld [vmem:[#allocation5 + $0x118] sm:$0xff]  ;;  %v10869_v16 = vrot.slane %v20804_v33, 1  ;;  %9888 = vrot.lane.b32.xlu0 %v20755_v57, %s15975_s13  ;;  %v14832_v18 = vpop.f32.mrf.mxu1 }
 0x426   : > { %10070 = vst.msk [vmem:[#allocation5 + $0x11c] sm:$0xf] %vm6821_vm11, %v20681_v34  ;;  %v13372_v63 = vcombine.high %v8425_v17, %v8428_v44  ;;  %v13371_v11 = vcombine.low %v8425_v17, %v8428_v44  ;;  %v6953_v1 = vpop.permute.xlu1 %6952  ;;  %v10228_v44 = vsel %vm1278_vm4, %v20688_v51, %v10227_v50  ;;  %9782 = vst.msk [vmem:[#allocation5 + $0x118] sm:$0xf] %vm6821_vm11, %v20571_v8  ;;  %v10155_v8 = vrot.slane %v20802_v40, 7 }
 0x427   : > { %v10870_v20 = vsel %vm1278_vm4, %v20688_v51, %v10869_v16  ;;  %v20827_v39 = vld [vmem:[#allocation3 + $0x158] sm:$0xff]  ;;  %v6951_v31 = vpop.permute.xlu0 %6950  ;;  %7008 = vst.msk [vmem:[#allocation5 + $0x154] sm:$0xf] %vm6990_vm12, %v6953_v1  ;;  %v14833_v24 = vpop.f32.mrf.mxu1 }
 0x428   : > { %9169 = vmatprep.mubr.bf16.mxu0 %v13372_v63  ;;  %v20832_v19 = vld [vmem:[#allocation3 + $0x158] sm:$0xff]  ;;  %v14623_v4 = vpack.c.bf16 %v10870_v20, %v10870_v20  ;;  %7007 = vst.msk [vmem:[#allocation5 + $0x140] sm:$0xf] %vm6990_vm12, %v6951_v31  ;;  %10370 = vrot.lane.b32.xlu1 %v20716_v38, %s15975_s13  ;;  %v21995_v27 = vrot.slane %v20827_v39, 1  ;;  %v14834_v61 = vadd.f32 %v14833_v24, %v14832_v18  ;;  %v20851_v24 = vpop.f32.mrf.mxu0 }
 0x429   : > { %9170 = vmatmul.mubr.bf16.gmra.mxu0 %v13371_v11  ;;  %10368 = vrot.lane.b32.xlu0 %v20830_v46, %s15975_s13  ;;  %v14835_v17 = vpop.f32.mrf.mxu1  ;;  %v9635_v12 = vrot.slane %v20832_v19, 1  ;;  %v14546_v46 = vpack.c.bf16 %v20376_v10, %v20376_v10 }
 0x42a   : > { %11314 = vst.msk [vmem:[#allocation5 + $0xd8] sm:$0xf] %vm6821_vm11, %v14623_v4  ;;  %v7434_v63 = vpop.permute.xlu1 %7433  ;;  %v10872_v30 = vsel %vm1278_vm4, %v10869_v16, %v21995_v27  ;;  %v6302_v1 = vadd.f32 %v20727_v49, %v14834_v61 }
 0x42b   : > { %v8429_v11 = vld [vmem:[#allocation5 + $0x134] sm:$0xff]  ;;  %v7432_v20 = vpop.permute.xlu0 %7431  ;;  %7488 = vst.msk [vmem:[#allocation5 + $0x158] sm:$0xf] %vm6990_vm12, %v7434_v63  ;;  %v8426_v51 = vld [vmem:[#allocation5 + $0x120] sm:$0xff]  ;;  %v14624_v31 = vpack.c.bf16 %v10872_v30, %v10872_v30  ;;  %v14836_v4 = vpop.f32.mrf.mxu1  ;;  %v10230_v16 = vsel %vm1278_vm4, %v10227_v50, %v9635_v12 }
 0x42c   : > { %v15643_v18 = vld [vmem:[#allocation5 + $0x124] ss:$20 sps:$4 sm:$0xff]   ;;  %7487 = vst.msk [vmem:[#allocation5 + $0x144] sm:$0xf] %vm6990_vm12, %v7432_v20  ;;  %10634 = vrot.lane.b32.xlu1 %v20009_v41, %s15975_s13  ;;  %v13373_v62 = vcombine.low %v8426_v51, %v8429_v11  ;;  %v6431_v61 = vadd.f32 %v6430_v25, %v6302_v1  ;;  %v14837_v27 = vadd.f32 %v14836_v4, %v14835_v17  ;;  %v6433_v11 = vpop.f32.mrf.mxu0 }
 0x42d   : > { %10632 = vrot.lane.b32.xlu0 %v19880_v29, %s15975_s13  ;;  %9290 = vmatprep.mubr.bf16.mxu1 %v15643_v18  ;;  %11315 = vst.msk [vmem:[#allocation5 + $0xec] sm:$0xf] %vm6821_vm11, %v14624_v31  ;;  %v14528_v41 = vpack.c.bf16 %v20549_v23, %v20549_v23  ;;  %v21996_v29 = vrot.slane %v20832_v19, 7  ;;  %v20877_v30 = vpack.c.bf16 %v10230_v16, %v10230_v16 }
 0x42e   : > { %9291 = vmatmul.mubr.bf16.gmra.mxu1 %v13373_v62  ;;  %v7722_v63 = vpop.permute.xlu1 %7721  ;;  %v6477_v50 = vmax.f32 %v6431_v61, 0.0  ;;  %v6305_v25 = vadd.f32 %v20727_v49, %v14837_v27  ;;  %v22253_v62 = vld [vmem:[#allocation26_spill] sm:$0xff]  ;;  %v20883_v1 = vpack.c.bf16 %v10228_v44, %v10228_v44  ;;  %v10156_v16 = vsel %vm1205_vm6, %v20685_v14, %v10155_v8  ;;  %v22254_v61 = vld [vmem:[#allocation25_spill] sm:$0xff] }
 0x42f   : > { %v7720_v17 = vpop.permute.xlu0 %7719  ;;  %7776 = vst.msk [vmem:[#allocation5 + $0x15c] sm:$0xf] %vm6990_vm12, %v7722_v63 }
 0x430   : > { %7775 = vst.msk [vmem:[#allocation5 + $0x148] sm:$0xf] %vm6990_vm12, %v7720_v17  ;;  %11114 = vrot.lane.b32.xlu1 %v20653_v58, %s15975_s13  ;;  %v6501_v23 = vmul.f32 %v6477_v50, %v22253_v62  ;;  %v6434_v27 = vadd.f32 %v6433_v11, %v6305_v25  ;;  %v20887_v58 = vpack.c.bf16 %v20651_v48, %v20651_v48 }
 0x431   : > { %10547 = vst.msk [vmem:[#allocation5 + $0xe4] sm:$0xf] %vm6821_vm11, %v14528_v41  ;;  %11112 = vrot.lane.b32.xlu0 %v20658_v3, %s15975_s13  ;;  %v10158_v3 = vsel %vm1205_vm6, %v10155_v8, %v21996_v29  ;;  %v14507_v11 = vpack.c.bf16 %v10156_v16, %v10156_v16  ;;  %v20970_v29 = vpack.c.bf16 %v20802_v40, %v20802_v40 }
 0x432   : > { %v8434_v20 = vld [vmem:[#allocation5 + $0x154] sm:$0xff]  ;;  %v8202_v51 = vpop.permute.xlu1 %8201  ;;  %6525 = vst.msk [vmem:[#allocation3 + $0x160] sm:$0xff] %vm340_vm5, %v6501_v23  ;;  %v6478_v31 = vmax.f32 %v6434_v27, 0.0  ;;  %v20905_v25 = vpack.c.bf16 %v10158_v3, %v10158_v3  ;;  %v14544_v23 = vpack.c.bf16 %v20240_v55, %v20240_v55 }
 0x433   : > { %v8431_v18 = vld [vmem:[#allocation5 + $0x140] sm:$0xff]  ;;  %10073 = vst.msk [vmem:[#allocation5 + $0x158] sm:$0xf] %vm6821_vm11, %v20877_v30  ;;  %v8200_v4 = vpop.permute.xlu0 %8199  ;;  %9785 = vst.msk [vmem:[#allocation5 + $0x154] sm:$0xf] %vm6821_vm11, %v14507_v11 }
 0x434   : > { %8256 = vst.msk [vmem:[#allocation5 + $0x160] sm:$0xf] %vm6990_vm12, %v8202_v51  ;;  %8255 = vst.msk [vmem:[#allocation5 + $0x14c] sm:$0xf] %vm6990_vm12, %v8200_v4  ;;  %9894 = vrot.lane.b32.xlu1 %v20887_v58, %s15975_s13  ;;  %v13377_v48 = vcombine.high %v8431_v18, %v8434_v20  ;;  %v13376_v44 = vcombine.low %v8431_v18, %v8434_v20  ;;  %v6502_v63 = vmul.f32 %v6478_v31, %v22254_v61 }
 0x435   : > { %10072 = vst.msk [vmem:[#allocation5 + $0x144] sm:$0xf] %vm6821_vm11, %v20883_v1  ;;  %9892 = vrot.lane.b32.xlu0 %v14528_v41, %s15975_s13  ;;  %v20916_v41 = vld [vmem:[%s21894_s6 + $0x118] sm:$0xff]   ;;  %v14543_v31 = vpack.c.bf16 %v20223_v45, %v20223_v45  ;;  %9784 = vst.msk [vmem:[#allocation5 + $0x140] sm:$0xf] %vm6821_vm11, %v20716_v38  ;;  %v22255_v61 = vrot.slane %v20827_v39, 1 }
 0x436   : > { %9176 = vmatprep.mubr.bf16.mxu0 %v13377_v48  ;;  %v6957_v50 = vpop.permute.xlu1 %6956  ;;  %6526 = vst.msk [vmem:[#allocation3 + $0x168] sm:$0xff] %vm340_vm5, %v6502_v63  ;;  %15398 = vmatprep.subr.bf16.mxu1 %v20916_v41 }
 0x437   : > { %v6955_v17 = vpop.permute.xlu0 %6954  ;;  %7010 = vst.msk [vmem:[#allocation5 + $0x17c] sm:$0xf] %vm6990_vm12, %v6957_v50  ;;  %9177 = vmatmul.mubr.bf16.gmra.mxu0 %v13376_v44 }
 0x438   : > { %7009 = vst.msk [vmem:[#allocation5 + $0x168] sm:$0xf] %vm6990_vm12, %v6955_v17  ;;  %10374 = vrot.lane.b32.xlu1 %v20905_v25, %s15975_s13 }
 0x439   : > { %10372 = vrot.lane.b32.xlu0 %v14507_v11, %s15975_s13  ;;  %v20918_v8 = vld [vmem:[#allocation3 + $0x160] sm:$0xff]  ;;  %v14461_v11 = vpack.c.bf16 %v20678_v35, %v20678_v35  ;;  %10548 = vst.msk [vmem:[#allocation5 + $0xf8] sm:$0xf] %vm6821_vm11, %v20887_v58  ;;  %10550 = vst.msk [vmem:[#allocation5 + $0x120] sm:$0xf] %vm6821_vm11, %v20970_v29 }
 0x43a   : > { %v7438_v62 = vpop.permute.xlu1 %7437  ;;  %v20922_v20 = vld [vmem:[#allocation3 + $0x160] sm:$0xff]  ;;  %v9637_v51 = vrot.slane %v20918_v8, 1 }
 0x43b   : > { %v8435_v27 = vld [vmem:[#allocation5 + $0x15c] sm:$0xff]  ;;  %v7436_v18 = vpop.permute.xlu0 %7435  ;;  %7490 = vst.msk [vmem:[#allocation5 + $0x180] sm:$0xf] %vm6990_vm12, %v7438_v62  ;;  %v8432_v4 = vld [vmem:[#allocation5 + $0x148] sm:$0xff]  ;;  %v10873_v48 = vrot.slane %v20922_v20, 1 }
 0x43c   : > { %v15645_v3 = vld [vmem:[#allocation5 + $0x14c] ss:$20 sps:$4 sm:$0xff]   ;;  %7489 = vst.msk [vmem:[#allocation5 + $0x16c] sm:$0xf] %vm6990_vm12, %v7436_v18  ;;  %10638 = vrot.lane.b32.xlu1 %v14544_v23, %s15975_s13  ;;  %v13378_v55 = vcombine.low %v8432_v4, %v8435_v27  ;;  %v10232_v50 = vsel %vm1278_vm4, %v9635_v12, %v9637_v51 }
 0x43d   : > { %10636 = vrot.lane.b32.xlu0 %v14543_v31, %s15975_s13  ;;  %9297 = vmatprep.mubr.bf16.mxu1 %v15645_v3  ;;  %v20935_v44 = vld [vmem:[#allocation3 + $0x168] sm:$0xff]  ;;  %v14838_v45 = vpop.f32.mrf.mxu1  ;;  %v10874_v38 = vsel %vm1278_vm4, %v22255_v61, %v10873_v48  ;;  %v10159_v31 = vrot.slane %v20918_v8, 7  ;;  %10549 = vst.msk [vmem:[#allocation5 + $0x10c] sm:$0xf] %vm6821_vm11, %v14461_v11 }
 0x43e   : > { %9298 = vmatmul.mubr.bf16.gmra.mxu1 %v13378_v55  ;;  %v7726_v16 = vpop.permute.xlu1 %7725  ;;  %v20940_v63 = vld [vmem:[#allocation3 + $0x168] sm:$0xff]  ;;  %v21999_v17 = vrot.slane %v20935_v44, 1  ;;  %v21998_v23 = vrot.slane %v20935_v44, 7  ;;  %v14625_v27 = vpack.c.bf16 %v10874_v38, %v10874_v38 }
 0x43f   : > { %v7724_v62 = vpop.permute.xlu0 %7723  ;;  %7778 = vst.msk [vmem:[#allocation5 + $0x184] sm:$0xf] %vm6990_vm12, %v7726_v16  ;;  %v14839_v18 = vpop.f32.mrf.mxu1  ;;  %v20953_v4 = vld [vmem:[#allocation5 + $0x100] ss:$20 sps:$4 sm:$0xff]   ;;  %v21997_v12 = vrot.slane %v20940_v63, 1 }
 0x440   : > { %7777 = vst.msk [vmem:[#allocation5 + $0x170] sm:$0xf] %vm6990_vm12, %v7724_v62  ;;  %11118 = vrot.lane.b32.xlu1 %v20671_v0, %s15975_s13  ;;  %v9640_v3 = vsel %vm1278_vm4, %v9637_v51, %v21999_v17  ;;  %v14840_v55 = vadd.f32 %v14839_v18, %v14838_v45  ;;  %v20964_v0 = vpack.c.bf16 %v10232_v50, %v10232_v50 }
 0x441   : > { %11116 = vrot.lane.b32.xlu0 %v20731_v15, %s15975_s13  ;;  %11316 = vst.msk [vmem:[#allocation5 + $0x100] sm:$0xf] %vm6821_vm11, %v14625_v27  ;;  %v20966_v16 = vpack.c.bf16 %v9640_v3, %v9640_v3  ;;  %v14841_v38 = vpop.f32.mrf.mxu1  ;;  %v10876_v15 = vsel %vm1278_vm4, %v10873_v48, %v21997_v12  ;;  %v10162_v50 = vsel %vm1205_vm6, %v10159_v31, %v21998_v23  ;;  %v22257_v3 = vrot.slane %v20832_v19, 7 }
 0x442   : > { %v8440_v61 = vld [vmem:[#allocation5 + $0x17c] sm:$0xff]  ;;  %v8206_v62 = vpop.permute.xlu1 %8205  ;;  %v6310_v35 = vadd.f32 %v20727_v49, %v14840_v55  ;;  %v14626_v27 = vpack.c.bf16 %v10876_v15, %v10876_v15 }
 0x443   : > { %22256 = vst [vmem:[#allocation42_spill] sm:$0xff] %v20966_v16  ;;  %v8437_v51 = vld [vmem:[#allocation5 + $0x168] sm:$0xff]  ;;  %v8204_v45 = vpop.permute.xlu0 %8203  ;;  %8258 = vst.msk [vmem:[#allocation5 + $0x188] sm:$0xf] %vm6990_vm12, %v8206_v62  ;;  %v14842_v40 = vpop.f32.mrf.mxu1  ;;  %v10160_v55 = vsel %vm1205_vm6, %v22257_v3, %v10159_v31 }
 0x444   : > { %10074 = vst.msk [vmem:[#allocation5 + $0x16c] sm:$0xf] %vm6821_vm11, %v20964_v0  ;;  %10075 = vst.msk [vmem:[#allocation5 + $0x180] sm:$0xf] %vm6821_vm11, %v20966_v16  ;;  %9898 = vrot.lane.b32.xlu1 %v20970_v29, %s15975_s13  ;;  %v13382_v48 = vcombine.high %v8437_v51, %v8440_v61  ;;  %v13381_v18 = vcombine.low %v8437_v51, %v8440_v61  ;;  %v6439_v62 = vadd.f32 %v20809_v22, %v6310_v35  ;;  %v22258_v22 = vld [vmem:[#allocation28_spill] sm:$0xff] }
 0x445   : > { %8257 = vst.msk [vmem:[#allocation5 + $0x174] sm:$0xf] %vm6990_vm12, %v8204_v45  ;;  %v14843_v15 = vadd.f32 %v14842_v40, %v14841_v38  ;;  %9896 = vrot.lane.b32.xlu0 %v14461_v11, %s15975_s13  ;;  %v20993_v45 = vpack.c.bf16 %v10162_v50, %v10162_v50  ;;  %v14509_v61 = vpack.c.bf16 %v10160_v55, %v10160_v55 }
 0x446   : > { %11317 = vst.msk [vmem:[#allocation5 + $0x114] sm:$0xf] %vm6821_vm11, %v14626_v27  ;;  %9183 = vmatprep.mubr.bf16.mxu0 %v13382_v48  ;;  %v6961_v12 = vpop.permute.xlu1 %6960  ;;  %v6479_v23 = vmax.f32 %v6439_v62, 0.0  ;;  %v14545_v11 = vpack.c.bf16 %v20371_v32, %v20371_v32  ;;  %9786 = vst.msk [vmem:[#allocation5 + $0x168] sm:$0xf] %vm6821_vm11, %v20905_v25  ;;  %v21028_v25 = vpop.f32.mrf.mxu0 }
 0x447   : > { %v6313_v17 = vadd.f32 %v20727_v49, %v14843_v15  ;;  %v6959_v16 = vpop.permute.xlu0 %6958  ;;  %7012 = vst.msk [vmem:[#allocation5 + $0x1a4] sm:$0xf] %vm6990_vm12, %v6961_v12  ;;  %9184 = vmatmul.mubr.bf16.gmra.mxu0 %v13381_v18  ;;  %v21034_v18 = vpack.c.bf16 %v20918_v8, %v20918_v8 }
 0x448   : > { %7011 = vst.msk [vmem:[#allocation5 + $0x190] sm:$0xf] %vm6990_vm12, %v6959_v16  ;;  %10378 = vrot.lane.b32.xlu1 %v20993_v45, %s15975_s13  ;;  %v6503_v31 = vmul.f32 %v6479_v23, %v22258_v22 }
 0x449   : > { %v6442_v38 = vadd.f32 %v20851_v24, %v6313_v17  ;;  %10376 = vrot.lane.b32.xlu0 %v14509_v61, %s15975_s13  ;;  %v22259_v24 = vld [vmem:[#allocation27_spill] sm:$0xff]  ;;  %9787 = vst.msk [vmem:[#allocation5 + $0x17c] sm:$0xf] %vm6821_vm11, %v14509_v61  ;;  %10552 = vst.msk [vmem:[#allocation5 + $0x148] sm:$0xf] %vm6821_vm11, %v21034_v18 }
 0x44a   : > { %v7442_v12 = vpop.permute.xlu1 %7441  ;;  %v8441_v51 = vld [vmem:[#allocation5 + $0x184] sm:$0xff]  ;;  %6527 = vst.msk [vmem:[#allocation3 + $0x170] sm:$0xff] %vm340_vm5, %v6503_v31  ;;  %v22260_v31 = vrot.slane %v20935_v44, 1 }
 0x44b   : > { %v6480_v58 = vmax.f32 %v6442_v38, 0.0  ;;  %v7440_v16 = vpop.permute.xlu0 %7439  ;;  %7492 = vst.msk [vmem:[#allocation5 + $0x1a8] sm:$0xf] %vm6990_vm12, %v7442_v12 }
 0x44c   : > { %v8438_v35 = vld [vmem:[#allocation5 + $0x170] sm:$0xff]  ;;  %7491 = vst.msk [vmem:[#allocation5 + $0x194] sm:$0xf] %vm6990_vm12, %v7440_v16  ;;  %10642 = vrot.lane.b32.xlu1 %v14546_v46, %s15975_s13  ;;  %v6446_v46 = vpop.f32.mrf.mxu0 }
 0x44d   : > { %v15647_v23 = vld [vmem:[#allocation5 + $0x174] ss:$20 sps:$4 sm:$0xff]   ;;  %v13383_v10 = vcombine.low %v8438_v35, %v8441_v51  ;;  %v6504_v17 = vmul.f32 %v6480_v58, %v22259_v24  ;;  %10640 = vrot.lane.b32.xlu0 %v14545_v11, %s15975_s13 }
 0x44e   : > { %9304 = vmatprep.mubr.bf16.mxu1 %v15647_v23  ;;  %v7730_v50 = vpop.permute.xlu1 %7729  ;;  %v10797_v23 = vrot.slane %v20804_v33, 7 }
 0x44f   : > { %9305 = vmatmul.mubr.bf16.gmra.mxu1 %v13383_v10  ;;  %6528 = vst.msk [vmem:[#allocation3 + $0x178] sm:$0xff] %vm340_vm5, %v6504_v17  ;;  %v7728_v32 = vpop.permute.xlu0 %7727  ;;  %v22262_v10 = vrot.slane %v20940_v63, 1 }
 0x450   : > { %7780 = vst.msk [vmem:[#allocation5 + $0x1ac] sm:$0xf] %vm6990_vm12, %v7730_v50  ;;  %7779 = vst.msk [vmem:[#allocation5 + $0x198] sm:$0xf] %vm6990_vm12, %v7728_v32  ;;  %11122 = vrot.lane.b32.xlu1 %v20707_v26, %s15975_s13  ;;  %v21042_v26 = vpack.c.bf16 %v20832_v19, %v20832_v19  ;;  %v22261_v19 = vrot.slane %v20935_v44, 7 }
 0x451   : > { %11120 = vrot.lane.b32.xlu0 %v20779_v43, %s15975_s13  ;;  %v21030_v27 = vld [vmem:[#allocation3 + $0x170] sm:$0xff] }
 0x452   : > { %v8446_v40 = vld [vmem:[#allocation5 + $0x1a4] sm:$0xff]  ;;  %v8210_v48 = vpop.permute.xlu1 %8209  ;;  %v21036_v3 = vld [vmem:[#allocation3 + $0x170] sm:$0xff]  ;;  %v9641_v55 = vrot.slane %v21030_v27, 1  ;;  %v10163_v43 = vrot.slane %v21030_v27, 7  ;;  %10551 = vst.msk [vmem:[#allocation5 + $0x134] sm:$0xf] %vm6821_vm11, %v21042_v26 }
 0x453   : > { %v8443_v62 = vld [vmem:[#allocation5 + $0x190] sm:$0xff]  ;;  %v8208_v15 = vpop.permute.xlu0 %8207  ;;  %8260 = vst.msk [vmem:[#allocation5 + $0x1b0] sm:$0xf] %vm6990_vm12, %v8210_v48  ;;  %v10877_v22 = vrot.slane %v21036_v3, 1 }
 0x454   : > { %8259 = vst.msk [vmem:[#allocation5 + $0x19c] sm:$0xf] %vm6990_vm12, %v8208_v15  ;;  %9902 = vrot.lane.b32.xlu1 %v21034_v18, %s15975_s13  ;;  %v13387_v8 = vcombine.high %v8443_v62, %v8446_v40  ;;  %v13386_v61 = vcombine.low %v8443_v62, %v8446_v40  ;;  %v9642_v38 = vsel %vm1278_vm4, %v22260_v31, %v9641_v55  ;;  %v21077_v15 = vld [vmem:[#allocation5 + $0x128] ss:$20 sps:$4 sm:$0xff]  }
 0x455   : > { %9900 = vrot.lane.b32.xlu0 %v21042_v26, %s15975_s13  ;;  %v10164_v12 = vsel %vm1205_vm6, %v22261_v19, %v10163_v43  ;;  %v21057_v51 = vpack.c.bf16 %v9642_v38, %v9642_v38  ;;  %v14844_v16 = vpop.f32.mrf.mxu1  ;;  %v10878_v24 = vsel %vm1278_vm4, %v22262_v10, %v10877_v22  ;;  %v14547_v62 = vpack.c.bf16 %v20431_v37, %v20431_v37  ;;  %v21088_v19 = vpop.f32.mrf.mxu0 }
 0x456   : > { %v21059_v58 = vld [vmem:[#allocation3 + $0x178] sm:$0xff]  ;;  %9191 = vmatprep.mubr.bf16.mxu0 %v13387_v8  ;;  %v6965_v11 = vpop.permute.xlu1 %6964  ;;  %v21061_v35 = vpack.c.bf16 %v10164_v12, %v10164_v12  ;;  %v14627_v48 = vpack.c.bf16 %v10878_v24, %v10878_v24  ;;  %v10799_v37 = vrot.slane %v20827_v39, 7  ;;  %9788 = vst.msk [vmem:[#allocation5 + $0x190] sm:$0xf] %vm6821_vm11, %v20993_v45  ;;  %v22263_v45 = vld [vmem:[#allocation30_spill] sm:$0xff]  ;;  %v15705_v39 = vld [vmem:[%s21894_s6 + $0xa8] sm:$0xff]  }
 0x457   : > { %v21067_v17 = vld [vmem:[#allocation3 + $0x178] sm:$0xff]  ;;  %v22001_v50 = vrot.slane %v21059_v58, 1  ;;  %v6963_v32 = vpop.permute.xlu0 %6962  ;;  %7014 = vst.msk [vmem:[#allocation5 + $0x1cc] sm:$0xf] %vm6990_vm12, %v6965_v11  ;;  %9192 = vmatmul.mubr.bf16.gmra.mxu0 %v13386_v61  ;;  %v22002_v40 = vrot.slane %v21059_v58, 7  ;;  %v14845_v33 = vpop.f32.mrf.mxu1 }
 0x458   : > { %10076 = vst.msk [vmem:[#allocation5 + $0x194] sm:$0xf] %vm6821_vm11, %v21057_v51  ;;  %v22003_v8 = vrot.slane %v21067_v17, 1  ;;  %v14846_v31 = vadd.f32 %v14845_v33, %v14844_v16  ;;  %11318 = vst.msk [vmem:[#allocation5 + $0x128] sm:$0xf] %vm6821_vm11, %v14627_v48  ;;  %v10798_v48 = vsel %vm1205_vm6, %v20685_v14, %v10797_v23  ;;  %v6449_v14 = vpop.f32.mrf.mxu0 }
 0x459   : > { %7013 = vst.msk [vmem:[#allocation5 + $0x1b8] sm:$0xf] %vm6990_vm12, %v6963_v32  ;;  %v9644_v61 = vsel %vm1278_vm4, %v9641_v55, %v22001_v50  ;;  %10380 = vrot.lane.b32.xlu0 %v21061_v35, %s15975_s13  ;;  %v10166_v38 = vsel %vm1205_vm6, %v10163_v43, %v22002_v40  ;;  %v14847_v11 = vpop.f32.mrf.mxu1 }
 0x45a   : > { %v21092_v12 = vpack.c.bf16 %v9644_v61, %v9644_v61  ;;  %v7446_v10 = vpop.permute.xlu1 %7445  ;;  %v21094_v24 = vpack.c.bf16 %v10166_v38, %v10166_v38  ;;  %v8447_v55 = vld [vmem:[#allocation5 + $0x1ac] sm:$0xff]  ;;  %v10880_v16 = vsel %vm1278_vm4, %v10877_v22, %v22003_v8  ;;  %v6318_v43 = vadd.f32 %v20727_v49, %v14846_v31  ;;  %9789 = vst.msk [vmem:[#allocation5 + $0x1a4] sm:$0xf] %vm6821_vm11, %v21061_v35 }
 0x45b   : > { %v7444_v32 = vpop.permute.xlu0 %7443  ;;  %7494 = vst.msk [vmem:[#allocation5 + $0x1d0] sm:$0xf] %vm6990_vm12, %v7446_v10  ;;  %v8444_v33 = vld [vmem:[#allocation5 + $0x198] sm:$0xff]  ;;  %v14628_v40 = vpack.c.bf16 %v10880_v16, %v10880_v16  ;;  %v14848_v61 = vpop.f32.mrf.mxu1  ;;  %v14576_v16 = vpack.c.bf16 %v10798_v48, %v10798_v48  ;;  %v21142_v35 = vpack.c.bf16 %v20935_v44, %v20935_v44 }
 0x45c   : > { %v15654_v50 = vld [vmem:[#allocation5 + $0x19c] ss:$20 sps:$4 sm:$0xff]   ;;  %10077 = vst.msk [vmem:[#allocation5 + $0x1a8] sm:$0xf] %vm6821_vm11, %v21092_v12  ;;  %10382 = vrot.lane.b32.xlu1 %v21094_v24, %s15975_s13  ;;  %v13388_v22 = vcombine.low %v8444_v33, %v8447_v55  ;;  %v14849_v38 = vadd.f32 %v14848_v61, %v14847_v11  ;;  %v6447_v10 = vadd.f32 %v6446_v46, %v6318_v43 }
 0x45d   : > { %7493 = vst.msk [vmem:[#allocation5 + $0x1bc] sm:$0xf] %vm6990_vm12, %v7444_v32  ;;  %10644 = vrot.lane.b32.xlu0 %v14547_v62, %s15975_s13  ;;  %9312 = vmatprep.mubr.bf16.mxu1 %v15654_v50  ;;  %v10800_v32 = vsel %vm1205_vm6, %v10797_v23, %v10799_v37 }
 0x45e   : > { %11319 = vst.msk [vmem:[#allocation5 + $0x13c] sm:$0xf] %vm6821_vm11, %v14628_v40  ;;  %9313 = vmatmul.mubr.bf16.gmra.mxu1 %v13388_v22  ;;  %v7734_v31 = vpop.permute.xlu1 %7733  ;;  %v6481_v8 = vmax.f32 %v6447_v10, 0.0  ;;  %v6321_v46 = vadd.f32 %v20727_v49, %v14849_v38  ;;  %v14577_v50 = vpack.c.bf16 %v10800_v32, %v10800_v32  ;;  %v10821_v40 = vrot.slane %v20673_v42, 7  ;;  %11027 = vst.msk [vmem:[#allocation5 + $0xe8] sm:$0xf] %vm6821_vm11, %v14576_v16 }
 0x45f   : > { %v7732_v55 = vpop.permute.xlu0 %7731  ;;  %7782 = vst.msk [vmem:[#allocation5 + $0x1d4] sm:$0xf] %vm6990_vm12, %v7734_v31  ;;  %v21127_v49 = vld [vmem:[#allocation3 + $0x1a8] sm:$0xff]  ;;  %v21156_v10 = vpack.c.bf16 %v21030_v27, %v21030_v27 }
 0x460   : > { %7781 = vst.msk [vmem:[#allocation5 + $0x1c0] sm:$0xf] %vm6990_vm12, %v7732_v55  ;;  %10646 = vrot.lane.b32.xlu1 %v20510_v47, %s15975_s13  ;;  %v6505_v23 = vmul.f32 %v6481_v8, %v22263_v45  ;;  %v6450_v62 = vadd.f32 %v6449_v14, %v6321_v46  ;;  %v10819_v11 = vrot.slane %v21127_v49, 7  ;;  %v21136_v8 = vld [vmem:[#allocation3 + $0x1a0] sm:$0xff] }
 0x461   : > { %11124 = vrot.lane.b32.xlu0 %v20755_v57, %s15975_s13  ;;  %11028 = vst.msk [vmem:[#allocation5 + $0xfc] sm:$0xf] %vm6821_vm11, %v14577_v50  ;;  %v10817_v57 = vrot.slane %v21136_v8, 7  ;;  %v15697_v45 = vld [vmem:[%s21894_s6 + $0xb8] sm:$0xff]   ;;  %10553 = vst.msk [vmem:[#allocation5 + $0x15c] sm:$0xf] %vm6821_vm11, %v21142_v35 }
 0x462   : > { %v8214_v47 = vpop.permute.xlu1 %8213  ;;  %v8452_v42 = vld [vmem:[#allocation5 + $0x1cc] sm:$0xff]  ;;  %6529 = vst.msk [vmem:[#allocation3 + $0x180] sm:$0xff] %vm340_vm5, %v6505_v23  ;;  %v6482_v29 = vmax.f32 %v6450_v62, 0.0  ;;  %v10822_v26 = vsel %vm1205_vm6, %v10819_v11, %v10821_v40  ;;  %v22264_v23 = vrot.slane %v21059_v58, 7 }
 0x463   : > { %v8212_v43 = vpop.permute.xlu0 %8211  ;;  %8262 = vst.msk [vmem:[#allocation5 + $0x1d8] sm:$0xf] %vm6990_vm12, %v8214_v47  ;;  %v10820_v38 = vsel %vm1205_vm6, %v10817_v57, %v10819_v11  ;;  %v15698_v47 = vld [vmem:[%s21894_s6 + $0xf0] sm:$0xff]  }
 0x464   : > { %v8449_v33 = vld [vmem:[#allocation5 + $0x1b8] sm:$0xff]  ;;  %8261 = vst.msk [vmem:[#allocation5 + $0x1c4] sm:$0xf] %vm6990_vm12, %v8212_v43  ;;  %11126 = vrot.lane.b32.xlu1 %v20800_v2, %s15975_s13  ;;  %v6506_v22 = vmul.f32 %v6482_v29, %v22234_v13  ;;  %v14588_v2 = vpack.c.bf16 %v10822_v26, %v10822_v26  ;;  %v14587_v13 = vpack.c.bf16 %v10820_v38, %v10820_v38  ;;  %v22266_v43 = vrot.slane %v21059_v58, 1 }
 0x465   : > { %v15661_v48 = vld [vmem:[#allocation5 + $0x1bc] ss:$20 sps:$4 sm:$0xff]   ;;  %v13391_v61 = vcombine.low %v8449_v33, %v8452_v42  ;;  %9904 = vrot.lane.b32.xlu0 %v21142_v35, %s15975_s13  ;;  %v22265_v42 = vrot.slane %v21067_v17, 1  ;;  %9790 = vst.msk [vmem:[#allocation5 + $0x1b8] sm:$0xf] %vm6821_vm11, %v21094_v24 }
 0x466   : > { %9198 = vmatprep.mubr.bf16.mxu0 %v15661_v48  ;;  %v9867_v44 = vpop.permute.xlu1 %9866  ;;  %6530 = vst.msk [vmem:[#allocation3 + $0x188] sm:$0xff] %vm340_vm5, %v6506_v22 }
 0x467   : > { %9199 = vmatmul.mubr.bf16.gmra.mxu0 %v13391_v61  ;;  %v9865_v31 = vpop.permute.xlu0 %9864  ;;  %9937 = vst.msk [vmem:[#allocation5 + $0x14] sm:$0xf] %vm6990_vm12, %v9867_v44 }
 0x468   : > { %15374 = vmatprep.mubr.msk.bf16.mxu0 %vm340_vm5, %v20421_v56  ;;  %9936 = vst.msk [vmem:[#allocation5] sm:$0xf] %vm6990_vm12, %v9865_v31  ;;  %9906 = vrot.lane.b32.xlu1 %v21156_v10, %s15975_s13 }
 0x469   : > { %v21165_v32 = vld [vmem:[#allocation3 + $0x180] sm:$0xff]  ;;  %10554 = vst.msk [vmem:[#allocation5 + $0x170] sm:$0xf] %vm6821_vm11, %v21156_v10 }
 0x46a   : > { %v8453_v14 = vld [vmem:[#allocation5 + $0x1d4] sm:$0xff]  ;;  %v10347_v16 = vpop.permute.xlu1 %10346  ;;  %v21170_v46 = vrot.slane %v21165_v32, 7  ;;  %v9645_v56 = vrot.slane %v21165_v32, 1 }
 0x46b   : > { %v8450_v27 = vld [vmem:[#allocation5 + $0x1c0] sm:$0xff]  ;;  %11039 = vst.msk [vmem:[#allocation5 + $0x1d8] sm:$0xf] %vm6821_vm11, %v14588_v2  ;;  %v10345_v55 = vpop.permute.xlu0 %10344 }
 0x46c   : > { %10417 = vst.msk [vmem:[#allocation5 + $0x18] sm:$0xf] %vm6990_vm12, %v10347_v16  ;;  %10416 = vst.msk [vmem:[#allocation5 + $0x4] sm:$0xf] %vm6990_vm12, %v10345_v55  ;;  %v13394_v50 = vcombine.high %v8450_v27, %v8453_v14  ;;  %v13393_v40 = vcombine.low %v8450_v27, %v8453_v14  ;;  %v10168_v62 = vsel %vm1205_vm6, %v22264_v23, %v21170_v46  ;;  %v9671_v11 = vsel %vm1278_vm4, %v9645_v56, 0.0  ;;  %v15699_v55 = vld [vmem:[%s21894_s6 + $0xb0] sm:$0xff]  }
 0x46d   : > { %11038 = vst.msk [vmem:[#allocation5 + $0x1c4] sm:$0xf] %vm6821_vm11, %v14587_v13  ;;  %v10882_v29 = vsel %vm1278_vm4, %v22265_v42, %v9645_v56  ;;  %v21192_v33 = vsel %vm1278_vm4, %v22266_v43, %v9645_v56  ;;  %v14513_v61 = vpack.c.bf16 %v10168_v62, %v10168_v62  ;;  %v21196_v22 = vld [vmem:[#allocation3 + $0x188] sm:$0xff]  ;;  %v14492_v38 = vpack.c.bf16 %v9671_v11, %v9671_v11  ;;  %v15704_v11 = vld [vmem:[%s21894_s6 + $0xe8] sm:$0xff]  }
 0x46e   : > { %9319 = vmatprep.mubr.bf16.mxu1 %v13394_v50  ;;  %v14850_v48 = vpop.f32.mrf.mxu1  ;;  %v9871_v26 = vpop.permute.xlu1 %9870  ;;  %v14629_v44 = vpack.c.bf16 %v10882_v29, %v10882_v29  ;;  %v10169_v31 = vrot.slane %v21196_v22, 7  ;;  %v21202_v13 = vld [vmem:[#allocation5 + $0x150] ss:$20 sps:$4 sm:$0xff]   ;;  %v10801_v14 = vrot.slane %v20922_v20, 7  ;;  %v21208_v16 = vpack.c.bf16 %v21196_v22, %v21196_v22 }
 0x46f   : > { %15375 = vmatmul.mubr.msk.bf16.vlgmr.msra.gmra.mxu0 %vm340_vm5, %v20232_v59  ;;  %v9869_v2 = vpop.permute.xlu0 %9868  ;;  %9320 = vmatmul.mubr.bf16.gmra.mxu1 %v13393_v40  ;;  %9939 = vst.msk [vmem:[#allocation5 + $0x3c] sm:$0xf] %vm6990_vm12, %v9871_v26  ;;  %v10883_v59 = vrot.slane %v21196_v22, 1  ;;  %v10803_v50 = vrot.slane %v20940_v63, 7 }
 0x470   : > { %15378 = vmatprep.mubr.msk.bf16.mxu0 %vm340_vm5, %v20508_v21  ;;  %9938 = vst.msk [vmem:[#allocation5 + $0x28] sm:$0xf] %vm6990_vm12, %v9869_v2  ;;  %v14851_v27 = vpop.f32.mrf.mxu1  ;;  %10384 = vrot.lane.b32.xlu0 %v14513_v61, %s15975_s13  ;;  %v10170_v20 = vsel %vm1205_vm6, %v21170_v46, %v10169_v31  ;;  %v15676_v2 = vld [vmem:[#allocation5] ss:$20 sps:$4 sm:$0xff]  }
 0x471   : > { %10079 = vst.msk [vmem:[#allocation5 + $0x1d0] sm:$0xf] %vm6821_vm11, %v14492_v38  ;;  %15151 = vmatpush3.bf16.msra.mxu0 %v15697_v45  ;;  %11320 = vst.msk [vmem:[#allocation5 + $0x150] sm:$0xf] %vm6821_vm11, %v14629_v44  ;;  %v14852_v21 = vadd.f32 %v14851_v27, %v14850_v48  ;;  %v10884_v40 = vsel %vm1278_vm4, %v9645_v56, %v10883_v59  ;;  %v21227_v62 = vpack.c.bf16 %v10170_v20, %v10170_v20  ;;  %v15899_v56 = vld [vmem:[%s21893_s5] ss:$0 sm:$0xff] }
 0x472   : > { %15152 = vmatprep.subr.bf16.mxu0 %v15698_v47  ;;  %10557 = vst.msk [vmem:[#allocation5 + $0x1ac] sm:$0xf] %vm6821_vm11, %v21208_v16  ;;  %v14853_v45 = vpop.f32.mrf.mxu1  ;;  %v10351_v23 = vpop.permute.xlu1 %10350  ;;  %v21232_v47 = vpack.c.bf16 %v10884_v40, %v10884_v40  ;;  %v10802_v48 = vsel %vm1205_vm6, %v10799_v37, %v10801_v14  ;;  %9791 = vst.msk [vmem:[#allocation5 + $0x1cc] sm:$0xf] %vm6821_vm11, %v14513_v61  ;;  %v15900_v37 = vld [vmem:[#allocation3 + $0x138] sm:$0xff]  ;;  %v10804_v24 = vsel %vm1205_vm6, %v10801_v14, %v10803_v50  ;;  %v22267_v14 = vld [vmem:[#allocation32_spill] sm:$0xff] }
 0x473   : > { %v6326_v42 = vadd.f32 %v15899_v56, %v14852_v21  ;;  %v10349_v29 = vpop.permute.xlu0 %10348  ;;  %10419 = vst.msk [vmem:[#allocation5 + $0x40] sm:$0xf] %vm6990_vm12, %v10351_v23  ;;  %v15678_v43 = vld [vmem:[#allocation5 + $0x4] ss:$20 sps:$4 sm:$0xff]   ;;  %10386 = vrot.lane.b32.xlu1 %v21227_v62, %s15975_s13  ;;  %v14578_v18 = vpack.c.bf16 %v10802_v48, %v10802_v48  ;;  %v14597_v27 = vpack.c.bf16 %v15900_v37, %v15900_v37 }
 0x474   : > { %10418 = vst.msk [vmem:[#allocation5 + $0x2c] sm:$0xf] %vm6990_vm12, %v10349_v29  ;;  %v14854_v26 = vpop.f32.mrf.mxu1  ;;  %10648 = vrot.lane.b32.xlu0 %v20512_v53, %s15975_s13  ;;  %12056 = vmatprep.mubr.bf16.mxu1 %v15678_v43  ;;  %v15738_v21 = vld [vmem:[%s21894_s6 + $0x110] sm:$0xff]   ;;  %v14579_v40 = vpack.c.bf16 %v10804_v24, %v10804_v24 }
 0x475   : > { %11321 = vst.msk [vmem:[#allocation5 + $0x164] sm:$0xf] %vm6821_vm11, %v21232_v47  ;;  %v6455_v38 = vadd.f32 %v21028_v25, %v6326_v42  ;;  %v14855_v44 = vadd.f32 %v14854_v26, %v14853_v45  ;;  %15153 = vmatpush3.bf16.msra.mxu0 %v15699_v55  ;;  %v15706_v25 = vld [vmem:[%s21894_s6 + $0xe0] sm:$0xff]   ;;  %11029 = vst.msk [vmem:[#allocation5 + $0x110] sm:$0xf] %vm6821_vm11, %v14578_v18  ;;  %v15901_v42 = vld [vmem:[#allocation3 + $0x140] sm:$0xff] }
 0x476   : > { %v9875_v53 = vpop.permute.xlu1 %9874  ;;  %15154 = vmatprep.subr.bf16.mxu0 %v15704_v11  ;;  %v15707_v11 = vld [vmem:[%s21894_s6 + $0xa0] sm:$0xff]   ;;  %11030 = vst.msk [vmem:[#allocation5 + $0x124] sm:$0xf] %vm6821_vm11, %v14579_v40  ;;  %v14598_v29 = vpack.c.bf16 %v15901_v42, %v15901_v42  ;;  %v15713_v37 = vld [vmem:[%s21894_s6 + $0xd0] sm:$0xff]   ;;  %11034 = vst.msk [vmem:[#allocation5 + $0x174] sm:$0xf] %vm6821_vm11, %v21227_v62 }
 0x477   : > { %15379 = vmatmul.mubr.msk.bf16.gmra.mxu0 %vm340_vm5, %v20615_v54  ;;  %v6483_v54 = vmax.f32 %v6455_v38, 0.0  ;;  %v6329_v61 = vadd.f32 %v15899_v56, %v14855_v44  ;;  %v14886_v20 = vpop.f32.mrf.mxu0  ;;  %v9873_v55 = vpop.permute.xlu0 %9872  ;;  %12057 = vmatmul.mubr.bf16.vlgmr.msra.gmra.mxu1 %v15676_v2  ;;  %9941 = vst.msk [vmem:[#allocation5 + $0x64] sm:$0xf] %vm6990_vm12, %v9875_v53  ;;  %v15681_v18 = vld [vmem:[#allocation5 + $0x28] ss:$20 sps:$4 sm:$0xff]   ;;  %v21309_v2 = vpack.c.bf16 %v21192_v33, %v21192_v33  ;;  %v15714_v33 = vld [vmem:[%s21894_s6 + $0x90] sm:$0xff]  }
 0x478   : > { %15382 = vmatprep.mubr.msk.bf16.mxu0 %vm340_vm5, %v20691_v60  ;;  %9940 = vst.msk [vmem:[#allocation5 + $0x50] sm:$0xf] %vm6990_vm12, %v9873_v55  ;;  %11128 = vrot.lane.b32.xlu0 %v14597_v27, %s15975_s13  ;;  %v15712_v38 = vld [vmem:[%s21894_s6 + $0x98] sm:$0xff]   ;;  %v15745_v44 = vld [vmem:[%s21894_s6 + $0x108] sm:$0xff]   ;;  %v21315_v53 = vpack.c.bf16 %v21165_v32, %v21165_v32 }
 0x479   : > { %10650 = vrot.lane.b32.xlu1 %v20610_v7, %s15975_s13  ;;  %v6507_v35 = vmul.f32 %v6483_v54, %v22267_v14  ;;  %v6458_v45 = vadd.f32 %v21088_v19, %v6329_v61  ;;  %v14887_v23 = vpop.f32.mrf.mxu0  ;;  %15155 = vmatpush3.bf16.msra.mxu0 %v15705_v39  ;;  %v21289_v7 = vpack.c.bf16 %v21059_v58, %v21059_v58  ;;  %v15711_v19 = vld [vmem:[%s21894_s6 + $0xd8] sm:$0xff]   ;;  %v22268_v58 = vld [vmem:[#allocation31_spill] sm:$0xff]  ;;  %v15718_v61 = vld [vmem:[%s21894_s6 + $0xc8] sm:$0xff]  }
 0x47a   : > { %15399 = vmatpush3.bf16.msra.mxu1 %v20916_v41  ;;  %v21285_v60 = vadd.f32 %v14887_v23, %v14886_v20  ;;  %v10355_v56 = vpop.permute.xlu1 %10354  ;;  %15156 = vmatprep.subr.bf16.mxu0 %v15706_v25  ;;  %10078 = vst.msk [vmem:[#allocation5 + $0x1bc] sm:$0xf] %vm6821_vm11, %v21309_v2  ;;  %10556 = vst.msk [vmem:[#allocation5 + $0x198] sm:$0xf] %vm6821_vm11, %v21315_v53 }
 0x47b   : > { %15400 = vmatprep.subr.bf16.mxu1 %v15738_v21  ;;  %6531 = vst.msk [vmem:[#allocation3 + $0x190] sm:$0xff] %vm340_vm5, %v6507_v35  ;;  %v6484_v41 = vmax.f32 %v6458_v45, 0.0  ;;  %v10353_v43 = vpop.permute.xlu0 %10352  ;;  %v15683_v48 = vld [vmem:[#allocation5 + $0x2c] ss:$20 sps:$4 sm:$0xff]   ;;  %v15752_v35 = vld [vmem:[%s21894_s6 + $0x100] sm:$0xff]  }
 0x47c   : > { %10421 = vst.msk [vmem:[#allocation5 + $0x68] sm:$0xf] %vm6990_vm12, %v10355_v56  ;;  %10420 = vst.msk [vmem:[#allocation5 + $0x54] sm:$0xf] %vm6990_vm12, %v10353_v43  ;;  %9908 = vrot.lane.b32.xlu0 %v21289_v7, %s15975_s13  ;;  %12064 = vmatprep.mubr.bf16.mxu1 %v15683_v48  ;;  %v15719_v56 = vld [vmem:[%s21894_s6 + $0x88] sm:$0xff]  }
 0x47d   : > { %11130 = vrot.lane.b32.xlu1 %v14598_v29, %s15975_s13  ;;  %v6508_v26 = vmul.f32 %v6484_v41, %v22268_v58  ;;  %15157 = vmatpush3.bf16.msra.mxu0 %v15707_v11  ;;  %v10805_v41 = vrot.slane %v21036_v3, 7  ;;  %10555 = vst.msk [vmem:[#allocation5 + $0x184] sm:$0xf] %vm6821_vm11, %v21289_v7 }
 0x47e   : > { %v9879_v39 = vpop.permute.xlu1 %9878  ;;  %15158 = vmatprep.subr.bf16.mxu0 %v15711_v19  ;;  %15401 = vmatpush3.bf16.msra.mxu1 %v15738_v21 }
 0x47f   : > { %15383 = vmatmul.mubr.msk.bf16.gmra.mxu0 %vm340_vm5, %v20837_v6  ;;  %6532 = vst.msk [vmem:[#allocation3 + $0x198] sm:$0xff] %vm340_vm5, %v6508_v26  ;;  %v14974_v27 = vpop.f32.mrf.mxu1  ;;  %v9877_v25 = vpop.permute.xlu0 %9876  ;;  %12065 = vmatmul.mubr.bf16.gmra.mxu1 %v15681_v18  ;;  %v15686_v23 = vld [vmem:[#allocation5 + $0x50] ss:$20 sps:$4 sm:$0xff]  }
 0x480   : > { %9943 = vst.msk [vmem:[#allocation5 + $0x8c] sm:$0xf] %vm6990_vm12, %v9879_v39  ;;  %15386 = vmatprep.mubr.msk.bf16.mxu0 %vm340_vm5, %v20953_v4  ;;  %9942 = vst.msk [vmem:[#allocation5 + $0x78] sm:$0xf] %vm6990_vm12, %v9877_v25  ;;  %v21329_v6 = vpop.f32.mrf.mxu0  ;;  %15402 = vmatprep.subr.bf16.mxu1 %v15745_v44  ;;  %v15721_v39 = vld [vmem:[%s21894_s6 + $0x80] sm:$0xff]  }
 0x481   : > { %9910 = vrot.lane.b32.xlu1 %v21315_v53, %s15975_s13  ;;  %v14975_v32 = vpop.f32.mrf.mxu1  ;;  %15159 = vmatpush3.bf16.msra.mxu0 %v15712_v38 }
 0x482   : > { %v21334_v24 = vadd.f32 %v14975_v32, %v14974_v27  ;;  %v10359_v4 = vpop.permute.xlu1 %10358  ;;  %v10102_v54 = vld [vmem:[#allocation3 + $0x190] sm:$0xff]  ;;  %15160 = vmatprep.subr.bf16.mxu0 %v15713_v37  ;;  %15403 = vmatpush3.bf16.msra.mxu1 %v15745_v44  ;;  %v21346_v45 = vpop.f32.mrf.mxu0  ;;  %v22269_v27 = vrot.slane %v20647_v28, 1 }
 0x483   : > { %v10357_v20 = vpop.permute.xlu0 %10356  ;;  %10423 = vst.msk [vmem:[#allocation5 + $0x90] sm:$0xf] %vm6990_vm12, %v10359_v4  ;;  %v15688_v21 = vld [vmem:[#allocation5 + $0x54] ss:$20 sps:$4 sm:$0xff]   ;;  %v10171_v55 = vrot.slane %v10102_v54, 7  ;;  %v21340_v40 = vpack.c.bf16 %v10102_v54, %v10102_v54  ;;  %v10885_v14 = vrot.slane %v10102_v54, 1  ;;  %15404 = vmatprep.subr.bf16.mxu1 %v15752_v35  ;;  %v21385_v38 = vpop.f32.mrf.mxu1 }
 0x484   : > { %10422 = vst.msk [vmem:[#allocation5 + $0x7c] sm:$0xf] %vm6990_vm12, %v10357_v20  ;;  %12071 = vmatprep.mubr.bf16.mxu1 %v15688_v21  ;;  %v10807_v4 = vrot.slane %v21067_v17, 7  ;;  %v10806_v21 = vsel %vm1205_vm6, %v10803_v50, %v10805_v41  ;;  %v15902_v50 = vld [vmem:[#allocation3 + $0x148] sm:$0xff] }
 0x485   : > { %v10172_v11 = vsel %vm1205_vm6, %v10169_v31, %v10171_v55  ;;  %15161 = vmatpush3.bf16.msra.mxu0 %v15714_v33  ;;  %10558 = vst.msk [vmem:[#allocation5 + $0x1c0] sm:$0xf] %vm6821_vm11, %v21340_v40  ;;  %v15720_v31 = vld [vmem:[%s21894_s6 + $0xc0] sm:$0xff]   ;;  %v10886_v43 = vsel %vm1278_vm4, %v10883_v59, %v10885_v14  ;;  %v15695_v59 = vld [vmem:[#allocation5 + $0x178] ss:$20 sps:$4 sm:$0xff]   ;;  %v14580_v10 = vpack.c.bf16 %v10806_v21, %v10806_v21 }
 0x486   : > { %v9883_v42 = vpop.permute.xlu1 %9882  ;;  %v21358_v29 = vpack.c.bf16 %v10172_v11, %v10172_v11  ;;  %v21360_v19 = vld [vmem:[#allocation3 + $0x198] sm:$0xff]  ;;  %15162 = vmatprep.subr.bf16.mxu0 %v15718_v61  ;;  %v21373_v26 = vpack.c.bf16 %v10886_v43, %v10886_v43  ;;  %15405 = vmatpush3.bf16.msra.mxu1 %v15752_v35  ;;  %v14599_v35 = vpack.c.bf16 %v15902_v50, %v15902_v50  ;;  %v15906_v50 = vld [vmem:[#allocation3 + $0x168] sm:$0xff] }
 0x487   : > { %15387 = vmatmul.mubr.msk.bf16.gmra.mxu0 %vm340_vm5, %v21077_v15  ;;  %v9881_v58 = vpop.permute.xlu0 %9880  ;;  %9945 = vst.msk [vmem:[#allocation5 + $0xb4] sm:$0xf] %vm6990_vm12, %v9883_v42  ;;  %12072 = vmatmul.mubr.bf16.gmra.mxu1 %v15686_v23  ;;  %v10173_v15 = vrot.slane %v21360_v19, 7  ;;  %v21376_v18 = vrot.slane %v21360_v19, 1  ;;  %v21380_v22 = vpack.c.bf16 %v21360_v19, %v21360_v19 }
 0x488   : > { %15390 = vmatprep.mubr.msk.bf16.mxu0 %vm340_vm5, %v21202_v13  ;;  %9944 = vst.msk [vmem:[#allocation5 + $0xa0] sm:$0xf] %vm6990_vm12, %v9881_v58  ;;  %10388 = vrot.lane.b32.xlu0 %v21358_v29, %s15975_s13 }
 0x489   : > { %v14892_v48 = vpop.f32.mrf.mxu0  ;;  %v10174_v44 = vsel %vm1205_vm6, %v10171_v55, %v10173_v15  ;;  %15163 = vmatpush3.bf16.msra.mxu0 %v15719_v56  ;;  %11322 = vst.msk [vmem:[#allocation5 + $0x178] sm:$0xf] %vm6821_vm11, %v21373_v26  ;;  %v10888_v37 = vsel %vm1278_vm4, %v10885_v14, %v21376_v18  ;;  %v10890_v25 = vsel %vm1278_vm4, %v21376_v18, %v22269_v27  ;;  %10559 = vst.msk [vmem:[#allocation5 + $0x1d4] sm:$0xf] %vm6821_vm11, %v21380_v22  ;;  %v21422_v55 = vpop.f32.mrf.mxu1  ;;  %v15691_v14 = vld [vmem:[#allocation5 + $0x78] ss:$20 sps:$4 sm:$0xff]  }
 0x48a   : > { %v10363_v32 = vpop.permute.xlu1 %10362  ;;  %v21403_v33 = vpack.c.bf16 %v10174_v44, %v10174_v44  ;;  %15164 = vmatprep.subr.bf16.mxu0 %v15720_v31  ;;  %v21406_v54 = vpack.c.bf16 %v10888_v37, %v10888_v37  ;;  %v14633_v61 = vpack.c.bf16 %v10890_v25, %v10890_v25  ;;  %11031 = vst.msk [vmem:[#allocation5 + $0x138] sm:$0xf] %vm6821_vm11, %v14580_v10  ;;  %v15903_v31 = vld [vmem:[#allocation3 + $0x150] sm:$0xff]  ;;  %11035 = vst.msk [vmem:[#allocation5 + $0x188] sm:$0xf] %vm6821_vm11, %v21358_v29 }
 0x48b   : > { %v14893_v13 = vpop.f32.mrf.mxu0  ;;  %v10361_v28 = vpop.permute.xlu0 %10360  ;;  %10425 = vst.msk [vmem:[#allocation5 + $0xb8] sm:$0xf] %vm6990_vm12, %v10363_v32  ;;  %v15693_v20 = vld [vmem:[#allocation5 + $0x7c] ss:$20 sps:$4 sm:$0xff]   ;;  %v14600_v43 = vpack.c.bf16 %v15903_v31, %v15903_v31  ;;  %v15905_v32 = vld [vmem:[#allocation3 + $0x160] sm:$0xff]  ;;  %v14604_v31 = vpack.c.bf16 %v21036_v3, %v21036_v3 }
 0x48c   : > { %10424 = vst.msk [vmem:[#allocation5 + $0xa4] sm:$0xf] %vm6990_vm12, %v10361_v28  ;;  %10652 = vrot.lane.b32.xlu0 %v20617_v36, %s15975_s13  ;;  %10390 = vrot.lane.b32.xlu1 %v21403_v33, %s15975_s13  ;;  %v10808_v36 = vsel %vm1205_vm6, %v10805_v41, %v10807_v4  ;;  %v15904_v13 = vld [vmem:[#allocation3 + $0x158] sm:$0xff] }
 0x48d   : > { %11323 = vst.msk [vmem:[#allocation5 + $0x18c] sm:$0xf] %vm6821_vm11, %v21406_v54  ;;  %11324 = vst.msk [vmem:[#allocation5 + $0x1a0] sm:$0xf] %vm6821_vm11, %v14633_v61  ;;  %12078 = vmatprep.mubr.bf16.mxu1 %v15693_v20  ;;  %15165 = vmatpush3.bf16.msra.mxu0 %v15721_v39  ;;  %v14581_v56 = vpack.c.bf16 %v10808_v36, %v10808_v36  ;;  %v21438_v42 = vpop.f32.mrf.mxu0  ;;  %v14601_v44 = vpack.c.bf16 %v15904_v13, %v15904_v13 }
 0x48e   : > { %v9887_v63 = vpop.permute.xlu1 %9886  ;;  %v14602_v61 = vpack.c.bf16 %v15905_v32, %v15905_v32  ;;  %11036 = vst.msk [vmem:[#allocation5 + $0x19c] sm:$0xf] %vm6821_vm11, %v21403_v33 }
 0x48f   : > { %15391 = vmatmul.mubr.msk.bf16.gmra.mxu0 %vm340_vm5, %v15695_v59  ;;  %v14980_v23 = vpop.f32.mrf.mxu1  ;;  %v9885_v11 = vpop.permute.xlu0 %9884  ;;  %9947 = vst.msk [vmem:[#allocation5 + $0xdc] sm:$0xf] %vm6990_vm12, %v9887_v63  ;;  %12079 = vmatmul.mubr.bf16.gmra.mxu1 %v15691_v14  ;;  %v15700_v58 = vld [vmem:[#allocation5 + $0xa0] ss:$20 sps:$4 sm:$0xff]  }
 0x490   : > { %15394 = vmatprep.mubr.msk.bf16.mxu0 %vm340_vm5, %v20742_v52  ;;  %9946 = vst.msk [vmem:[#allocation5 + $0xc8] sm:$0xf] %vm6990_vm12, %v9885_v11  ;;  %11132 = vrot.lane.b32.xlu0 %v14599_v35, %s15975_s13  ;;  %v14603_v35 = vpack.c.bf16 %v15906_v50, %v15906_v50 }
 0x491   : > { %10654 = vrot.lane.b32.xlu1 %v20681_v34, %s15975_s13  ;;  %v14981_v41 = vpop.f32.mrf.mxu1  ;;  %11032 = vst.msk [vmem:[#allocation5 + $0x14c] sm:$0xf] %vm6821_vm11, %v14581_v56  ;;  %v21446_v34 = vpop.f32.mrf.mxu0 }
 0x492   : > { %v10367_v7 = vpop.permute.xlu1 %10366 }
 0x493   : > { %v10365_v48 = vpop.permute.xlu0 %10364  ;;  %10427 = vst.msk [vmem:[#allocation5 + $0xe0] sm:$0xf] %vm6990_vm12, %v10367_v7  ;;  %v15702_v52 = vld [vmem:[#allocation5 + $0xa4] ss:$20 sps:$4 sm:$0xff]  }
 0x494   : > { %10426 = vst.msk [vmem:[#allocation5 + $0xcc] sm:$0xf] %vm6990_vm12, %v10365_v48  ;;  %10656 = vrot.lane.b32.xlu0 %v20718_v5, %s15975_s13  ;;  %12086 = vmatprep.mubr.bf16.mxu1 %v15702_v52  ;;  %v21455_v5 = vpop.f32.mrf.mxu1 }
 0x495   : > { %11134 = vrot.lane.b32.xlu1 %v14600_v43, %s15975_s13 }
 0x496   : > { %v9891_v59 = vpop.permute.xlu1 %9890 }
 0x497   : > { %15395 = vmatmul.mubr.msk.bf16.gmra.mxu0 %vm340_vm5, %v20775_v9  ;;  %v9889_v39 = vpop.permute.xlu0 %9888  ;;  %9949 = vst.msk [vmem:[#allocation5 + $0x104] sm:$0xf] %vm6990_vm12, %v9891_v59  ;;  %12087 = vmatmul.mubr.bf16.gmra.mxu1 %v15700_v58  ;;  %v15708_v14 = vld [vmem:[#allocation5 + $0xc8] ss:$20 sps:$4 sm:$0xff]   ;;  %v14605_v58 = vpack.c.bf16 %v21067_v17, %v21067_v17 }
 0x498   : > { %v14898_v37 = vpop.f32.mrf.mxu0  ;;  %9948 = vst.msk [vmem:[#allocation5 + $0xf0] sm:$0xf] %vm6990_vm12, %v9889_v39  ;;  %11136 = vrot.lane.b32.xlu0 %v14601_v44, %s15975_s13 }
 0x499   : > { %10658 = vrot.lane.b32.xlu1 %v20883_v1, %s15975_s13  ;;  %v21464_v1 = vpop.f32.mrf.mxu1 }
 0x49a   : > { %v14899_v27 = vpop.f32.mrf.mxu0  ;;  %v10371_v9 = vpop.permute.xlu1 %10370  ;;  %v14985_v19 = vadd.f32 %v21464_v1, %v21455_v5 }
 0x49b   : > { %v21457_v25 = vadd.f32 %v14899_v27, %v14898_v37  ;;  %v10369_v28 = vpop.permute.xlu0 %10368  ;;  %10429 = vst.msk [vmem:[#allocation5 + $0x108] sm:$0xf] %vm6990_vm12, %v10371_v9  ;;  %v15710_v21 = vld [vmem:[#allocation5 + $0xcc] ss:$20 sps:$4 sm:$0xff]  }
 0x49c   : > { %v14901_v20 = vpop.f32.mrf.mxu0  ;;  %10428 = vst.msk [vmem:[#allocation5 + $0xf4] sm:$0xf] %vm6990_vm12, %v10369_v28  ;;  %10660 = vrot.lane.b32.xlu0 %v20877_v30, %s15975_s13  ;;  %12093 = vmatprep.mubr.bf16.mxu1 %v15710_v21  ;;  %v10810_v30 = vsel %vm1205_vm6, %v10807_v4, %v21170_v46  ;;  %v22270_v46 = vld [vmem:[#allocation42_spill] sm:$0xff]  ;;  %v14897_v28 = vadd.f32 %v21446_v34, %v21438_v42 }
 0x49d   : > { %11138 = vrot.lane.b32.xlu1 %v14602_v61, %s15975_s13  ;;  %v14582_v56 = vpack.c.bf16 %v10810_v30, %v10810_v30  ;;  %v14891_v42 = vadd.f32 %v21346_v45, %v21329_v6 }
 0x49e   : > { %v14902_v10 = vpop.f32.mrf.mxu0  ;;  %v10635_v63 = vpop.permute.xlu1 %10634 }
 0x49f   : > { %v10633_v36 = vpop.permute.xlu0 %10632  ;;  %v14986_v23 = vpop.f32.mrf.mxu1  ;;  %10705 = vst.msk [vmem:[#allocation5 + $0x1c] sm:$0xf] %vm6990_vm12, %v10635_v63  ;;  %12094 = vmatmul.mubr.bf16.gmra.mxu1 %v15708_v14  ;;  %v15715_v4 = vld [vmem:[#allocation5 + $0xf0] ss:$20 sps:$4 sm:$0xff]  }
 0x4a0   : > { %10704 = vst.msk [vmem:[#allocation5 + $0x8] sm:$0xf] %vm6990_vm12, %v10633_v36  ;;  %11140 = vrot.lane.b32.xlu0 %v14603_v35, %s15975_s13 }
 0x4a1   : > { %10662 = vrot.lane.b32.xlu1 %v20964_v0, %s15975_s13  ;;  %v14987_v11 = vpop.f32.mrf.mxu1  ;;  %11033 = vst.msk [vmem:[#allocation5 + $0x160] sm:$0xf] %vm6821_vm11, %v14582_v56 }
 0x4a2   : > { %v21475_v41 = vadd.f32 %v14987_v11, %v14986_v23  ;;  %v11115_v7 = vpop.permute.xlu1 %11114 }
 0x4a3   : > { %v11113_v43 = vpop.permute.xlu0 %11112  ;;  %v14989_v48 = vpop.f32.mrf.mxu1  ;;  %11185 = vst.msk [vmem:[#allocation5 + $0x20] sm:$0xf] %vm6990_vm12, %v11115_v7  ;;  %v15717_v0 = vld [vmem:[#allocation5 + $0xf4] ss:$20 sps:$4 sm:$0xff]  }
 0x4a4   : > { %11184 = vst.msk [vmem:[#allocation5 + $0xc] sm:$0xf] %vm6990_vm12, %v11113_v43  ;;  %10664 = vrot.lane.b32.xlu0 %v22270_v46, %s15975_s13  ;;  %12100 = vmatprep.mubr.bf16.mxu1 %v15717_v0 }
 0x4a5   : > { %11142 = vrot.lane.b32.xlu1 %v14604_v31, %s15975_s13  ;;  %v14990_v3 = vpop.f32.mrf.mxu1 }
 0x4a6   : > { %v9895_v52 = vpop.permute.xlu1 %9894 }
 0x4a7   : > { %v9893_v59 = vpop.permute.xlu0 %9892  ;;  %9951 = vst.msk [vmem:[#allocation5 + $0x12c] sm:$0xf] %vm6990_vm12, %v9895_v52  ;;  %12101 = vmatmul.mubr.bf16.gmra.mxu1 %v15715_v4  ;;  %v15722_v27 = vld [vmem:[#allocation5 + $0x8] ss:$20 sps:$4 sm:$0xff]  }
 0x4a8   : > { %v14904_v13 = vpop.f32.mrf.mxu0  ;;  %9950 = vst.msk [vmem:[#allocation5 + $0x118] sm:$0xf] %vm6990_vm12, %v9893_v59  ;;  %11144 = vrot.lane.b32.xlu0 %v14605_v58, %s15975_s13 }
 0x4a9   : > { %10666 = vrot.lane.b32.xlu1 %v21057_v51, %s15975_s13  ;;  %v21507_v51 = vld [vmem:[%s21895_s7] ss:$0 sm:$0xff] }
 0x4aa   : > { %v14905_v62 = vpop.f32.mrf.mxu0  ;;  %v10375_v39 = vpop.permute.xlu1 %10374  ;;  %v9120_v21 = vadd.f32 %v21285_v60, %v21507_v51 }
 0x4ab   : > { %v14906_v44 = vadd.f32 %v14905_v62, %v14904_v13  ;;  %v10373_v37 = vpop.permute.xlu0 %10372  ;;  %10431 = vst.msk [vmem:[#allocation5 + $0x130] sm:$0xf] %vm6990_vm12, %v10375_v39  ;;  %v15724_v9 = vld [vmem:[#allocation5 + $0xc] ss:$20 sps:$4 sm:$0xff]  }
 0x4ac   : > { %v14907_v17 = vpop.f32.mrf.mxu0  ;;  %10430 = vst.msk [vmem:[#allocation5 + $0x11c] sm:$0xf] %vm6990_vm12, %v10373_v37  ;;  %10668 = vrot.lane.b32.xlu0 %v21092_v12, %s15975_s13  ;;  %12177 = vmatprep.mubr.bf16.mxu0 %v15724_v9  ;;  %v21532_v60 = vadd.f32 %v21334_v24, %v9120_v21  ;;  %v9123_v24 = vadd.f32 %v14891_v42, %v21507_v51 }
 0x4ad   : > { %11146 = vrot.lane.b32.xlu1 %v21315_v53, %s15975_s13  ;;  %12178 = vmatmul.mubr.bf16.vlgmr.msra.gmra.mxu0 %v15722_v27  ;;  %v10818_v53 = vsel %vm1205_vm6, %v10173_v15, %v10817_v57  ;;  %v9142_v63 = vadd.f32 %v14906_v44, %v21507_v51 }
 0x4ae   : > { %v14908_v29 = vpop.f32.mrf.mxu0  ;;  %v10639_v61 = vpop.permute.xlu1 %10638  ;;  %v14586_v33 = vpack.c.bf16 %v10818_v53, %v10818_v53 }
 0x4af   : > { %v14909_v32 = vadd.f32 %v14908_v29, %v14907_v17  ;;  %v10637_v12 = vpop.permute.xlu0 %10636  ;;  %v14992_v20 = vpop.f32.mrf.mxu1  ;;  %10707 = vst.msk [vmem:[#allocation5 + $0x44] sm:$0xf] %vm6990_vm12, %v10639_v61  ;;  %v15725_v6 = vld [vmem:[#allocation5 + $0x118] ss:$20 sps:$4 sm:$0xff]  }
 0x4b0   : > { %10706 = vst.msk [vmem:[#allocation5 + $0x30] sm:$0xf] %vm6990_vm12, %v10637_v12  ;;  %11148 = vrot.lane.b32.xlu0 %v21208_v16, %s15975_s13  ;;  %v14979_v16 = vadd.f32 %v21422_v55, %v21385_v38 }
 0x4b1   : > { %10670 = vrot.lane.b32.xlu1 %v21309_v2, %s15975_s13  ;;  %v14993_v34 = vpop.f32.mrf.mxu1  ;;  %11037 = vst.msk [vmem:[#allocation5 + $0x1b0] sm:$0xf] %vm6821_vm11, %v14586_v33  ;;  %v9130_v2 = vadd.f32 %v14897_v28, %v21507_v51  ;;  %v9145_v56 = vadd.f32 %v14909_v32, %v21507_v51 }
 0x4b2   : > { %v14994_v57 = vadd.f32 %v14993_v34, %v14992_v20  ;;  %v11119_v15 = vpop.permute.xlu1 %11118  ;;  %v21548_v36 = vadd.f32 %v14979_v16, %v9123_v24 }
 0x4b3   : > { %v11117_v10 = vpop.permute.xlu0 %11116  ;;  %v14995_v14 = vpop.f32.mrf.mxu1  ;;  %11187 = vst.msk [vmem:[#allocation5 + $0x48] sm:$0xf] %vm6990_vm12, %v11119_v15  ;;  %v15727_v45 = vld [vmem:[#allocation5 + $0x11c] ss:$20 sps:$4 sm:$0xff]   ;;  %v21544_v38 = vadd.f32 %v14985_v19, %v9130_v2 }
 0x4b4   : > { %11186 = vst.msk [vmem:[#allocation5 + $0x34] sm:$0xf] %vm6990_vm12, %v11117_v10  ;;  %10672 = vrot.lane.b32.xlu0 %v21232_v47, %s15975_s13  ;;  %12108 = vmatprep.mubr.bf16.mxu1 %v15727_v45  ;;  %v14610_v47 = vpack.c.bf16 %v21136_v8, %v21136_v8  ;;  %v21559_v30 = vadd.f32 %v14994_v57, %v9142_v63 }
 0x4b5   : > { %11150 = vrot.lane.b32.xlu1 %v21340_v40, %s15975_s13  ;;  %v14996_v5 = vpop.f32.mrf.mxu1  ;;  %12109 = vmatmul.mubr.bf16.gmra.mxu1 %v15725_v6  ;;  %v9135_v40 = vadd.f32 %v21457_v25, %v21507_v51  ;;  %v14611_v25 = vpack.c.bf16 %v21127_v49, %v21127_v49 }
 0x4b6   : > { %v14997_v55 = vadd.f32 %v14996_v5, %v14995_v14  ;;  %v9899_v1 = vpop.permute.xlu1 %9898 }
 0x4b7   : > { %v9897_v50 = vpop.permute.xlu0 %9896  ;;  %9953 = vst.msk [vmem:[#allocation5 + $0x154] sm:$0xf] %vm6990_vm12, %v9899_v1  ;;  %v21566_v8 = vadd.f32 %v21475_v41, %v9135_v40 }
 0x4b8   : > { %v14910_v35 = vpop.f32.mrf.mxu0  ;;  %9952 = vst.msk [vmem:[#allocation5 + $0x140] sm:$0xf] %vm6990_vm12, %v9897_v50  ;;  %11152 = vrot.lane.b32.xlu0 %v21380_v22, %s15975_s13  ;;  %v15729_v22 = vld [vmem:[#allocation5 + $0x30] ss:$20 sps:$4 sm:$0xff]   ;;  %v21574_v0 = vadd.f32 %v14997_v55, %v9145_v56 }
 0x4b9   : > { %10674 = vrot.lane.b32.xlu1 %v21373_v26, %s15975_s13  ;;  %v10271_v26 = vsel %vm1278_vm4, %v21376_v18, 0.0 }
 0x4ba   : > { %v14911_v23 = vpop.f32.mrf.mxu0  ;;  %v10379_v11 = vpop.permute.xlu1 %10378  ;;  %v14564_v18 = vpack.c.bf16 %v10271_v26, %v10271_v26 }
 0x4bb   : > { %v10377_v7 = vpop.permute.xlu0 %10376  ;;  %10433 = vst.msk [vmem:[#allocation5 + $0x158] sm:$0xf] %vm6990_vm12, %v10379_v11  ;;  %v15731_v43 = vld [vmem:[#allocation5 + $0x34] ss:$20 sps:$4 sm:$0xff]  }
 0x4bc   : > { %v14913_v31 = vpop.f32.mrf.mxu0  ;;  %10432 = vst.msk [vmem:[#allocation5 + $0x144] sm:$0xf] %vm6990_vm12, %v10377_v7  ;;  %10676 = vrot.lane.b32.xlu0 %v21406_v54, %s15975_s13  ;;  %12185 = vmatprep.mubr.bf16.mxu0 %v15731_v43  ;;  %v15907_v54 = vld [vmem:[#allocation3 + $0x1b0] sm:$0xff] }
 0x4bd   : > { %11154 = vrot.lane.b32.xlu1 %v14610_v47, %s15975_s13  ;;  %12186 = vmatmul.mubr.bf16.gmra.mxu0 %v15729_v22  ;;  %v14612_v49 = vpack.c.bf16 %v15907_v54, %v15907_v54 }
 0x4be   : > { %v14914_v48 = vpop.f32.mrf.mxu0  ;;  %v10643_v3 = vpop.permute.xlu1 %10642 }
 0x4bf   : > { %v14915_v46 = vadd.f32 %v14914_v48, %v14913_v31  ;;  %v10641_v41 = vpop.permute.xlu0 %10640  ;;  %v14998_v4 = vpop.f32.mrf.mxu1  ;;  %10709 = vst.msk [vmem:[#allocation5 + $0x6c] sm:$0xf] %vm6990_vm12, %v10643_v3  ;;  %v15732_v62 = vld [vmem:[#allocation5 + $0x140] ss:$20 sps:$4 sm:$0xff]  }
 0x4c0   : > { %10708 = vst.msk [vmem:[#allocation5 + $0x58] sm:$0xf] %vm6990_vm12, %v10641_v41  ;;  %11156 = vrot.lane.b32.xlu0 %v14611_v25, %s15975_s13 }
 0x4c1   : > { %10678 = vrot.lane.b32.xlu1 %v14564_v18, %s15975_s13  ;;  %v14999_v52 = vpop.f32.mrf.mxu1  ;;  %v9152_v37 = vadd.f32 %v14915_v46, %v21507_v51 }
 0x4c2   : > { %v11123_v58 = vpop.permute.xlu1 %11122 }
 0x4c3   : > { %v11121_v59 = vpop.permute.xlu0 %11120  ;;  %v15001_v13 = vpop.f32.mrf.mxu1  ;;  %11189 = vst.msk [vmem:[#allocation5 + $0x70] sm:$0xf] %vm6990_vm12, %v11123_v58  ;;  %v15734_v44 = vld [vmem:[#allocation5 + $0x144] ss:$20 sps:$4 sm:$0xff]  }
 0x4c4   : > { %11188 = vst.msk [vmem:[#allocation5 + $0x5c] sm:$0xf] %vm6990_vm12, %v11121_v59  ;;  %12115 = vmatprep.mubr.bf16.mxu1 %v15734_v44 }
 0x4c5   : > { %11158 = vrot.lane.b32.xlu1 %v14612_v49, %s15975_s13  ;;  %v15002_v39 = vpop.f32.mrf.mxu1  ;;  %12116 = vmatmul.mubr.bf16.gmra.mxu1 %v15732_v62  ;;  %s296_s13 = sand.u32 1, %s15961_s28  }
 0x4c6   : > { %v15003_v17 = vadd.f32 %v15002_v39, %v15001_v13  ;;  %v9903_v27 = vpop.permute.xlu1 %9902  ;;  %s12499_s10 = sshll.u32 %s296_s13, 8  ;;  %s21848_s25 = scalar_lea.sflag [#allocation7], %s296_s13 }
 0x4c7   : > { %v9901_v9 = vpop.permute.xlu0 %9900  ;;  %9955 = vst.msk [vmem:[#allocation5 + $0x17c] sm:$0xf] %vm6990_vm12, %v9903_v27  ;;  %v15735_v53 = vld [vmem:[#allocation5 + $0x58] ss:$20 sps:$4 sm:$0xff]   ;;  %s21696_s12 = scalar_lea.vmem [#allocation6], %s12499_s10  ;;  %s15915_s10 = scalar_lea.vmem %s15914_s26, 8192 }
 0x4c8   : > { %v14916_v29 = vpop.f32.mrf.mxu0  ;;  %9954 = vst.msk [vmem:[#allocation5 + $0x168] sm:$0xf] %vm6990_vm12, %v9901_v9  ;;  %v21586_v32 = vadd.f32 %v15003_v17, %v9152_v37  ;;  %s12433_s19 = sshll.u32 %s21696_s12, 4  ;;  %s21843_s19 = int_to_ptr.vmem [resolvable:$true] %s12433_s19 }
 0x4c9   : > { %s15909_s9 = scalar_lea.vmem %s21843_s19, 4096  ;;  %p15916_p0 = scmp.lt.s32.totalorder %s21843_s19, %s15914_s26 }
 0x4ca   : > { %v14917_v61 = vpop.f32.mrf.mxu0  ;;  %p15910_p11 = scmp.ne.s32.totalorder %s21843_s19, %s15909_s9  ;;  %p15917_p1 = scmp.lt.s32.totalorder %s15915_s10, %s15909_s9 }
 0x4cb   : > { %v14918_v28 = vadd.f32 %v14917_v61, %v14916_v29  ;;  %v10381_v12 = vpop.permute.xlu0 %10380  ;;  %v15737_v21 = vld [vmem:[#allocation5 + $0x5c] ss:$20 sps:$4 sm:$0xff]  }
 0x4cc   : > { %v14919_v20 = vpop.f32.mrf.mxu0  ;;  %10434 = vst.msk [vmem:[#allocation5 + $0x16c] sm:$0xf] %vm6990_vm12, %v10381_v12  ;;  %12192 = vmatprep.mubr.bf16.mxu0 %v15737_v21  ;;  %p15911_p12 = pnand %p15910_p11, %p16063_p5  ;;  %p15918_p2 = por %p15917_p1, %p15916_p0 }
 0x4cd   : > { %12193 = vmatmul.mubr.bf16.gmra.mxu0 %v15735_v53  ;;  %v9157_v15 = vadd.f32 %v14918_v28, %v21507_v51 }
 0x4ce   : > { %v14920_v33 = vpop.f32.mrf.mxu0  ;;  %v10383_v42 = vpop.permute.xlu1 %10382  ;;  %p15912_p13 = pneg %p15911_p12 }
 0x4cf   : > { %v10645_v19 = vpop.permute.xlu0 %10644  ;;  %10435 = vst.msk [vmem:[#allocation5 + $0x180] sm:$0xf] %vm6990_vm12, %v10383_v42  ;;  %v15739_v5 = vld [vmem:[#allocation5 + $0x168] ss:$20 sps:$4 sm:$0xff]  }
 0x4d0   : > { %v15004_v34 = vpop.f32.mrf.mxu1  ;;  %10710 = vst.msk [vmem:[#allocation5 + $0x80] sm:$0xf] %vm6990_vm12, %v10645_v19  ;;  %p15919_p3 = pnand %p15918_p2, %p15912_p13 }
 0x4d2   : > { %v15005_v57 = vpop.f32.mrf.mxu1  ;;  %v10647_v2 = vpop.permute.xlu1 %10646 }
 0x4d3   : > { %v15006_v16 = vadd.f32 %v15005_v57, %v15004_v34  ;;  %v11125_v10 = vpop.permute.xlu0 %11124  ;;  %10711 = vst.msk [vmem:[#allocation5 + $0x94] sm:$0xf] %vm6990_vm12, %v10647_v2 }
 0x4d4   : > { %v15007_v14 = vpop.f32.mrf.mxu1  ;;  %11190 = vst.msk [vmem:[#allocation5 + $0x84] sm:$0xf] %vm6990_vm12, %v11125_v10 }
 0x4d5   : > { %v21594_v6 = vadd.f32 %v15006_v16, %v9157_v15 }
 0x4d6   : > { %v15008_v45 = vpop.f32.mrf.mxu1  ;;  %v11127_v24 = vpop.permute.xlu1 %11126  ;;  %v15741_v55 = vld [vmem:[#allocation5 + $0x16c] ss:$20 sps:$4 sm:$0xff]  }
 0x4d7   : > { %v9905_v1 = vpop.permute.xlu0 %9904  ;;  %11191 = vst.msk [vmem:[#allocation5 + $0x98] sm:$0xf] %vm6990_vm12, %v11127_v24  ;;  %v14922_v63 = vpop.f32.mrf.mxu0  ;;  %12122 = vmatprep.mubr.bf16.mxu1 %v15741_v55 }
 0x4d8   : > { %9956 = vst.msk [vmem:[#allocation5 + $0x190] sm:$0xf] %vm6990_vm12, %v9905_v1  ;;  %12123 = vmatmul.mubr.bf16.gmra.mxu1 %v15739_v5 }
 0x4d9   : > { %v14923_v50 = vpop.f32.mrf.mxu0 }
 0x4da   : > { %v14924_v35 = vadd.f32 %v14923_v50, %v14922_v63  ;;  %v9907_v47 = vpop.permute.xlu1 %9906  ;;  %v15742_v7 = vld [vmem:[#allocation5 + $0x80] ss:$20 sps:$4 sm:$0xff]  }
 0x4db   : > { %9957 = vst.msk [vmem:[#allocation5 + $0x1a4] sm:$0xf] %vm6990_vm12, %v9907_v47  ;;  %v14925_v40 = vpop.f32.mrf.mxu0 }
 0x4dc   : > { %v9164_v43 = vadd.f32 %v14924_v35, %v21507_v51 }
 0x4dd   : > { %v14926_v23 = vpop.f32.mrf.mxu0 }
 0x4de   : > { %v14927_v11 = vadd.f32 %v14926_v23, %v14925_v40  ;;  %v15010_v56 = vpop.f32.mrf.mxu1  ;;  %v15744_v31 = vld [vmem:[#allocation5 + $0x84] ss:$20 sps:$4 sm:$0xff]  }
 0x4df   : > { %12199 = vmatprep.mubr.bf16.mxu0 %v15744_v31 }
 0x4e0   : > { %v15011_v22 = vpop.f32.mrf.mxu1  ;;  %12200 = vmatmul.mubr.bf16.gmra.mxu0 %v15742_v7  ;;  %v9167_v18 = vadd.f32 %v14927_v11, %v21507_v51 }
 0x4e1   : > { %v15012_v26 = vadd.f32 %v15011_v22, %v15010_v56  ;;  %v15756_v22 = vld [vmem:[#allocation5 + $0x10] ss:$20 sps:$4 sm:$0xff]  }
 0x4e2   : > { %v10385_v25 = vpop.permute.xlu0 %10384  ;;  %v15013_v48 = vpop.f32.mrf.mxu1  ;;  %v15746_v27 = vld [vmem:[#allocation5 + $0x190] ss:$20 sps:$4 sm:$0xff]  }
 0x4e3   : > { %10436 = vst.msk [vmem:[#allocation5 + $0x194] sm:$0xf] %vm6990_vm12, %v10385_v25  ;;  %v21601_v46 = vadd.f32 %v15012_v26, %v9164_v43 }
 0x4e4   : > { %v15014_v3 = vpop.f32.mrf.mxu1 }
 0x4e5   : > { %v15015_v41 = vadd.f32 %v15014_v3, %v15013_v48  ;;  %v10387_v54 = vpop.permute.xlu1 %10386 }
 0x4e6   : > { %v10649_v4 = vpop.permute.xlu0 %10648  ;;  %10437 = vst.msk [vmem:[#allocation5 + $0x1a8] sm:$0xf] %vm6990_vm12, %v10387_v54  ;;  %v15760_v54 = vld [vmem:[#allocation5 + $0x38] ss:$20 sps:$4 sm:$0xff]  }
 0x4e7   : > { %10712 = vst.msk [vmem:[#allocation5 + $0xa8] sm:$0xf] %vm6990_vm12, %v10649_v4  ;;  %v21606_v52 = vadd.f32 %v15015_v41, %v9167_v18 }
 0x4e9   : > { %v14928_v49 = vpop.f32.mrf.mxu0 }
 0x4ea   : > { %v11129_v59 = vpop.permute.xlu0 %11128 }
 0x4eb   : > { %v14929_v58 = vpop.f32.mrf.mxu0  ;;  %v10651_v13 = vpop.permute.xlu1 %10650  ;;  %11192 = vst.msk [vmem:[#allocation5 + $0xac] sm:$0xf] %vm6990_vm12, %v11129_v59 }
 0x4ec   : > { %10713 = vst.msk [vmem:[#allocation5 + $0xbc] sm:$0xf] %vm6990_vm12, %v10651_v13  ;;  %v15761_v58 = vld [vmem:[#allocation5 + $0x60] ss:$20 sps:$4 sm:$0xff]  }
 0x4ed   : > { %v14931_v62 = vpop.f32.mrf.mxu0  ;;  %v15748_v9 = vld [vmem:[#allocation5 + $0x194] ss:$20 sps:$4 sm:$0xff]  }
 0x4ee   : > { %v9909_v37 = vpop.permute.xlu0 %9908  ;;  %v15016_v17 = vpop.f32.mrf.mxu1  ;;  %12130 = vmatprep.mubr.bf16.mxu1 %v15748_v9 }
 0x4ef   : > { %v14932_v44 = vpop.f32.mrf.mxu0  ;;  %9958 = vst.msk [vmem:[#allocation5 + $0x1b8] sm:$0xf] %vm6990_vm12, %v9909_v37  ;;  %v11131_v29 = vpop.permute.xlu1 %11130  ;;  %12131 = vmatmul.mubr.bf16.gmra.mxu1 %v15746_v27 }
 0x4f0   : > { %v14933_v39 = vadd.f32 %v14932_v44, %v14931_v62  ;;  %11193 = vst.msk [vmem:[#allocation5 + $0xc0] sm:$0xf] %vm6990_vm12, %v11131_v29  ;;  %v15017_v61 = vpop.f32.mrf.mxu1 }
 0x4f1   : > { %v15765_v61 = vld [vmem:[#allocation5 + $0x88] ss:$20 sps:$4 sm:$0xff]  }
 0x4f2   : > { %v15019_v28 = vpop.f32.mrf.mxu1  ;;  %v9174_v53 = vadd.f32 %v14933_v39, %v21507_v51 }
 0x4f3   : > { %v9911_v12 = vpop.permute.xlu1 %9910  ;;  %v15749_v42 = vld [vmem:[#allocation5 + $0xa8] ss:$20 sps:$4 sm:$0xff]  }
 0x4f4   : > { %9959 = vst.msk [vmem:[#allocation5 + $0x1cc] sm:$0xf] %vm6990_vm12, %v9911_v12  ;;  %v15020_v20 = vpop.f32.mrf.mxu1  ;;  %v15766_v12 = vld [vmem:[#allocation5 + $0xb0] ss:$20 sps:$4 sm:$0xff]  }
 0x4f5   : > { %v15021_v21 = vadd.f32 %v15020_v20, %v15019_v28 }
 0x4f7   : > { %v14934_v33 = vpop.f32.mrf.mxu0  ;;  %v15751_v19 = vld [vmem:[#allocation5 + $0xac] ss:$20 sps:$4 sm:$0xff]   ;;  %v21614_v34 = vadd.f32 %v15021_v21, %v9174_v53 }
 0x4f8   : > { %12207 = vmatprep.mubr.bf16.mxu0 %v15751_v19 }
 0x4f9   : > { %v14935_v57 = vpop.f32.mrf.mxu0  ;;  %12208 = vmatmul.mubr.bf16.gmra.mxu0 %v15749_v42 }
 0x4fa   : > { %v14936_v15 = vadd.f32 %v14935_v57, %v14934_v33  ;;  %v10389_v16 = vpop.permute.xlu0 %10388 }
 0x4fb   : > { %10438 = vst.msk [vmem:[#allocation5 + $0x1bc] sm:$0xf] %vm6990_vm12, %v10389_v16  ;;  %v14937_v2 = vpop.f32.mrf.mxu0  ;;  %v15753_v56 = vld [vmem:[#allocation5 + $0x1b8] ss:$20 sps:$4 sm:$0xff]  }
 0x4fc   : > { %v9179_v55 = vadd.f32 %v14936_v15, %v21507_v51 }
 0x4fd   : > { %v14938_v10 = vpop.f32.mrf.mxu0 }
 0x4fe   : > { %v10653_v14 = vpop.permute.xlu0 %10652  ;;  %v15022_v45 = vpop.f32.mrf.mxu1  ;;  %v15770_v10 = vld [vmem:[#allocation5 + $0xd8] ss:$20 sps:$4 sm:$0xff]  }
 0x4ff   : > { %10714 = vst.msk [vmem:[#allocation5 + $0xd0] sm:$0xf] %vm6990_vm12, %v10653_v14  ;;  %v10391_v24 = vpop.permute.xlu1 %10390  ;;  %v15771_v14 = vld [vmem:[#allocation5 + $0x100] ss:$20 sps:$4 sm:$0xff]  }
 0x500   : > { %10439 = vst.msk [vmem:[#allocation5 + $0x1d0] sm:$0xf] %vm6990_vm12, %v10391_v24  ;;  %v15023_v5 = vpop.f32.mrf.mxu1 }
 0x501   : > { %v15024_v1 = vadd.f32 %v15023_v5, %v15022_v45 }
 0x502   : > { %v11133_v63 = vpop.permute.xlu0 %11132  ;;  %v15025_v50 = vpop.f32.mrf.mxu1 }
 0x503   : > { %11194 = vst.msk [vmem:[#allocation5 + $0xd4] sm:$0xf] %vm6990_vm12, %v11133_v63  ;;  %v10655_v35 = vpop.permute.xlu1 %10654  ;;  %v21621_v47 = vadd.f32 %v15024_v1, %v9179_v55 }
 0x504   : > { %10715 = vst.msk [vmem:[#allocation5 + $0xe4] sm:$0xf] %vm6990_vm12, %v10655_v35  ;;  %v15026_v40 = vpop.f32.mrf.mxu1 }
 0x506   : > { %v10657_v23 = vpop.permute.xlu0 %10656 }
 0x507   : > { %10716 = vst.msk [vmem:[#allocation5 + $0xf8] sm:$0xf] %vm6990_vm12, %v10657_v23  ;;  %v11135_v11 = vpop.permute.xlu1 %11134  ;;  %v15755_v7 = vld [vmem:[#allocation5 + $0x1bc] ss:$20 sps:$4 sm:$0xff]   ;;  %v21626_v31 = vpop.f32.mrf.mxu0 }
 0x508   : > { %11195 = vst.msk [vmem:[#allocation5 + $0xe8] sm:$0xf] %vm6990_vm12, %v11135_v11  ;;  %12137 = vmatprep.mubr.bf16.mxu1 %v15755_v7  ;;  %v15775_v23 = vld [vmem:[#allocation5 + $0x128] ss:$20 sps:$4 sm:$0xff]  }
 0x509   : > { %12138 = vmatmul.mubr.bf16.gmra.mxu1 %v15753_v56  ;;  %v21631_v25 = vpop.f32.mrf.mxu0  ;;  %v15776_v56 = vld [vmem:[#allocation5 + $0x150] ss:$20 sps:$4 sm:$0xff]  }
 0x50a   : > { %v11137_v43 = vpop.permute.xlu0 %11136  ;;  %15406 = vmatprep.mubr.msk.bf16.mxu1 %vm340_vm5, %v15756_v22 }
 0x50b   : > { %11196 = vst.msk [vmem:[#allocation5 + $0xfc] sm:$0xf] %vm6990_vm12, %v11137_v43  ;;  %v10659_v26 = vpop.permute.xlu1 %10658  ;;  %v15757_v18 = vld [vmem:[#allocation5 + $0xd0] ss:$20 sps:$4 sm:$0xff]   ;;  %v21637_v49 = vpop.f32.mrf.mxu0 }
 0x50c   : > { %10717 = vst.msk [vmem:[#allocation5 + $0x10c] sm:$0xf] %vm6990_vm12, %v10659_v26 }
 0x50d   : > { %v21645_v44 = vpop.f32.mrf.mxu0 }
 0x50e   : > { %v10661_v48 = vpop.permute.xlu0 %10660 }
 0x50f   : > { %10718 = vst.msk [vmem:[#allocation5 + $0x120] sm:$0xf] %vm6990_vm12, %v10661_v48  ;;  %v11139_v3 = vpop.permute.xlu1 %11138  ;;  %v15759_v41 = vld [vmem:[#allocation5 + $0xd4] ss:$20 sps:$4 sm:$0xff]   ;;  %v21634_v4 = vpop.f32.mrf.mxu1 }
 0x510   : > { %11197 = vst.msk [vmem:[#allocation5 + $0x110] sm:$0xf] %vm6990_vm12, %v11139_v3  ;;  %12214 = vmatprep.mubr.bf16.mxu0 %v15759_v41 }
 0x511   : > { %12215 = vmatmul.mubr.bf16.gmra.mxu0 %v15757_v18  ;;  %15407 = vmatmul.mubr.msk.bf16.vlgmr.msra.gmra.mxu1 %vm340_vm5, %v15760_v54  ;;  %v21642_v62 = vpop.f32.mrf.mxu1 }
 0x512   : > { %v11141_v59 = vpop.permute.xlu0 %11140  ;;  %15410 = vmatprep.mubr.msk.bf16.mxu1 %vm340_vm5, %v15761_v58 }
 0x513   : > { %11198 = vst.msk [vmem:[#allocation5 + $0x124] sm:$0xf] %vm6990_vm12, %v11141_v59  ;;  %v10663_v13 = vpop.permute.xlu1 %10662  ;;  %v15762_v27 = vld [vmem:[#allocation5 + $0xf8] ss:$20 sps:$4 sm:$0xff]   ;;  %v21648_v29 = vpop.f32.mrf.mxu1 }
 0x514   : > { %10719 = vst.msk [vmem:[#allocation5 + $0x134] sm:$0xf] %vm6990_vm12, %v10663_v13 }
 0x515   : > { %v21654_v21 = vpop.f32.mrf.mxu1 }
 0x516   : > { %v10665_v39 = vpop.permute.xlu0 %10664 }
 0x517   : > { %10720 = vst.msk [vmem:[#allocation5 + $0x148] sm:$0xf] %vm6990_vm12, %v10665_v39  ;;  %v11143_v37 = vpop.permute.xlu1 %11142  ;;  %v14946_v17 = vpop.f32.mrf.mxu0  ;;  %v15764_v9 = vld [vmem:[#allocation5 + $0xfc] ss:$20 sps:$4 sm:$0xff]   ;;  %v15780_v39 = vld [vmem:[#allocation5 + $0x178] ss:$20 sps:$4 sm:$0xff]  }
 0x518   : > { %11199 = vst.msk [vmem:[#allocation5 + $0x138] sm:$0xf] %vm6990_vm12, %v11143_v37  ;;  %12221 = vmatprep.mubr.bf16.mxu0 %v15764_v9 }
 0x519   : > { %v14947_v28 = vpop.f32.mrf.mxu0  ;;  %12222 = vmatmul.mubr.bf16.gmra.mxu0 %v15762_v27  ;;  %15411 = vmatmul.mubr.msk.bf16.gmra.mxu1 %vm340_vm5, %v15765_v61  ;;  %v15781_v27 = vld [vmem:[#allocation5 + $0x1a0] ss:$20 sps:$4 sm:$0xff]  }
 0x51a   : > { %v11145_v20 = vpop.permute.xlu0 %11144  ;;  %15414 = vmatprep.mubr.msk.bf16.mxu1 %vm340_vm5, %v15766_v12 }
 0x51b   : > { %11200 = vst.msk [vmem:[#allocation5 + $0x14c] sm:$0xf] %vm6990_vm12, %v11145_v20  ;;  %v10667_v53 = vpop.permute.xlu1 %10666  ;;  %v15767_v57 = vld [vmem:[#allocation5 + $0x120] ss:$20 sps:$4 sm:$0xff]   ;;  %v21658_v16 = vpop.f32.mrf.mxu0 }
 0x51c   : > { %10721 = vst.msk [vmem:[#allocation5 + $0x15c] sm:$0xf] %vm6990_vm12, %v10667_v53 }
 0x51d   : > { %v21664_v5 = vpop.f32.mrf.mxu0 }
 0x51e   : > { %v10669_v33 = vpop.permute.xlu0 %10668  ;;  %v15034_v42 = vpop.f32.mrf.mxu1 }
 0x51f   : > { %10722 = vst.msk [vmem:[#allocation5 + $0x170] sm:$0xf] %vm6990_vm12, %v10669_v33  ;;  %v11147_v19 = vpop.permute.xlu1 %11146  ;;  %v15769_v15 = vld [vmem:[#allocation5 + $0x124] ss:$20 sps:$4 sm:$0xff]  }
 0x520   : > { %11201 = vst.msk [vmem:[#allocation5 + $0x160] sm:$0xf] %vm6990_vm12, %v11147_v19  ;;  %v15035_v2 = vpop.f32.mrf.mxu1  ;;  %12229 = vmatprep.mubr.bf16.mxu0 %v15769_v15  ;;  %v15785_v15 = vld [vmem:[#allocation5 + $0x1c8] ss:$20 sps:$4 sm:$0xff]  }
 0x521   : > { %12230 = vmatmul.mubr.bf16.gmra.mxu0 %v15767_v57  ;;  %15415 = vmatmul.mubr.msk.bf16.gmra.mxu1 %vm340_vm5, %v15770_v10 }
 0x522   : > { %v11149_v45 = vpop.permute.xlu0 %11148  ;;  %15418 = vmatprep.mubr.msk.bf16.mxu1 %vm340_vm5, %v15771_v14  ;;  %v21673_v11 = vpop.f32.mrf.mxu1 }
 0x523   : > { %11202 = vst.msk [vmem:[#allocation5 + $0x174] sm:$0xf] %vm6990_vm12, %v11149_v45  ;;  %v10671_v24 = vpop.permute.xlu1 %10670  ;;  %v15772_v50 = vld [vmem:[#allocation5 + $0x148] ss:$20 sps:$4 sm:$0xff]  }
 0x524   : > { %10723 = vst.msk [vmem:[#allocation5 + $0x184] sm:$0xf] %vm6990_vm12, %v10671_v24  ;;  %v21680_v48 = vpop.f32.mrf.mxu1 }
 0x526   : > { %v10673_v55 = vpop.permute.xlu0 %10672 }
 0x527   : > { %v21667_v1 = vpop.f32.mrf.mxu0  ;;  %10724 = vst.msk [vmem:[#allocation5 + $0x198] sm:$0xf] %vm6990_vm12, %v10673_v55  ;;  %v11151_v63 = vpop.permute.xlu1 %11150  ;;  %v15774_v35 = vld [vmem:[#allocation5 + $0x14c] ss:$20 sps:$4 sm:$0xff]  }
 0x528   : > { %11203 = vst.msk [vmem:[#allocation5 + $0x188] sm:$0xf] %vm6990_vm12, %v11151_v63  ;;  %12236 = vmatprep.mubr.bf16.mxu0 %v15774_v35 }
 0x529   : > { %v21671_v40 = vpop.f32.mrf.mxu0  ;;  %12237 = vmatmul.mubr.bf16.gmra.mxu0 %v15772_v50  ;;  %15419 = vmatmul.mubr.msk.bf16.gmra.mxu1 %vm340_vm5, %v15775_v23 }
 0x52a   : > { %v11153_v7 = vpop.permute.xlu0 %11152  ;;  %15422 = vmatprep.mubr.msk.bf16.mxu1 %vm340_vm5, %v15776_v56 }
 0x52b   : > { %v14955_v22 = vpop.f32.mrf.mxu0  ;;  %11204 = vst.msk [vmem:[#allocation5 + $0x19c] sm:$0xf] %vm6990_vm12, %v11153_v7  ;;  %v10675_v43 = vpop.permute.xlu1 %10674  ;;  %v15777_v58 = vld [vmem:[#allocation5 + $0x170] ss:$20 sps:$4 sm:$0xff]  }
 0x52c   : > { %10725 = vst.msk [vmem:[#allocation5 + $0x1ac] sm:$0xf] %vm6990_vm12, %v10675_v43 }
 0x52d   : > { %v14956_v26 = vpop.f32.mrf.mxu0 }
 0x52e   : > { %v10677_v3 = vpop.permute.xlu0 %10676 }
 0x52f   : > { %v15376_v18 = vpop.f32.mrf.mxu0  ;;  %10726 = vst.msk [vmem:[#allocation5 + $0x1c0] sm:$0xf] %vm6990_vm12, %v10677_v3  ;;  %v21683_v41 = vpop.f32.mrf.mxu1  ;;  %v15779_v59 = vld [vmem:[#allocation5 + $0x174] ss:$20 sps:$4 sm:$0xff]  }
 0x530   : > { %v11155_v54 = vpop.permute.xlu1 %11154  ;;  %12243 = vmatprep.mubr.bf16.mxu0 %v15779_v59 }
 0x531   : > { %11205 = vst.msk [vmem:[#allocation5 + $0x1b0] sm:$0xf] %vm6990_vm12, %v11155_v54  ;;  %v9361_v13 = vpop.f32.mrf.mxu0  ;;  %v21688_v37 = vpop.f32.mrf.mxu1  ;;  %12244 = vmatmul.mubr.bf16.gmra.mxu0 %v15777_v58  ;;  %15423 = vmatmul.mubr.msk.bf16.gmra.mxu1 %vm340_vm5, %v15780_v39 }
 0x532   : > { %v9362_v17 = vadd.f32 %v9361_v13, %v21532_v60  ;;  %v11157_v9 = vpop.permute.xlu0 %11156  ;;  %15426 = vmatprep.mubr.msk.bf16.mxu1 %vm340_vm5, %v15781_v27 }
 0x533   : > { %v15377_v61 = vpop.f32.mrf.mxu0  ;;  %11206 = vst.msk [vmem:[#allocation5 + $0x1c4] sm:$0xf] %vm6990_vm12, %v11157_v9  ;;  %v15043_v12 = vpop.f32.mrf.mxu1  ;;  %v15782_v45 = vld [vmem:[#allocation5 + $0x198] ss:$20 sps:$4 sm:$0xff]  }
 0x534   : > { %v9448_v28 = vmax.f32 %v9362_v17, 0.0  ;;  %v10679_v20 = vpop.permute.xlu1 %10678  ;;  %v9372_v53 = vadd.f32 %v15377_v61, %v21544_v38 }
 0x535   : > { %10727 = vst.msk [vmem:[#allocation5 + $0x1d4] sm:$0xf] %vm6990_vm12, %v10679_v20  ;;  %v9364_v33 = vpop.f32.mrf.mxu0  ;;  %v15044_v42 = vpop.f32.mrf.mxu1 }
 0x536   : > { %9464 = vst [vmem:[%s21696_s12] sm:$0xff] %v9448_v28  ;;  %v9450_v60 = vmax.f32 %v9372_v53, 0.0  ;;  %v9365_v19 = vadd.f32 %v9364_v33, %v21548_v36  ;;  %v15030_v42 = vadd.f32 %v21642_v62, %v21634_v4  ;;  %v15033_v4 = vadd.f32 %v21654_v21, %v21648_v29 }
 0x537   : > { %v15380_v57 = vpop.f32.mrf.mxu0  ;;  %v15078_v38 = vpop.f32.mrf.mxu1  ;;  %v15042_v29 = vadd.f32 %v21688_v37, %v21683_v41  ;;  %v14951_v41 = vadd.f32 %v21664_v5, %v21658_v16 }
 0x538   : > { %9466 = vst [vmem:[%s21696_s12 + $0x10] sm:$0xff] %v9450_v60  ;;  %v9449_v2 = vmax.f32 %v9365_v19, 0.0  ;;  %v11159_v10 = vpop.permute.xlu1 %11158  ;;  %v9384_v14 = vadd.f32 %v15380_v57, %v21559_v30  ;;  %v15784_v24 = vld [vmem:[#allocation5 + $0x19c] ss:$20 sps:$4 sm:$0xff]  }
 0x539   : > { %11207 = vst.msk [vmem:[#allocation5 + $0x1d8] sm:$0xf] %vm6990_vm12, %v11159_v10  ;;  %v9376_v55 = vpop.f32.mrf.mxu0  ;;  %v15079_v36 = vpop.f32.mrf.mxu1  ;;  %12251 = vmatprep.mubr.bf16.mxu0 %v15784_v24  ;;  %15427 = vmatmul.mubr.msk.bf16.gmra.mxu1 %vm340_vm5, %v15785_v15 }
 0x53a   : > { %9465 = vst [vmem:[%s21696_s12 + $0x8] sm:$0xff] %v9449_v2  ;;  %v9452_v63 = vmax.f32 %v9384_v14, 0.0  ;;  %v9377_v50 = vadd.f32 %v9376_v55, %v21566_v8  ;;  %v21705_v35 = vadd.f32 %v15079_v36, %v15078_v38  ;;  %12252 = vmatmul.mubr.bf16.gmra.mxu0 %v15782_v45 }
 0x53b   : > { %v15381_v23 = vpop.f32.mrf.mxu0  ;;  %v15081_v7 = vpop.f32.mrf.mxu1 }
 0x53c   : > { %9468 = vst [vmem:[%s21696_s12 + $0x20] sm:$0xff] %v9452_v63  ;;  %v9451_v30 = vmax.f32 %v9377_v50, 0.0  ;;  %v9387_v56 = vadd.f32 %v15381_v23, %v21574_v0  ;;  %v15786_v58 = vld [vmem:[#allocation5 + $0x1c0] ss:$20 sps:$4 sm:$0xff]  }
 0x53d   : > { %v9379_v22 = vpop.f32.mrf.mxu0  ;;  %v15082_v26 = vpop.f32.mrf.mxu1 }
 0x53e   : > { %9467 = vst [vmem:[%s21696_s12 + $0x18] sm:$0xff] %v9451_v30  ;;  %v9453_v43 = vmax.f32 %v9387_v56, 0.0  ;;  %v21711_v8 = vadd.f32 %v15082_v26, %v15081_v7 }
 0x53f   : > { %v15384_v3 = vpop.f32.mrf.mxu0  ;;  %v15084_v54 = vpop.f32.mrf.mxu1 }
 0x540   : > { %9469 = vst [vmem:[%s21696_s12 + $0x28] sm:$0xff] %v9453_v43  ;;  %v9399_v18 = vadd.f32 %v15384_v3, %v21594_v6  ;;  %v15788_v59 = vld [vmem:[#allocation5 + $0x1c4] ss:$20 sps:$4 sm:$0xff]   ;;  %v14942_v6 = vadd.f32 %v21631_v25, %v21626_v31  ;;  %v14945_v31 = vadd.f32 %v21645_v44, %v21637_v49  ;;  %v14954_v49 = vadd.f32 %v21671_v40, %v21667_v1 }
 0x541   : > { %v9391_v13 = vpop.f32.mrf.mxu0  ;;  %v15085_v17 = vpop.f32.mrf.mxu1  ;;  %12258 = vmatprep.mubr.bf16.mxu0 %v15788_v59 }
 0x542   : > { %v9455_v39 = vmax.f32 %v9399_v18, 0.0  ;;  %12259 = vmatmul.mubr.bf16.gmra.mxu0 %v15786_v58  ;;  %v9186_v2 = vadd.f32 %v14942_v6, %v21507_v51  ;;  %v9189_v63 = vadd.f32 %v14945_v31, %v21507_v51  ;;  %v9201_v1 = vadd.f32 %v14954_v49, %v21507_v51 }
 0x543   : > { %v15385_v0 = vpop.f32.mrf.mxu0  ;;  %v15087_v27 = vpop.f32.mrf.mxu1  ;;  %v15039_v58 = vadd.f32 %v21680_v48, %v21673_v11  ;;  %v9196_v17 = vadd.f32 %v14951_v41, %v21507_v51 }
 0x544   : > { %9471 = vst [vmem:[%s21696_s12 + $0x38] sm:$0xff] %v9455_v39  ;;  %v9307_v24 = vadd.f32 %v15030_v42, %v9186_v2  ;;  %v9310_v30 = vadd.f32 %v15033_v4, %v9189_v63  ;;  %v9322_v3 = vadd.f32 %v15042_v29, %v9201_v1 }
 0x545   : > { %v9393_v9 = vpop.f32.mrf.mxu0  ;;  %v15088_v28 = vpop.f32.mrf.mxu1 }
 0x546   : > { %v9394_v61 = vadd.f32 %v9393_v9, %v21586_v32  ;;  %v21717_v12 = vadd.f32 %v15088_v28, %v15087_v27  ;;  %v9317_v9 = vadd.f32 %v15039_v58, %v9196_v17 }
 0x547   : > { %v15388_v20 = vpop.f32.mrf.mxu0  ;;  %v15090_v33 = vpop.f32.mrf.mxu1 }
 0x548   : > { %v9454_v53 = vmax.f32 %v9394_v61, 0.0 }
 0x549   : > { %v9405_v60 = vpop.f32.mrf.mxu0  ;;  %v15091_v57 = vpop.f32.mrf.mxu1 }
 0x54a   : > { %9470 = vst [vmem:[%s21696_s12 + $0x30] sm:$0xff] %v9454_v53  ;;  %v9406_v19 = vadd.f32 %v9405_v60, %v21601_v46  ;;  %v21725_v15 = vadd.f32 %v15091_v57, %v15090_v33 }
 0x54b   : > { %v15389_v32 = vpop.f32.mrf.mxu0  ;;  %v15093_v10 = vpop.f32.mrf.mxu1 }
 0x54c   : > { %v9456_v25 = vmax.f32 %v9406_v19, 0.0  ;;  %v9416_v38 = vadd.f32 %v15389_v32, %v21614_v34 }
 0x54d   : > { %v9408_v14 = vpop.f32.mrf.mxu0  ;;  %v15094_v45 = vpop.f32.mrf.mxu1 }
 0x54e   : > { %9472 = vst [vmem:[%s21696_s12 + $0x40] sm:$0xff] %v9456_v25  ;;  %v9458_v46 = vmax.f32 %v9416_v38, 0.0  ;;  %v9409_v62 = vadd.f32 %v9408_v14, %v21606_v52  ;;  %v12059_v14 = vadd.f32 %v21705_v35, %v21507_v51 }
 0x54f   : > { %v15392_v55 = vpop.f32.mrf.mxu0  ;;  %v15096_v50 = vpop.f32.mrf.mxu1 }
 0x550   : > { %9474 = vst [vmem:[%s21696_s12 + $0x50] sm:$0xff] %v9458_v46  ;;  %v9457_v34 = vmax.f32 %v9409_v62, 0.0  ;;  %v9428_v44 = vadd.f32 %v15392_v55, %v9307_v24  ;;  %v21771_v24 = vld [vmem:[%s21895_s7] ss:$0 sm:$0xff] }
 0x551   : > { %v9420_v36 = vpop.f32.mrf.mxu0  ;;  %v15097_v23 = vpop.f32.mrf.mxu1  ;;  %v12062_v55 = vadd.f32 %v21771_v24, %v21711_v8 }
 0x552   : > { %9473 = vst [vmem:[%s21696_s12 + $0x48] sm:$0xff] %v9457_v34  ;;  %v9460_v52 = vmax.f32 %v9428_v44, 0.0  ;;  %v9421_v21 = vadd.f32 %v9420_v36, %v21621_v47  ;;  %v21743_v56 = vadd.f32 %v15097_v23, %v15096_v50  ;;  %v12069_v23 = vadd.f32 %v21771_v24, %v21717_v12 }
 0x553   : > { %v15393_v7 = vpop.f32.mrf.mxu0  ;;  %v15099_v43 = vpop.f32.mrf.mxu1 }
 0x554   : > { %9476 = vst [vmem:[%s21696_s12 + $0x60] sm:$0xff] %v9460_v52  ;;  %v9459_v40 = vmax.f32 %v9421_v21, 0.0  ;;  %v9431_v22 = vadd.f32 %v15393_v7, %v9310_v30 }
 0x555   : > { %v9423_v26 = vpop.f32.mrf.mxu0  ;;  %v15100_v47 = vpop.f32.mrf.mxu1 }
 0x556   : > { %9475 = vst [vmem:[%s21696_s12 + $0x58] sm:$0xff] %v9459_v40  ;;  %v9461_v37 = vmax.f32 %v9431_v22, 0.0  ;;  %v21750_v18 = vadd.f32 %v15100_v47, %v15099_v43 }
 0x557   : > { %v15396_v54 = vpop.f32.mrf.mxu0  ;;  %v15102_v13 = vpop.f32.mrf.mxu1 }
 0x558   : > { %9477 = vst [vmem:[%s21696_s12 + $0x68] sm:$0xff] %v9461_v37  ;;  %v9443_v59 = vadd.f32 %v15396_v54, %v9322_v3  ;;  %v12074_v37 = vadd.f32 %v21771_v24, %v21725_v15 }
 0x559   : > { %v9435_v39 = vpop.f32.mrf.mxu0  ;;  %v15103_v16 = vpop.f32.mrf.mxu1 }
 0x55a   : > { %v9463_v0 = vmax.f32 %v9443_v59, 0.0 }
 0x55b   : > { %v15397_v5 = vpop.f32.mrf.mxu0  ;;  %v15105_v27 = vpop.f32.mrf.mxu1 }
 0x55c   : > { %9479 = vst [vmem:[%s21696_s12 + $0x78] sm:$0xff] %v9463_v0 }
 0x55d   : > { %v9437_v61 = vpop.f32.mrf.mxu0  ;;  %v15106_v20 = vpop.f32.mrf.mxu1 }
 0x55e   : > { %v9438_v28 = vadd.f32 %v9437_v61, %v9317_v9  ;;  %v21757_v6 = vadd.f32 %v15106_v20, %v15105_v27 }
 0x55f   : > { %v15108_v11 = vpop.f32.mrf.mxu1 }
 0x560   : > { %v9462_v53 = vmax.f32 %v9438_v28, 0.0 }
 0x561   : > { %v15109_v48 = vpop.f32.mrf.mxu1 }
 0x562   : > { %9478 = vst [vmem:[%s21696_s12 + $0x70] sm:$0xff] %v9462_v53  ;;  %v21760_v33 = vadd.f32 %v15109_v48, %v15108_v11 }
 0x563   : > { %v15111_v60 = vpop.f32.mrf.mxu1 }
 0x565   : > { %v15112_v42 = vpop.f32.mrf.mxu1 }
 0x567   : > { %v15114_v19 = vpop.f32.mrf.mxu1 }
 0x569   : > { %v15115_v57 = vpop.f32.mrf.mxu1 }
 0x56a   : > { %v21762_v32 = vadd.f32 %v15115_v57, %v15114_v19 }
 0x56b   : > { %v15117_v2 = vpop.f32.mrf.mxu1 }
 0x56d   : > { %v15118_v31 = vpop.f32.mrf.mxu1  ;;  %v15166_v38 = vpop.f32.mrf.mxu0 }
 0x56e   : > { %v21764_v25 = vadd.f32 %v15118_v31, %v15117_v2 }
 0x56f   : > { %v15167_v10 = vpop.f32.mrf.mxu0 }
 0x570   : > { %v15168_v4 = vadd.f32 %v15167_v10, %v15166_v38 }
 0x571   : > { %v15169_v46 = vpop.f32.mrf.mxu0 }
 0x572   : > { %v12180_v62 = vadd.f32 %v15168_v4, %v12059_v14 }
 0x573   : > { %v15170_v45 = vpop.f32.mrf.mxu0 }
 0x574   : > { %v15171_v63 = vadd.f32 %v15170_v45, %v15169_v46 }
 0x575   : > { %v15120_v49 = vpop.f32.mrf.mxu1 }
 0x576   : > { %v12183_v34 = vadd.f32 %v15171_v63, %v12062_v55  ;;  %v12081_v63 = vadd.f32 %v21771_v24, %v21743_v56 }
 0x577   : > { %v15121_v44 = vpop.f32.mrf.mxu1 }
 0x579   : > { %v15123_v50 = vpop.f32.mrf.mxu1 }
 0x57b   : > { %v15124_v36 = vpop.f32.mrf.mxu1 }
 0x57c   : > { %v21775_v29 = vadd.f32 %v15124_v36, %v15123_v50 }
 0x57d   : > { %v15172_v51 = vpop.f32.mrf.mxu0 }
 0x57f   : > { %v15173_v35 = vpop.f32.mrf.mxu0 }
 0x581   : > { %v15175_v52 = vpop.f32.mrf.mxu0 }
 0x583   : > { %v15176_v21 = vpop.f32.mrf.mxu0 }
 0x584   : > { %v15177_v30 = vadd.f32 %v15176_v21, %v15175_v52 }
 0x585   : > { %v15126_v7 = vpop.f32.mrf.mxu1 }
 0x586   : > { %v12190_v1 = vadd.f32 %v15177_v30, %v12069_v23 }
 0x587   : > { %v15127_v40 = vpop.f32.mrf.mxu1 }
 0x588   : > { %v21779_v8 = vadd.f32 %v15127_v40, %v15126_v7 }
 0x589   : > { %v15129_v22 = vpop.f32.mrf.mxu1 }
 0x58b   : > { %v15130_v43 = vpop.f32.mrf.mxu1 }
 0x58d   : > { %v15178_v26 = vpop.f32.mrf.mxu0 }
 0x58f   : > { %v15179_v41 = vpop.f32.mrf.mxu0 }
 0x590   : > { %v15180_v47 = vadd.f32 %v15179_v41, %v15178_v26 }
 0x591   : > { %v15181_v3 = vpop.f32.mrf.mxu0 }
 0x592   : > { %v12195_v54 = vadd.f32 %v15180_v47, %v12074_v37  ;;  %v12096_v47 = vadd.f32 %v21771_v24, %v21760_v33 }
 0x593   : > { %v15182_v58 = vpop.f32.mrf.mxu0 }
 0x598   : > { %v15132_v59 = vpop.f32.mrf.mxu1 }
 0x59a   : > { %v15133_v13 = vpop.f32.mrf.mxu1 }
 0x59b   : > { %v21783_v12 = vadd.f32 %v15133_v13, %v15132_v59 }
 0x59c   : > { %v15135_v39 = vpop.f32.mrf.mxu1 }
 0x59e   : > { %v15136_v17 = vpop.f32.mrf.mxu1 }
 0x59f   : > { %v21785_v0 = vadd.f32 %v15136_v17, %v15135_v39 }
 0x5a0   : > { %v15184_v16 = vpop.f32.mrf.mxu0 }
 0x5a2   : > { %v15185_v5 = vpop.f32.mrf.mxu0 }
 0x5a3   : > { %v15186_v4 = vadd.f32 %v15185_v5, %v15184_v16 }
 0x5a4   : > { %v15187_v61 = vpop.f32.mrf.mxu0 }
 0x5a5   : > { %v12202_v21 = vadd.f32 %v15186_v4, %v12081_v63  ;;  %v12113_v4 = vadd.f32 %v21771_v24, %v21775_v29 }
 0x5a6   : > { %v15188_v28 = vpop.f32.mrf.mxu0 }
 0x5a7   : > { %v15189_v51 = vadd.f32 %v15188_v28, %v15187_v61  ;;  %v12091_v61 = vadd.f32 %v21771_v24, %v21757_v6 }
 0x5af   : > { %v15138_v27 = vpop.f32.mrf.mxu1 }
 0x5b1   : > { %v15139_v9 = vpop.f32.mrf.mxu1 }
 0x5b3   : > { %v21787_v53 = vpop.f32.mrf.mxu1 }
 0x5b5   : > { %v21789_v11 = vpop.f32.mrf.mxu1 }
 0x5b9   : > { %v15190_v20 = vpop.f32.mrf.mxu0 }
 0x5bb   : > { %v15191_v15 = vpop.f32.mrf.mxu0 }
 0x5bd   : > { %v15193_v60 = vpop.f32.mrf.mxu0 }
 0x5bf   : > { %v15194_v57 = vpop.f32.mrf.mxu0 }
 0x5c0   : > { %v15195_v5 = vadd.f32 %v15194_v57, %v15193_v60 }
 0x5c9   : > { %v21791_v48 = vpop.f32.mrf.mxu1 }
 0x5cb   : > { %v21793_v42 = vpop.f32.mrf.mxu1 }
 0x5cd   : > { %v15147_v19 = vpop.f32.mrf.mxu1 }
 0x5ce   : > { %v12212_v19 = vadd.f32 %v15195_v5, %v12091_v61 }
 0x5cf   : > { %v15148_v2 = vpop.f32.mrf.mxu1 }
 0x5d1   : > { %v15196_v31 = vpop.f32.mrf.mxu0  ;;  %v15408_v38 = vpop.f32.mrf.mxu1 }
 0x5d2   : > { %v12103_v38 = vadd.f32 %v21771_v24, %v21762_v32 }
 0x5d3   : > { %v15197_v10 = vpop.f32.mrf.mxu0  ;;  %v12300_v14 = vpop.f32.mrf.mxu1 }
 0x5d4   : > { %v12301_v46 = vadd.f32 %v12300_v14, %v12180_v62  ;;  %v12084_v62 = vadd.f32 %v21771_v24, %v21750_v18  ;;  %v15198_v22 = vadd.f32 %v15197_v10, %v15196_v31 }
 0x5d5   : > { %v15199_v45 = vpop.f32.mrf.mxu0  ;;  %v15409_v55 = vpop.f32.mrf.mxu1 }
 0x5d6   : > { %v12387_v49 = vmax.f32 %v12301_v46, 0.0  ;;  %v12311_v44 = vadd.f32 %v15409_v55, %v12190_v1  ;;  %v12205_v41 = vadd.f32 %v15189_v51, %v12084_v62  ;;  %v12217_v39 = vadd.f32 %v15198_v22, %v12096_v47 }
 0x5d7   : > { %v15200_v50 = vpop.f32.mrf.mxu0  ;;  %v12303_v36 = vpop.f32.mrf.mxu1 }
 0x5d8   : > { %12403 = vst [vmem:[%s21696_s12 + $0x80] sm:$0xff] %v12387_v49  ;;  %v12389_v35 = vmax.f32 %v12311_v44, 0.0  ;;  %v12304_v52 = vadd.f32 %v12303_v36, %v12183_v34  ;;  %v12106_v49 = vadd.f32 %v21771_v24, %v21764_v25 }
 0x5d9   : > { %v15202_v23 = vpop.f32.mrf.mxu0  ;;  %v15412_v30 = vpop.f32.mrf.mxu1 }
 0x5da   : > { %12405 = vst [vmem:[%s21696_s12 + $0x90] sm:$0xff] %v12389_v35  ;;  %v12388_v7 = vmax.f32 %v12304_v52, 0.0  ;;  %v12323_v40 = vadd.f32 %v15412_v30, %v12202_v21  ;;  %v12118_v30 = vadd.f32 %v21771_v24, %v21779_v8 }
 0x5db   : > { %v15203_v56 = vpop.f32.mrf.mxu0  ;;  %v12315_v1 = vpop.f32.mrf.mxu1 }
 0x5dc   : > { %12404 = vst [vmem:[%s21696_s12 + $0x88] sm:$0xff] %v12388_v7  ;;  %v12391_v43 = vmax.f32 %v12323_v40, 0.0  ;;  %v12316_v26 = vadd.f32 %v12315_v1, %v12195_v54  ;;  %v15204_v15 = vadd.f32 %v15203_v56, %v15202_v23 }
 0x5dd   : > { %v15205_v34 = vpop.f32.mrf.mxu0  ;;  %v15413_v37 = vpop.f32.mrf.mxu1 }
 0x5de   : > { %12407 = vst [vmem:[%s21696_s12 + $0xa0] sm:$0xff] %v12391_v43  ;;  %v12390_v3 = vmax.f32 %v12316_v26, 0.0  ;;  %v12326_v18 = vadd.f32 %v15413_v37, %v12205_v41  ;;  %v12224_v45 = vadd.f32 %v15204_v15, %v12103_v38  ;;  %v12125_v26 = vadd.f32 %v21771_v24, %v21783_v12 }
 0x5df   : > { %v15206_v58 = vpop.f32.mrf.mxu0  ;;  %v12318_v59 = vpop.f32.mrf.mxu1 }
 0x5e0   : > { %12406 = vst [vmem:[%s21696_s12 + $0x98] sm:$0xff] %v12390_v3  ;;  %v12392_v13 = vmax.f32 %v12326_v18, 0.0  ;;  %v15207_v6 = vadd.f32 %v15206_v58, %v15205_v34  ;;  %v12128_v59 = vadd.f32 %v21771_v24, %v21785_v0 }
 0x5e1   : > { %v15208_v17 = vpop.f32.mrf.mxu0  ;;  %v15416_v16 = vpop.f32.mrf.mxu1 }
 0x5e2   : > { %12408 = vst [vmem:[%s21696_s12 + $0xa8] sm:$0xff] %v12392_v13  ;;  %v12338_v54 = vadd.f32 %v15416_v16, %v12217_v39  ;;  %v12227_v29 = vadd.f32 %v15207_v6, %v12106_v49 }
 0x5e3   : > { %v15209_v27 = vpop.f32.mrf.mxu0  ;;  %v12330_v9 = vpop.f32.mrf.mxu1 }
 0x5e4   : > { %v12394_v33 = vmax.f32 %v12338_v54, 0.0  ;;  %v15143_v9 = vadd.f32 %v21789_v11, %v21787_v53 }
 0x5e5   : > { %v15211_v28 = vpop.f32.mrf.mxu0  ;;  %v15417_v20 = vpop.f32.mrf.mxu1 }
 0x5e6   : > { %12410 = vst [vmem:[%s21696_s12 + $0xb8] sm:$0xff] %v12394_v33  ;;  %v12135_v15 = vadd.f32 %v21771_v24, %v15143_v9 }
 0x5e7   : > { %v15212_v2 = vpop.f32.mrf.mxu0  ;;  %v12332_v31 = vpop.f32.mrf.mxu1 }
 0x5e8   : > { %v15213_v60 = vadd.f32 %v15212_v2, %v15211_v28  ;;  %v12333_v57 = vadd.f32 %v12332_v31, %v12212_v19  ;;  %v15146_v19 = vadd.f32 %v21793_v42, %v21791_v48 }
 0x5e9   : > { %v15214_v10 = vpop.f32.mrf.mxu0  ;;  %v15420_v14 = vpop.f32.mrf.mxu1 }
 0x5ea   : > { %v12393_v46 = vmax.f32 %v12333_v57, 0.0  ;;  %v12234_v32 = vadd.f32 %v15213_v60, %v12113_v4  ;;  %v12140_v11 = vadd.f32 %v21771_v24, %v15146_v19 }
 0x5eb   : > { %v15215_v55 = vpop.f32.mrf.mxu0  ;;  %v12344_v63 = vpop.f32.mrf.mxu1 }
 0x5ec   : > { %12409 = vst [vmem:[%s21696_s12 + $0xb0] sm:$0xff] %v12393_v46  ;;  %v12345_v44 = vadd.f32 %v12344_v63, %v12224_v45  ;;  %v15216_v51 = vadd.f32 %v15215_v55, %v15214_v10 }
 0x5ed   : > { %v15217_v50 = vpop.f32.mrf.mxu0  ;;  %v15421_v36 = vpop.f32.mrf.mxu1 }
 0x5ee   : > { %v12395_v35 = vmax.f32 %v12345_v44, 0.0  ;;  %v12355_v52 = vadd.f32 %v15421_v36, %v12234_v32  ;;  %v12239_v1 = vadd.f32 %v15216_v51, %v12118_v30 }
 0x5ef   : > { %v15218_v21 = vpop.f32.mrf.mxu0  ;;  %v12347_v23 = vpop.f32.mrf.mxu1 }
 0x5f0   : > { %12411 = vst [vmem:[%s21696_s12 + $0xc0] sm:$0xff] %v12395_v35  ;;  %v12397_v62 = vmax.f32 %v12355_v52, 0.0  ;;  %v12348_v7 = vadd.f32 %v12347_v23, %v12227_v29 }
 0x5f1   : > { %v15220_v25 = vpop.f32.mrf.mxu0  ;;  %v15424_v40 = vpop.f32.mrf.mxu1 }
 0x5f2   : > { %12413 = vst [vmem:[%s21696_s12 + $0xd0] sm:$0xff] %v12397_v62  ;;  %v12396_v56 = vmax.f32 %v12348_v7, 0.0 }
 0x5f3   : > { %v15221_v22 = vpop.f32.mrf.mxu0  ;;  %v12359_v43 = vpop.f32.mrf.mxu1 }
 0x5f4   : > { %12412 = vst [vmem:[%s21696_s12 + $0xc8] sm:$0xff] %v12396_v56  ;;  %v15222_v41 = vadd.f32 %v15221_v22, %v15220_v25  ;;  %v12360_v34 = vadd.f32 %v12359_v43, %v12239_v1 }
 0x5f5   : > { %v15223_v37 = vpop.f32.mrf.mxu0  ;;  %v15425_v47 = vpop.f32.mrf.mxu1 }
 0x5f6   : > { %v12246_v8 = vadd.f32 %v15222_v41, %v12125_v26  ;;  %v12398_v3 = vmax.f32 %v12360_v34, 0.0 }
 0x5f7   : > { %v15224_v18 = vpop.f32.mrf.mxu0  ;;  %v12362_v58 = vpop.f32.mrf.mxu1 }
 0x5f8   : > { %v12367_v13 = vadd.f32 %v15424_v40, %v12246_v8  ;;  %12414 = vst [vmem:[%s21696_s12 + $0xd8] sm:$0xff] %v12398_v3  ;;  %v15225_v39 = vadd.f32 %v15224_v18, %v15223_v37 }
 0x5f9   : > { %v15428_v16 = vpop.f32.mrf.mxu1 }
 0x5fa   : > { %v15226_v17 = vpop.f32.mrf.mxu0  ;;  %v12399_v12 = vmax.f32 %v12367_v13, 0.0  ;;  %v12249_v5 = vadd.f32 %v15225_v39, %v12128_v59 }
 0x5fb   : > { %v12374_v27 = vpop.f32.mrf.mxu1 }
 0x5fc   : > { %v15227_v54 = vpop.f32.mrf.mxu0  ;;  %12415 = vst [vmem:[%s21696_s12 + $0xe0] sm:$0xff] %v12399_v12  ;;  %v12370_v61 = vadd.f32 %v15425_v47, %v12249_v5 }
 0x5fd   : > { %v15429_v28 = vpop.f32.mrf.mxu1 }
 0x5fe   : > { %v15229_v33 = vpop.f32.mrf.mxu0  ;;  %v12400_v20 = vmax.f32 %v12370_v61, 0.0 }
 0x5ff   : > { %v12376_v60 = vpop.f32.mrf.mxu1 }
 0x600   : > { %v15230_v0 = vpop.f32.mrf.mxu0  ;;  %12416 = vst [vmem:[%s21696_s12 + $0xe8] sm:$0xff] %v12400_v20 }
 0x601   : > { %v15231_v2 = vadd.f32 %v15230_v0, %v15229_v33 }
 0x602   : > { %v15232_v31 = vpop.f32.mrf.mxu0 }
 0x603   : > { %v12256_v38 = vadd.f32 %v15231_v2, %v12135_v15 }
 0x604   : > { %v15233_v53 = vpop.f32.mrf.mxu0 }
 0x605   : > { %v12377_v57 = vadd.f32 %v12376_v60, %v12256_v38  ;;  %v15234_v10 = vadd.f32 %v15233_v53, %v15232_v31 }
 0x606   : > { %v15235_v14 = vpop.f32.mrf.mxu0 }
 0x607   : > { %v12401_v4 = vmax.f32 %v12377_v57, 0.0  ;;  %v12261_v6 = vadd.f32 %v15234_v10, %v12140_v11 }
 0x608   : > { %v15236_v48 = vpop.f32.mrf.mxu0 }
 0x609   : > { %12417 = vst [vmem:[%s21696_s12 + $0xf0] sm:$0xff] %v12401_v4  ;;  %v12382_v42 = vadd.f32 %v15428_v16, %v12261_v6 }
 0x60b   : > { %v12402_v24 = vmax.f32 %v12382_v42, 0.0 }
 0x60d   : > { %12418 = vst [vmem:[%s21696_s12 + $0xf8] sm:$0xff] %v12402_v24 }
 0x60e   : > { %15922 = shalt.err (!%p15919_p3)
}
 0x60f   : > { %s15923_s13 = scalar_lea.hbm %s21841_s23, 4096  ;;  %s15927_s18 = scalar_lea.hbm %s21896_s8, 8192 }
 0x610   : > { %p15924_p4 = scmp.ne.s32.totalorder %s21841_s23, %s15923_s13  ;;  %p15928_p9 = scmp.lt.s32.totalorder %s21841_s23, %s21896_s8 }
 0x611   : > { %p15929_p10 = scmp.lt.s32.totalorder %s15927_s18, %s15923_s13 }
 0x612   : > { %p15925_p7 = pnand %p15924_p4, %p16063_p5 }
 0x613   : > { %p15930_p11 = por %p15929_p10, %p15928_p9 }
 0x614   : > { %p15926_p8 = pneg %p15925_p7 }
 0x616   : > { %p15931_p12 = pnand %p15930_p11, %p15926_p8 }
 0x618   : > { %15934 = shalt.err (!%p15931_p12)
}
 0x619   : > { %s15978_s22 = smov 128   ;;  %s15979_s9 = smov 8  }
 0x61a   : > { %15431 = dma.vmem_to_hbm [thread:$0]  (%p16063_p5), %s21843_s19, 4096, %s21841_s23, %s21848_s25, %s15978_s22, %s15978_s22, %s15979_s9  }
 0x61b PF: > { %p15437_p13 = scmp.ge.s32.totalorder %s15969_s30, 2  ;;  %s12448_s24 = sand.u32 1, %s15957_s27  }
 0x61c   : > { %s12449_s26 = scalar_lea.sflag [#allocation7], %s12448_s24 }
 0x61d   : > { %p15434_p0 = pnand %p15437_p13, %p16067_p6 }
 0x61f   : > { %p15435_p1 = pneg %p15434_p0 }
 0x621   : > { %15952 = dma.done.wait (%p15435_p1), %s12449_s26, 4096  }
 0x622   : > { %15954 = vsyncadd (%p15435_p1), %s12449_s26, 4294963200  ;;  %p18_p2 = scmp.ge.s32.totalorder %s16050_s11, 4   ;;  %s22271_s27 = smov %s15961_s28 }
 0x623   : > { %s22272_s28 = smov %s15965_s29  ;;  %s22273_s29 = smov %s16061_s14 }
 0x624   : > { %s22274_s30 = smov %s16050_s11  ;;  %20 = sbr.rel (!%p18_p2) target bundleno = 3 (0x3), region = 87 }
 0x629   :  { %12454 = vsyncpa [#allocation7], 1 }
 0x62a   :  { %12456 = vsyncpa [#allocation7 + $0x1], 1 }

</bundles_post_ra>
